<compile_context>
chip_gen: v7x
topology: tpu7x:2x2x1
jax: 0.10.0
libtpu: 0.0.40
codegen_flags: <defaults>
</compile_context>

<pallas_src>
import functools

import numpy as np
import jax
import jax.numpy as jnp
from jax.experimental import pallas as pl
from jax.experimental.pallas import tpu as pltpu

EPS = 1e-5
LANES = 128
NUM_CLASSES = 10
CH1 = (1, 4, 8)               # residual_block_1 channels
CH2 = (8, 16, 32)             # residual_block_2 channels
BATCH = 2
IMG = 28                      # MNIST-like input implied by the 7*7*32 classifier
OH1 = IMG // 2                # 14
OH2 = OH1 // 2                # 7
M1 = BATCH * OH1 * OH1        # 392 rows after block-1 im2col (multiple of 8)
POS2 = OH2 * OH2              # 49 spatial positions per image after block 2
NP2 = ((BATCH * POS2 + 15) // 16) * 16    # 112: block-2 rows padded to bf16 tile
K1P = 16                      # lane-padded block-1 im2col depth (9 -> 16)

_VMEM = pl.BlockSpec(memory_space=pltpu.MemorySpace.VMEM)


# ------------------------------ kernel helpers ------------------------------
def _bn_cols(y, gamma, beta, inv_m):
    """Training-mode BatchNorm over rows, per lane (channel), scale/shift form.

    Single-pass stats (sums over all rows; zero pad-rows contribute nothing,
    the real-row count enters through inv_m).  Apply = y*scale + shift.
    """
    s1 = jnp.sum(y, axis=0, keepdims=True)
    s2 = jnp.sum(y * y, axis=0, keepdims=True)
    mean = s1 * inv_m
    var = jnp.maximum(s2 * inv_m - mean * mean, 0.0)
    scale = gamma * jax.lax.rsqrt(var + EPS)
    shift = beta - mean * scale
    return y * scale + shift


def _convnet_kernel(a1_ref, w1c_ref, w12_ref, bn1_ref,
                    gcat_ref, w2t_ref, w22_ref, ws2_ref, bn2_ref,
                    wcls_ref, linb_ref,
                    logits_ref, probas_ref, *, batch, np2, pos2, n_classes):
    f32 = jnp.float32
    bf16 = jnp.bfloat16

    # --------------------- residual block 1 (1 -> 4 -> 8) -------------------
    m1 = a1_ref.shape[0]
    inv1 = 1.0 / m1
    # conv_1 and the 1x1 stride-2 shortcut share one 256-lane MXU matmul.
    y = jnp.dot(a1_ref[...], w1c_ref[...], preferred_element_type=f32)   # [m1,256]
    h1 = jnp.maximum(_bn_cols(y[:, :LANES], bn1_ref[0:1, :], bn1_ref[1:2, :], inv1),
                     0.0)
    y2 = jnp.dot(h1.astype(bf16), w12_ref[...], preferred_element_type=f32)
    r1 = jnp.maximum(
        _bn_cols(y2, bn1_ref[2:3, :], bn1_ref[3:4, :], inv1)
        + _bn_cols(y[:, LANES:], bn1_ref[4:5, :], bn1_ref[5:6, :], inv1), 0.0)

    # --------------------- residual block 2 (8 -> 16 -> 32) -----------------
    # In-kernel im2col (3x3, stride 2, pad 1) as one 0/1 row-selection matmul:
    # row (t*np2 + out_row) of a2 is the tap-t input pixel for that output
    # position; zero rows = conv padding + the 98->112 row padding (exact copy,
    # so the bf16 round-trip is exact).
    a2 = jnp.dot(gcat_ref[...], r1.astype(bf16), preferred_element_type=f32)
    a2 = a2.astype(bf16)                                          # [9*np2, 128]

    n_real = batch * pos2
    inv2 = 1.0 / n_real
    c1 = jnp.zeros((np2, LANES), f32)
    for t in range(9):                                            # 9-tap accumulation
        c1 = c1 + jnp.dot(a2[t * np2:(t + 1) * np2, :], w2t_ref[t],
                          preferred_element_type=f32)
    # zero the padding rows of h2 so they cannot pollute the next BN's stats
    rowi = jax.lax.broadcasted_iota(jnp.int32, (np2, 1), 0)
    h2 = jnp.where(rowi < n_real,
                   jnp.maximum(_bn_cols(c1, bn2_ref[0:1, :], bn2_ref[1:2, :], inv2),
                               0.0),
                   0.0)
    y2b = jnp.dot(h2.astype(bf16), w22_ref[...], preferred_element_type=f32)
    ysc = jnp.dot(a2[4 * np2:5 * np2, :], ws2_ref[...], preferred_element_type=f32)
    r2 = jnp.maximum(
        _bn_cols(y2b, bn2_ref[2:3, :], bn2_ref[3:4, :], inv2)
        + _bn_cols(ysc, bn2_ref[4:5, :], bn2_ref[5:6, :], inv2), 0.0)   # [np2,128]

    # --------------------- linear (per-position weights) + softmax ----------
    lane1 = jax.lax.broadcasted_iota(jnp.int32, (1, LANES), 1)
    rows = []
    for b in range(batch):
        r2b = r2[b * pos2:(b + 1) * pos2, :]                      # [49,128]
        acc = jnp.zeros((1, LANES), f32)
        for cls in range(n_classes):
            s = jnp.sum(jnp.sum(r2b * wcls_ref[cls], axis=1, keepdims=True),
                        axis=0, keepdims=True)                    # [1,1]
            acc = acc + s * (lane1 == cls).astype(f32)
        rows.append(acc)
    logits = jnp.concatenate(rows, axis=0) + linb_ref[...]        # [batch,128]
    logits_ref[...] = logits

    laneb = jax.lax.broadcasted_iota(jnp.int32, (batch, LANES), 1)
    masked = jnp.where(laneb < n_classes, logits, jnp.float32(-1e30))
    mmax = jnp.max(masked, axis=1, keepdims=True)
    e = jnp.exp(masked - mmax)
    probas_ref[...] = e / jnp.sum(e, axis=1, keepdims=True)       # exact divide


# ------------------------------ pallas_call wrapper -------------------------
def convnet_pallas(a1, p):
    kern = functools.partial(_convnet_kernel, batch=BATCH, np2=NP2, pos2=POS2,
                             n_classes=NUM_CLASSES)
    return pl.pallas_call(
        kern,
        out_shape=(jax.ShapeDtypeStruct((BATCH, LANES), jnp.float32),
                   jax.ShapeDtypeStruct((BATCH, LANES), jnp.float32)),
        in_specs=[_VMEM] * 11,
        out_specs=(_VMEM, _VMEM),
    )(a1, p["w1c"], p["w12"], p["bn1"], p["gcat"], p["w2t"], p["w22"],
      p["ws2"], p["bn2"], p["wcls"], p["linb"])


# ------------------------------ host-side glue ------------------------------
def im2col_nhwc(x, kh, kw, stride, pad):
    """Channels-last im2col: [B,H,W,C] -> [B*OH*OW, KH*KW*C], order (ki,kj,c)."""
    if pad:
        x = jnp.pad(x, ((0, 0), (pad, pad), (pad, pad), (0, 0)))
    b, h, w, c = x.shape
    oh = (h - kh) // stride + 1
    ow = (w - kw) // stride + 1
    cols = []
    for i in range(kh):
        for j in range(kw):
            cols.append(x[:, i:i + stride * (oh - 1) + 1:stride,
                            j:j + stride * (ow - 1) + 1:stride, :])
    patches = jnp.stack(cols, axis=3)            # [b, oh, ow, kh*kw, c]
    return patches.reshape(b * oh * ow, kh * kw * c), oh, ow


def make_im2col_selection(batch, h, w, stride, pad, rows_per_tap):
    """0/1 selection matrix G with G[t*rows_per_tap + out_row, in_row] = 1 when
    tap t of a 3x3 conv at out_row reads in_row (zero row => conv padding)."""
    oh = (h + 2 * pad - 3) // stride + 1
    ow = (w + 2 * pad - 3) // stride + 1
    g = np.zeros((9 * rows_per_tap, batch * h * w), np.float32)
    for ki in range(3):
        for kj in range(3):
            t = ki * 3 + kj
            for b in range(batch):
                for oy in range(oh):
                    for ox in range(ow):
                        iy = oy * stride - pad + ki
                        ix = ox * stride - pad + kj
                        if 0 <= iy < h and 0 <= ix < w:
                            g[t * rows_per_tap + b * oh * ow + oy * ow + ox,
                              b * h * w + iy * w + ix] = 1.0
    return jnp.asarray(g, jnp.bfloat16)


def make_params(key):
    c10, c11, c12 = CH1
    c20, c21, c22 = CH2
    keys = jax.random.split(key, 8)
    # Conv2d biases omitted: a per-channel constant before training-mode BN
    # cancels exactly.  BN gamma=1 / beta=0 (torch defaults).
    w1 = jax.random.normal(keys[0], (c11, c10, 3, 3), jnp.float32) / np.sqrt(c10 * 9.0)
    ws1 = jax.random.normal(keys[1], (c12, c10, 1, 1), jnp.float32) / np.sqrt(float(c10))
    w12 = jax.random.normal(keys[2], (c12, c11, 1, 1), jnp.float32) / np.sqrt(float(c11))
    w2 = jax.random.normal(keys[3], (c21, c20, 3, 3), jnp.float32) / np.sqrt(c20 * 9.0)
    ws2 = jax.random.normal(keys[4], (c22, c20, 1, 1), jnp.float32) / np.sqrt(float(c20))
    w22 = jax.random.normal(keys[5], (c22, c21, 1, 1), jnp.float32) / np.sqrt(float(c21))
    wl = jax.random.normal(keys[6], (NUM_CLASSES, POS2 * c22), jnp.float32) / np.sqrt(
        float(POS2 * c22))
    bl = jax.random.normal(keys[7], (NUM_CLASSES,), jnp.float32) * 0.05

    # block 1: conv_1 (im2col layout) + shortcut (centre tap) fused at 256 lanes
    w1_t = jnp.transpose(w1, (2, 3, 1, 0)).reshape(9 * c10, c11)
    w1_main = jnp.zeros((K1P, LANES), jnp.float32).at[:9 * c10, :c11].set(w1_t)
    w1_sc = jnp.zeros((K1P, LANES), jnp.float32).at[4 * c10:5 * c10, :c12].set(
        ws1.reshape(c12, c10).T)
    w1c = jnp.concatenate([w1_main, w1_sc], axis=1).astype(jnp.bfloat16)   # [16,256]
    w12_p = (jnp.zeros((LANES, LANES), jnp.float32)
             .at[:c11, :c12].set(w12.reshape(c12, c11).T)).astype(jnp.bfloat16)
    bn1 = jnp.zeros((6, LANES), jnp.float32)            # g1,b1,g2,b2,gs,bs
    bn1 = bn1.at[0, :c11].set(1.0).at[2, :c12].set(1.0).at[4, :c12].set(1.0)

    # block 2: conv_1 as 9 per-tap [cin,cout] matrices; conv_2; shortcut
    w2t = np.zeros((9, LANES, LANES), np.float32)
    w2np = np.asarray(w2)                                # [16, 8, 3, 3]
    for ki in range(3):
        for kj in range(3):
            w2t[ki * 3 + kj, :c20, :c21] = w2np[:, :, ki, kj].T
    w2t = jnp.asarray(w2t, jnp.bfloat16)
    w22_p = (jnp.zeros((LANES, LANES), jnp.float32)
             .at[:c21, :c22].set(w22.reshape(c22, c21).T)).astype(jnp.bfloat16)
    ws2_p = (jnp.zeros((LANES, LANES), jnp.float32)
             .at[:c20, :c22].set(ws2.reshape(c22, c20).T)).astype(jnp.bfloat16)
    bn2 = jnp.zeros((6, LANES), jnp.float32)
    bn2 = bn2.at[0, :c21].set(1.0).at[2, :c22].set(1.0).at[4, :c22].set(1.0)

    # classifier: torch flattens NCHW as (c, y, x) -> per-position [p, c] planes
    wcls = np.zeros((NUM_CLASSES, POS2, LANES), np.float32)
    wcls[:, :, :c22] = np.transpose(np.asarray(wl).reshape(NUM_CLASSES, c22, POS2),
                                    (0, 2, 1))
    wcls = jnp.asarray(wcls)
    linb = jnp.zeros((1, LANES), jnp.float32).at[0, :NUM_CLASSES].set(bl)

    gcat = make_im2col_selection(BATCH, OH1, OH1, 2, 1, NP2)      # [9*112, 392]

    return dict(w1c=w1c, w12=w12_p, bn1=bn1, gcat=gcat, w2t=w2t, w22=w22_p,
                ws2=ws2_p, bn2=bn2, wcls=wcls, linb=linb)


@jax.jit
def convnet_forward(x_nchw, params):
    x = jnp.transpose(x_nchw, (0, 2, 3, 1))                 # one NCHW->NHWC at boundary
    a1, _, _ = im2col_nhwc(x, 3, 3, 2, 1)                   # [B*14*14, 9]
    a1 = jnp.pad(a1, ((0, 0), (0, K1P - a1.shape[1]))).astype(jnp.bfloat16)
    logits_p, probas_p = convnet_pallas(a1, params)
    return logits_p[:, :NUM_CLASSES], probas_p[:, :NUM_CLASSES]


if __name__ == "__main__":
    key = jax.random.PRNGKey(0)
    kx, kp = jax.random.split(key)

    x = jax.random.normal(kx, (BATCH, 1, IMG, IMG), jnp.float32)
    params = make_params(kp)

    logits, probas = convnet_forward(x, params)
    jax.block_until_ready((logits, probas))

    assert logits.shape == (BATCH, NUM_CLASSES)
    assert probas.shape == (BATCH, NUM_CLASSES)
    assert bool(jnp.all(jnp.isfinite(logits)))
    assert bool(jnp.all(jnp.isfinite(probas)))
    assert bool(jnp.allclose(jnp.sum(probas, axis=1), 1.0, atol=1e-4))
    print("KERNEL_OK")
</pallas_src>

<mosaic_0001>
module attributes {stable_mosaic.version = 11 : i64} {
  func.func @_convnet_kernel(%arg0: memref<392x16xbf16, #tpu.memory_space<vmem>>, %arg1: memref<16x256xbf16, #tpu.memory_space<vmem>>, %arg2: memref<128x128xbf16, #tpu.memory_space<vmem>>, %arg3: memref<6x128xf32, #tpu.memory_space<vmem>>, %arg4: memref<1008x392xbf16, #tpu.memory_space<vmem>>, %arg5: memref<9x128x128xbf16, #tpu.memory_space<vmem>>, %arg6: memref<128x128xbf16, #tpu.memory_space<vmem>>, %arg7: memref<128x128xbf16, #tpu.memory_space<vmem>>, %arg8: memref<6x128xf32, #tpu.memory_space<vmem>>, %arg9: memref<10x49x128xf32, #tpu.memory_space<vmem>>, %arg10: memref<1x128xf32, #tpu.memory_space<vmem>>, %arg11: memref<2x128xf32, #tpu.memory_space<vmem>>, %arg12: memref<2x128xf32, #tpu.memory_space<vmem>>) attributes {dimension_semantics = [], scalar_prefetch = 0 : i64, scratch_operands = 0 : i64, tpu.core_type = #tpu.core_type<tc>} {
    %c0 = arith.constant 0 : index
    %c0_0 = arith.constant 0 : index
    %0 = vector.load %arg0[%c0, %c0_0] : memref<392x16xbf16, #tpu.memory_space<vmem>>, vector<392x16xbf16>
    %c0_1 = arith.constant 0 : index
    %c0_2 = arith.constant 0 : index
    %1 = vector.load %arg1[%c0_1, %c0_2] : memref<16x256xbf16, #tpu.memory_space<vmem>>, vector<16x256xbf16>
    %cst = arith.constant dense<0.000000e+00> : vector<392x256xf32>
    %2 = tpu.matmul %0, %1, %cst {dimension_numbers = #tpu.dot_dimension_numbers<[1], [0], [0], [1], [0, 0, 1, 1], [], []>} : vector<392x16xbf16>, vector<16x256xbf16>, vector<392x256xf32> -> vector<392x256xf32>
    %3 = vector.extract_strided_slice %2 {offsets = [0, 0], sizes = [392, 128], strides = [1, 1]} : vector<392x256xf32> to vector<392x128xf32>
    %c0_3 = arith.constant 0 : index
    %c0_4 = arith.constant 0 : index
    %4 = vector.load %arg3[%c0_3, %c0_4] : memref<6x128xf32, #tpu.memory_space<vmem>>, vector<1x128xf32>
    %c1 = arith.constant 1 : index
    %c0_5 = arith.constant 0 : index
    %5 = vector.load %arg3[%c1, %c0_5] : memref<6x128xf32, #tpu.memory_space<vmem>>, vector<1x128xf32>
    %cst_6 = arith.constant dense<0.000000e+00> : vector<128xf32>
    %6 = vector.multi_reduction <add>, %3, %cst_6 [0] : vector<392x128xf32> to vector<128xf32>
    %7 = vector.shape_cast %6 : vector<128xf32> to vector<1x128xf32>
    %8 = arith.mulf %3, %3 : vector<392x128xf32>
    %cst_7 = arith.constant dense<0.000000e+00> : vector<128xf32>
    %9 = vector.multi_reduction <add>, %8, %cst_7 [0] : vector<392x128xf32> to vector<128xf32>
    %10 = vector.shape_cast %9 : vector<128xf32> to vector<1x128xf32>
    %cst_8 = arith.constant 0.00255102036 : f32
    %11 = vector.broadcast %cst_8 : f32 to vector<1x128xf32>
    %12 = arith.mulf %7, %11 : vector<1x128xf32>
    %cst_9 = arith.constant 0.00255102036 : f32
    %13 = vector.broadcast %cst_9 : f32 to vector<1x128xf32>
    %14 = arith.mulf %10, %13 : vector<1x128xf32>
    %15 = arith.mulf %12, %12 : vector<1x128xf32>
    %16 = arith.subf %14, %15 : vector<1x128xf32>
    %cst_10 = arith.constant 0.000000e+00 : f32
    %17 = vector.broadcast %cst_10 : f32 to vector<1x128xf32>
    %18 = arith.maximumf %16, %17 : vector<1x128xf32>
    %cst_11 = arith.constant 9.99999974E-6 : f32
    %19 = vector.broadcast %cst_11 : f32 to vector<1x128xf32>
    %20 = arith.addf %18, %19 : vector<1x128xf32>
    %21 = math.rsqrt %20 : vector<1x128xf32>
    %22 = arith.mulf %4, %21 : vector<1x128xf32>
    %23 = arith.mulf %12, %22 : vector<1x128xf32>
    %24 = arith.subf %5, %23 : vector<1x128xf32>
    %25 = vector.broadcast %22 : vector<1x128xf32> to vector<392x128xf32>
    %26 = arith.mulf %3, %25 : vector<392x128xf32>
    %27 = vector.broadcast %24 : vector<1x128xf32> to vector<392x128xf32>
    %28 = arith.addf %26, %27 : vector<392x128xf32>
    %cst_12 = arith.constant 0.000000e+00 : f32
    %29 = vector.broadcast %cst_12 : f32 to vector<392x128xf32>
    %30 = arith.maximumf %28, %29 : vector<392x128xf32>
    %31 = arith.truncf %30 : vector<392x128xf32> to vector<392x128xbf16>
    %c0_13 = arith.constant 0 : index
    %c0_14 = arith.constant 0 : index
    %32 = vector.load %arg2[%c0_13, %c0_14] : memref<128x128xbf16, #tpu.memory_space<vmem>>, vector<128x128xbf16>
    %cst_15 = arith.constant dense<0.000000e+00> : vector<392x128xf32>
    %33 = tpu.matmul %31, %32, %cst_15 {dimension_numbers = #tpu.dot_dimension_numbers<[1], [0], [0], [1], [0, 0, 1, 1], [], []>} : vector<392x128xbf16>, vector<128x128xbf16>, vector<392x128xf32> -> vector<392x128xf32>
    %c2 = arith.constant 2 : index
    %c0_16 = arith.constant 0 : index
    %34 = vector.load %arg3[%c2, %c0_16] : memref<6x128xf32, #tpu.memory_space<vmem>>, vector<1x128xf32>
    %c3 = arith.constant 3 : index
    %c0_17 = arith.constant 0 : index
    %35 = vector.load %arg3[%c3, %c0_17] : memref<6x128xf32, #tpu.memory_space<vmem>>, vector<1x128xf32>
    %cst_18 = arith.constant dense<0.000000e+00> : vector<128xf32>
    %36 = vector.multi_reduction <add>, %33, %cst_18 [0] : vector<392x128xf32> to vector<128xf32>
    %37 = vector.shape_cast %36 : vector<128xf32> to vector<1x128xf32>
    %38 = arith.mulf %33, %33 : vector<392x128xf32>
    %cst_19 = arith.constant dense<0.000000e+00> : vector<128xf32>
    %39 = vector.multi_reduction <add>, %38, %cst_19 [0] : vector<392x128xf32> to vector<128xf32>
    %40 = vector.shape_cast %39 : vector<128xf32> to vector<1x128xf32>
    %cst_20 = arith.constant 0.00255102036 : f32
    %41 = vector.broadcast %cst_20 : f32 to vector<1x128xf32>
    %42 = arith.mulf %37, %41 : vector<1x128xf32>
    %cst_21 = arith.constant 0.00255102036 : f32
    %43 = vector.broadcast %cst_21 : f32 to vector<1x128xf32>
    %44 = arith.mulf %40, %43 : vector<1x128xf32>
    %45 = arith.mulf %42, %42 : vector<1x128xf32>
    %46 = arith.subf %44, %45 : vector<1x128xf32>
    %cst_22 = arith.constant 0.000000e+00 : f32
    %47 = vector.broadcast %cst_22 : f32 to vector<1x128xf32>
    %48 = arith.maximumf %46, %47 : vector<1x128xf32>
    %cst_23 = arith.constant 9.99999974E-6 : f32
    %49 = vector.broadcast %cst_23 : f32 to vector<1x128xf32>
    %50 = arith.addf %48, %49 : vector<1x128xf32>
    %51 = math.rsqrt %50 : vector<1x128xf32>
    %52 = arith.mulf %34, %51 : vector<1x128xf32>
    %53 = arith.mulf %42, %52 : vector<1x128xf32>
    %54 = arith.subf %35, %53 : vector<1x128xf32>
    %55 = vector.broadcast %52 : vector<1x128xf32> to vector<392x128xf32>
    %56 = arith.mulf %33, %55 : vector<392x128xf32>
    %57 = vector.broadcast %54 : vector<1x128xf32> to vector<392x128xf32>
    %58 = arith.addf %56, %57 : vector<392x128xf32>
    %59 = vector.extract_strided_slice %2 {offsets = [0, 128], sizes = [392, 128], strides = [1, 1]} : vector<392x256xf32> to vector<392x128xf32>
    %c4 = arith.constant 4 : index
    %c0_24 = arith.constant 0 : index
    %60 = vector.load %arg3[%c4, %c0_24] : memref<6x128xf32, #tpu.memory_space<vmem>>, vector<1x128xf32>
    %c5 = arith.constant 5 : index
    %c0_25 = arith.constant 0 : index
    %61 = vector.load %arg3[%c5, %c0_25] : memref<6x128xf32, #tpu.memory_space<vmem>>, vector<1x128xf32>
    %cst_26 = arith.constant dense<0.000000e+00> : vector<128xf32>
    %62 = vector.multi_reduction <add>, %59, %cst_26 [0] : vector<392x128xf32> to vector<128xf32>
    %63 = vector.shape_cast %62 : vector<128xf32> to vector<1x128xf32>
    %64 = arith.mulf %59, %59 : vector<392x128xf32>
    %cst_27 = arith.constant dense<0.000000e+00> : vector<128xf32>
    %65 = vector.multi_reduction <add>, %64, %cst_27 [0] : vector<392x128xf32> to vector<128xf32>
    %66 = vector.shape_cast %65 : vector<128xf32> to vector<1x128xf32>
    %cst_28 = arith.constant 0.00255102036 : f32
    %67 = vector.broadcast %cst_28 : f32 to vector<1x128xf32>
    %68 = arith.mulf %63, %67 : vector<1x128xf32>
    %cst_29 = arith.constant 0.00255102036 : f32
    %69 = vector.broadcast %cst_29 : f32 to vector<1x128xf32>
    %70 = arith.mulf %66, %69 : vector<1x128xf32>
    %71 = arith.mulf %68, %68 : vector<1x128xf32>
    %72 = arith.subf %70, %71 : vector<1x128xf32>
    %cst_30 = arith.constant 0.000000e+00 : f32
    %73 = vector.broadcast %cst_30 : f32 to vector<1x128xf32>
    %74 = arith.maximumf %72, %73 : vector<1x128xf32>
    %cst_31 = arith.constant 9.99999974E-6 : f32
    %75 = vector.broadcast %cst_31 : f32 to vector<1x128xf32>
    %76 = arith.addf %74, %75 : vector<1x128xf32>
    %77 = math.rsqrt %76 : vector<1x128xf32>
    %78 = arith.mulf %60, %77 : vector<1x128xf32>
    %79 = arith.mulf %68, %78 : vector<1x128xf32>
    %80 = arith.subf %61, %79 : vector<1x128xf32>
    %81 = vector.broadcast %78 : vector<1x128xf32> to vector<392x128xf32>
    %82 = arith.mulf %59, %81 : vector<392x128xf32>
    %83 = vector.broadcast %80 : vector<1x128xf32> to vector<392x128xf32>
    %84 = arith.addf %82, %83 : vector<392x128xf32>
    %85 = arith.addf %58, %84 : vector<392x128xf32>
    %cst_32 = arith.constant 0.000000e+00 : f32
    %86 = vector.broadcast %cst_32 : f32 to vector<392x128xf32>
    %87 = arith.maximumf %85, %86 : vector<392x128xf32>
    %c0_33 = arith.constant 0 : index
    %c0_34 = arith.constant 0 : index
    %88 = vector.load %arg4[%c0_33, %c0_34] : memref<1008x392xbf16, #tpu.memory_space<vmem>>, vector<1008x392xbf16>
    %89 = arith.truncf %87 : vector<392x128xf32> to vector<392x128xbf16>
    %cst_35 = arith.constant dense<0.000000e+00> : vector<1008x128xf32>
    %90 = tpu.matmul %88, %89, %cst_35 {dimension_numbers = #tpu.dot_dimension_numbers<[1], [0], [0], [1], [0, 0, 1, 1], [], []>} : vector<1008x392xbf16>, vector<392x128xbf16>, vector<1008x128xf32> -> vector<1008x128xf32>
    %91 = arith.truncf %90 : vector<1008x128xf32> to vector<1008x128xbf16>
    %cst_36 = arith.constant 0.000000e+00 : f32
    %92 = vector.broadcast %cst_36 : f32 to vector<112x128xf32>
    %93 = vector.extract_strided_slice %91 {offsets = [0, 0], sizes = [112, 128], strides = [1, 1]} : vector<1008x128xbf16> to vector<112x128xbf16>
    %c0_37 = arith.constant 0 : index
    %c0_38 = arith.constant 0 : index
    %c0_39 = arith.constant 0 : index
    %94 = vector.load %arg5[%c0_37, %c0_38, %c0_39] : memref<9x128x128xbf16, #tpu.memory_space<vmem>>, vector<1x128x128xbf16>
    %95 = vector.shape_cast %94 : vector<1x128x128xbf16> to vector<128x128xbf16>
    %cst_40 = arith.constant dense<0.000000e+00> : vector<112x128xf32>
    %96 = tpu.matmul %93, %95, %cst_40 {dimension_numbers = #tpu.dot_dimension_numbers<[1], [0], [0], [1], [0, 0, 1, 1], [], []>} : vector<112x128xbf16>, vector<128x128xbf16>, vector<112x128xf32> -> vector<112x128xf32>
    %97 = arith.addf %92, %96 : vector<112x128xf32>
    %98 = vector.extract_strided_slice %91 {offsets = [112, 0], sizes = [112, 128], strides = [1, 1]} : vector<1008x128xbf16> to vector<112x128xbf16>
    %c1_41 = arith.constant 1 : index
    %c0_42 = arith.constant 0 : index
    %c0_43 = arith.constant 0 : index
    %99 = vector.load %arg5[%c1_41, %c0_42, %c0_43] : memref<9x128x128xbf16, #tpu.memory_space<vmem>>, vector<1x128x128xbf16>
    %100 = vector.shape_cast %99 : vector<1x128x128xbf16> to vector<128x128xbf16>
    %cst_44 = arith.constant dense<0.000000e+00> : vector<112x128xf32>
    %101 = tpu.matmul %98, %100, %cst_44 {dimension_numbers = #tpu.dot_dimension_numbers<[1], [0], [0], [1], [0, 0, 1, 1], [], []>} : vector<112x128xbf16>, vector<128x128xbf16>, vector<112x128xf32> -> vector<112x128xf32>
    %102 = arith.addf %97, %101 : vector<112x128xf32>
    %103 = vector.extract_strided_slice %91 {offsets = [224, 0], sizes = [112, 128], strides = [1, 1]} : vector<1008x128xbf16> to vector<112x128xbf16>
    %c2_45 = arith.constant 2 : index
    %c0_46 = arith.constant 0 : index
    %c0_47 = arith.constant 0 : index
    %104 = vector.load %arg5[%c2_45, %c0_46, %c0_47] : memref<9x128x128xbf16, #tpu.memory_space<vmem>>, vector<1x128x128xbf16>
    %105 = vector.shape_cast %104 : vector<1x128x128xbf16> to vector<128x128xbf16>
    %cst_48 = arith.constant dense<0.000000e+00> : vector<112x128xf32>
    %106 = tpu.matmul %103, %105, %cst_48 {dimension_numbers = #tpu.dot_dimension_numbers<[1], [0], [0], [1], [0, 0, 1, 1], [], []>} : vector<112x128xbf16>, vector<128x128xbf16>, vector<112x128xf32> -> vector<112x128xf32>
    %107 = arith.addf %102, %106 : vector<112x128xf32>
    %108 = vector.extract_strided_slice %91 {offsets = [336, 0], sizes = [112, 128], strides = [1, 1]} : vector<1008x128xbf16> to vector<112x128xbf16>
    %c3_49 = arith.constant 3 : index
    %c0_50 = arith.constant 0 : index
    %c0_51 = arith.constant 0 : index
    %109 = vector.load %arg5[%c3_49, %c0_50, %c0_51] : memref<9x128x128xbf16, #tpu.memory_space<vmem>>, vector<1x128x128xbf16>
    %110 = vector.shape_cast %109 : vector<1x128x128xbf16> to vector<128x128xbf16>
    %cst_52 = arith.constant dense<0.000000e+00> : vector<112x128xf32>
    %111 = tpu.matmul %108, %110, %cst_52 {dimension_numbers = #tpu.dot_dimension_numbers<[1], [0], [0], [1], [0, 0, 1, 1], [], []>} : vector<112x128xbf16>, vector<128x128xbf16>, vector<112x128xf32> -> vector<112x128xf32>
    %112 = arith.addf %107, %111 : vector<112x128xf32>
    %113 = vector.extract_strided_slice %91 {offsets = [448, 0], sizes = [112, 128], strides = [1, 1]} : vector<1008x128xbf16> to vector<112x128xbf16>
    %c4_53 = arith.constant 4 : index
    %c0_54 = arith.constant 0 : index
    %c0_55 = arith.constant 0 : index
    %114 = vector.load %arg5[%c4_53, %c0_54, %c0_55] : memref<9x128x128xbf16, #tpu.memory_space<vmem>>, vector<1x128x128xbf16>
    %115 = vector.shape_cast %114 : vector<1x128x128xbf16> to vector<128x128xbf16>
    %cst_56 = arith.constant dense<0.000000e+00> : vector<112x128xf32>
    %116 = tpu.matmul %113, %115, %cst_56 {dimension_numbers = #tpu.dot_dimension_numbers<[1], [0], [0], [1], [0, 0, 1, 1], [], []>} : vector<112x128xbf16>, vector<128x128xbf16>, vector<112x128xf32> -> vector<112x128xf32>
    %117 = arith.addf %112, %116 : vector<112x128xf32>
    %118 = vector.extract_strided_slice %91 {offsets = [560, 0], sizes = [112, 128], strides = [1, 1]} : vector<1008x128xbf16> to vector<112x128xbf16>
    %c5_57 = arith.constant 5 : index
    %c0_58 = arith.constant 0 : index
    %c0_59 = arith.constant 0 : index
    %119 = vector.load %arg5[%c5_57, %c0_58, %c0_59] : memref<9x128x128xbf16, #tpu.memory_space<vmem>>, vector<1x128x128xbf16>
    %120 = vector.shape_cast %119 : vector<1x128x128xbf16> to vector<128x128xbf16>
    %cst_60 = arith.constant dense<0.000000e+00> : vector<112x128xf32>
    %121 = tpu.matmul %118, %120, %cst_60 {dimension_numbers = #tpu.dot_dimension_numbers<[1], [0], [0], [1], [0, 0, 1, 1], [], []>} : vector<112x128xbf16>, vector<128x128xbf16>, vector<112x128xf32> -> vector<112x128xf32>
    %122 = arith.addf %117, %121 : vector<112x128xf32>
    %123 = vector.extract_strided_slice %91 {offsets = [672, 0], sizes = [112, 128], strides = [1, 1]} : vector<1008x128xbf16> to vector<112x128xbf16>
    %c6 = arith.constant 6 : index
    %c0_61 = arith.constant 0 : index
    %c0_62 = arith.constant 0 : index
    %124 = vector.load %arg5[%c6, %c0_61, %c0_62] : memref<9x128x128xbf16, #tpu.memory_space<vmem>>, vector<1x128x128xbf16>
    %125 = vector.shape_cast %124 : vector<1x128x128xbf16> to vector<128x128xbf16>
    %cst_63 = arith.constant dense<0.000000e+00> : vector<112x128xf32>
    %126 = tpu.matmul %123, %125, %cst_63 {dimension_numbers = #tpu.dot_dimension_numbers<[1], [0], [0], [1], [0, 0, 1, 1], [], []>} : vector<112x128xbf16>, vector<128x128xbf16>, vector<112x128xf32> -> vector<112x128xf32>
    %127 = arith.addf %122, %126 : vector<112x128xf32>
    %128 = vector.extract_strided_slice %91 {offsets = [784, 0], sizes = [112, 128], strides = [1, 1]} : vector<1008x128xbf16> to vector<112x128xbf16>
    %c7 = arith.constant 7 : index
    %c0_64 = arith.constant 0 : index
    %c0_65 = arith.constant 0 : index
    %129 = vector.load %arg5[%c7, %c0_64, %c0_65] : memref<9x128x128xbf16, #tpu.memory_space<vmem>>, vector<1x128x128xbf16>
    %130 = vector.shape_cast %129 : vector<1x128x128xbf16> to vector<128x128xbf16>
    %cst_66 = arith.constant dense<0.000000e+00> : vector<112x128xf32>
    %131 = tpu.matmul %128, %130, %cst_66 {dimension_numbers = #tpu.dot_dimension_numbers<[1], [0], [0], [1], [0, 0, 1, 1], [], []>} : vector<112x128xbf16>, vector<128x128xbf16>, vector<112x128xf32> -> vector<112x128xf32>
    %132 = arith.addf %127, %131 : vector<112x128xf32>
    %133 = vector.extract_strided_slice %91 {offsets = [896, 0], sizes = [112, 128], strides = [1, 1]} : vector<1008x128xbf16> to vector<112x128xbf16>
    %c8 = arith.constant 8 : index
    %c0_67 = arith.constant 0 : index
    %c0_68 = arith.constant 0 : index
    %134 = vector.load %arg5[%c8, %c0_67, %c0_68] : memref<9x128x128xbf16, #tpu.memory_space<vmem>>, vector<1x128x128xbf16>
    %135 = vector.shape_cast %134 : vector<1x128x128xbf16> to vector<128x128xbf16>
    %cst_69 = arith.constant dense<0.000000e+00> : vector<112x128xf32>
    %136 = tpu.matmul %133, %135, %cst_69 {dimension_numbers = #tpu.dot_dimension_numbers<[1], [0], [0], [1], [0, 0, 1, 1], [], []>} : vector<112x128xbf16>, vector<128x128xbf16>, vector<112x128xf32> -> vector<112x128xf32>
    %137 = arith.addf %132, %136 : vector<112x128xf32>
    %138 = tpu.iota {dimensions = array<i32: 0>} : vector<112x1xi32>
    %c98_i32 = arith.constant 98 : i32
    %139 = vector.broadcast %c98_i32 : i32 to vector<112x1xi32>
    %140 = arith.cmpi slt, %138, %139 : vector<112x1xi32>
    %c0_70 = arith.constant 0 : index
    %c0_71 = arith.constant 0 : index
    %141 = vector.load %arg8[%c0_70, %c0_71] : memref<6x128xf32, #tpu.memory_space<vmem>>, vector<1x128xf32>
    %c1_72 = arith.constant 1 : index
    %c0_73 = arith.constant 0 : index
    %142 = vector.load %arg8[%c1_72, %c0_73] : memref<6x128xf32, #tpu.memory_space<vmem>>, vector<1x128xf32>
    %cst_74 = arith.constant dense<0.000000e+00> : vector<128xf32>
    %143 = vector.multi_reduction <add>, %137, %cst_74 [0] : vector<112x128xf32> to vector<128xf32>
    %144 = vector.shape_cast %143 : vector<128xf32> to vector<1x128xf32>
    %145 = arith.mulf %137, %137 : vector<112x128xf32>
    %cst_75 = arith.constant dense<0.000000e+00> : vector<128xf32>
    %146 = vector.multi_reduction <add>, %145, %cst_75 [0] : vector<112x128xf32> to vector<128xf32>
    %147 = vector.shape_cast %146 : vector<128xf32> to vector<1x128xf32>
    %cst_76 = arith.constant 0.0102040814 : f32
    %148 = vector.broadcast %cst_76 : f32 to vector<1x128xf32>
    %149 = arith.mulf %144, %148 : vector<1x128xf32>
    %cst_77 = arith.constant 0.0102040814 : f32
    %150 = vector.broadcast %cst_77 : f32 to vector<1x128xf32>
    %151 = arith.mulf %147, %150 : vector<1x128xf32>
    %152 = arith.mulf %149, %149 : vector<1x128xf32>
    %153 = arith.subf %151, %152 : vector<1x128xf32>
    %cst_78 = arith.constant 0.000000e+00 : f32
    %154 = vector.broadcast %cst_78 : f32 to vector<1x128xf32>
    %155 = arith.maximumf %153, %154 : vector<1x128xf32>
    %cst_79 = arith.constant 9.99999974E-6 : f32
    %156 = vector.broadcast %cst_79 : f32 to vector<1x128xf32>
    %157 = arith.addf %155, %156 : vector<1x128xf32>
    %158 = math.rsqrt %157 : vector<1x128xf32>
    %159 = arith.mulf %141, %158 : vector<1x128xf32>
    %160 = arith.mulf %149, %159 : vector<1x128xf32>
    %161 = arith.subf %142, %160 : vector<1x128xf32>
    %162 = vector.broadcast %159 : vector<1x128xf32> to vector<112x128xf32>
    %163 = arith.mulf %137, %162 : vector<112x128xf32>
    %164 = vector.broadcast %161 : vector<1x128xf32> to vector<112x128xf32>
    %165 = arith.addf %163, %164 : vector<112x128xf32>
    %cst_80 = arith.constant 0.000000e+00 : f32
    %166 = vector.broadcast %cst_80 : f32 to vector<112x128xf32>
    %167 = arith.maximumf %165, %166 : vector<112x128xf32>
    %cst_81 = arith.constant 0.000000e+00 : f32
    %168 = vector.shape_cast %140 : vector<112x1xi1> to vector<112x1xi1>
    %169 = vector.broadcast %168 : vector<112x1xi1> to vector<112x128xi1>
    %170 = vector.broadcast %cst_81 : f32 to vector<112x128xf32>
    %171 = arith.select %169, %167, %170 : vector<112x128xi1>, vector<112x128xf32>
    %172 = arith.truncf %171 : vector<112x128xf32> to vector<112x128xbf16>
    %c0_82 = arith.constant 0 : index
    %c0_83 = arith.constant 0 : index
    %173 = vector.load %arg6[%c0_82, %c0_83] : memref<128x128xbf16, #tpu.memory_space<vmem>>, vector<128x128xbf16>
    %cst_84 = arith.constant dense<0.000000e+00> : vector<112x128xf32>
    %174 = tpu.matmul %172, %173, %cst_84 {dimension_numbers = #tpu.dot_dimension_numbers<[1], [0], [0], [1], [0, 0, 1, 1], [], []>} : vector<112x128xbf16>, vector<128x128xbf16>, vector<112x128xf32> -> vector<112x128xf32>
    %175 = vector.extract_strided_slice %91 {offsets = [448, 0], sizes = [112, 128], strides = [1, 1]} : vector<1008x128xbf16> to vector<112x128xbf16>
    %c0_85 = arith.constant 0 : index
    %c0_86 = arith.constant 0 : index
    %176 = vector.load %arg7[%c0_85, %c0_86] : memref<128x128xbf16, #tpu.memory_space<vmem>>, vector<128x128xbf16>
    %cst_87 = arith.constant dense<0.000000e+00> : vector<112x128xf32>
    %177 = tpu.matmul %175, %176, %cst_87 {dimension_numbers = #tpu.dot_dimension_numbers<[1], [0], [0], [1], [0, 0, 1, 1], [], []>} : vector<112x128xbf16>, vector<128x128xbf16>, vector<112x128xf32> -> vector<112x128xf32>
    %c2_88 = arith.constant 2 : index
    %c0_89 = arith.constant 0 : index
    %178 = vector.load %arg8[%c2_88, %c0_89] : memref<6x128xf32, #tpu.memory_space<vmem>>, vector<1x128xf32>
    %c3_90 = arith.constant 3 : index
    %c0_91 = arith.constant 0 : index
    %179 = vector.load %arg8[%c3_90, %c0_91] : memref<6x128xf32, #tpu.memory_space<vmem>>, vector<1x128xf32>
    %cst_92 = arith.constant dense<0.000000e+00> : vector<128xf32>
    %180 = vector.multi_reduction <add>, %174, %cst_92 [0] : vector<112x128xf32> to vector<128xf32>
    %181 = vector.shape_cast %180 : vector<128xf32> to vector<1x128xf32>
    %182 = arith.mulf %174, %174 : vector<112x128xf32>
    %cst_93 = arith.constant dense<0.000000e+00> : vector<128xf32>
    %183 = vector.multi_reduction <add>, %182, %cst_93 [0] : vector<112x128xf32> to vector<128xf32>
    %184 = vector.shape_cast %183 : vector<128xf32> to vector<1x128xf32>
    %cst_94 = arith.constant 0.0102040814 : f32
    %185 = vector.broadcast %cst_94 : f32 to vector<1x128xf32>
    %186 = arith.mulf %181, %185 : vector<1x128xf32>
    %cst_95 = arith.constant 0.0102040814 : f32
    %187 = vector.broadcast %cst_95 : f32 to vector<1x128xf32>
    %188 = arith.mulf %184, %187 : vector<1x128xf32>
    %189 = arith.mulf %186, %186 : vector<1x128xf32>
    %190 = arith.subf %188, %189 : vector<1x128xf32>
    %cst_96 = arith.constant 0.000000e+00 : f32
    %191 = vector.broadcast %cst_96 : f32 to vector<1x128xf32>
    %192 = arith.maximumf %190, %191 : vector<1x128xf32>
    %cst_97 = arith.constant 9.99999974E-6 : f32
    %193 = vector.broadcast %cst_97 : f32 to vector<1x128xf32>
    %194 = arith.addf %192, %193 : vector<1x128xf32>
    %195 = math.rsqrt %194 : vector<1x128xf32>
    %196 = arith.mulf %178, %195 : vector<1x128xf32>
    %197 = arith.mulf %186, %196 : vector<1x128xf32>
    %198 = arith.subf %179, %197 : vector<1x128xf32>
    %199 = vector.broadcast %196 : vector<1x128xf32> to vector<112x128xf32>
    %200 = arith.mulf %174, %199 : vector<112x128xf32>
    %201 = vector.broadcast %198 : vector<1x128xf32> to vector<112x128xf32>
    %202 = arith.addf %200, %201 : vector<112x128xf32>
    %c4_98 = arith.constant 4 : index
    %c0_99 = arith.constant 0 : index
    %203 = vector.load %arg8[%c4_98, %c0_99] : memref<6x128xf32, #tpu.memory_space<vmem>>, vector<1x128xf32>
    %c5_100 = arith.constant 5 : index
    %c0_101 = arith.constant 0 : index
    %204 = vector.load %arg8[%c5_100, %c0_101] : memref<6x128xf32, #tpu.memory_space<vmem>>, vector<1x128xf32>
    %cst_102 = arith.constant dense<0.000000e+00> : vector<128xf32>
    %205 = vector.multi_reduction <add>, %177, %cst_102 [0] : vector<112x128xf32> to vector<128xf32>
    %206 = vector.shape_cast %205 : vector<128xf32> to vector<1x128xf32>
    %207 = arith.mulf %177, %177 : vector<112x128xf32>
    %cst_103 = arith.constant dense<0.000000e+00> : vector<128xf32>
    %208 = vector.multi_reduction <add>, %207, %cst_103 [0] : vector<112x128xf32> to vector<128xf32>
    %209 = vector.shape_cast %208 : vector<128xf32> to vector<1x128xf32>
    %cst_104 = arith.constant 0.0102040814 : f32
    %210 = vector.broadcast %cst_104 : f32 to vector<1x128xf32>
    %211 = arith.mulf %206, %210 : vector<1x128xf32>
    %cst_105 = arith.constant 0.0102040814 : f32
    %212 = vector.broadcast %cst_105 : f32 to vector<1x128xf32>
    %213 = arith.mulf %209, %212 : vector<1x128xf32>
    %214 = arith.mulf %211, %211 : vector<1x128xf32>
    %215 = arith.subf %213, %214 : vector<1x128xf32>
    %cst_106 = arith.constant 0.000000e+00 : f32
    %216 = vector.broadcast %cst_106 : f32 to vector<1x128xf32>
    %217 = arith.maximumf %215, %216 : vector<1x128xf32>
    %cst_107 = arith.constant 9.99999974E-6 : f32
    %218 = vector.broadcast %cst_107 : f32 to vector<1x128xf32>
    %219 = arith.addf %217, %218 : vector<1x128xf32>
    %220 = math.rsqrt %219 : vector<1x128xf32>
    %221 = arith.mulf %203, %220 : vector<1x128xf32>
    %222 = arith.mulf %211, %221 : vector<1x128xf32>
    %223 = arith.subf %204, %222 : vector<1x128xf32>
    %224 = vector.broadcast %221 : vector<1x128xf32> to vector<112x128xf32>
    %225 = arith.mulf %177, %224 : vector<112x128xf32>
    %226 = vector.broadcast %223 : vector<1x128xf32> to vector<112x128xf32>
    %227 = arith.addf %225, %226 : vector<112x128xf32>
    %228 = arith.addf %202, %227 : vector<112x128xf32>
    %cst_108 = arith.constant 0.000000e+00 : f32
    %229 = vector.broadcast %cst_108 : f32 to vector<112x128xf32>
    %230 = arith.maximumf %228, %229 : vector<112x128xf32>
    %231 = tpu.iota {dimensions = array<i32: 1>} : vector<1x128xi32>
    %232 = vector.extract_strided_slice %230 {offsets = [0, 0], sizes = [49, 128], strides = [1, 1]} : vector<112x128xf32> to vector<49x128xf32>
    %cst_109 = arith.constant 0.000000e+00 : f32
    %233 = vector.broadcast %cst_109 : f32 to vector<1x128xf32>
    %c0_110 = arith.constant 0 : index
    %c0_111 = arith.constant 0 : index
    %c0_112 = arith.constant 0 : index
    %234 = vector.load %arg9[%c0_110, %c0_111, %c0_112] : memref<10x49x128xf32, #tpu.memory_space<vmem>>, vector<1x49x128xf32>
    %235 = vector.shape_cast %234 : vector<1x49x128xf32> to vector<49x128xf32>
    %236 = arith.mulf %232, %235 : vector<49x128xf32>
    %cst_113 = arith.constant dense<0.000000e+00> : vector<49xf32>
    %237 = vector.multi_reduction <add>, %236, %cst_113 [1] : vector<49x128xf32> to vector<49xf32>
    %238 = vector.shape_cast %237 : vector<49xf32> to vector<49x1xf32>
    %cst_114 = arith.constant dense<0.000000e+00> : vector<1xf32>
    %239 = vector.multi_reduction <add>, %238, %cst_114 [0] : vector<49x1xf32> to vector<1xf32>
    %240 = vector.shape_cast %239 : vector<1xf32> to vector<1x1xf32>
    %c0_i32 = arith.constant 0 : i32
    %241 = vector.broadcast %c0_i32 : i32 to vector<1x128xi32>
    %242 = arith.cmpi eq, %231, %241 : vector<1x128xi32>
    %243 = arith.extui %242 : vector<1x128xi1> to vector<1x128xi32>
    %244 = arith.sitofp %243 : vector<1x128xi32> to vector<1x128xf32>
    %245 = vector.broadcast %240 : vector<1x1xf32> to vector<1x128xf32>
    %246 = arith.mulf %245, %244 : vector<1x128xf32>
    %247 = arith.addf %233, %246 : vector<1x128xf32>
    %c1_115 = arith.constant 1 : index
    %c0_116 = arith.constant 0 : index
    %c0_117 = arith.constant 0 : index
    %248 = vector.load %arg9[%c1_115, %c0_116, %c0_117] : memref<10x49x128xf32, #tpu.memory_space<vmem>>, vector<1x49x128xf32>
    %249 = vector.shape_cast %248 : vector<1x49x128xf32> to vector<49x128xf32>
    %250 = arith.mulf %232, %249 : vector<49x128xf32>
    %cst_118 = arith.constant dense<0.000000e+00> : vector<49xf32>
    %251 = vector.multi_reduction <add>, %250, %cst_118 [1] : vector<49x128xf32> to vector<49xf32>
    %252 = vector.shape_cast %251 : vector<49xf32> to vector<49x1xf32>
    %cst_119 = arith.constant dense<0.000000e+00> : vector<1xf32>
    %253 = vector.multi_reduction <add>, %252, %cst_119 [0] : vector<49x1xf32> to vector<1xf32>
    %254 = vector.shape_cast %253 : vector<1xf32> to vector<1x1xf32>
    %c1_i32 = arith.constant 1 : i32
    %255 = vector.broadcast %c1_i32 : i32 to vector<1x128xi32>
    %256 = arith.cmpi eq, %231, %255 : vector<1x128xi32>
    %257 = arith.extui %256 : vector<1x128xi1> to vector<1x128xi32>
    %258 = arith.sitofp %257 : vector<1x128xi32> to vector<1x128xf32>
    %259 = vector.broadcast %254 : vector<1x1xf32> to vector<1x128xf32>
    %260 = arith.mulf %259, %258 : vector<1x128xf32>
    %261 = arith.addf %247, %260 : vector<1x128xf32>
    %c2_120 = arith.constant 2 : index
    %c0_121 = arith.constant 0 : index
    %c0_122 = arith.constant 0 : index
    %262 = vector.load %arg9[%c2_120, %c0_121, %c0_122] : memref<10x49x128xf32, #tpu.memory_space<vmem>>, vector<1x49x128xf32>
    %263 = vector.shape_cast %262 : vector<1x49x128xf32> to vector<49x128xf32>
    %264 = arith.mulf %232, %263 : vector<49x128xf32>
    %cst_123 = arith.constant dense<0.000000e+00> : vector<49xf32>
    %265 = vector.multi_reduction <add>, %264, %cst_123 [1] : vector<49x128xf32> to vector<49xf32>
    %266 = vector.shape_cast %265 : vector<49xf32> to vector<49x1xf32>
    %cst_124 = arith.constant dense<0.000000e+00> : vector<1xf32>
    %267 = vector.multi_reduction <add>, %266, %cst_124 [0] : vector<49x1xf32> to vector<1xf32>
    %268 = vector.shape_cast %267 : vector<1xf32> to vector<1x1xf32>
    %c2_i32 = arith.constant 2 : i32
    %269 = vector.broadcast %c2_i32 : i32 to vector<1x128xi32>
    %270 = arith.cmpi eq, %231, %269 : vector<1x128xi32>
    %271 = arith.extui %270 : vector<1x128xi1> to vector<1x128xi32>
    %272 = arith.sitofp %271 : vector<1x128xi32> to vector<1x128xf32>
    %273 = vector.broadcast %268 : vector<1x1xf32> to vector<1x128xf32>
    %274 = arith.mulf %273, %272 : vector<1x128xf32>
    %275 = arith.addf %261, %274 : vector<1x128xf32>
    %c3_125 = arith.constant 3 : index
    %c0_126 = arith.constant 0 : index
    %c0_127 = arith.constant 0 : index
    %276 = vector.load %arg9[%c3_125, %c0_126, %c0_127] : memref<10x49x128xf32, #tpu.memory_space<vmem>>, vector<1x49x128xf32>
    %277 = vector.shape_cast %276 : vector<1x49x128xf32> to vector<49x128xf32>
    %278 = arith.mulf %232, %277 : vector<49x128xf32>
    %cst_128 = arith.constant dense<0.000000e+00> : vector<49xf32>
    %279 = vector.multi_reduction <add>, %278, %cst_128 [1] : vector<49x128xf32> to vector<49xf32>
    %280 = vector.shape_cast %279 : vector<49xf32> to vector<49x1xf32>
    %cst_129 = arith.constant dense<0.000000e+00> : vector<1xf32>
    %281 = vector.multi_reduction <add>, %280, %cst_129 [0] : vector<49x1xf32> to vector<1xf32>
    %282 = vector.shape_cast %281 : vector<1xf32> to vector<1x1xf32>
    %c3_i32 = arith.constant 3 : i32
    %283 = vector.broadcast %c3_i32 : i32 to vector<1x128xi32>
    %284 = arith.cmpi eq, %231, %283 : vector<1x128xi32>
    %285 = arith.extui %284 : vector<1x128xi1> to vector<1x128xi32>
    %286 = arith.sitofp %285 : vector<1x128xi32> to vector<1x128xf32>
    %287 = vector.broadcast %282 : vector<1x1xf32> to vector<1x128xf32>
    %288 = arith.mulf %287, %286 : vector<1x128xf32>
    %289 = arith.addf %275, %288 : vector<1x128xf32>
    %c4_130 = arith.constant 4 : index
    %c0_131 = arith.constant 0 : index
    %c0_132 = arith.constant 0 : index
    %290 = vector.load %arg9[%c4_130, %c0_131, %c0_132] : memref<10x49x128xf32, #tpu.memory_space<vmem>>, vector<1x49x128xf32>
    %291 = vector.shape_cast %290 : vector<1x49x128xf32> to vector<49x128xf32>
    %292 = arith.mulf %232, %291 : vector<49x128xf32>
    %cst_133 = arith.constant dense<0.000000e+00> : vector<49xf32>
    %293 = vector.multi_reduction <add>, %292, %cst_133 [1] : vector<49x128xf32> to vector<49xf32>
    %294 = vector.shape_cast %293 : vector<49xf32> to vector<49x1xf32>
    %cst_134 = arith.constant dense<0.000000e+00> : vector<1xf32>
    %295 = vector.multi_reduction <add>, %294, %cst_134 [0] : vector<49x1xf32> to vector<1xf32>
    %296 = vector.shape_cast %295 : vector<1xf32> to vector<1x1xf32>
    %c4_i32 = arith.constant 4 : i32
    %297 = vector.broadcast %c4_i32 : i32 to vector<1x128xi32>
    %298 = arith.cmpi eq, %231, %297 : vector<1x128xi32>
    %299 = arith.extui %298 : vector<1x128xi1> to vector<1x128xi32>
    %300 = arith.sitofp %299 : vector<1x128xi32> to vector<1x128xf32>
    %301 = vector.broadcast %296 : vector<1x1xf32> to vector<1x128xf32>
    %302 = arith.mulf %301, %300 : vector<1x128xf32>
    %303 = arith.addf %289, %302 : vector<1x128xf32>
    %c5_135 = arith.constant 5 : index
    %c0_136 = arith.constant 0 : index
    %c0_137 = arith.constant 0 : index
    %304 = vector.load %arg9[%c5_135, %c0_136, %c0_137] : memref<10x49x128xf32, #tpu.memory_space<vmem>>, vector<1x49x128xf32>
    %305 = vector.shape_cast %304 : vector<1x49x128xf32> to vector<49x128xf32>
    %306 = arith.mulf %232, %305 : vector<49x128xf32>
    %cst_138 = arith.constant dense<0.000000e+00> : vector<49xf32>
    %307 = vector.multi_reduction <add>, %306, %cst_138 [1] : vector<49x128xf32> to vector<49xf32>
    %308 = vector.shape_cast %307 : vector<49xf32> to vector<49x1xf32>
    %cst_139 = arith.constant dense<0.000000e+00> : vector<1xf32>
    %309 = vector.multi_reduction <add>, %308, %cst_139 [0] : vector<49x1xf32> to vector<1xf32>
    %310 = vector.shape_cast %309 : vector<1xf32> to vector<1x1xf32>
    %c5_i32 = arith.constant 5 : i32
    %311 = vector.broadcast %c5_i32 : i32 to vector<1x128xi32>
    %312 = arith.cmpi eq, %231, %311 : vector<1x128xi32>
    %313 = arith.extui %312 : vector<1x128xi1> to vector<1x128xi32>
    %314 = arith.sitofp %313 : vector<1x128xi32> to vector<1x128xf32>
    %315 = vector.broadcast %310 : vector<1x1xf32> to vector<1x128xf32>
    %316 = arith.mulf %315, %314 : vector<1x128xf32>
    %317 = arith.addf %303, %316 : vector<1x128xf32>
    %c6_140 = arith.constant 6 : index
    %c0_141 = arith.constant 0 : index
    %c0_142 = arith.constant 0 : index
    %318 = vector.load %arg9[%c6_140, %c0_141, %c0_142] : memref<10x49x128xf32, #tpu.memory_space<vmem>>, vector<1x49x128xf32>
    %319 = vector.shape_cast %318 : vector<1x49x128xf32> to vector<49x128xf32>
    %320 = arith.mulf %232, %319 : vector<49x128xf32>
    %cst_143 = arith.constant dense<0.000000e+00> : vector<49xf32>
    %321 = vector.multi_reduction <add>, %320, %cst_143 [1] : vector<49x128xf32> to vector<49xf32>
    %322 = vector.shape_cast %321 : vector<49xf32> to vector<49x1xf32>
    %cst_144 = arith.constant dense<0.000000e+00> : vector<1xf32>
    %323 = vector.multi_reduction <add>, %322, %cst_144 [0] : vector<49x1xf32> to vector<1xf32>
    %324 = vector.shape_cast %323 : vector<1xf32> to vector<1x1xf32>
    %c6_i32 = arith.constant 6 : i32
    %325 = vector.broadcast %c6_i32 : i32 to vector<1x128xi32>
    %326 = arith.cmpi eq, %231, %325 : vector<1x128xi32>
    %327 = arith.extui %326 : vector<1x128xi1> to vector<1x128xi32>
    %328 = arith.sitofp %327 : vector<1x128xi32> to vector<1x128xf32>
    %329 = vector.broadcast %324 : vector<1x1xf32> to vector<1x128xf32>
    %330 = arith.mulf %329, %328 : vector<1x128xf32>
    %331 = arith.addf %317, %330 : vector<1x128xf32>
    %c7_145 = arith.constant 7 : index
    %c0_146 = arith.constant 0 : index
    %c0_147 = arith.constant 0 : index
    %332 = vector.load %arg9[%c7_145, %c0_146, %c0_147] : memref<10x49x128xf32, #tpu.memory_space<vmem>>, vector<1x49x128xf32>
    %333 = vector.shape_cast %332 : vector<1x49x128xf32> to vector<49x128xf32>
    %334 = arith.mulf %232, %333 : vector<49x128xf32>
    %cst_148 = arith.constant dense<0.000000e+00> : vector<49xf32>
    %335 = vector.multi_reduction <add>, %334, %cst_148 [1] : vector<49x128xf32> to vector<49xf32>
    %336 = vector.shape_cast %335 : vector<49xf32> to vector<49x1xf32>
    %cst_149 = arith.constant dense<0.000000e+00> : vector<1xf32>
    %337 = vector.multi_reduction <add>, %336, %cst_149 [0] : vector<49x1xf32> to vector<1xf32>
    %338 = vector.shape_cast %337 : vector<1xf32> to vector<1x1xf32>
    %c7_i32 = arith.constant 7 : i32
    %339 = vector.broadcast %c7_i32 : i32 to vector<1x128xi32>
    %340 = arith.cmpi eq, %231, %339 : vector<1x128xi32>
    %341 = arith.extui %340 : vector<1x128xi1> to vector<1x128xi32>
    %342 = arith.sitofp %341 : vector<1x128xi32> to vector<1x128xf32>
    %343 = vector.broadcast %338 : vector<1x1xf32> to vector<1x128xf32>
    %344 = arith.mulf %343, %342 : vector<1x128xf32>
    %345 = arith.addf %331, %344 : vector<1x128xf32>
    %c8_150 = arith.constant 8 : index
    %c0_151 = arith.constant 0 : index
    %c0_152 = arith.constant 0 : index
    %346 = vector.load %arg9[%c8_150, %c0_151, %c0_152] : memref<10x49x128xf32, #tpu.memory_space<vmem>>, vector<1x49x128xf32>
    %347 = vector.shape_cast %346 : vector<1x49x128xf32> to vector<49x128xf32>
    %348 = arith.mulf %232, %347 : vector<49x128xf32>
    %cst_153 = arith.constant dense<0.000000e+00> : vector<49xf32>
    %349 = vector.multi_reduction <add>, %348, %cst_153 [1] : vector<49x128xf32> to vector<49xf32>
    %350 = vector.shape_cast %349 : vector<49xf32> to vector<49x1xf32>
    %cst_154 = arith.constant dense<0.000000e+00> : vector<1xf32>
    %351 = vector.multi_reduction <add>, %350, %cst_154 [0] : vector<49x1xf32> to vector<1xf32>
    %352 = vector.shape_cast %351 : vector<1xf32> to vector<1x1xf32>
    %c8_i32 = arith.constant 8 : i32
    %353 = vector.broadcast %c8_i32 : i32 to vector<1x128xi32>
    %354 = arith.cmpi eq, %231, %353 : vector<1x128xi32>
    %355 = arith.extui %354 : vector<1x128xi1> to vector<1x128xi32>
    %356 = arith.sitofp %355 : vector<1x128xi32> to vector<1x128xf32>
    %357 = vector.broadcast %352 : vector<1x1xf32> to vector<1x128xf32>
    %358 = arith.mulf %357, %356 : vector<1x128xf32>
    %359 = arith.addf %345, %358 : vector<1x128xf32>
    %c9 = arith.constant 9 : index
    %c0_155 = arith.constant 0 : index
    %c0_156 = arith.constant 0 : index
    %360 = vector.load %arg9[%c9, %c0_155, %c0_156] : memref<10x49x128xf32, #tpu.memory_space<vmem>>, vector<1x49x128xf32>
    %361 = vector.shape_cast %360 : vector<1x49x128xf32> to vector<49x128xf32>
    %362 = arith.mulf %232, %361 : vector<49x128xf32>
    %cst_157 = arith.constant dense<0.000000e+00> : vector<49xf32>
    %363 = vector.multi_reduction <add>, %362, %cst_157 [1] : vector<49x128xf32> to vector<49xf32>
    %364 = vector.shape_cast %363 : vector<49xf32> to vector<49x1xf32>
    %cst_158 = arith.constant dense<0.000000e+00> : vector<1xf32>
    %365 = vector.multi_reduction <add>, %364, %cst_158 [0] : vector<49x1xf32> to vector<1xf32>
    %366 = vector.shape_cast %365 : vector<1xf32> to vector<1x1xf32>
    %c9_i32 = arith.constant 9 : i32
    %367 = vector.broadcast %c9_i32 : i32 to vector<1x128xi32>
    %368 = arith.cmpi eq, %231, %367 : vector<1x128xi32>
    %369 = arith.extui %368 : vector<1x128xi1> to vector<1x128xi32>
    %370 = arith.sitofp %369 : vector<1x128xi32> to vector<1x128xf32>
    %371 = vector.broadcast %366 : vector<1x1xf32> to vector<1x128xf32>
    %372 = arith.mulf %371, %370 : vector<1x128xf32>
    %373 = arith.addf %359, %372 : vector<1x128xf32>
    %374 = vector.extract_strided_slice %230 {offsets = [49, 0], sizes = [49, 128], strides = [1, 1]} : vector<112x128xf32> to vector<49x128xf32>
    %cst_159 = arith.constant 0.000000e+00 : f32
    %375 = vector.broadcast %cst_159 : f32 to vector<1x128xf32>
    %c0_160 = arith.constant 0 : index
    %c0_161 = arith.constant 0 : index
    %c0_162 = arith.constant 0 : index
    %376 = vector.load %arg9[%c0_160, %c0_161, %c0_162] : memref<10x49x128xf32, #tpu.memory_space<vmem>>, vector<1x49x128xf32>
    %377 = vector.shape_cast %376 : vector<1x49x128xf32> to vector<49x128xf32>
    %378 = arith.mulf %374, %377 : vector<49x128xf32>
    %cst_163 = arith.constant dense<0.000000e+00> : vector<49xf32>
    %379 = vector.multi_reduction <add>, %378, %cst_163 [1] : vector<49x128xf32> to vector<49xf32>
    %380 = vector.shape_cast %379 : vector<49xf32> to vector<49x1xf32>
    %cst_164 = arith.constant dense<0.000000e+00> : vector<1xf32>
    %381 = vector.multi_reduction <add>, %380, %cst_164 [0] : vector<49x1xf32> to vector<1xf32>
    %382 = vector.shape_cast %381 : vector<1xf32> to vector<1x1xf32>
    %c0_i32_165 = arith.constant 0 : i32
    %383 = vector.broadcast %c0_i32_165 : i32 to vector<1x128xi32>
    %384 = arith.cmpi eq, %231, %383 : vector<1x128xi32>
    %385 = arith.extui %384 : vector<1x128xi1> to vector<1x128xi32>
    %386 = arith.sitofp %385 : vector<1x128xi32> to vector<1x128xf32>
    %387 = vector.broadcast %382 : vector<1x1xf32> to vector<1x128xf32>
    %388 = arith.mulf %387, %386 : vector<1x128xf32>
    %389 = arith.addf %375, %388 : vector<1x128xf32>
    %c1_166 = arith.constant 1 : index
    %c0_167 = arith.constant 0 : index
    %c0_168 = arith.constant 0 : index
    %390 = vector.load %arg9[%c1_166, %c0_167, %c0_168] : memref<10x49x128xf32, #tpu.memory_space<vmem>>, vector<1x49x128xf32>
    %391 = vector.shape_cast %390 : vector<1x49x128xf32> to vector<49x128xf32>
    %392 = arith.mulf %374, %391 : vector<49x128xf32>
    %cst_169 = arith.constant dense<0.000000e+00> : vector<49xf32>
    %393 = vector.multi_reduction <add>, %392, %cst_169 [1] : vector<49x128xf32> to vector<49xf32>
    %394 = vector.shape_cast %393 : vector<49xf32> to vector<49x1xf32>
    %cst_170 = arith.constant dense<0.000000e+00> : vector<1xf32>
    %395 = vector.multi_reduction <add>, %394, %cst_170 [0] : vector<49x1xf32> to vector<1xf32>
    %396 = vector.shape_cast %395 : vector<1xf32> to vector<1x1xf32>
    %c1_i32_171 = arith.constant 1 : i32
    %397 = vector.broadcast %c1_i32_171 : i32 to vector<1x128xi32>
    %398 = arith.cmpi eq, %231, %397 : vector<1x128xi32>
    %399 = arith.extui %398 : vector<1x128xi1> to vector<1x128xi32>
    %400 = arith.sitofp %399 : vector<1x128xi32> to vector<1x128xf32>
    %401 = vector.broadcast %396 : vector<1x1xf32> to vector<1x128xf32>
    %402 = arith.mulf %401, %400 : vector<1x128xf32>
    %403 = arith.addf %389, %402 : vector<1x128xf32>
    %c2_172 = arith.constant 2 : index
    %c0_173 = arith.constant 0 : index
    %c0_174 = arith.constant 0 : index
    %404 = vector.load %arg9[%c2_172, %c0_173, %c0_174] : memref<10x49x128xf32, #tpu.memory_space<vmem>>, vector<1x49x128xf32>
    %405 = vector.shape_cast %404 : vector<1x49x128xf32> to vector<49x128xf32>
    %406 = arith.mulf %374, %405 : vector<49x128xf32>
    %cst_175 = arith.constant dense<0.000000e+00> : vector<49xf32>
    %407 = vector.multi_reduction <add>, %406, %cst_175 [1] : vector<49x128xf32> to vector<49xf32>
    %408 = vector.shape_cast %407 : vector<49xf32> to vector<49x1xf32>
    %cst_176 = arith.constant dense<0.000000e+00> : vector<1xf32>
    %409 = vector.multi_reduction <add>, %408, %cst_176 [0] : vector<49x1xf32> to vector<1xf32>
    %410 = vector.shape_cast %409 : vector<1xf32> to vector<1x1xf32>
    %c2_i32_177 = arith.constant 2 : i32
    %411 = vector.broadcast %c2_i32_177 : i32 to vector<1x128xi32>
    %412 = arith.cmpi eq, %231, %411 : vector<1x128xi32>
    %413 = arith.extui %412 : vector<1x128xi1> to vector<1x128xi32>
    %414 = arith.sitofp %413 : vector<1x128xi32> to vector<1x128xf32>
    %415 = vector.broadcast %410 : vector<1x1xf32> to vector<1x128xf32>
    %416 = arith.mulf %415, %414 : vector<1x128xf32>
    %417 = arith.addf %403, %416 : vector<1x128xf32>
    %c3_178 = arith.constant 3 : index
    %c0_179 = arith.constant 0 : index
    %c0_180 = arith.constant 0 : index
    %418 = vector.load %arg9[%c3_178, %c0_179, %c0_180] : memref<10x49x128xf32, #tpu.memory_space<vmem>>, vector<1x49x128xf32>
    %419 = vector.shape_cast %418 : vector<1x49x128xf32> to vector<49x128xf32>
    %420 = arith.mulf %374, %419 : vector<49x128xf32>
    %cst_181 = arith.constant dense<0.000000e+00> : vector<49xf32>
    %421 = vector.multi_reduction <add>, %420, %cst_181 [1] : vector<49x128xf32> to vector<49xf32>
    %422 = vector.shape_cast %421 : vector<49xf32> to vector<49x1xf32>
    %cst_182 = arith.constant dense<0.000000e+00> : vector<1xf32>
    %423 = vector.multi_reduction <add>, %422, %cst_182 [0] : vector<49x1xf32> to vector<1xf32>
    %424 = vector.shape_cast %423 : vector<1xf32> to vector<1x1xf32>
    %c3_i32_183 = arith.constant 3 : i32
    %425 = vector.broadcast %c3_i32_183 : i32 to vector<1x128xi32>
    %426 = arith.cmpi eq, %231, %425 : vector<1x128xi32>
    %427 = arith.extui %426 : vector<1x128xi1> to vector<1x128xi32>
    %428 = arith.sitofp %427 : vector<1x128xi32> to vector<1x128xf32>
    %429 = vector.broadcast %424 : vector<1x1xf32> to vector<1x128xf32>
    %430 = arith.mulf %429, %428 : vector<1x128xf32>
    %431 = arith.addf %417, %430 : vector<1x128xf32>
    %c4_184 = arith.constant 4 : index
    %c0_185 = arith.constant 0 : index
    %c0_186 = arith.constant 0 : index
    %432 = vector.load %arg9[%c4_184, %c0_185, %c0_186] : memref<10x49x128xf32, #tpu.memory_space<vmem>>, vector<1x49x128xf32>
    %433 = vector.shape_cast %432 : vector<1x49x128xf32> to vector<49x128xf32>
    %434 = arith.mulf %374, %433 : vector<49x128xf32>
    %cst_187 = arith.constant dense<0.000000e+00> : vector<49xf32>
    %435 = vector.multi_reduction <add>, %434, %cst_187 [1] : vector<49x128xf32> to vector<49xf32>
    %436 = vector.shape_cast %435 : vector<49xf32> to vector<49x1xf32>
    %cst_188 = arith.constant dense<0.000000e+00> : vector<1xf32>
    %437 = vector.multi_reduction <add>, %436, %cst_188 [0] : vector<49x1xf32> to vector<1xf32>
    %438 = vector.shape_cast %437 : vector<1xf32> to vector<1x1xf32>
    %c4_i32_189 = arith.constant 4 : i32
    %439 = vector.broadcast %c4_i32_189 : i32 to vector<1x128xi32>
    %440 = arith.cmpi eq, %231, %439 : vector<1x128xi32>
    %441 = arith.extui %440 : vector<1x128xi1> to vector<1x128xi32>
    %442 = arith.sitofp %441 : vector<1x128xi32> to vector<1x128xf32>
    %443 = vector.broadcast %438 : vector<1x1xf32> to vector<1x128xf32>
    %444 = arith.mulf %443, %442 : vector<1x128xf32>
    %445 = arith.addf %431, %444 : vector<1x128xf32>
    %c5_190 = arith.constant 5 : index
    %c0_191 = arith.constant 0 : index
    %c0_192 = arith.constant 0 : index
    %446 = vector.load %arg9[%c5_190, %c0_191, %c0_192] : memref<10x49x128xf32, #tpu.memory_space<vmem>>, vector<1x49x128xf32>
    %447 = vector.shape_cast %446 : vector<1x49x128xf32> to vector<49x128xf32>
    %448 = arith.mulf %374, %447 : vector<49x128xf32>
    %cst_193 = arith.constant dense<0.000000e+00> : vector<49xf32>
    %449 = vector.multi_reduction <add>, %448, %cst_193 [1] : vector<49x128xf32> to vector<49xf32>
    %450 = vector.shape_cast %449 : vector<49xf32> to vector<49x1xf32>
    %cst_194 = arith.constant dense<0.000000e+00> : vector<1xf32>
    %451 = vector.multi_reduction <add>, %450, %cst_194 [0] : vector<49x1xf32> to vector<1xf32>
    %452 = vector.shape_cast %451 : vector<1xf32> to vector<1x1xf32>
    %c5_i32_195 = arith.constant 5 : i32
    %453 = vector.broadcast %c5_i32_195 : i32 to vector<1x128xi32>
    %454 = arith.cmpi eq, %231, %453 : vector<1x128xi32>
    %455 = arith.extui %454 : vector<1x128xi1> to vector<1x128xi32>
    %456 = arith.sitofp %455 : vector<1x128xi32> to vector<1x128xf32>
    %457 = vector.broadcast %452 : vector<1x1xf32> to vector<1x128xf32>
    %458 = arith.mulf %457, %456 : vector<1x128xf32>
    %459 = arith.addf %445, %458 : vector<1x128xf32>
    %c6_196 = arith.constant 6 : index
    %c0_197 = arith.constant 0 : index
    %c0_198 = arith.constant 0 : index
    %460 = vector.load %arg9[%c6_196, %c0_197, %c0_198] : memref<10x49x128xf32, #tpu.memory_space<vmem>>, vector<1x49x128xf32>
    %461 = vector.shape_cast %460 : vector<1x49x128xf32> to vector<49x128xf32>
    %462 = arith.mulf %374, %461 : vector<49x128xf32>
    %cst_199 = arith.constant dense<0.000000e+00> : vector<49xf32>
    %463 = vector.multi_reduction <add>, %462, %cst_199 [1] : vector<49x128xf32> to vector<49xf32>
    %464 = vector.shape_cast %463 : vector<49xf32> to vector<49x1xf32>
    %cst_200 = arith.constant dense<0.000000e+00> : vector<1xf32>
    %465 = vector.multi_reduction <add>, %464, %cst_200 [0] : vector<49x1xf32> to vector<1xf32>
    %466 = vector.shape_cast %465 : vector<1xf32> to vector<1x1xf32>
    %c6_i32_201 = arith.constant 6 : i32
    %467 = vector.broadcast %c6_i32_201 : i32 to vector<1x128xi32>
    %468 = arith.cmpi eq, %231, %467 : vector<1x128xi32>
    %469 = arith.extui %468 : vector<1x128xi1> to vector<1x128xi32>
    %470 = arith.sitofp %469 : vector<1x128xi32> to vector<1x128xf32>
    %471 = vector.broadcast %466 : vector<1x1xf32> to vector<1x128xf32>
    %472 = arith.mulf %471, %470 : vector<1x128xf32>
    %473 = arith.addf %459, %472 : vector<1x128xf32>
    %c7_202 = arith.constant 7 : index
    %c0_203 = arith.constant 0 : index
    %c0_204 = arith.constant 0 : index
    %474 = vector.load %arg9[%c7_202, %c0_203, %c0_204] : memref<10x49x128xf32, #tpu.memory_space<vmem>>, vector<1x49x128xf32>
    %475 = vector.shape_cast %474 : vector<1x49x128xf32> to vector<49x128xf32>
    %476 = arith.mulf %374, %475 : vector<49x128xf32>
    %cst_205 = arith.constant dense<0.000000e+00> : vector<49xf32>
    %477 = vector.multi_reduction <add>, %476, %cst_205 [1] : vector<49x128xf32> to vector<49xf32>
    %478 = vector.shape_cast %477 : vector<49xf32> to vector<49x1xf32>
    %cst_206 = arith.constant dense<0.000000e+00> : vector<1xf32>
    %479 = vector.multi_reduction <add>, %478, %cst_206 [0] : vector<49x1xf32> to vector<1xf32>
    %480 = vector.shape_cast %479 : vector<1xf32> to vector<1x1xf32>
    %c7_i32_207 = arith.constant 7 : i32
    %481 = vector.broadcast %c7_i32_207 : i32 to vector<1x128xi32>
    %482 = arith.cmpi eq, %231, %481 : vector<1x128xi32>
    %483 = arith.extui %482 : vector<1x128xi1> to vector<1x128xi32>
    %484 = arith.sitofp %483 : vector<1x128xi32> to vector<1x128xf32>
    %485 = vector.broadcast %480 : vector<1x1xf32> to vector<1x128xf32>
    %486 = arith.mulf %485, %484 : vector<1x128xf32>
    %487 = arith.addf %473, %486 : vector<1x128xf32>
    %c8_208 = arith.constant 8 : index
    %c0_209 = arith.constant 0 : index
    %c0_210 = arith.constant 0 : index
    %488 = vector.load %arg9[%c8_208, %c0_209, %c0_210] : memref<10x49x128xf32, #tpu.memory_space<vmem>>, vector<1x49x128xf32>
    %489 = vector.shape_cast %488 : vector<1x49x128xf32> to vector<49x128xf32>
    %490 = arith.mulf %374, %489 : vector<49x128xf32>
    %cst_211 = arith.constant dense<0.000000e+00> : vector<49xf32>
    %491 = vector.multi_reduction <add>, %490, %cst_211 [1] : vector<49x128xf32> to vector<49xf32>
    %492 = vector.shape_cast %491 : vector<49xf32> to vector<49x1xf32>
    %cst_212 = arith.constant dense<0.000000e+00> : vector<1xf32>
    %493 = vector.multi_reduction <add>, %492, %cst_212 [0] : vector<49x1xf32> to vector<1xf32>
    %494 = vector.shape_cast %493 : vector<1xf32> to vector<1x1xf32>
    %c8_i32_213 = arith.constant 8 : i32
    %495 = vector.broadcast %c8_i32_213 : i32 to vector<1x128xi32>
    %496 = arith.cmpi eq, %231, %495 : vector<1x128xi32>
    %497 = arith.extui %496 : vector<1x128xi1> to vector<1x128xi32>
    %498 = arith.sitofp %497 : vector<1x128xi32> to vector<1x128xf32>
    %499 = vector.broadcast %494 : vector<1x1xf32> to vector<1x128xf32>
    %500 = arith.mulf %499, %498 : vector<1x128xf32>
    %501 = arith.addf %487, %500 : vector<1x128xf32>
    %c9_214 = arith.constant 9 : index
    %c0_215 = arith.constant 0 : index
    %c0_216 = arith.constant 0 : index
    %502 = vector.load %arg9[%c9_214, %c0_215, %c0_216] : memref<10x49x128xf32, #tpu.memory_space<vmem>>, vector<1x49x128xf32>
    %503 = vector.shape_cast %502 : vector<1x49x128xf32> to vector<49x128xf32>
    %504 = arith.mulf %374, %503 : vector<49x128xf32>
    %cst_217 = arith.constant dense<0.000000e+00> : vector<49xf32>
    %505 = vector.multi_reduction <add>, %504, %cst_217 [1] : vector<49x128xf32> to vector<49xf32>
    %506 = vector.shape_cast %505 : vector<49xf32> to vector<49x1xf32>
    %cst_218 = arith.constant dense<0.000000e+00> : vector<1xf32>
    %507 = vector.multi_reduction <add>, %506, %cst_218 [0] : vector<49x1xf32> to vector<1xf32>
    %508 = vector.shape_cast %507 : vector<1xf32> to vector<1x1xf32>
    %c9_i32_219 = arith.constant 9 : i32
    %509 = vector.broadcast %c9_i32_219 : i32 to vector<1x128xi32>
    %510 = arith.cmpi eq, %231, %509 : vector<1x128xi32>
    %511 = arith.extui %510 : vector<1x128xi1> to vector<1x128xi32>
    %512 = arith.sitofp %511 : vector<1x128xi32> to vector<1x128xf32>
    %513 = vector.broadcast %508 : vector<1x1xf32> to vector<1x128xf32>
    %514 = arith.mulf %513, %512 : vector<1x128xf32>
    %515 = arith.addf %501, %514 : vector<1x128xf32>
    %516 = tpu.concatenate %373, %515 in 0 : vector<1x128xf32>, vector<1x128xf32> -> vector<2x128xf32>
    %c0_220 = arith.constant 0 : index
    %c0_221 = arith.constant 0 : index
    %517 = vector.load %arg10[%c0_220, %c0_221] : memref<1x128xf32, #tpu.memory_space<vmem>>, vector<1x128xf32>
    %518 = vector.broadcast %517 : vector<1x128xf32> to vector<2x128xf32>
    %519 = arith.addf %516, %518 : vector<2x128xf32>
    %c0_222 = arith.constant 0 : index
    %c0_223 = arith.constant 0 : index
    %520 = vector.load %arg11[%c0_222, %c0_223] : memref<2x128xf32, #tpu.memory_space<vmem>>, vector<2x128xf32>
    tpu.vector_store %arg11[%c0_222, %c0_223], %519 {strides = array<i32>} : memref<2x128xf32, #tpu.memory_space<vmem>>, vector<2x128xf32>,
    %521 = tpu.iota {dimensions = array<i32: 1>} : vector<2x128xi32>
    %c10_i32 = arith.constant 10 : i32
    %522 = vector.broadcast %c10_i32 : i32 to vector<2x128xi32>
    %523 = arith.cmpi slt, %521, %522 : vector<2x128xi32>
    %cst_224 = arith.constant -1.000000e+30 : f32
    %524 = vector.broadcast %cst_224 : f32 to vector<2x128xf32>
    %525 = arith.select %523, %519, %524 : vector<2x128xi1>, vector<2x128xf32>
    %cst_225 = arith.constant dense<0xFF800000> : vector<2xf32>
    %526 = vector.multi_reduction <maximumf>, %525, %cst_225 [1] : vector<2x128xf32> to vector<2xf32>
    %527 = vector.shape_cast %526 : vector<2xf32> to vector<2x1xf32>
    %528 = vector.broadcast %527 : vector<2x1xf32> to vector<2x128xf32>
    %529 = arith.subf %525, %528 : vector<2x128xf32>
    %530 = math.exp %529 : vector<2x128xf32>
    %cst_226 = arith.constant dense<0.000000e+00> : vector<2xf32>
    %531 = vector.multi_reduction <add>, %530, %cst_226 [1] : vector<2x128xf32> to vector<2xf32>
    %532 = vector.shape_cast %531 : vector<2xf32> to vector<2x1xf32>
    %533 = vector.broadcast %532 : vector<2x1xf32> to vector<2x128xf32>
    %534 = arith.divf %530, %533 : vector<2x128xf32>
    %c0_227 = arith.constant 0 : index
    %c0_228 = arith.constant 0 : index
    %535 = vector.load %arg12[%c0_227, %c0_228] : memref<2x128xf32, #tpu.memory_space<vmem>>, vector<2x128xf32>
    tpu.vector_store %arg12[%c0_227, %c0_228], %534 {strides = array<i32>} : memref<2x128xf32, #tpu.memory_space<vmem>>, vector<2x128xf32>,
    return
  }
}

</mosaic_0001>

<bundles_post_ra>
// kernel: convnet_forward.1
= control target key start
LH: loop header
LB: loop body
LE: loop exit
PB: predicated region body
PF: predicated region fallthrough
CT: control target
= control target key end

     0   :  { %18 = vsyncpa [#allocation3], 0  ;;  %v16423_v2 = vmov 0   ;;  %vm227_vm0 = vcmask 130048   ;;  %s16410_s0 = inlined_call_operand.vmem [shape: bf16[392,16], index: 0, kind: input, shape index: {}]   ;;  %s16411_s1 = inlined_call_operand.vmem [shape: bf16[16,256], index: 1, kind: input, shape index: {}]   ;;  %s16412_s2 = inlined_call_operand.vmem [shape: bf16[128,128], index: 2, kind: input, shape index: {}]   ;;  %s16413_s3 = inlined_call_operand.vmem [shape: f32[6,128], index: 3, kind: input, shape index: {}]   ;;  %s16414_s4 = inlined_call_operand.vmem [shape: bf16[1008,392], index: 4, kind: input, shape index: {}]   ;;  %s16415_s5 = inlined_call_operand.vmem [shape: bf16[9,128,128], index: 5, kind: input, shape index: {}]   ;;  %s16416_s6 = inlined_call_operand.vmem [shape: bf16[128,128], index: 6, kind: input, shape index: {}]   ;;  %s16417_s7 = inlined_call_operand.vmem [shape: bf16[128,128], index: 7, kind: input, shape index: {}]   ;;  %s16418_s8 = inlined_call_operand.vmem [shape: f32[6,128], index: 8, kind: input, shape index: {}]   ;;  %s16419_s9 = inlined_call_operand.vmem [shape: f32[10,49,128], index: 9, kind: input, shape index: {}]   ;;  %s16420_s10 = inlined_call_operand.vmem [shape: f32[1,128], index: 10, kind: input, shape index: {}]   ;;  %s16421_s11 = inlined_call_operand.hbm [shape: f32[2,128], index: 11, kind: output, shape index: {0}]   ;;  %s16422_s12 = inlined_call_operand.hbm [shape: f32[2,128], index: 12, kind: output, shape index: {1}]  }
   0x1   :  { %v10278_v0 = vld [vmem:[%s16411_s1 + $0x4] ss:$8 sps:$4 sm:$0xff]   ;;  %v10280_v1 = vld [vmem:[%s16411_s1] ss:$8 sps:$4 sm:$0xff]   ;;  %335 = vmatprep.mubr.bf16.mxu0 %v16423_v2  ;;  %v10283_v5 = vld [vmem:[%s16410_s0 + $0x10] sm:$0xff]  }
   0x2   :  { %303 = vmatprep.subr.bf16.mxu0 %v10278_v0  ;;  %v10281_v3 = vld [vmem:[%s16410_s0] sm:$0xff]   ;;  %v10282_v4 = vld [vmem:[%s16410_s0 + $0x8] sm:$0xff]   ;;  %v10284_v6 = vld [vmem:[%s16410_s0 + $0x18] sm:$0xff]  }
   0x3   :  { %304 = vmatpush1.bf16.msra.mxu0 %v10280_v1  ;;  %v10285_v7 = vld [vmem:[%s16410_s0 + $0x20] sm:$0xff]   ;;  %v10286_v8 = vld [vmem:[%s16410_s0 + $0x28] sm:$0xff]   ;;  %v10287_v9 = vld [vmem:[%s16410_s0 + $0x30] sm:$0xff]  }
   0x4   :  { %3545 = vmatprep.subr.bf16.mxu0 %v16423_v2  ;;  %v10288_v10 = vld [vmem:[%s16410_s0 + $0x38] sm:$0xff]   ;;  %v10289_v11 = vld [vmem:[%s16410_s0 + $0x40] sm:$0xff]   ;;  %v10290_v12 = vld [vmem:[%s16410_s0 + $0x48] sm:$0xff]  }
   0x5   :  { %v10291_v13 = vld [vmem:[%s16410_s0 + $0x50] sm:$0xff]   ;;  %v10292_v14 = vld [vmem:[%s16410_s0 + $0x58] sm:$0xff]   ;;  %v10293_v15 = vld [vmem:[%s16410_s0 + $0x60] sm:$0xff]  }
   0x6   :  { %8369 = vmatmul.mubr.msk.bf16.vlgmr.msra.gmra.mrb[0].mxu0 %vm227_vm0, %v10281_v3  ;;  %v10294_v16 = vld [vmem:[%s16410_s0 + $0x68] sm:$0xff]   ;;  %v10295_v17 = vld [vmem:[%s16410_s0 + $0x70] sm:$0xff]   ;;  %v10296_v18 = vld [vmem:[%s16410_s0 + $0x78] sm:$0xff]  }
   0x7   :  { %345 = vmatprep.mubr.bf16.mxu0 %v16423_v2  ;;  %v10297_v19 = vld [vmem:[%s16410_s0 + $0x80] sm:$0xff]   ;;  %v10298_v20 = vld [vmem:[%s16410_s0 + $0x88] sm:$0xff]   ;;  %v10299_v21 = vld [vmem:[%s16410_s0 + $0x90] sm:$0xff]  }
   0x8   :  { %v10300_v22 = vld [vmem:[%s16410_s0 + $0x98] sm:$0xff]   ;;  %v10301_v23 = vld [vmem:[%s16410_s0 + $0xa0] sm:$0xff]   ;;  %v10302_v24 = vld [vmem:[%s16410_s0 + $0xa8] sm:$0xff]  }
   0xe   :  { %8370 = vmatmul.mubr.msk.bf16.gmra.mrb[4].mxu0 %vm227_vm0, %v10282_v4 }
   0xf   :  { %355 = vmatprep.mubr.bf16.mxu0 %v16423_v2 }
  0x16   :  { %8371 = vmatmul.mubr.msk.bf16.gmra.mrb[8].mxu0 %vm227_vm0, %v10283_v5 }
  0x17   :  { %365 = vmatprep.mubr.bf16.mxu0 %v16423_v2 }
  0x1e   :  { %8372 = vmatmul.mubr.msk.bf16.gmra.mrb[12].mxu0 %vm227_vm0, %v10284_v6 }
  0x1f   :  { %375 = vmatprep.mubr.bf16.mxu0 %v16423_v2 }
  0x26   :  { %8373 = vmatmul.mubr.msk.bf16.gmra.mrb[16].mxu0 %vm227_vm0, %v10285_v7 }
  0x27   :  { %385 = vmatprep.mubr.bf16.mxu0 %v16423_v2 }
  0x2e   :  { %8374 = vmatmul.mubr.msk.bf16.gmra.mrb[20].mxu0 %vm227_vm0, %v10286_v8 }
  0x2f   :  { %395 = vmatprep.mubr.bf16.mxu0 %v16423_v2 }
  0x36   :  { %8375 = vmatmul.mubr.msk.bf16.gmra.mrb[24].mxu0 %vm227_vm0, %v10287_v9 }
  0x37   :  { %405 = vmatprep.mubr.bf16.mxu0 %v16423_v2 }
  0x3e   :  { %8376 = vmatmul.mubr.msk.bf16.gmra.mrb[28].mxu0 %vm227_vm0, %v10288_v10 }
  0x3f   :  { %415 = vmatprep.mubr.bf16.mxu0 %v16423_v2 }
  0x46   :  { %8377 = vmatmul.mubr.msk.bf16.gmra.mrb[32].mxu0 %vm227_vm0, %v10289_v11 }
  0x47   :  { %425 = vmatprep.mubr.bf16.mxu0 %v16423_v2 }
  0x4e   :  { %8378 = vmatmul.mubr.msk.bf16.gmra.mrb[36].mxu0 %vm227_vm0, %v10290_v12 }
  0x4f   :  { %435 = vmatprep.mubr.bf16.mxu0 %v16423_v2 }
  0x56   :  { %8379 = vmatmul.mubr.msk.bf16.gmra.mrb[40].mxu0 %vm227_vm0, %v10291_v13 }
  0x57   :  { %445 = vmatprep.mubr.bf16.mxu0 %v16423_v2 }
  0x5e   :  { %8380 = vmatmul.mubr.msk.bf16.gmra.mrb[44].mxu0 %vm227_vm0, %v10292_v14 }
  0x5f   :  { %455 = vmatprep.mubr.bf16.mxu0 %v16423_v2 }
  0x66   :  { %8381 = vmatmul.mubr.msk.bf16.gmra.mrb[48].mxu0 %vm227_vm0, %v10293_v15 }
  0x67   :  { %465 = vmatprep.mubr.bf16.mxu0 %v16423_v2 }
  0x6e   :  { %8382 = vmatmul.mubr.msk.bf16.gmra.mrb[52].mxu0 %vm227_vm0, %v10294_v16 }
  0x6f   :  { %475 = vmatprep.mubr.bf16.mxu0 %v16423_v2 }
  0x76   :  { %8383 = vmatmul.mubr.msk.bf16.gmra.mrb[56].mxu0 %vm227_vm0, %v10295_v17 }
  0x77   :  { %485 = vmatprep.mubr.bf16.mxu0 %v16423_v2 }
  0x7e   :  { %8384 = vmatmul.mubr.msk.bf16.gmra.mrb[60].mxu0 %vm227_vm0, %v10296_v18 }
  0x7f   :  { %495 = vmatprep.mubr.bf16.mxu0 %v16423_v2 }
  0x86   :  { %8385 = vmatmul.mubr.msk.bf16.gmra.mrb[64].mxu0 %vm227_vm0, %v10297_v19 }
  0x87   :  { %505 = vmatprep.mubr.bf16.mxu0 %v16423_v2 }
  0x8e   :  { %8386 = vmatmul.mubr.msk.bf16.gmra.mrb[68].mxu0 %vm227_vm0, %v10298_v20 }
  0x8f   :  { %515 = vmatprep.mubr.bf16.mxu0 %v16423_v2 }
  0x96   :  { %8387 = vmatmul.mubr.msk.bf16.gmra.mrb[72].mxu0 %vm227_vm0, %v10299_v21 }
  0x97   :  { %525 = vmatprep.mubr.bf16.mxu0 %v16423_v2 }
  0x9e   :  { %8388 = vmatmul.mubr.msk.bf16.gmra.mrb[76].mxu0 %vm227_vm0, %v10300_v22 }
  0x9f   :  { %535 = vmatprep.mubr.bf16.mxu0 %v16423_v2 }
  0xa6   :  { %8389 = vmatmul.mubr.msk.bf16.gmra.mrb[80].mxu0 %vm227_vm0, %v10301_v23 }
  0xa7   :  { %545 = vmatprep.mubr.bf16.mxu0 %v16423_v2 }
  0xae   :  { %8390 = vmatmul.mubr.msk.bf16.gmra.mrb[84].mxu0 %vm227_vm0, %v10302_v24 }
  0xaf   :  { %19 = vsyncpa [#allocation5], 0  ;;  %555 = vmatprep.mubr.bf16.mxu0 %v16423_v2  ;;  %v10303_v25 = vld [vmem:[%s16410_s0 + $0xb0] sm:$0xff]   ;;  %v10304_v26 = vld [vmem:[%s16410_s0 + $0xb8] sm:$0xff]   ;;  %vm10856_vm1 = vmmov 0   ;;  %vm3541_vm2 = vcmask 1043456  }
  0xb0   :  { %v10305_v27 = vld [vmem:[%s16410_s0 + $0xc0] ss:$0 sps:$4 sm:$0xff]   ;;  %vm3351_vm3 = vcmask 64512   ;;  %vm10857_vm5 = vmmov 1   ;;  %vm6913_vm7 = vcmask 1040384   ;;  %vm7426_vm8 = vcmask 1046528  }
  0xb1   :  { %vm7401_vm9 = vcmask 1047553   ;;  %vm7415_vm10 = vcmask 1041408   ;;  %s10858_s23 = smov [#allocation2]  }
  0xb6   :  { %8391 = vmatmul.mubr.msk.bf16.gmra.mrb[88].mxu0 %vm227_vm0, %v10303_v25 }
  0xb7   :  { %565 = vmatprep.mubr.bf16.mxu0 %v16423_v2 }
  0xbe   :  { %8392 = vmatmul.mubr.msk.bf16.gmra.mrb[92].mxu0 %vm227_vm0, %v10304_v26 }
  0xbf   :  { %575 = vmatprep.mubr.bf16.mxu0 %v16423_v2 }
  0xc6   :  { %8393 = vmatmul.mubr.msk.bf16.gmra.mrb[96].mxu0 %vm227_vm0, %v10305_v27 }
  0xd9   :  { %v11057_v28 = vpop.f32.mrb[0].mxu0 }
  0xda   :  { %v11059_v29 = vpop.f32.mrb[1].mxu0  ;;  %v640_v31 = vmul.f32 %v11057_v28, %v11057_v28 }
  0xdb   :  { %v11061_v30 = vpop.f32.mrb[2].mxu0  ;;  %v1560_v35 = vmul.f32 %v11059_v29, %v11059_v29 }
  0xdc   :  { %v586_v32 = vadd.f32 %v11061_v30, %v11057_v28  ;;  %v641_v33 = vmul.f32 %v11061_v30, %v11061_v30  ;;  %v11069_v34 = vpop.f32.mrb[3].mxu0 }
  0xdd   :  { %v1506_v36 = vadd.f32 %v11069_v34, %v11059_v29  ;;  %v1561_v37 = vmul.f32 %v11069_v34, %v11069_v34 }
  0xde   :  { %v689_v38 = vadd.f32 %v641_v33, %v640_v31 }
  0xdf   :  { %v1609_v39 = vadd.f32 %v1561_v37, %v1560_v35 }
  0xe1   :  { %v11077_v40 = vpop.f32.mrb[4].mxu0 }
  0xe2   :  { %16565 = vst [vmem:[#allocation8_spill] sm:$0xff] %v11077_v40  ;;  %v587_v41 = vadd.f32 %v586_v32, %v11077_v40  ;;  %v642_v42 = vmul.f32 %v11077_v40, %v11077_v40  ;;  %v11082_v43 = vpop.f32.mrb[5].mxu0 }
  0xe3   :  { %v1507_v44 = vadd.f32 %v1506_v36, %v11082_v43  ;;  %v1562_v45 = vmul.f32 %v11082_v43, %v11082_v43  ;;  %v11087_v46 = vpop.f32.mrb[6].mxu0 }
  0xe4   :  { %16566 = vst [vmem:[#allocation9_spill] sm:$0xff] %v11087_v46  ;;  %v690_v47 = vadd.f32 %v689_v38, %v642_v42  ;;  %v588_v48 = vadd.f32 %v587_v41, %v11087_v46  ;;  %v643_v49 = vmul.f32 %v11087_v46, %v11087_v46  ;;  %v11092_v50 = vpop.f32.mrb[7].mxu0 }
  0xe5   :  { %v1610_v51 = vadd.f32 %v1609_v39, %v1562_v45  ;;  %v1508_v52 = vadd.f32 %v1507_v44, %v11092_v50  ;;  %v1563_v53 = vmul.f32 %v11092_v50, %v11092_v50 }
  0xe6   :  { %v691_v54 = vadd.f32 %v690_v47, %v643_v49 }
  0xe7   :  { %v1611_v55 = vadd.f32 %v1610_v51, %v1563_v53 }
  0xe9   :  { %v11097_v56 = vpop.f32.mrb[8].mxu0 }
  0xea   :  { %16567 = vst [vmem:[#allocation10_spill] sm:$0xff] %v11097_v56  ;;  %v589_v57 = vadd.f32 %v588_v48, %v11097_v56  ;;  %v644_v58 = vmul.f32 %v11097_v56, %v11097_v56  ;;  %v11102_v59 = vpop.f32.mrb[9].mxu0 }
  0xeb   :  { %v1509_v60 = vadd.f32 %v1508_v52, %v11102_v59  ;;  %v1564_v61 = vmul.f32 %v11102_v59, %v11102_v59  ;;  %v11107_v62 = vpop.f32.mrb[10].mxu0 }
  0xec   :  { %16568 = vst [vmem:[#allocation11_spill] sm:$0xff] %v11107_v62  ;;  %v692_v63 = vadd.f32 %v691_v54, %v644_v58  ;;  %v590_v0 = vadd.f32 %v589_v57, %v11107_v62  ;;  %v645_v1 = vmul.f32 %v11107_v62, %v11107_v62  ;;  %v11112_v3 = vpop.f32.mrb[11].mxu0 }
  0xed   :  { %v1612_v4 = vadd.f32 %v1611_v55, %v1564_v61  ;;  %v1510_v5 = vadd.f32 %v1509_v60, %v11112_v3  ;;  %v1565_v6 = vmul.f32 %v11112_v3, %v11112_v3 }
  0xee   :  { %v693_v7 = vadd.f32 %v692_v63, %v645_v1 }
  0xef   :  { %v1613_v8 = vadd.f32 %v1612_v4, %v1565_v6 }
  0xf1   :  { %v11117_v9 = vpop.f32.mrb[12].mxu0 }
  0xf2   :  { %16569 = vst [vmem:[#allocation12_spill] sm:$0xff] %v11117_v9  ;;  %v591_v10 = vadd.f32 %v590_v0, %v11117_v9  ;;  %v646_v11 = vmul.f32 %v11117_v9, %v11117_v9  ;;  %v11122_v12 = vpop.f32.mrb[13].mxu0 }
  0xf3   :  { %v1511_v13 = vadd.f32 %v1510_v5, %v11122_v12  ;;  %v1566_v14 = vmul.f32 %v11122_v12, %v11122_v12  ;;  %v11127_v15 = vpop.f32.mrb[14].mxu0 }
  0xf4   :  { %16570 = vst [vmem:[#allocation13_spill] sm:$0xff] %v11127_v15  ;;  %v694_v16 = vadd.f32 %v693_v7, %v646_v11  ;;  %v592_v17 = vadd.f32 %v591_v10, %v11127_v15  ;;  %v647_v18 = vmul.f32 %v11127_v15, %v11127_v15  ;;  %v11132_v19 = vpop.f32.mrb[15].mxu0 }
  0xf5   :  { %v1614_v20 = vadd.f32 %v1613_v8, %v1566_v14  ;;  %v1512_v21 = vadd.f32 %v1511_v13, %v11132_v19  ;;  %v1567_v22 = vmul.f32 %v11132_v19, %v11132_v19 }
  0xf6   :  { %v695_v23 = vadd.f32 %v694_v16, %v647_v18 }
  0xf7   :  { %v1615_v24 = vadd.f32 %v1614_v20, %v1567_v22 }
  0xf9   :  { %v11137_v25 = vpop.f32.mrb[16].mxu0 }
  0xfa   :  { %16571 = vst [vmem:[#allocation14_spill] sm:$0xff] %v11137_v25  ;;  %v593_v26 = vadd.f32 %v592_v17, %v11137_v25  ;;  %v648_v27 = vmul.f32 %v11137_v25, %v11137_v25  ;;  %v11142_v31 = vpop.f32.mrb[17].mxu0 }
  0xfb   :  { %v1513_v32 = vadd.f32 %v1512_v21, %v11142_v31  ;;  %v1568_v33 = vmul.f32 %v11142_v31, %v11142_v31  ;;  %v11147_v35 = vpop.f32.mrb[18].mxu0 }
  0xfc   :  { %16572 = vst [vmem:[#allocation15_spill] sm:$0xff] %v11147_v35  ;;  %v696_v36 = vadd.f32 %v695_v23, %v648_v27  ;;  %v594_v37 = vadd.f32 %v593_v26, %v11147_v35  ;;  %v649_v38 = vmul.f32 %v11147_v35, %v11147_v35  ;;  %v11152_v39 = vpop.f32.mrb[19].mxu0 }
  0xfd   :  { %v1616_v41 = vadd.f32 %v1615_v24, %v1568_v33  ;;  %v1514_v42 = vadd.f32 %v1513_v32, %v11152_v39  ;;  %v1569_v44 = vmul.f32 %v11152_v39, %v11152_v39 }
  0xfe   :  { %v697_v45 = vadd.f32 %v696_v36, %v649_v38 }
  0xff   :  { %v1617_v47 = vadd.f32 %v1616_v41, %v1569_v44 }
 0x101   :  { %v11157_v48 = vpop.f32.mrb[20].mxu0 }
 0x102   :  { %16573 = vst [vmem:[#allocation16_spill] sm:$0xff] %v11157_v48  ;;  %v595_v49 = vadd.f32 %v594_v37, %v11157_v48  ;;  %v650_v51 = vmul.f32 %v11157_v48, %v11157_v48  ;;  %v11162_v52 = vpop.f32.mrb[21].mxu0 }
 0x103   :  { %v1515_v53 = vadd.f32 %v1514_v42, %v11162_v52  ;;  %v1570_v54 = vmul.f32 %v11162_v52, %v11162_v52  ;;  %v11167_v55 = vpop.f32.mrb[22].mxu0 }
 0x104   :  { %16574 = vst [vmem:[#allocation17_spill] sm:$0xff] %v11167_v55  ;;  %v698_v57 = vadd.f32 %v697_v45, %v650_v51  ;;  %v596_v58 = vadd.f32 %v595_v49, %v11167_v55  ;;  %v651_v60 = vmul.f32 %v11167_v55, %v11167_v55  ;;  %v11172_v61 = vpop.f32.mrb[23].mxu0 }
 0x105   :  { %v1618_v63 = vadd.f32 %v1617_v47, %v1570_v54  ;;  %v1516_v0 = vadd.f32 %v1515_v53, %v11172_v61  ;;  %v1571_v1 = vmul.f32 %v11172_v61, %v11172_v61 }
 0x106   :  { %v699_v4 = vadd.f32 %v698_v57, %v651_v60 }
 0x107   :  { %v1619_v5 = vadd.f32 %v1618_v63, %v1571_v1 }
 0x109   :  { %v11177_v6 = vpop.f32.mrb[24].mxu0 }
 0x10a   :  { %16575 = vst [vmem:[#allocation18_spill] sm:$0xff] %v11177_v6  ;;  %v597_v7 = vadd.f32 %v596_v58, %v11177_v6  ;;  %v652_v8 = vmul.f32 %v11177_v6, %v11177_v6  ;;  %v11182_v10 = vpop.f32.mrb[25].mxu0 }
 0x10b   :  { %v1517_v11 = vadd.f32 %v1516_v0, %v11182_v10  ;;  %v1572_v13 = vmul.f32 %v11182_v10, %v11182_v10  ;;  %v11187_v14 = vpop.f32.mrb[26].mxu0 }
 0x10c   :  { %16576 = vst [vmem:[#allocation19_spill] sm:$0xff] %v11187_v14  ;;  %v700_v16 = vadd.f32 %v699_v4, %v652_v8  ;;  %v598_v17 = vadd.f32 %v597_v7, %v11187_v14  ;;  %v653_v18 = vmul.f32 %v11187_v14, %v11187_v14  ;;  %v11192_v20 = vpop.f32.mrb[27].mxu0 }
 0x10d   :  { %v1620_v21 = vadd.f32 %v1619_v5, %v1572_v13  ;;  %v1518_v22 = vadd.f32 %v1517_v11, %v11192_v20  ;;  %v1573_v23 = vmul.f32 %v11192_v20, %v11192_v20 }
 0x10e   :  { %v701_v24 = vadd.f32 %v700_v16, %v653_v18 }
 0x10f   :  { %v1621_v26 = vadd.f32 %v1620_v21, %v1573_v23 }
 0x111   :  { %v11197_v27 = vpop.f32.mrb[28].mxu0 }
 0x112   :  { %16577 = vst [vmem:[#allocation20_spill] sm:$0xff] %v11197_v27  ;;  %v599_v32 = vadd.f32 %v598_v17, %v11197_v27  ;;  %v654_v33 = vmul.f32 %v11197_v27, %v11197_v27  ;;  %v11202_v36 = vpop.f32.mrb[29].mxu0 }
 0x113   :  { %v1519_v37 = vadd.f32 %v1518_v22, %v11202_v36  ;;  %v1574_v38 = vmul.f32 %v11202_v36, %v11202_v36  ;;  %v11207_v41 = vpop.f32.mrb[30].mxu0 }
 0x114   :  { %16578 = vst [vmem:[#allocation21_spill] sm:$0xff] %v11207_v41  ;;  %v702_v42 = vadd.f32 %v701_v24, %v654_v33  ;;  %v600_v44 = vadd.f32 %v599_v32, %v11207_v41  ;;  %v655_v45 = vmul.f32 %v11207_v41, %v11207_v41  ;;  %v11212_v47 = vpop.f32.mrb[31].mxu0  ;;  %v16596_v41 = vmov 0  }
 0x115   :  { %v1622_v49 = vadd.f32 %v1621_v26, %v1574_v38  ;;  %v1520_v51 = vadd.f32 %v1519_v37, %v11212_v47  ;;  %v1575_v53 = vmul.f32 %v11212_v47, %v11212_v47 }
 0x116   :  { %v703_v54 = vadd.f32 %v702_v42, %v655_v45 }
 0x117   :  { %v1623_v57 = vadd.f32 %v1622_v49, %v1575_v53 }
 0x119   :  { %v11217_v58 = vpop.f32.mrb[32].mxu0 }
 0x11a   :  { %16579 = vst [vmem:[#allocation22_spill] sm:$0xff] %v11217_v58  ;;  %v601_v60 = vadd.f32 %v600_v44, %v11217_v58  ;;  %v656_v63 = vmul.f32 %v11217_v58, %v11217_v58  ;;  %v11222_v0 = vpop.f32.mrb[33].mxu0 }
 0x11b   :  { %v1521_v1 = vadd.f32 %v1520_v51, %v11222_v0  ;;  %v1576_v4 = vmul.f32 %v11222_v0, %v11222_v0  ;;  %v11227_v5 = vpop.f32.mrb[34].mxu0 }
 0x11c   :  { %16580 = vst [vmem:[#allocation23_spill] sm:$0xff] %v11227_v5  ;;  %v704_v7 = vadd.f32 %v703_v54, %v656_v63  ;;  %v602_v8 = vadd.f32 %v601_v60, %v11227_v5  ;;  %v657_v11 = vmul.f32 %v11227_v5, %v11227_v5  ;;  %v11232_v13 = vpop.f32.mrb[35].mxu0 }
 0x11d   :  { %v1624_v16 = vadd.f32 %v1623_v57, %v1576_v4  ;;  %v1522_v17 = vadd.f32 %v1521_v1, %v11232_v13  ;;  %v1577_v18 = vmul.f32 %v11232_v13, %v11232_v13 }
 0x11e   :  { %v705_v21 = vadd.f32 %v704_v7, %v657_v11 }
 0x11f   :  { %v1625_v22 = vadd.f32 %v1624_v16, %v1577_v18 }
 0x121   :  { %v11237_v23 = vpop.f32.mrb[36].mxu0 }
 0x122   :  { %16581 = vst [vmem:[#allocation24_spill] sm:$0xff] %v11237_v23  ;;  %v603_v24 = vadd.f32 %v602_v8, %v11237_v23  ;;  %v658_v26 = vmul.f32 %v11237_v23, %v11237_v23  ;;  %v11242_v32 = vpop.f32.mrb[37].mxu0 }
 0x123   :  { %v1523_v33 = vadd.f32 %v1522_v17, %v11242_v32  ;;  %v1578_v37 = vmul.f32 %v11242_v32, %v11242_v32  ;;  %v11247_v38 = vpop.f32.mrb[38].mxu0 }
 0x124   :  { %16582 = vst [vmem:[#allocation25_spill] sm:$0xff] %v11247_v38  ;;  %v706_v42 = vadd.f32 %v705_v21, %v658_v26  ;;  %v604_v44 = vadd.f32 %v603_v24, %v11247_v38  ;;  %v659_v45 = vmul.f32 %v11247_v38, %v11247_v38  ;;  %v11252_v49 = vpop.f32.mrb[39].mxu0 }
 0x125   :  { %v1626_v51 = vadd.f32 %v1625_v22, %v1578_v37  ;;  %v1524_v53 = vadd.f32 %v1523_v33, %v11252_v49  ;;  %v1579_v54 = vmul.f32 %v11252_v49, %v11252_v49 }
 0x126   :  { %v707_v57 = vadd.f32 %v706_v42, %v659_v45 }
 0x127   :  { %v1627_v60 = vadd.f32 %v1626_v51, %v1579_v54 }
 0x129   :  { %v11257_v63 = vpop.f32.mrb[40].mxu0 }
 0x12a   :  { %16583 = vst [vmem:[#allocation26_spill] sm:$0xff] %v11257_v63  ;;  %v605_v1 = vadd.f32 %v604_v44, %v11257_v63  ;;  %v660_v4 = vmul.f32 %v11257_v63, %v11257_v63  ;;  %v11262_v7 = vpop.f32.mrb[41].mxu0 }
 0x12b   :  { %v1525_v8 = vadd.f32 %v1524_v53, %v11262_v7  ;;  %v1580_v11 = vmul.f32 %v11262_v7, %v11262_v7  ;;  %v11267_v16 = vpop.f32.mrb[42].mxu0 }
 0x12c   :  { %16584 = vst [vmem:[#allocation27_spill] sm:$0xff] %v11267_v16  ;;  %v708_v17 = vadd.f32 %v707_v57, %v660_v4  ;;  %v606_v18 = vadd.f32 %v605_v1, %v11267_v16  ;;  %v661_v21 = vmul.f32 %v11267_v16, %v11267_v16  ;;  %v11272_v22 = vpop.f32.mrb[43].mxu0 }
 0x12d   :  { %v1628_v24 = vadd.f32 %v1627_v60, %v1580_v11  ;;  %v1526_v26 = vadd.f32 %v1525_v8, %v11272_v22  ;;  %v1581_v33 = vmul.f32 %v11272_v22, %v11272_v22 }
 0x12e   :  { %v709_v37 = vadd.f32 %v708_v17, %v661_v21 }
 0x12f   :  { %v1629_v42 = vadd.f32 %v1628_v24, %v1581_v33  ;;  %v10306_v33 = vld [vmem:[%s16412_s2] sm:$0xff]  }
 0x131   :  { %v11277_v44 = vpop.f32.mrb[44].mxu0 }
 0x132   :  { %16585 = vst [vmem:[#allocation28_spill] sm:$0xff] %v11277_v44  ;;  %v607_v45 = vadd.f32 %v606_v18, %v11277_v44  ;;  %v662_v51 = vmul.f32 %v11277_v44, %v11277_v44  ;;  %v11282_v53 = vpop.f32.mrb[45].mxu0  ;;  %v16589_v44 = vmov 0.0  }
 0x133   :  { %v1527_v54 = vadd.f32 %v1526_v26, %v11282_v53  ;;  %v1582_v57 = vmul.f32 %v11282_v53, %v11282_v53  ;;  %v11287_v60 = vpop.f32.mrb[46].mxu0  ;;  %9224 = vmatprep.mubr.msk.bf16.mxu1 %vm10856_vm1, %v16589_v44 }
 0x134   :  { %16586 = vst [vmem:[#allocation29_spill] sm:$0xff] %v11287_v60  ;;  %v710_v1 = vadd.f32 %v709_v37, %v662_v51  ;;  %v608_v4 = vadd.f32 %v607_v45, %v11287_v60  ;;  %v663_v8 = vmul.f32 %v11287_v60, %v11287_v60  ;;  %v11292_v11 = vpop.f32.mrb[47].mxu0  ;;  %v16425_v37 = vmov 0.0  }
 0x135   :  { %v1630_v17 = vadd.f32 %v1629_v42, %v1582_v57  ;;  %v1528_v18 = vadd.f32 %v1527_v54, %v11292_v11  ;;  %v1583_v21 = vmul.f32 %v11292_v11, %v11292_v11  ;;  %9208 = vmatprep.subr.bf16.mxu1 %v16425_v37 }
 0x136   :  { %v711_v24 = vadd.f32 %v710_v1, %v663_v8  ;;  %9209 = vmatpush3.bf16.msra.mxu1 %v10306_v33 }
 0x137   :  { %v1631_v26 = vadd.f32 %v1630_v17, %v1583_v21  ;;  %9210 = vmatprep.subr.bf16.mxu1 %v16425_v37  ;;  %v10307_v17 = vld [vmem:[%s16412_s2 + $0x8] sm:$0xff]  }
 0x139   :  { %v11301_v45 = vpop.f32.mrb[48].mxu0 }
 0x13a   :  { %16587 = vst [vmem:[#allocation30_spill] sm:$0xff] %v11301_v45  ;;  %v609_v51 = vadd.f32 %v608_v4, %v11301_v45  ;;  %v664_v42 = vmul.f32 %v11301_v45, %v11301_v45  ;;  %v11306_v54 = vpop.f32.mrb[49].mxu0  ;;  %9211 = vmatpush3.bf16.msra.mxu1 %v10307_v17  ;;  %v10309_v17 = vld [vmem:[%s16412_s2 + $0x18] sm:$0xff]  }
 0x13b   :  { %v1529_v57 = vadd.f32 %v1528_v18, %v11306_v54  ;;  %v1584_v1 = vmul.f32 %v11306_v54, %v11306_v54  ;;  %v11312_v8 = vpop.f32.mrb[50].mxu0  ;;  %9212 = vmatprep.subr.bf16.mxu1 %v16589_v44 }
 0x13c   :  { %16588 = vst [vmem:[#allocation31_spill] sm:$0xff] %v11312_v8  ;;  %v712_v21 = vadd.f32 %v711_v24, %v664_v42  ;;  %v610_v4 = vadd.f32 %v609_v51, %v11312_v8  ;;  %v665_v33 = vmul.f32 %v11312_v8, %v11312_v8  ;;  %v11320_v2 = vpop.f32.mrb[51].mxu0  ;;  %v10308_v24 = vld [vmem:[%s16412_s2 + $0x10] sm:$0xff]  }
 0x13d   :  { %v1632_v37 = vadd.f32 %v1631_v26, %v1584_v1  ;;  %v1530_v18 = vadd.f32 %v1529_v57, %v11320_v2  ;;  %v1585_v45 = vmul.f32 %v11320_v2, %v11320_v2 }
 0x13e   :  { %v713_v60 = vadd.f32 %v712_v21, %v665_v33  ;;  %9213 = vmatpush3.bf16.msra.mxu1 %v10308_v24 }
 0x13f   :  { %v1633_v16 = vadd.f32 %v1632_v37, %v1585_v45  ;;  %9214 = vmatprep.subr.bf16.mxu1 %v16589_v44 }
 0x141   :  { %v11329_v51 = vpop.f32.mrb[52].mxu0 }
 0x142   :  { %16590 = vst [vmem:[#allocation32_spill] sm:$0xff] %v11329_v51  ;;  %v611_v42 = vadd.f32 %v610_v4, %v11329_v51  ;;  %v666_v26 = vmul.f32 %v11329_v51, %v11329_v51  ;;  %v11334_v57 = vpop.f32.mrb[53].mxu0  ;;  %9215 = vmatpush3.bf16.msra.mxu1 %v10309_v17  ;;  %v10311_v17 = vld [vmem:[%s16412_s2 + $0x28] sm:$0xff]  }
 0x143   :  { %v1531_v1 = vadd.f32 %v1530_v18, %v11334_v57  ;;  %v1586_v37 = vmul.f32 %v11334_v57, %v11334_v57  ;;  %v11340_v45 = vpop.f32.mrb[54].mxu0  ;;  %9216 = vmatprep.subr.bf16.mxu1 %v16589_v44 }
 0x144   :  { %16591 = vst [vmem:[#allocation33_spill] sm:$0xff] %v11340_v45  ;;  %v714_v21 = vadd.f32 %v713_v60, %v666_v26  ;;  %v612_v4 = vadd.f32 %v611_v42, %v11340_v45  ;;  %v667_v33 = vmul.f32 %v11340_v45, %v11340_v45  ;;  %v11348_v24 = vpop.f32.mrb[55].mxu0  ;;  %v10310_v60 = vld [vmem:[%s16412_s2 + $0x20] sm:$0xff]  }
 0x145   :  { %v1634_v51 = vadd.f32 %v1633_v16, %v1586_v37  ;;  %v1532_v18 = vadd.f32 %v1531_v1, %v11348_v24  ;;  %v1587_v8 = vmul.f32 %v11348_v24, %v11348_v24 }
 0x146   :  { %v715_v63 = vadd.f32 %v714_v21, %v667_v33  ;;  %9217 = vmatpush3.bf16.msra.mxu1 %v10310_v60 }
 0x147   :  { %v1635_v38 = vadd.f32 %v1634_v51, %v1587_v8  ;;  %9218 = vmatprep.subr.bf16.mxu1 %v16589_v44 }
 0x149   :  { %v11357_v42 = vpop.f32.mrb[56].mxu0 }
 0x14a   :  { %16592 = vst [vmem:[#allocation34_spill] sm:$0xff] %v11357_v42  ;;  %v613_v26 = vadd.f32 %v612_v4, %v11357_v42  ;;  %v668_v16 = vmul.f32 %v11357_v42, %v11357_v42  ;;  %v11362_v1 = vpop.f32.mrb[57].mxu0  ;;  %9219 = vmatpush3.bf16.msra.mxu1 %v10311_v17 }
 0x14b   :  { %v1533_v37 = vadd.f32 %v1532_v18, %v11362_v1  ;;  %v1588_v8 = vmul.f32 %v11362_v1, %v11362_v1  ;;  %v11368_v51 = vpop.f32.mrb[58].mxu0  ;;  %9220 = vmatprep.subr.bf16.mxu1 %v16589_v44 }
 0x14c   :  { %16593 = vst [vmem:[#allocation35_spill] sm:$0xff] %v11368_v51  ;;  %v716_v21 = vadd.f32 %v715_v63, %v668_v16  ;;  %v614_v4 = vadd.f32 %v613_v26, %v11368_v51  ;;  %v669_v33 = vmul.f32 %v11368_v51, %v11368_v51  ;;  %v11376_v60 = vpop.f32.mrb[59].mxu0  ;;  %v10312_v63 = vld [vmem:[%s16412_s2 + $0x30] sm:$0xff]  }
 0x14d   :  { %v1636_v42 = vadd.f32 %v1635_v38, %v1588_v8  ;;  %v1534_v18 = vadd.f32 %v1533_v37, %v11376_v60  ;;  %v1589_v45 = vmul.f32 %v11376_v60, %v11376_v60  ;;  %v10313_v38 = vld [vmem:[%s16412_s2 + $0x38] sm:$0xff]  }
 0x14e   :  { %v717_v23 = vadd.f32 %v716_v21, %v669_v33  ;;  %9221 = vmatpush3.bf16.msra.mxu1 %v10312_v63 }
 0x14f   :  { %v1637_v5 = vadd.f32 %v1636_v42, %v1589_v45  ;;  %9222 = vmatprep.subr.bf16.mxu1 %v16589_v44 }
 0x151   :  { %v11385_v26 = vpop.f32.mrb[60].mxu0 }
 0x152   :  { %16594 = vst [vmem:[#allocation36_spill] sm:$0xff] %v11385_v26  ;;  %v615_v16 = vadd.f32 %v614_v4, %v11385_v26  ;;  %v670_v45 = vmul.f32 %v11385_v26, %v11385_v26  ;;  %v11395_v42 = vpop.f32.mrb[61].mxu0  ;;  %9223 = vmatpush3.bf16.msra.mxu1 %v10313_v38 }
 0x153   :  { %v1535_v37 = vadd.f32 %v1534_v18, %v11395_v42  ;;  %v1590_v8 = vmul.f32 %v11395_v42, %v11395_v42  ;;  %v11401_v17 = vpop.f32.mrb[62].mxu0  ;;  %9808 = vmatprep.subr.bf16.mxu1 %v16596_v41 }
 0x154   :  { %16595 = vst [vmem:[#allocation37_spill] sm:$0xff] %v11401_v17  ;;  %v718_v21 = vadd.f32 %v717_v23, %v670_v45  ;;  %v616_v33 = vadd.f32 %v615_v16, %v11401_v17  ;;  %v671_v4 = vmul.f32 %v11401_v17, %v11401_v17  ;;  %v11406_v63 = vpop.f32.mrb[63].mxu0 }
 0x155   :  { %v1638_v26 = vadd.f32 %v1637_v5, %v1590_v8  ;;  %v1536_v51 = vadd.f32 %v1535_v37, %v11406_v63  ;;  %v1591_v58 = vmul.f32 %v11406_v63, %v11406_v63 }
 0x156   :  { %v719_v18 = vadd.f32 %v718_v21, %v671_v4 }
 0x157   :  { %v1639_v27 = vadd.f32 %v1638_v26, %v1591_v58 }
 0x159   :  { %v11412_v14 = vpop.f32.mrb[64].mxu0 }
 0x15a   :  { %16597 = vst [vmem:[#allocation38_spill] sm:$0xff] %v11412_v14  ;;  %v617_v23 = vadd.f32 %v616_v33, %v11412_v14  ;;  %v672_v16 = vmul.f32 %v11412_v14, %v11412_v14  ;;  %v11417_v45 = vpop.f32.mrb[65].mxu0 }
 0x15b   :  { %v1537_v5 = vadd.f32 %v1536_v51, %v11417_v45  ;;  %v1592_v37 = vmul.f32 %v11417_v45, %v11417_v45  ;;  %v11422_v8 = vpop.f32.mrb[66].mxu0 }
 0x15c   :  { %16598 = vst [vmem:[#allocation39_spill] sm:$0xff] %v11422_v8  ;;  %v720_v38 = vadd.f32 %v719_v18, %v672_v16  ;;  %v618_v21 = vadd.f32 %v617_v23, %v11422_v8  ;;  %v673_v58 = vmul.f32 %v11422_v8, %v11422_v8  ;;  %v11427_v26 = vpop.f32.mrb[67].mxu0 }
 0x15d   :  { %16599 = vst [vmem:[#allocation40_spill] sm:$0xff] %v11427_v26  ;;  %v1640_v33 = vadd.f32 %v1639_v27, %v1592_v37  ;;  %v1538_v4 = vadd.f32 %v1537_v5, %v11427_v26  ;;  %v1593_v41 = vmul.f32 %v11427_v26, %v11427_v26 }
 0x15e   :  { %v721_v51 = vadd.f32 %v720_v38, %v673_v58 }
 0x15f   :  { %v1641_v14 = vadd.f32 %v1640_v33, %v1593_v41 }
 0x161   :  { %v11432_v17 = vpop.f32.mrb[68].mxu0 }
 0x162   :  { %16600 = vst [vmem:[#allocation41_spill] sm:$0xff] %v11432_v17  ;;  %v619_v6 = vadd.f32 %v618_v21, %v11432_v17  ;;  %v674_v18 = vmul.f32 %v11432_v17, %v11432_v17  ;;  %v11437_v23 = vpop.f32.mrb[69].mxu0 }
 0x163   :  { %16601 = vst [vmem:[#allocation42_spill] sm:$0xff] %v11437_v23  ;;  %v1539_v16 = vadd.f32 %v1538_v4, %v11437_v23  ;;  %v1594_v27 = vmul.f32 %v11437_v23, %v11437_v23  ;;  %v11442_v5 = vpop.f32.mrb[70].mxu0 }
 0x164   :  { %16602 = vst [vmem:[#allocation43_spill] sm:$0xff] %v11442_v5  ;;  %v722_v37 = vadd.f32 %v721_v51, %v674_v18  ;;  %v620_v38 = vadd.f32 %v619_v6, %v11442_v5  ;;  %v675_v41 = vmul.f32 %v11442_v5, %v11442_v5  ;;  %v11447_v58 = vpop.f32.mrb[71].mxu0 }
 0x165   :  { %16603 = vst [vmem:[#allocation44_spill] sm:$0xff] %v11447_v58  ;;  %v1642_v21 = vadd.f32 %v1641_v14, %v1594_v27  ;;  %v1540_v33 = vadd.f32 %v1539_v16, %v11447_v58  ;;  %v1595_v17 = vmul.f32 %v11447_v58, %v11447_v58 }
 0x166   :  { %v723_v4 = vadd.f32 %v722_v37, %v675_v41 }
 0x167   :  { %v1643_v8 = vadd.f32 %v1642_v21, %v1595_v17 }
 0x169   :  { %v11452_v55 = vpop.f32.mrb[72].mxu0 }
 0x16a   :  { %16604 = vst [vmem:[#allocation45_spill] sm:$0xff] %v11452_v55  ;;  %v621_v44 = vadd.f32 %v620_v38, %v11452_v55  ;;  %v676_v6 = vmul.f32 %v11452_v55, %v11452_v55  ;;  %v11457_v51 = vpop.f32.mrb[73].mxu0 }
 0x16b   :  { %16605 = vst [vmem:[#allocation46_spill] sm:$0xff] %v11457_v51  ;;  %v1541_v18 = vadd.f32 %v1540_v33, %v11457_v51  ;;  %v1596_v14 = vmul.f32 %v11457_v51, %v11457_v51  ;;  %v11462_v16 = vpop.f32.mrb[74].mxu0 }
 0x16c   :  { %16606 = vst [vmem:[#allocation47_spill] sm:$0xff] %v11462_v16  ;;  %v724_v27 = vadd.f32 %v723_v4, %v676_v6  ;;  %v622_v37 = vadd.f32 %v621_v44, %v11462_v16  ;;  %v677_v17 = vmul.f32 %v11462_v16, %v11462_v16  ;;  %v11467_v41 = vpop.f32.mrb[75].mxu0 }
 0x16d   :  { %16607 = vst [vmem:[#allocation48_spill] sm:$0xff] %v11467_v41  ;;  %v1644_v38 = vadd.f32 %v1643_v8, %v1596_v14  ;;  %v1542_v21 = vadd.f32 %v1541_v18, %v11467_v41  ;;  %v1597_v55 = vmul.f32 %v11467_v41, %v11467_v41 }
 0x16e   :  { %v725_v33 = vadd.f32 %v724_v27, %v677_v17 }
 0x16f   :  { %v1645_v5 = vadd.f32 %v1644_v38, %v1597_v55 }
 0x171   :  { %v11472_v48 = vpop.f32.mrb[76].mxu0 }
 0x172   :  { %16608 = vst [vmem:[#allocation49_spill] sm:$0xff] %v11472_v48  ;;  %v623_v35 = vadd.f32 %v622_v37, %v11472_v48  ;;  %v678_v44 = vmul.f32 %v11472_v48, %v11472_v48  ;;  %v11477_v4 = vpop.f32.mrb[77].mxu0 }
 0x173   :  { %16609 = vst [vmem:[#allocation50_spill] sm:$0xff] %v11477_v4  ;;  %v1543_v6 = vadd.f32 %v1542_v21, %v11477_v4  ;;  %v1598_v8 = vmul.f32 %v11477_v4, %v11477_v4  ;;  %v11482_v18 = vpop.f32.mrb[78].mxu0 }
 0x174   :  { %16610 = vst [vmem:[#allocation51_spill] sm:$0xff] %v11482_v18  ;;  %v726_v14 = vadd.f32 %v725_v33, %v678_v44  ;;  %v624_v27 = vadd.f32 %v623_v35, %v11482_v18  ;;  %v679_v55 = vmul.f32 %v11482_v18, %v11482_v18  ;;  %v11487_v17 = vpop.f32.mrb[79].mxu0 }
 0x175   :  { %16611 = vst [vmem:[#allocation52_spill] sm:$0xff] %v11487_v17  ;;  %v1646_v37 = vadd.f32 %v1645_v5, %v1598_v8  ;;  %v1544_v38 = vadd.f32 %v1543_v6, %v11487_v17  ;;  %v1599_v48 = vmul.f32 %v11487_v17, %v11487_v17 }
 0x176   :  { %v727_v21 = vadd.f32 %v726_v14, %v679_v55 }
 0x177   :  { %v1647_v16 = vadd.f32 %v1646_v37, %v1599_v48 }
 0x179   :  { %v11492_v25 = vpop.f32.mrb[80].mxu0 }
 0x17a   :  { %16612 = vst [vmem:[#allocation53_spill] sm:$0xff] %v11492_v25  ;;  %v625_v15 = vadd.f32 %v624_v27, %v11492_v25  ;;  %v680_v35 = vmul.f32 %v11492_v25, %v11492_v25  ;;  %v11497_v33 = vpop.f32.mrb[81].mxu0 }
 0x17b   :  { %16613 = vst [vmem:[#allocation54_spill] sm:$0xff] %v11497_v33  ;;  %v1545_v44 = vadd.f32 %v1544_v38, %v11497_v33  ;;  %v1600_v5 = vmul.f32 %v11497_v33, %v11497_v33  ;;  %v11502_v6 = vpop.f32.mrb[82].mxu0 }
 0x17c   :  { %16614 = vst [vmem:[#allocation55_spill] sm:$0xff] %v11502_v6  ;;  %v728_v8 = vadd.f32 %v727_v21, %v680_v35  ;;  %v626_v14 = vadd.f32 %v625_v15, %v11502_v6  ;;  %v681_v48 = vmul.f32 %v11502_v6, %v11502_v6  ;;  %v11507_v55 = vpop.f32.mrb[83].mxu0 }
 0x17d   :  { %16615 = vst [vmem:[#allocation56_spill] sm:$0xff] %v11507_v55  ;;  %v1648_v27 = vadd.f32 %v1647_v16, %v1600_v5  ;;  %v1546_v37 = vadd.f32 %v1545_v44, %v11507_v55  ;;  %v1601_v25 = vmul.f32 %v11507_v55, %v11507_v55 }
 0x17e   :  { %v729_v38 = vadd.f32 %v728_v8, %v681_v48 }
 0x17f   :  { %v1649_v18 = vadd.f32 %v1648_v27, %v1601_v25 }
 0x181   :  { %v11512_v9 = vpop.f32.mrb[84].mxu0 }
 0x182   :  { %16616 = vst [vmem:[#allocation57_spill] sm:$0xff] %v11512_v9  ;;  %v627_v62 = vadd.f32 %v626_v14, %v11512_v9  ;;  %v682_v15 = vmul.f32 %v11512_v9, %v11512_v9  ;;  %v11517_v21 = vpop.f32.mrb[85].mxu0 }
 0x183   :  { %16617 = vst [vmem:[#allocation58_spill] sm:$0xff] %v11517_v21  ;;  %v1547_v35 = vadd.f32 %v1546_v37, %v11517_v21  ;;  %v1602_v16 = vmul.f32 %v11517_v21, %v11517_v21  ;;  %v11522_v44 = vpop.f32.mrb[86].mxu0 }
 0x184   :  { %16618 = vst [vmem:[#allocation59_spill] sm:$0xff] %v11522_v44  ;;  %v730_v5 = vadd.f32 %v729_v38, %v682_v15  ;;  %v628_v8 = vadd.f32 %v627_v62, %v11522_v44  ;;  %v683_v25 = vmul.f32 %v11522_v44, %v11522_v44  ;;  %v11527_v48 = vpop.f32.mrb[87].mxu0 }
 0x185   :  { %16619 = vst [vmem:[#allocation60_spill] sm:$0xff] %v11527_v48  ;;  %v1650_v14 = vadd.f32 %v1649_v18, %v1602_v16  ;;  %v1548_v27 = vadd.f32 %v1547_v35, %v11527_v48  ;;  %v1603_v9 = vmul.f32 %v11527_v48, %v11527_v48 }
 0x186   :  { %v731_v37 = vadd.f32 %v730_v5, %v683_v25 }
 0x187   :  { %v1651_v6 = vadd.f32 %v1650_v14, %v1603_v9 }
 0x189   :  { %v11532_v56 = vpop.f32.mrb[88].mxu0 }
 0x18a   :  { %16620 = vst [vmem:[#allocation61_spill] sm:$0xff] %v11532_v56  ;;  %v629_v46 = vadd.f32 %v628_v8, %v11532_v56  ;;  %v684_v62 = vmul.f32 %v11532_v56, %v11532_v56  ;;  %v11537_v38 = vpop.f32.mrb[89].mxu0 }
 0x18b   :  { %16621 = vst [vmem:[#allocation62_spill] sm:$0xff] %v11537_v38  ;;  %v1549_v15 = vadd.f32 %v1548_v27, %v11537_v38  ;;  %v1604_v18 = vmul.f32 %v11537_v38, %v11537_v38  ;;  %v11542_v35 = vpop.f32.mrb[90].mxu0 }
 0x18c   :  { %16622 = vst [vmem:[#allocation63_spill] sm:$0xff] %v11542_v35  ;;  %v732_v16 = vadd.f32 %v731_v37, %v684_v62  ;;  %v630_v5 = vadd.f32 %v629_v46, %v11542_v35  ;;  %v685_v9 = vmul.f32 %v11542_v35, %v11542_v35  ;;  %v11547_v25 = vpop.f32.mrb[91].mxu0 }
 0x18d   :  { %16623 = vst [vmem:[#allocation64_spill] sm:$0xff] %v11547_v25  ;;  %v1652_v8 = vadd.f32 %v1651_v6, %v1604_v18  ;;  %v1550_v14 = vadd.f32 %v1549_v15, %v11547_v25  ;;  %v1605_v56 = vmul.f32 %v11547_v25, %v11547_v25 }
 0x18e   :  { %v733_v27 = vadd.f32 %v732_v16, %v685_v9 }
 0x18f   :  { %v1653_v44 = vadd.f32 %v1652_v8, %v1605_v56 }
 0x191   :  { %v11552_v40 = vpop.f32.mrb[92].mxu0 }
 0x192   :  { %16624 = vst [vmem:[#allocation65_spill] sm:$0xff] %v11552_v40  ;;  %v686_v37 = vmul.f32 %v11552_v40, %v11552_v40  ;;  %v11556_v62 = vpop.f32.mrb[93].mxu0  ;;  %v631_v46 = vadd.f32 %v630_v5, %v11552_v40 }
 0x193   :  { %16625 = vst [vmem:[#allocation66_spill] sm:$0xff] %v11556_v62  ;;  %v1606_v35 = vmul.f32 %v11556_v62, %v11556_v62  ;;  %v11561_v6 = vpop.f32.mrb[94].mxu0  ;;  %v1551_v15 = vadd.f32 %v1550_v14, %v11556_v62 }
 0x194   :  { %16626 = vst [vmem:[#allocation67_spill] sm:$0xff] %v11561_v6  ;;  %v687_v18 = vmul.f32 %v11561_v6, %v11561_v6  ;;  %v11566_v56 = vpop.f32.mrb[95].mxu0  ;;  %v632_v16 = vadd.f32 %v631_v46, %v11561_v6  ;;  %v734_v9 = vadd.f32 %v733_v27, %v686_v37 }
 0x195   :  { %16627 = vst [vmem:[#allocation68_spill] sm:$0xff] %v11566_v56  ;;  %v1607_v8 = vmul.f32 %v11566_v56, %v11566_v56  ;;  %v1552_v5 = vadd.f32 %v1551_v15, %v11566_v56  ;;  %v1654_v40 = vadd.f32 %v1653_v44, %v1606_v35 }
 0x196   :  { %v735_v25 = vadd.f32 %v734_v9, %v687_v18 }
 0x197   :  { %v1655_v38 = vadd.f32 %v1654_v40, %v1607_v8 }
 0x199   :  { %v11572_v48 = vpop.f32.mrb[96].mxu0 }
 0x19a   :  { %v633_v14 = vadd.f32 %v632_v16, %v11572_v48  ;;  %v688_v62 = vmul.f32 %v11572_v48, %v11572_v48  ;;  %v11577_v21 = vpop.f32.mrb[97].mxu0 }
 0x19b   :  { %v1553_v46 = vadd.f32 %v1552_v5, %v11577_v21  ;;  %v1608_v27 = vmul.f32 %v11577_v21, %v11577_v21  ;;  %v581_v37 = vpop.f32.mrb[98].mxu0 }
 0x19c   :  { %v634_v6 = vrot.slane %v633_v14, 4  ;;  %v736_v15 = vadd.f32 %v735_v25, %v688_v62  ;;  %v582_v44 = vpop.f32.mrb[99].mxu0 }
 0x19d   :  { %v1554_v35 = vrot.slane %v1553_v46, 4  ;;  %v1656_v40 = vadd.f32 %v1655_v38, %v1608_v27 }
 0x19e   :  { %v635_v18 = vadd.f32 %v634_v6, %v633_v14  ;;  %v737_v9 = vrot.slane %v736_v15, 4 }
 0x19f   :  { %v1555_v8 = vadd.f32 %v1554_v35, %v1553_v46  ;;  %v1657_v16 = vrot.slane %v1656_v40, 4 }
 0x1a0   :  { %v636_v56 = vrot.slane %v635_v18, 2  ;;  %v738_v55 = vadd.f32 %v737_v9, %v736_v15 }
 0x1a1   :  { %v1556_v33 = vrot.slane %v1555_v8, 2  ;;  %v1658_v17 = vadd.f32 %v1657_v16, %v1656_v40 }
 0x1a2   :  { %v637_v4 = vadd.f32 %v636_v56, %v635_v18  ;;  %v739_v41 = vrot.slane %v738_v55, 2 }
 0x1a3   :  { %v1557_v5 = vadd.f32 %v1556_v33, %v1555_v8  ;;  %v1659_v51 = vrot.slane %v1658_v17, 2 }
 0x1a4   :  { %v638_v58 = vrot.slane %v637_v4, 1  ;;  %v740_v23 = vadd.f32 %v739_v41, %v738_v55 }
 0x1a5   :  { %v1558_v37 = vrot.slane %v1557_v5, 1  ;;  %v1660_v26 = vadd.f32 %v1659_v51, %v1658_v17  ;;  %v16489_v51 = vlaneseq }
 0x1a6   :  { %v639_v25 = vadd.f32 %v638_v58, %v637_v4  ;;  %v741_v62 = vrot.slane %v740_v23, 1  ;;  %v1504_v4 = vld [vmem:[%s16413_s3 + $0x4] sm:$0x1] }
 0x1a7   :  { %v1559_v44 = vadd.f32 %v1558_v37, %v1557_v5  ;;  %v1661_v38 = vrot.slane %v1660_v26, 1  ;;  %v11583_v58 = vshrl.u32 %v16489_v51, 7  ;;  %v585_v37 = vld [vmem:[%s16413_s3 + $0x1] sm:$0x1] }
 0x1a8   :  { %v742_v6 = vadd.f32 %v741_v62, %v740_v23  ;;  %v743_v14 = vmul.f32 0.0025510204, %v639_v25 }
 0x1a9   :  { %v1662_v46 = vadd.f32 %v1661_v38, %v1660_v26  ;;  %v1663_v27 = vmul.f32 0.0025510204, %v1559_v44  ;;  %16628 = vst [vmem:[#allocation69_spill] sm:$0xff] %v11583_v58  ;;  %v584_v26 = vld [vmem:[%s16413_s3] sm:$0x1]  ;;  %v11589_v23 = vsub.s32 0, %v11583_v58 }
 0x1aa   :  { %v744_v35 = vmul.f32 0.0025510204, %v742_v6  ;;  %v745_v15 = vmul.f32 %v743_v14, %v743_v14  ;;  %v1505_v38 = vld [vmem:[%s16413_s3 + $0x5] sm:$0x1] }
 0x1ab   :  { %v1664_v9 = vmul.f32 0.0025510204, %v1662_v46  ;;  %v1665_v40 = vmul.f32 %v1663_v27, %v1663_v27  ;;  %16629 = vst [vmem:[#allocation70_spill] sm:$0xff] %v11589_v23 }
 0x1ac   :  { %v746_v56 = vsub.f32 %v744_v35, %v745_v15 }
 0x1ad   :  { %v1666_v18 = vsub.f32 %v1664_v9, %v1665_v40 }
 0x1ae   :  { %v747_v33 = vmax.f32 %v746_v56, 0.0 }
 0x1af   :  { %v1667_v8 = vmax.f32 %v1666_v18, 0.0 }
 0x1b0   :  { %v748_v16 = vadd.f32 1e-05, %v747_v33 }
 0x1b1   :  { %v1668_v41 = vadd.f32 1e-05, %v1667_v8 }
 0x1b2   :  { %10780 = vrsqrt.f32 %v748_v16 }
 0x1b3   :  { %10782 = vrsqrt.f32 %v1668_v41 }
 0x1bc   :  { %v10781_v17 = vpop.eup %10780 }
 0x1bd   :  { %v10783_v55 = vpop.eup %10782  ;;  %v750_v5 = vmul.f32 %v10781_v17, %v584_v26 }
 0x1be   :  { %v1670_v25 = vmul.f32 %v10783_v55, %v1504_v4 }
 0x1bf   :  { %v751_v62 = vmul.f32 %v750_v5, %v743_v14  ;;  %v11598_v44 = vrot.slane %v750_v5, %v11589_v23 }
 0x1c0   :  { %v1671_v6 = vmul.f32 %v1670_v25, %v1663_v27  ;;  %v1676_v46 = vrot.slane %v1670_v25, %v11589_v23 }
 0x1c1   :  { %v752_v35 = vsub.f32 %v585_v37, %v751_v62  ;;  %v11606_v15 = vmul.f32 %v11598_v44, %v11572_v48  ;;  %v757_v9 = vmul.f32 %v11598_v44, %v11057_v28  ;;  %v758_v14 = vmul.f32 %v11598_v44, %v11061_v30  ;;  %v16642_v62 = vld [vmem:[#allocation54_spill] sm:$0xff] }
 0x1c2   :  { %v1672_v40 = vsub.f32 %v1505_v38, %v1671_v6  ;;  %v1725_v56 = vmul.f32 %v1676_v46, %v11577_v21  ;;  %v11614_v18 = vmul.f32 %v1676_v46, %v11059_v29  ;;  %v11617_v27 = vmul.f32 %v1676_v46, %v11069_v34  ;;  %v16643_v6 = vld [vmem:[#allocation56_spill] sm:$0xff] }
 0x1c3   :  { %v11620_v33 = vrot.slane %v752_v35, %v11589_v23  ;;  %v11623_v48 = vmul.f32 %v1676_v46, %v11082_v43  ;;  %v11626_v28 = vmul.f32 %v1676_v46, %v11092_v50  ;;  %v1681_v30 = vmul.f32 %v1676_v46, %v11102_v59 }
 0x1c4   :  { %16630 = vst [vmem:[#allocation71_spill] sm:$0xff] %v11614_v18  ;;  %16631 = vst [vmem:[#allocation72_spill] sm:$0xff] %v11617_v27  ;;  %v11630_v8 = vrot.slane %v1672_v40, %v11589_v23  ;;  %v1682_v29 = vmul.f32 %v1676_v46, %v11112_v3  ;;  %v1683_v21 = vmul.f32 %v1676_v46, %v11122_v12  ;;  %v16644_v40 = vld [vmem:[#allocation58_spill] sm:$0xff] }
 0x1c5   :  { %16632 = vst [vmem:[#allocation73_spill] sm:$0xff] %v11623_v48  ;;  %16633 = vst [vmem:[#allocation74_spill] sm:$0xff] %v11626_v28  ;;  %v1684_v34 = vmul.f32 %v1676_v46, %v11132_v19  ;;  %v11636_v16 = vmul.f32 %v1676_v46, %v11142_v31  ;;  %v11639_v43 = vmul.f32 %v1676_v46, %v11152_v39 }
 0x1c6   :  { %v11642_v50 = vmul.f32 %v1676_v46, %v11162_v52  ;;  %v11645_v59 = vmul.f32 %v1676_v46, %v11172_v61  ;;  %v11648_v41 = vadd.f32 %v11630_v8, %v1725_v56  ;;  %v11651_v3 = vmul.f32 %v1676_v46, %v11182_v10 }
 0x1c7   :  { %v11654_v12 = vmul.f32 %v1676_v46, %v11192_v20  ;;  %v11657_v19 = vmul.f32 %v1676_v46, %v11202_v36  ;;  %v11660_v31 = vmul.f32 %v1676_v46, %v11212_v47  ;;  %v11663_v39 = vmul.f32 %v1676_v46, %v11222_v0 }
 0x1c8   :  { %16634 = vst [vmem:[#allocation75_spill] sm:$0xff] %v11648_v41  ;;  %v11666_v52 = vmul.f32 %v1676_v46, %v11232_v13  ;;  %v11669_v61 = vmul.f32 %v1676_v46, %v11242_v32  ;;  %v11672_v10 = vmul.f32 %v1676_v46, %v11252_v49  ;;  %v11675_v20 = vmul.f32 %v1676_v46, %v11262_v7  ;;  %v16660_v41 = vld [vmem:[#allocation8_spill] sm:$0xff] }
 0x1c9   :  { %v11678_v36 = vmul.f32 %v1676_v46, %v11272_v22  ;;  %v11681_v47 = vmul.f32 %v1676_v46, %v11282_v53  ;;  %v11684_v0 = vmul.f32 %v1676_v46, %v11292_v11  ;;  %v11687_v13 = vmul.f32 %v1676_v46, %v11306_v54 }
 0x1ca   :  { %v11690_v32 = vmul.f32 %v1676_v46, %v11320_v2  ;;  %v11693_v49 = vmul.f32 %v1676_v46, %v11334_v57  ;;  %v11696_v7 = vmul.f32 %v1676_v46, %v11348_v24  ;;  %v11699_v22 = vmul.f32 %v1676_v46, %v11362_v1  ;;  %v16635_v57 = vld [vmem:[#allocation40_spill] sm:$0xff]  ;;  %v16636_v24 = vld [vmem:[#allocation42_spill] sm:$0xff] }
 0x1cb   :  { %v11702_v53 = vmul.f32 %v1676_v46, %v11376_v60  ;;  %v11705_v11 = vmul.f32 %v1676_v46, %v11395_v42  ;;  %v11708_v54 = vmul.f32 %v1676_v46, %v11406_v63  ;;  %v11711_v2 = vmul.f32 %v1676_v46, %v11417_v45  ;;  %v16637_v1 = vld [vmem:[#allocation44_spill] sm:$0xff]  ;;  %v16638_v60 = vld [vmem:[#allocation46_spill] sm:$0xff] }
 0x1cc   :  { %v11714_v26 = vmul.f32 %v1676_v46, %v16635_v57  ;;  %v11717_v4 = vmul.f32 %v1676_v46, %v16636_v24  ;;  %v11720_v17 = vmul.f32 %v1676_v46, %v16637_v1  ;;  %v11723_v55 = vmul.f32 %v1676_v46, %v16638_v60  ;;  %v16639_v42 = vld [vmem:[#allocation48_spill] sm:$0xff]  ;;  %v16640_v63 = vld [vmem:[#allocation50_spill] sm:$0xff] }
 0x1cd   :  { %v11726_v5 = vmul.f32 %v1676_v46, %v16639_v42  ;;  %v11729_v37 = vmul.f32 %v1676_v46, %v16640_v63  ;;  %v16641_v45 = vld [vmem:[#allocation52_spill] sm:$0xff]  ;;  %v11735_v38 = vmul.f32 %v1676_v46, %v16642_v62  ;;  %v11738_v35 = vmul.f32 %v1676_v46, %v16643_v6  ;;  %v16648_v1 = vld [vmem:[#allocation62_spill] sm:$0xff] }
 0x1ce   :  { %v11732_v25 = vmul.f32 %v1676_v46, %v16641_v45  ;;  %v11741_v56 = vmul.f32 %v1676_v46, %v16644_v40  ;;  %v16646_v57 = vld [vmem:[#allocation60_spill] sm:$0xff]  ;;  %v11747_v60 = vmul.f32 %v1676_v46, %v16648_v1  ;;  %v16652_v45 = vld [vmem:[#allocation66_spill] sm:$0xff]  ;;  %v11759_v6 = vadd.f32 %v11630_v8, %v1681_v30 }
 0x1cf   :  { %v11744_v24 = vmul.f32 %v1676_v46, %v16646_v57  ;;  %v16650_v42 = vld [vmem:[#allocation64_spill] sm:$0xff]  ;;  %v11753_v51 = vmul.f32 %v1676_v46, %v16652_v45  ;;  %v11762_v40 = vadd.f32 %v11630_v8, %v1682_v29  ;;  %v11765_v57 = vadd.f32 %v11630_v8, %v1683_v21 }
 0x1d0   :  { %16645 = vst [vmem:[#allocation40_spill] sm:$0xff] %v11741_v56  ;;  %16649 = vst [vmem:[#allocation44_spill] sm:$0xff] %v11747_v60  ;;  %v11750_v63 = vmul.f32 %v1676_v46, %v16650_v42  ;;  %v16654_v62 = vld [vmem:[#allocation68_spill] sm:$0xff]  ;;  %v11768_v1 = vadd.f32 %v11630_v8, %v1684_v34  ;;  %v810_v42 = vadd.f32 %v11620_v33, %v757_v9 }
 0x1d1   :  { %16647 = vst [vmem:[#allocation42_spill] sm:$0xff] %v11744_v24  ;;  %16653 = vst [vmem:[#allocation48_spill] sm:$0xff] %v11753_v51  ;;  %v11756_v58 = vmul.f32 %v1676_v46, %v16654_v62  ;;  %v811_v45 = vadd.f32 %v11620_v33, %v758_v14  ;;  %v759_v46 = vmul.f32 %v11598_v44, %v16660_v41  ;;  %v16661_v62 = vld [vmem:[#allocation9_spill] sm:$0xff]  ;;  %v16676_v24 = vld [vmem:[#allocation23_spill] sm:$0xff] }
 0x1d2   :  { %16651 = vst [vmem:[#allocation46_spill] sm:$0xff] %v11750_v63  ;;  %16656 = vst [vmem:[#allocation52_spill] sm:$0xff] %v11759_v6  ;;  %v760_v30 = vmul.f32 %v11598_v44, %v16661_v62  ;;  %v16662_v6 = vld [vmem:[#allocation10_spill] sm:$0xff]  ;;  %v16665_v14 = vld [vmem:[#allocation13_spill] sm:$0xff] }
 0x1d3   :  { %16655 = vst [vmem:[#allocation50_spill] sm:$0xff] %v11756_v58  ;;  %16657 = vst [vmem:[#allocation54_spill] sm:$0xff] %v11762_v40  ;;  %v761_v29 = vmul.f32 %v11598_v44, %v16662_v6  ;;  %v16663_v40 = vld [vmem:[#allocation11_spill] sm:$0xff]  ;;  %v860_v23 = vmax.f32 %v811_v45, 0.0  ;;  %v812_v9 = vadd.f32 %v11620_v33, %v759_v46  ;;  %v764_v28 = vmul.f32 %v11598_v44, %v16665_v14  ;;  %v16668_v63 = vld [vmem:[#allocation16_spill] sm:$0xff] }
 0x1d4   :  { %16658 = vst [vmem:[#allocation56_spill] sm:$0xff] %v11765_v57  ;;  %16659 = vst [vmem:[#allocation58_spill] sm:$0xff] %v11768_v1  ;;  %v762_v21 = vmul.f32 %v11598_v44, %v16663_v40  ;;  %v16664_v57 = vld [vmem:[#allocation12_spill] sm:$0xff]  ;;  %v859_v1 = vmax.f32 %v810_v42, 0.0  ;;  %v813_v41 = vadd.f32 %v11620_v33, %v760_v30  ;;  %v16667_v30 = vld [vmem:[#allocation15_spill] sm:$0xff] }
 0x1d5   :  { %v763_v34 = vmul.f32 %v11598_v44, %v16664_v57  ;;  %v814_v62 = vadd.f32 %v11620_v33, %v761_v29  ;;  %v861_v40 = vmax.f32 %v812_v9, 0.0  ;;  %v817_v18 = vadd.f32 %v11620_v33, %v764_v28  ;;  %v16666_v57 = vld [vmem:[#allocation14_spill] sm:$0xff]  ;;  %v16670_v9 = vld [vmem:[#allocation17_spill] sm:$0xff] }
 0x1d6   :  { %v815_v48 = vadd.f32 %v11620_v33, %v762_v21  ;;  %v908_v27 = vpack.c.bf16 %v860_v23, %v859_v1  ;;  %v765_v42 = vmul.f32 %v11598_v44, %v16666_v57  ;;  %v862_v45 = vmax.f32 %v813_v41, 0.0 }
 0x1d7   :  { %v816_v6 = vadd.f32 %v11620_v33, %v763_v34  ;;  %v863_v46 = vmax.f32 %v814_v62, 0.0  ;;  %v866_v14 = vmax.f32 %v817_v18, 0.0  ;;  %v766_v29 = vmul.f32 %v11598_v44, %v16667_v30 }
 0x1d8   :  { %v864_v58 = vmax.f32 %v815_v48, 0.0  ;;  %9225 = vmatmul.mubr.bf16.vlgmr.msra.gmra.mrb[0].mxu1 %v908_v27  ;;  %v818_v21 = vadd.f32 %v11620_v33, %v765_v42  ;;  %v767_v23 = vmul.f32 %v11598_v44, %v16668_v63  ;;  %v16669_v1 = vmov 0.0   ;;  %v16671_v48 = vld [vmem:[#allocation18_spill] sm:$0xff]  ;;  %v16672_v42 = vld [vmem:[#allocation19_spill] sm:$0xff] }
 0x1d9   :  { %v865_v51 = vmax.f32 %v816_v6, 0.0  ;;  %9228 = vmatprep.mubr.msk.bf16.mxu1 %vm10856_vm1, %v16669_v1  ;;  %v909_v28 = vpack.c.bf16 %v862_v45, %v861_v40  ;;  %v768_v41 = vmul.f32 %v11598_v44, %v16670_v9  ;;  %v769_v27 = vmul.f32 %v11598_v44, %v16671_v48  ;;  %v16673_v40 = vld [vmem:[#allocation20_spill] sm:$0xff]  ;;  %v16674_v48 = vld [vmem:[#allocation21_spill] sm:$0xff] }
 0x1da   :  { %v910_v34 = vpack.c.bf16 %v864_v58, %v863_v46  ;;  %v819_v62 = vadd.f32 %v11620_v33, %v766_v29  ;;  %v867_v6 = vmax.f32 %v818_v21, 0.0  ;;  %v820_v57 = vadd.f32 %v11620_v33, %v767_v23 }
 0x1db   :  { %v11803_v18 = vpack.c.bf16 %v866_v14, %v865_v51  ;;  %v821_v63 = vadd.f32 %v11620_v33, %v768_v41  ;;  %v770_v30 = vmul.f32 %v11598_v44, %v16672_v42  ;;  %v822_v58 = vadd.f32 %v11620_v33, %v769_v27  ;;  %v16675_v14 = vld [vmem:[#allocation22_spill] sm:$0xff] }
 0x1dc   :  { %v771_v45 = vmul.f32 %v11598_v44, %v16673_v40  ;;  %v868_v46 = vmax.f32 %v819_v62, 0.0  ;;  %v869_v9 = vmax.f32 %v820_v57, 0.0  ;;  %v772_v51 = vmul.f32 %v11598_v44, %v16674_v48 }
 0x1dd   :  { %v773_v29 = vmul.f32 %v11598_v44, %v16675_v14  ;;  %v870_v21 = vmax.f32 %v821_v63, 0.0  ;;  %v823_v23 = vadd.f32 %v11620_v33, %v770_v30  ;;  %v871_v41 = vmax.f32 %v822_v58, 0.0  ;;  %v16677_v14 = vld [vmem:[#allocation24_spill] sm:$0xff] }
 0x1de   :  { %v824_v60 = vadd.f32 %v11620_v33, %v771_v45  ;;  %v11819_v42 = vpack.c.bf16 %v868_v46, %v867_v6  ;;  %v825_v27 = vadd.f32 %v11620_v33, %v772_v51  ;;  %v774_v62 = vmul.f32 %v11598_v44, %v16676_v24  ;;  %v16678_v45 = vld [vmem:[#allocation25_spill] sm:$0xff]  ;;  %v16680_v51 = vld [vmem:[#allocation26_spill] sm:$0xff] }
 0x1df   :  { %v826_v57 = vadd.f32 %v11620_v33, %v773_v29  ;;  %v11825_v40 = vpack.c.bf16 %v870_v21, %v869_v9  ;;  %v872_v48 = vmax.f32 %v823_v23, 0.0  ;;  %v775_v63 = vmul.f32 %v11598_v44, %v16677_v14  ;;  %v16681_v29 = vld [vmem:[#allocation27_spill] sm:$0xff] }
 0x1e0   :  { %v873_v56 = vmax.f32 %v824_v60, 0.0  ;;  %9229 = vmatmul.mubr.bf16.gmra.mrb[4].mxu1 %v909_v28  ;;  %v874_v30 = vmax.f32 %v825_v27, 0.0  ;;  %v827_v58 = vadd.f32 %v11620_v33, %v774_v62  ;;  %v776_v46 = vmul.f32 %v11598_v44, %v16678_v45  ;;  %v16683_v62 = vld [vmem:[#allocation28_spill] sm:$0xff] }
 0x1e1   :  { %v875_v6 = vmax.f32 %v826_v57, 0.0  ;;  %9232 = vmatprep.mubr.msk.bf16.mxu1 %vm10856_vm1, %v16669_v1  ;;  %v11834_v24 = vpack.c.bf16 %v872_v48, %v871_v41  ;;  %v828_v9 = vadd.f32 %v11620_v33, %v775_v63  ;;  %v777_v60 = vmul.f32 %v11598_v44, %v16680_v51  ;;  %v16684_v63 = vld [vmem:[#allocation29_spill] sm:$0xff] }
 0x1e2   :  { %v778_v28 = vmul.f32 %v11598_v44, %v16681_v29  ;;  %v11841_v21 = vpack.c.bf16 %v874_v30, %v873_v56  ;;  %v876_v23 = vmax.f32 %v827_v58, 0.0  ;;  %v829_v27 = vadd.f32 %v11620_v33, %v776_v46  ;;  %v16685_v30 = vld [vmem:[#allocation30_spill] sm:$0xff] }
 0x1e3   :  { %16679 = vst [vmem:[#allocation60_spill] sm:$0xff] %v11834_v24  ;;  %v779_v57 = vmul.f32 %v11598_v44, %v16683_v62  ;;  %v877_v14 = vmax.f32 %v828_v9, 0.0  ;;  %v830_v41 = vadd.f32 %v11620_v33, %v777_v60  ;;  %v780_v45 = vmul.f32 %v11598_v44, %v16684_v63  ;;  %v16686_v9 = vld [vmem:[#allocation31_spill] sm:$0xff] }
 0x1e4   :  { %16682 = vst [vmem:[#allocation62_spill] sm:$0xff] %v11841_v21  ;;  %v831_v48 = vadd.f32 %v11620_v33, %v778_v28  ;;  %v11850_v51 = vpack.c.bf16 %v876_v23, %v875_v6  ;;  %v878_v24 = vmax.f32 %v829_v27, 0.0  ;;  %v781_v58 = vmul.f32 %v11598_v44, %v16685_v30  ;;  %v16688_v6 = vld [vmem:[#allocation32_spill] sm:$0xff] }
 0x1e5   :  { %v832_v56 = vadd.f32 %v11620_v33, %v779_v57  ;;  %v879_v46 = vmax.f32 %v830_v41, 0.0  ;;  %v833_v62 = vadd.f32 %v11620_v33, %v780_v45  ;;  %v782_v60 = vmul.f32 %v11598_v44, %v16686_v9  ;;  %v16690_v41 = vld [vmem:[#allocation33_spill] sm:$0xff] }
 0x1e6   :  { %v880_v29 = vmax.f32 %v831_v48, 0.0  ;;  %v11858_v21 = vpack.c.bf16 %v878_v24, %v877_v14  ;;  %v834_v63 = vadd.f32 %v11620_v33, %v781_v58  ;;  %v783_v23 = vmul.f32 %v11598_v44, %v16688_v6  ;;  %v16691_v24 = vld [vmem:[#allocation34_spill] sm:$0xff] }
 0x1e7   :  { %v881_v28 = vmax.f32 %v832_v56, 0.0  ;;  %v882_v57 = vmax.f32 %v833_v62, 0.0  ;;  %v835_v30 = vadd.f32 %v11620_v33, %v782_v60  ;;  %v784_v48 = vmul.f32 %v11598_v44, %v16690_v41  ;;  %v16692_v56 = vld [vmem:[#allocation35_spill] sm:$0xff]  ;;  %v16694_v60 = vld [vmem:[#allocation36_spill] sm:$0xff]  ;;  %v16695_v41 = vld [vmem:[#allocation37_spill] sm:$0xff] }
 0x1e8   :  { %16687 = vst [vmem:[#allocation64_spill] sm:$0xff] %v11858_v21  ;;  %v11863_v27 = vpack.c.bf16 %v880_v29, %v879_v46  ;;  %9233 = vmatmul.mubr.bf16.gmra.mrb[8].mxu1 %v910_v34  ;;  %v883_v45 = vmax.f32 %v834_v63, 0.0  ;;  %v836_v9 = vadd.f32 %v11620_v33, %v783_v23  ;;  %v785_v14 = vmul.f32 %v11598_v44, %v16691_v24 }
 0x1e9   :  { %v786_v58 = vmul.f32 %v11598_v44, %v16692_v56  ;;  %9236 = vmatprep.mubr.msk.bf16.mxu1 %vm10856_vm1, %v16669_v1  ;;  %v11875_v46 = vpack.c.bf16 %v882_v57, %v881_v28  ;;  %v884_v29 = vmax.f32 %v835_v30, 0.0  ;;  %v837_v62 = vadd.f32 %v11620_v33, %v784_v48  ;;  %v16697_v57 = vld [vmem:[#allocation38_spill] sm:$0xff] }
 0x1ea   :  { %16689 = vst [vmem:[#allocation66_spill] sm:$0xff] %v11863_v27  ;;  %v787_v34 = vmul.f32 %v11598_v44, %v16694_v60  ;;  %v885_v63 = vmax.f32 %v836_v9, 0.0  ;;  %v838_v6 = vadd.f32 %v11620_v33, %v785_v14  ;;  %v788_v24 = vmul.f32 %v11598_v44, %v16695_v41  ;;  %v16698_v9 = vld [vmem:[#allocation39_spill] sm:$0xff] }
 0x1eb   :  { %16693 = vst [vmem:[#allocation68_spill] sm:$0xff] %v11875_v46  ;;  %v839_v23 = vadd.f32 %v11620_v33, %v786_v58  ;;  %v11884_v56 = vpack.c.bf16 %v884_v29, %v883_v45  ;;  %v886_v27 = vmax.f32 %v837_v62, 0.0  ;;  %v789_v30 = vmul.f32 %v11598_v44, %v16697_v57  ;;  %v16699_v45 = vld [vmem:[#allocation41_spill] sm:$0xff] }
 0x1ec   :  { %v840_v28 = vadd.f32 %v11620_v33, %v787_v34  ;;  %v887_v48 = vmax.f32 %v838_v6, 0.0  ;;  %v841_v60 = vadd.f32 %v11620_v33, %v788_v24  ;;  %v790_v14 = vmul.f32 %v11598_v44, %v16698_v9  ;;  %v16701_v6 = vld [vmem:[#allocation43_spill] sm:$0xff]  ;;  %v16702_v9 = vld [vmem:[#allocation45_spill] sm:$0xff] }
 0x1ed   :  { %16696 = vst [vmem:[#allocation8_spill] sm:$0xff] %v11884_v56  ;;  %v888_v46 = vmax.f32 %v839_v23, 0.0  ;;  %v11892_v21 = vpack.c.bf16 %v886_v27, %v885_v63  ;;  %v842_v41 = vadd.f32 %v11620_v33, %v789_v30  ;;  %v791_v29 = vmul.f32 %v11598_v44, %v16699_v45  ;;  %v16703_v63 = vld [vmem:[#allocation47_spill] sm:$0xff] }
 0x1ee   :  { %v889_v58 = vmax.f32 %v840_v28, 0.0  ;;  %v890_v34 = vmax.f32 %v841_v60, 0.0  ;;  %v843_v57 = vadd.f32 %v11620_v33, %v790_v14  ;;  %v792_v23 = vmul.f32 %v11598_v44, %v16701_v6  ;;  %v16705_v60 = vld [vmem:[#allocation49_spill] sm:$0xff]  ;;  %v16706_v6 = vld [vmem:[#allocation51_spill] sm:$0xff] }
 0x1ef   :  { %v11897_v62 = vpack.c.bf16 %v888_v46, %v887_v48  ;;  %v891_v24 = vmax.f32 %v842_v41, 0.0  ;;  %v844_v56 = vadd.f32 %v11620_v33, %v791_v29  ;;  %v793_v27 = vmul.f32 %v11598_v44, %v16702_v9 }
 0x1f0   :  { %v794_v28 = vmul.f32 %v11598_v44, %v16703_v63  ;;  %9237 = vmatmul.mubr.bf16.gmra.mrb[12].mxu1 %v11803_v18  ;;  %v11908_v30 = vpack.c.bf16 %v890_v34, %v889_v58  ;;  %v892_v46 = vmax.f32 %v843_v57, 0.0  ;;  %v845_v48 = vadd.f32 %v11620_v33, %v792_v23  ;;  %v16708_v57 = vld [vmem:[#allocation53_spill] sm:$0xff] }
 0x1f1   :  { %16700 = vst [vmem:[#allocation9_spill] sm:$0xff] %v11897_v62  ;;  %v795_v14 = vmul.f32 %v11598_v44, %v16705_v60  ;;  %9240 = vmatprep.mubr.msk.bf16.mxu1 %vm10856_vm1, %v16669_v1  ;;  %v893_v41 = vmax.f32 %v844_v56, 0.0  ;;  %v846_v45 = vadd.f32 %v11620_v33, %v793_v27  ;;  %v796_v9 = vmul.f32 %v11598_v44, %v16706_v6  ;;  %v16709_v56 = vld [vmem:[#allocation55_spill] sm:$0xff] }
 0x1f2   :  { %16704 = vst [vmem:[#allocation10_spill] sm:$0xff] %v11908_v30  ;;  %v847_v29 = vadd.f32 %v11620_v33, %v794_v28  ;;  %v11919_v18 = vpack.c.bf16 %v892_v46, %v891_v24  ;;  %v894_v58 = vmax.f32 %v845_v48, 0.0  ;;  %v797_v23 = vmul.f32 %v11598_v44, %v16708_v57  ;;  %v16710_v24 = vld [vmem:[#allocation57_spill] sm:$0xff] }
 0x1f3   :  { %v848_v34 = vadd.f32 %v11620_v33, %v795_v14  ;;  %v895_v63 = vmax.f32 %v846_v45, 0.0  ;;  %v849_v30 = vadd.f32 %v11620_v33, %v796_v9  ;;  %v798_v27 = vmul.f32 %v11598_v44, %v16709_v56  ;;  %v16711_v45 = vld [vmem:[#allocation59_spill] sm:$0xff]  ;;  %v16712_v56 = vld [vmem:[#allocation61_spill] sm:$0xff] }
 0x1f4   :  { %16707 = vst [vmem:[#allocation11_spill] sm:$0xff] %v11919_v18  ;;  %v896_v60 = vmax.f32 %v847_v29, 0.0  ;;  %v11927_v62 = vpack.c.bf16 %v894_v58, %v893_v41  ;;  %v850_v6 = vadd.f32 %v11620_v33, %v797_v23  ;;  %v799_v46 = vmul.f32 %v11598_v44, %v16710_v24  ;;  %v16713_v58 = vld [vmem:[#allocation63_spill] sm:$0xff] }
 0x1f5   :  { %v897_v28 = vmax.f32 %v848_v34, 0.0  ;;  %v898_v14 = vmax.f32 %v849_v30, 0.0  ;;  %v851_v57 = vadd.f32 %v11620_v33, %v798_v27  ;;  %v800_v29 = vmul.f32 %v11598_v44, %v16711_v45  ;;  %v16714_v30 = vld [vmem:[#allocation65_spill] sm:$0xff]  ;;  %v16715_v45 = vld [vmem:[#allocation67_spill] sm:$0xff] }
 0x1f6   :  { %v11932_v48 = vpack.c.bf16 %v896_v60, %v895_v63  ;;  %v899_v9 = vmax.f32 %v850_v6, 0.0  ;;  %v852_v18 = vadd.f32 %v11620_v33, %v799_v46  ;;  %v801_v41 = vmul.f32 %v11598_v44, %v16712_v56 }
 0x1f7   :  { %v802_v34 = vmul.f32 %v11598_v44, %v16713_v58  ;;  %v11942_v23 = vpack.c.bf16 %v898_v14, %v897_v28  ;;  %v900_v24 = vmax.f32 %v851_v57, 0.0  ;;  %v853_v63 = vadd.f32 %v11620_v33, %v800_v29 }
 0x1f8   :  { %v803_v60 = vmul.f32 %v11598_v44, %v16714_v30  ;;  %9241 = vmatmul.mubr.bf16.gmra.mrb[16].mxu1 %v11819_v42  ;;  %v901_v27 = vmax.f32 %v852_v18, 0.0  ;;  %v854_v6 = vadd.f32 %v11620_v33, %v801_v41  ;;  %v804_v56 = vmul.f32 %v11598_v44, %v16715_v45  ;;  %v16758_v45 = vld [vmem:[#allocation48_spill] sm:$0xff] }
 0x1f9   :  { %v855_v46 = vadd.f32 %v11620_v33, %v802_v34  ;;  %9244 = vmatprep.mubr.msk.bf16.mxu1 %vm10856_vm1, %v16669_v1  ;;  %v11954_v28 = vpack.c.bf16 %v900_v24, %v899_v9  ;;  %v902_v14 = vmax.f32 %v853_v63, 0.0  ;;  %v11959_v29 = vadd.f32 %v11620_v33, %v11606_v15 }
 0x1fa   :  { %v856_v57 = vadd.f32 %v11620_v33, %v803_v60  ;;  %v903_v42 = vmax.f32 %v854_v6, 0.0  ;;  %v857_v41 = vadd.f32 %v11620_v33, %v804_v56  ;;  %v11964_v58 = vadd.f32 %v11630_v8, %v11636_v16  ;;  %v16754_v6 = vld [vmem:[#allocation44_spill] sm:$0xff]  ;;  %v16760_v56 = vld [vmem:[#allocation50_spill] sm:$0xff] }
 0x1fb   :  { %v904_v18 = vmax.f32 %v855_v46, 0.0  ;;  %v11966_v44 = vpack.c.bf16 %v902_v14, %v901_v27  ;;  %v11970_v9 = vadd.f32 %v11630_v8, %v11639_v43  ;;  %v11976_v15 = vadd.f32 %v11630_v8, %v11642_v50  ;;  %v16752_v27 = vld [vmem:[#allocation42_spill] sm:$0xff] }
 0x1fc   :  { %16716 = vst [vmem:[#allocation12_spill] sm:$0xff] %v11964_v58  ;;  %v905_v34 = vmax.f32 %v856_v57, 0.0  ;;  %v906_v63 = vmax.f32 %v857_v41, 0.0  ;;  %v11980_v33 = vadd.f32 %v11630_v8, %v11645_v59  ;;  %v11984_v16 = vadd.f32 %v11630_v8, %v11651_v3  ;;  %v16756_v46 = vld [vmem:[#allocation46_spill] sm:$0xff]  ;;  %v16762_v57 = vld [vmem:[#allocation71_spill] sm:$0xff] }
 0x1fd   :  { %16717 = vst [vmem:[#allocation13_spill] sm:$0xff] %v11970_v9  ;;  %v11972_v24 = vpack.c.bf16 %v904_v18, %v903_v42  ;;  %16718 = vst [vmem:[#allocation14_spill] sm:$0xff] %v11976_v15  ;;  %v11988_v30 = vadd.f32 %v11630_v8, %v11654_v12  ;;  %v11992_v43 = vadd.f32 %v11630_v8, %v11657_v19  ;;  %v16764_v18 = vld [vmem:[#allocation72_spill] sm:$0xff] }
 0x1fe   :  { %16719 = vst [vmem:[#allocation15_spill] sm:$0xff] %v11980_v33  ;;  %16720 = vst [vmem:[#allocation16_spill] sm:$0xff] %v11984_v16  ;;  %v11994_v60 = vpack.c.bf16 %v906_v63, %v905_v34  ;;  %v11998_v50 = vadd.f32 %v11630_v8, %v11660_v31  ;;  %v12002_v59 = vadd.f32 %v11630_v8, %v11663_v39  ;;  %v16766_v34 = vld [vmem:[#allocation73_spill] sm:$0xff] }
 0x1ff   :  { %16721 = vst [vmem:[#allocation17_spill] sm:$0xff] %v11988_v30  ;;  %16722 = vst [vmem:[#allocation18_spill] sm:$0xff] %v11992_v43  ;;  %v12006_v3 = vadd.f32 %v11630_v8, %v11666_v52  ;;  %v12010_v12 = vadd.f32 %v11630_v8, %v11669_v61  ;;  %v12014_v19 = vadd.f32 %v11630_v8, %v11672_v10 }
 0x200   :  { %16723 = vst [vmem:[#allocation19_spill] sm:$0xff] %v11998_v50  ;;  %16724 = vst [vmem:[#allocation20_spill] sm:$0xff] %v12002_v59  ;;  %v12018_v31 = vadd.f32 %v11630_v8, %v11675_v20  ;;  %v12022_v39 = vadd.f32 %v11630_v8, %v11678_v36  ;;  %9245 = vmatmul.mubr.bf16.gmra.mrb[20].mxu1 %v11825_v40  ;;  %v12027_v52 = vadd.f32 %v11630_v8, %v11681_v47  ;;  %v16750_v40 = vld [vmem:[#allocation40_spill] sm:$0xff] }
 0x201   :  { %16725 = vst [vmem:[#allocation21_spill] sm:$0xff] %v12006_v3  ;;  %16726 = vst [vmem:[#allocation22_spill] sm:$0xff] %v12010_v12  ;;  %v12031_v61 = vadd.f32 %v11630_v8, %v11684_v0  ;;  %v12035_v10 = vadd.f32 %v11630_v8, %v11687_v13  ;;  %v12039_v20 = vadd.f32 %v11630_v8, %v11690_v32  ;;  %9248 = vmatprep.mubr.msk.bf16.mxu1 %vm10856_vm1, %v16669_v1 }
 0x202   :  { %16727 = vst [vmem:[#allocation23_spill] sm:$0xff] %v12014_v19  ;;  %16728 = vst [vmem:[#allocation24_spill] sm:$0xff] %v12018_v31  ;;  %v12045_v36 = vadd.f32 %v11630_v8, %v11693_v49  ;;  %v12049_v47 = vadd.f32 %v11630_v8, %v11696_v7  ;;  %v12053_v0 = vadd.f32 %v11630_v8, %v11699_v22 }
 0x203   :  { %16729 = vst [vmem:[#allocation25_spill] sm:$0xff] %v12022_v39  ;;  %16730 = vst [vmem:[#allocation26_spill] sm:$0xff] %v12027_v52  ;;  %v12057_v13 = vadd.f32 %v11630_v8, %v11702_v53  ;;  %v12061_v32 = vadd.f32 %v11630_v8, %v11705_v11  ;;  %v12065_v49 = vadd.f32 %v11630_v8, %v11708_v54 }
 0x204   :  { %16731 = vst [vmem:[#allocation27_spill] sm:$0xff] %v12031_v61  ;;  %16732 = vst [vmem:[#allocation28_spill] sm:$0xff] %v12035_v10  ;;  %v12069_v7 = vadd.f32 %v11630_v8, %v11711_v2  ;;  %v12073_v22 = vadd.f32 %v11630_v8, %v11714_v26  ;;  %v12077_v53 = vadd.f32 %v11630_v8, %v11717_v4 }
 0x205   :  { %16733 = vst [vmem:[#allocation29_spill] sm:$0xff] %v12039_v20  ;;  %16734 = vst [vmem:[#allocation30_spill] sm:$0xff] %v12045_v36  ;;  %v12081_v11 = vadd.f32 %v11630_v8, %v11720_v17  ;;  %v12085_v54 = vadd.f32 %v11630_v8, %v11723_v55  ;;  %v12089_v2 = vadd.f32 %v11630_v8, %v11726_v5 }
 0x206   :  { %16735 = vst [vmem:[#allocation31_spill] sm:$0xff] %v12049_v47  ;;  %16736 = vst [vmem:[#allocation32_spill] sm:$0xff] %v12053_v0  ;;  %v12093_v26 = vadd.f32 %v11630_v8, %v11729_v37  ;;  %v12097_v4 = vadd.f32 %v11630_v8, %v11732_v25  ;;  %v12101_v17 = vadd.f32 %v11630_v8, %v11735_v38 }
 0x207   :  { %16737 = vst [vmem:[#allocation33_spill] sm:$0xff] %v12057_v13  ;;  %16738 = vst [vmem:[#allocation34_spill] sm:$0xff] %v12061_v32  ;;  %v12105_v55 = vadd.f32 %v11630_v8, %v11738_v35  ;;  %v12109_v5 = vadd.f32 %v11630_v8, %v16750_v40  ;;  %v12113_v37 = vadd.f32 %v11630_v8, %v16752_v27  ;;  %v16768_v40 = vld [vmem:[#allocation74_spill] sm:$0xff] }
 0x208   :  { %16739 = vst [vmem:[#allocation35_spill] sm:$0xff] %v12065_v49  ;;  %16740 = vst [vmem:[#allocation36_spill] sm:$0xff] %v12069_v7  ;;  %v12117_v25 = vadd.f32 %v11630_v8, %v16754_v6  ;;  %v12121_v38 = vadd.f32 %v11630_v8, %v16756_v46  ;;  %v12125_v35 = vadd.f32 %v11630_v8, %v16758_v45  ;;  %v16770_v6 = vld [vmem:[#allocation60_spill] sm:$0xff]  ;;  %v16771_v46 = vld [vmem:[#allocation62_spill] sm:$0xff] }
 0x209   :  { %16741 = vst [vmem:[#allocation37_spill] sm:$0xff] %v12073_v22  ;;  %16742 = vst [vmem:[#allocation38_spill] sm:$0xff] %v12077_v53  ;;  %v12129_v14 = vadd.f32 %v11630_v8, %v16760_v56  ;;  %v12133_v42 = vadd.f32 %v11630_v8, %v16762_v57  ;;  %v12137_v41 = vadd.f32 %v11630_v8, %v16764_v18  ;;  %9249 = vmatmul.mubr.bf16.gmra.mrb[24].mxu1 %v16770_v6  ;;  %v16772_v45 = vld [vmem:[#allocation64_spill] sm:$0xff]  ;;  %v16777_v18 = vld [vmem:[#allocation10_spill] sm:$0xff] }
 0x20a   :  { %16743 = vst [vmem:[#allocation39_spill] sm:$0xff] %v12081_v11  ;;  %16744 = vst [vmem:[#allocation41_spill] sm:$0xff] %v12085_v54  ;;  %v12141_v63 = vadd.f32 %v11630_v8, %v16766_v34  ;;  %v12145_v27 = vadd.f32 %v11630_v8, %v16768_v40  ;;  %9252 = vmatprep.mubr.msk.bf16.mxu1 %vm10856_vm1, %v16669_v1  ;;  %v16773_v8 = vld [vmem:[#allocation66_spill] sm:$0xff]  ;;  %v16774_v56 = vld [vmem:[#allocation68_spill] sm:$0xff] }
 0x20b   :  { %16745 = vst [vmem:[#allocation43_spill] sm:$0xff] %v12089_v2  ;;  %16746 = vst [vmem:[#allocation45_spill] sm:$0xff] %v12093_v26  ;;  %v16775_v57 = vld [vmem:[#allocation8_spill] sm:$0xff]  ;;  %v16778_v34 = vld [vmem:[#allocation11_spill] sm:$0xff] }
 0x20c   :  { %16747 = vst [vmem:[#allocation47_spill] sm:$0xff] %v12097_v4  ;;  %16748 = vst [vmem:[#allocation49_spill] sm:$0xff] %v12101_v17 }
 0x20d   :  { %16749 = vst [vmem:[#allocation51_spill] sm:$0xff] %v12105_v55  ;;  %16751 = vst [vmem:[#allocation53_spill] sm:$0xff] %v12109_v5 }
 0x20e   :  { %16753 = vst [vmem:[#allocation55_spill] sm:$0xff] %v12113_v37  ;;  %16755 = vst [vmem:[#allocation57_spill] sm:$0xff] %v12117_v25 }
 0x20f   :  { %16757 = vst [vmem:[#allocation59_spill] sm:$0xff] %v12121_v38  ;;  %16759 = vst [vmem:[#allocation61_spill] sm:$0xff] %v12125_v35 }
 0x210   :  { %16761 = vst [vmem:[#allocation63_spill] sm:$0xff] %v12129_v14  ;;  %16763 = vst [vmem:[#allocation65_spill] sm:$0xff] %v12133_v42 }
 0x211   :  { %16765 = vst [vmem:[#allocation67_spill] sm:$0xff] %v12137_v41  ;;  %16767 = vst [vmem:[#allocation40_spill] sm:$0xff] %v12141_v63  ;;  %9253 = vmatmul.mubr.bf16.gmra.mrb[28].mxu1 %v16771_v46 }
 0x212   :  { %16769 = vst [vmem:[#allocation42_spill] sm:$0xff] %v12145_v27  ;;  %9256 = vmatprep.mubr.msk.bf16.mxu1 %vm10856_vm1, %v16669_v1 }
 0x219   :  { %9257 = vmatmul.mubr.bf16.gmra.mrb[32].mxu1 %v11850_v51  ;;  %v16776_v51 = vld [vmem:[#allocation9_spill] sm:$0xff] }
 0x21a   :  { %9260 = vmatprep.mubr.msk.bf16.mxu1 %vm10856_vm1, %v16669_v1 }
 0x221   :  { %9261 = vmatmul.mubr.bf16.gmra.mrb[36].mxu1 %v16772_v45 }
 0x222   :  { %9264 = vmatprep.mubr.msk.bf16.mxu1 %vm10856_vm1, %v16669_v1 }
 0x229   :  { %9265 = vmatmul.mubr.bf16.gmra.mrb[40].mxu1 %v16773_v8 }
 0x22a   :  { %9268 = vmatprep.mubr.msk.bf16.mxu1 %vm10856_vm1, %v16669_v1 }
 0x231   :  { %9269 = vmatmul.mubr.bf16.gmra.mrb[44].mxu1 %v16774_v56 }
 0x232   :  { %9272 = vmatprep.mubr.msk.bf16.mxu1 %vm10856_vm1, %v16669_v1 }
 0x239   :  { %9273 = vmatmul.mubr.bf16.gmra.mrb[48].mxu1 %v16775_v57 }
 0x23a   :  { %9276 = vmatprep.mubr.msk.bf16.mxu1 %vm10856_vm1, %v16669_v1 }
 0x241   :  { %9277 = vmatmul.mubr.bf16.gmra.mrb[52].mxu1 %v11892_v21  ;;  %v907_v21 = vmax.f32 %v11959_v29, 0.0 }
 0x242   :  { %9280 = vmatprep.mubr.msk.bf16.mxu1 %vm10856_vm1, %v16669_v1 }
 0x249   :  { %9281 = vmatmul.mubr.bf16.gmra.mrb[56].mxu1 %v16776_v51 }
 0x24a   :  { %9284 = vmatprep.mubr.msk.bf16.mxu1 %vm10856_vm1, %v16669_v1 }
 0x251   :  { %9285 = vmatmul.mubr.bf16.gmra.mrb[60].mxu1 %v16777_v18 }
 0x252   :  { %9288 = vmatprep.mubr.msk.bf16.mxu1 %vm10856_vm1, %v16669_v1 }
 0x259   :  { %9289 = vmatmul.mubr.bf16.gmra.mrb[64].mxu1 %v16778_v34 }
 0x25a   :  { %9292 = vmatprep.mubr.msk.bf16.mxu1 %vm10856_vm1, %v16669_v1 }
 0x261   :  { %9293 = vmatmul.mubr.bf16.gmra.mrb[68].mxu1 %v11927_v62  ;;  %v932_v62 = vpack.c.bf16 %v907_v21, %v907_v21 }
 0x262   :  { %9296 = vmatprep.mubr.msk.bf16.mxu1 %vm10856_vm1, %v16669_v1 }
 0x269   :  { %9297 = vmatmul.mubr.bf16.gmra.mrb[72].mxu1 %v11932_v48 }
 0x26a   :  { %9300 = vmatprep.mubr.msk.bf16.mxu1 %vm10856_vm1, %v16669_v1 }
 0x271   :  { %9301 = vmatmul.mubr.bf16.gmra.mrb[76].mxu1 %v11942_v23 }
 0x272   :  { %9304 = vmatprep.mubr.msk.bf16.mxu1 %vm10856_vm1, %v16669_v1 }
 0x279   :  { %9305 = vmatmul.mubr.bf16.gmra.mrb[80].mxu1 %v11954_v28 }
 0x27a   :  { %9308 = vmatprep.mubr.msk.bf16.mxu1 %vm10856_vm1, %v16669_v1 }
 0x281   :  { %9309 = vmatmul.mubr.bf16.gmra.mrb[84].mxu1 %v11966_v44 }
 0x282   :  { %9312 = vmatprep.mubr.msk.bf16.mxu1 %vm10856_vm1, %v16669_v1 }
 0x289   :  { %9313 = vmatmul.mubr.bf16.gmra.mrb[88].mxu1 %v11972_v24 }
 0x28a   :  { %9316 = vmatprep.mubr.msk.bf16.mxu1 %vm10856_vm1, %v16669_v1 }
 0x291   :  { %9317 = vmatmul.mubr.bf16.gmra.mrb[92].mxu1 %v11994_v60 }
 0x292   :  { %9320 = vmatprep.mubr.msk.bf16.mxu1 %vm10856_vm1, %v16669_v1 }
 0x299   :  { %9321 = vmatmul.mubr.bf16.gmra.mrb[96].mxu1 %v932_v62 }
 0x2ab   :  { %v12202_v48 = vpop.f32.mrb[0].mxu1 }
 0x2ac   :  { %v9226_v23 = vpop.f32.mrb[1].mxu1  ;;  %v1285_v44 = vmul.f32 %v12202_v48, %v12202_v48 }
 0x2ad   :  { %v12204_v28 = vpop.f32.mrb[2].mxu1 }
 0x2ae   :  { %v1231_v24 = vadd.f32 %v12204_v28, %v12202_v48  ;;  %v1286_v60 = vmul.f32 %v12204_v28, %v12204_v28  ;;  %v9227_v40 = vpop.f32.mrb[3].mxu1 }
 0x2b0   :  { %v1334_v6 = vadd.f32 %v1286_v60, %v1285_v44 }
 0x2b3   :  { %v12212_v46 = vpop.f32.mrb[4].mxu1 }
 0x2b4   :  { %v1232_v29 = vadd.f32 %v1231_v24, %v12212_v46  ;;  %v1287_v45 = vmul.f32 %v12212_v46, %v12212_v46  ;;  %v9230_v8 = vpop.f32.mrb[5].mxu1 }
 0x2b5   :  { %v12217_v56 = vpop.f32.mrb[6].mxu1 }
 0x2b6   :  { %v1335_v57 = vadd.f32 %v1334_v6, %v1287_v45  ;;  %v1233_v51 = vadd.f32 %v1232_v29, %v12217_v56  ;;  %v1288_v18 = vmul.f32 %v12217_v56, %v12217_v56  ;;  %v9231_v34 = vpop.f32.mrb[7].mxu1 }
 0x2b8   :  { %v1336_v21 = vadd.f32 %v1335_v57, %v1288_v18 }
 0x2bb   :  { %v12222_v62 = vpop.f32.mrb[8].mxu1 }
 0x2bc   :  { %v1234_v23 = vadd.f32 %v1233_v51, %v12222_v62  ;;  %v1289_v44 = vmul.f32 %v12222_v62, %v12222_v62  ;;  %v9234_v24 = vpop.f32.mrb[9].mxu1 }
 0x2bd   :  { %v12227_v60 = vpop.f32.mrb[10].mxu1 }
 0x2be   :  { %v1337_v40 = vadd.f32 %v1336_v21, %v1289_v44  ;;  %v1235_v6 = vadd.f32 %v1234_v23, %v12227_v60  ;;  %v1290_v29 = vmul.f32 %v12227_v60, %v12227_v60  ;;  %v9235_v45 = vpop.f32.mrb[11].mxu1 }
 0x2c0   :  { %v1338_v8 = vadd.f32 %v1337_v40, %v1290_v29 }
 0x2c3   :  { %v12232_v34 = vpop.f32.mrb[12].mxu1 }
 0x2c4   :  { %v1236_v57 = vadd.f32 %v1235_v6, %v12232_v34  ;;  %v1291_v51 = vmul.f32 %v12232_v34, %v12232_v34  ;;  %v9238_v18 = vpop.f32.mrb[13].mxu1 }
 0x2c5   :  { %v12237_v1 = vpop.f32.mrb[14].mxu1 }
 0x2c6   :  { %v1339_v24 = vadd.f32 %v1338_v8, %v1291_v51  ;;  %v1237_v21 = vadd.f32 %v1236_v57, %v12237_v1  ;;  %v1292_v23 = vmul.f32 %v12237_v1, %v12237_v1  ;;  %v9239_v44 = vpop.f32.mrb[15].mxu1 }
 0x2c8   :  { %v1340_v27 = vadd.f32 %v1339_v24, %v1292_v23 }
 0x2cb   :  { %v12242_v45 = vpop.f32.mrb[16].mxu1 }
 0x2cc   :  { %v1238_v40 = vadd.f32 %v1237_v21, %v12242_v45  ;;  %v1293_v6 = vmul.f32 %v12242_v45, %v12242_v45  ;;  %v9242_v29 = vpop.f32.mrb[17].mxu1 }
 0x2cd   :  { %v12247_v63 = vpop.f32.mrb[18].mxu1 }
 0x2ce   :  { %v1341_v18 = vadd.f32 %v1340_v27, %v1293_v6  ;;  %v1239_v8 = vadd.f32 %v1238_v40, %v12247_v63  ;;  %v1294_v57 = vmul.f32 %v12247_v63, %v12247_v63  ;;  %v9243_v51 = vpop.f32.mrb[19].mxu1 }
 0x2d0   :  { %v1342_v41 = vadd.f32 %v1341_v18, %v1294_v57 }
 0x2d3   :  { %v12252_v44 = vpop.f32.mrb[20].mxu1 }
 0x2d4   :  { %v1240_v24 = vadd.f32 %v1239_v8, %v12252_v44  ;;  %v1295_v21 = vmul.f32 %v12252_v44, %v12252_v44  ;;  %v9246_v23 = vpop.f32.mrb[21].mxu1 }
 0x2d5   :  { %v12257_v42 = vpop.f32.mrb[22].mxu1 }
 0x2d6   :  { %v1343_v29 = vadd.f32 %v1342_v41, %v1295_v21  ;;  %v1241_v27 = vadd.f32 %v1240_v24, %v12257_v42  ;;  %v1296_v40 = vmul.f32 %v12257_v42, %v12257_v42  ;;  %v9247_v6 = vpop.f32.mrb[23].mxu1 }
 0x2d8   :  { %v1344_v14 = vadd.f32 %v1343_v29, %v1296_v40 }
 0x2dc   :  { %v12262_v51 = vpop.f32.mrb[24].mxu1 }
 0x2dd   :  { %v1242_v18 = vadd.f32 %v1241_v27, %v12262_v51  ;;  %v1297_v8 = vmul.f32 %v12262_v51, %v12262_v51  ;;  %v9250_v57 = vpop.f32.mrb[25].mxu1 }
 0x2de   :  { %v12267_v35 = vpop.f32.mrb[26].mxu1 }
 0x2df   :  { %v1345_v23 = vadd.f32 %v1344_v14, %v1297_v8  ;;  %v1243_v41 = vadd.f32 %v1242_v18, %v12267_v35  ;;  %v1298_v24 = vmul.f32 %v12267_v35, %v12267_v35  ;;  %v9251_v21 = vpop.f32.mrb[27].mxu1 }
 0x2e1   :  { %v1346_v38 = vadd.f32 %v1345_v23, %v1298_v24 }
 0x2e4   :  { %v12272_v6 = vpop.f32.mrb[28].mxu1 }
 0x2e5   :  { %v1244_v29 = vadd.f32 %v1243_v41, %v12272_v6  ;;  %v1299_v27 = vmul.f32 %v12272_v6, %v12272_v6  ;;  %v9254_v40 = vpop.f32.mrb[29].mxu1 }
 0x2e6   :  { %v12277_v25 = vpop.f32.mrb[30].mxu1 }
 0x2e7   :  { %v1347_v57 = vadd.f32 %v1346_v38, %v1299_v27  ;;  %v1245_v14 = vadd.f32 %v1244_v29, %v12277_v25  ;;  %v1300_v18 = vmul.f32 %v12277_v25, %v12277_v25  ;;  %v9255_v8 = vpop.f32.mrb[31].mxu1 }
 0x2e9   :  { %v1348_v37 = vadd.f32 %v1347_v57, %v1300_v18 }
 0x2ec   :  { %v12282_v21 = vpop.f32.mrb[32].mxu1 }
 0x2ed   :  { %v1246_v23 = vadd.f32 %v1245_v14, %v12282_v21  ;;  %v1301_v41 = vmul.f32 %v12282_v21, %v12282_v21  ;;  %v9258_v24 = vpop.f32.mrb[33].mxu1 }
 0x2ee   :  { %v12287_v5 = vpop.f32.mrb[34].mxu1 }
 0x2ef   :  { %v1349_v40 = vadd.f32 %v1348_v37, %v1301_v41  ;;  %v1247_v38 = vadd.f32 %v1246_v23, %v12287_v5  ;;  %v1302_v29 = vmul.f32 %v12287_v5, %v12287_v5  ;;  %v9259_v27 = vpop.f32.mrb[35].mxu1 }
 0x2f1   :  { %v1350_v55 = vadd.f32 %v1349_v40, %v1302_v29 }
 0x2f4   :  { %v12292_v8 = vpop.f32.mrb[36].mxu1 }
 0x2f5   :  { %v1248_v57 = vadd.f32 %v1247_v38, %v12292_v8  ;;  %v1303_v14 = vmul.f32 %v12292_v8, %v12292_v8  ;;  %v9262_v18 = vpop.f32.mrb[37].mxu1 }
 0x2f6   :  { %v12297_v17 = vpop.f32.mrb[38].mxu1 }
 0x2f7   :  { %v1351_v24 = vadd.f32 %v1350_v55, %v1303_v14  ;;  %v1249_v37 = vadd.f32 %v1248_v57, %v12297_v17  ;;  %v1304_v23 = vmul.f32 %v12297_v17, %v12297_v17  ;;  %v9263_v41 = vpop.f32.mrb[39].mxu1 }
 0x2f9   :  { %v1352_v4 = vadd.f32 %v1351_v24, %v1304_v23 }
 0x2fc   :  { %v12302_v27 = vpop.f32.mrb[40].mxu1 }
 0x2fd   :  { %v1250_v40 = vadd.f32 %v1249_v37, %v12302_v27  ;;  %v1305_v38 = vmul.f32 %v12302_v27, %v12302_v27  ;;  %v9266_v29 = vpop.f32.mrb[41].mxu1 }
 0x2fe   :  { %v12307_v26 = vpop.f32.mrb[42].mxu1 }
 0x2ff   :  { %v1353_v18 = vadd.f32 %v1352_v4, %v1305_v38  ;;  %v1251_v55 = vadd.f32 %v1250_v40, %v12307_v26  ;;  %v1306_v57 = vmul.f32 %v12307_v26, %v12307_v26  ;;  %v9267_v14 = vpop.f32.mrb[43].mxu1 }
 0x301   :  { %v1354_v2 = vadd.f32 %v1353_v18, %v1306_v57 }
 0x304   :  { %v12312_v41 = vpop.f32.mrb[44].mxu1 }
 0x305   :  { %v1252_v24 = vadd.f32 %v1251_v55, %v12312_v41  ;;  %v1307_v37 = vmul.f32 %v12312_v41, %v12312_v41  ;;  %v9270_v23 = vpop.f32.mrb[45].mxu1 }
 0x306   :  { %v12317_v54 = vpop.f32.mrb[46].mxu1 }
 0x307   :  { %v1355_v29 = vadd.f32 %v1354_v2, %v1307_v37  ;;  %v1253_v4 = vadd.f32 %v1252_v24, %v12317_v54  ;;  %v1308_v40 = vmul.f32 %v12317_v54, %v12317_v54  ;;  %v9271_v38 = vpop.f32.mrb[47].mxu1 }
 0x309   :  { %v1356_v11 = vadd.f32 %v1355_v29, %v1308_v40 }
 0x30c   :  { %v12322_v14 = vpop.f32.mrb[48].mxu1 }
 0x30d   :  { %v1254_v18 = vadd.f32 %v1253_v4, %v12322_v14  ;;  %v1309_v55 = vmul.f32 %v12322_v14, %v12322_v14  ;;  %v9274_v57 = vpop.f32.mrb[49].mxu1 }
 0x30e   :  { %v12327_v53 = vpop.f32.mrb[50].mxu1 }
 0x30f   :  { %v1357_v23 = vadd.f32 %v1356_v11, %v1309_v55  ;;  %v1255_v2 = vadd.f32 %v1254_v18, %v12327_v53  ;;  %v1310_v24 = vmul.f32 %v12327_v53, %v12327_v53  ;;  %v9275_v37 = vpop.f32.mrb[51].mxu1 }
 0x311   :  { %v1358_v22 = vadd.f32 %v1357_v23, %v1310_v24 }
 0x314   :  { %v12332_v38 = vpop.f32.mrb[52].mxu1 }
 0x315   :  { %v1256_v29 = vadd.f32 %v1255_v2, %v12332_v38  ;;  %v1311_v4 = vmul.f32 %v12332_v38, %v12332_v38  ;;  %v9278_v40 = vpop.f32.mrb[53].mxu1 }
 0x316   :  { %v12337_v7 = vpop.f32.mrb[54].mxu1 }
 0x317   :  { %v1359_v57 = vadd.f32 %v1358_v22, %v1311_v4  ;;  %v1257_v11 = vadd.f32 %v1256_v29, %v12337_v7  ;;  %v1312_v18 = vmul.f32 %v12337_v7, %v12337_v7  ;;  %v9279_v55 = vpop.f32.mrb[55].mxu1 }
 0x319   :  { %v1360_v49 = vadd.f32 %v1359_v57, %v1312_v18 }
 0x31c   :  { %v12342_v37 = vpop.f32.mrb[56].mxu1 }
 0x31d   :  { %v1258_v23 = vadd.f32 %v1257_v11, %v12342_v37  ;;  %v1313_v2 = vmul.f32 %v12342_v37, %v12342_v37  ;;  %v9282_v24 = vpop.f32.mrb[57].mxu1 }
 0x31e   :  { %v12347_v32 = vpop.f32.mrb[58].mxu1 }
 0x31f   :  { %v1361_v40 = vadd.f32 %v1360_v49, %v1313_v2  ;;  %v1259_v22 = vadd.f32 %v1258_v23, %v12347_v32  ;;  %v1314_v29 = vmul.f32 %v12347_v32, %v12347_v32  ;;  %v9283_v4 = vpop.f32.mrb[59].mxu1 }
 0x321   :  { %v1362_v13 = vadd.f32 %v1361_v40, %v1314_v29 }
 0x324   :  { %v12352_v55 = vpop.f32.mrb[60].mxu1 }
 0x325   :  { %v1260_v57 = vadd.f32 %v1259_v22, %v12352_v55  ;;  %v1315_v11 = vmul.f32 %v12352_v55, %v12352_v55  ;;  %v9286_v18 = vpop.f32.mrb[61].mxu1 }
 0x326   :  { %v12357_v0 = vpop.f32.mrb[62].mxu1 }
 0x327   :  { %v1363_v24 = vadd.f32 %v1362_v13, %v1315_v11  ;;  %v1261_v49 = vadd.f32 %v1260_v57, %v12357_v0  ;;  %v1316_v23 = vmul.f32 %v12357_v0, %v12357_v0  ;;  %v9287_v2 = vpop.f32.mrb[63].mxu1 }
 0x329   :  { %v1364_v47 = vadd.f32 %v1363_v24, %v1316_v23 }
 0x32c   :  { %v12362_v4 = vpop.f32.mrb[64].mxu1 }
 0x32d   :  { %v1262_v40 = vadd.f32 %v1261_v49, %v12362_v4  ;;  %v1317_v22 = vmul.f32 %v12362_v4, %v12362_v4  ;;  %v9290_v29 = vpop.f32.mrb[65].mxu1 }
 0x32e   :  { %v12367_v36 = vpop.f32.mrb[66].mxu1 }
 0x32f   :  { %v1365_v18 = vadd.f32 %v1364_v47, %v1317_v22  ;;  %v1263_v13 = vadd.f32 %v1262_v40, %v12367_v36  ;;  %v1318_v57 = vmul.f32 %v12367_v36, %v12367_v36  ;;  %v9291_v11 = vpop.f32.mrb[67].mxu1 }
 0x331   :  { %v1366_v20 = vadd.f32 %v1365_v18, %v1318_v57 }
 0x334   :  { %v12372_v2 = vpop.f32.mrb[68].mxu1 }
 0x335   :  { %v1264_v24 = vadd.f32 %v1263_v13, %v12372_v2  ;;  %v1319_v49 = vmul.f32 %v12372_v2, %v12372_v2  ;;  %v9294_v23 = vpop.f32.mrb[69].mxu1 }
 0x336   :  { %v12377_v10 = vpop.f32.mrb[70].mxu1 }
 0x337   :  { %v1367_v29 = vadd.f32 %v1366_v20, %v1319_v49  ;;  %v1265_v47 = vadd.f32 %v1264_v24, %v12377_v10  ;;  %v1320_v40 = vmul.f32 %v12377_v10, %v12377_v10  ;;  %v9295_v22 = vpop.f32.mrb[71].mxu1 }
 0x339   :  { %v1368_v61 = vadd.f32 %v1367_v29, %v1320_v40 }
 0x33c   :  { %v12382_v11 = vpop.f32.mrb[72].mxu1 }
 0x33d   :  { %v1266_v18 = vadd.f32 %v1265_v47, %v12382_v11  ;;  %v1321_v13 = vmul.f32 %v12382_v11, %v12382_v11  ;;  %v9298_v57 = vpop.f32.mrb[73].mxu1 }
 0x33e   :  { %v12387_v52 = vpop.f32.mrb[74].mxu1 }
 0x33f   :  { %v1369_v23 = vadd.f32 %v1368_v61, %v1321_v13  ;;  %v1267_v20 = vadd.f32 %v1266_v18, %v12387_v52  ;;  %v1322_v24 = vmul.f32 %v12387_v52, %v12387_v52  ;;  %v9299_v49 = vpop.f32.mrb[75].mxu1 }
 0x341   :  { %v1370_v39 = vadd.f32 %v1369_v23, %v1322_v24 }
 0x344   :  { %v12392_v22 = vpop.f32.mrb[76].mxu1 }
 0x345   :  { %v1268_v29 = vadd.f32 %v1267_v20, %v12392_v22  ;;  %v1323_v47 = vmul.f32 %v12392_v22, %v12392_v22  ;;  %v9302_v40 = vpop.f32.mrb[77].mxu1 }
 0x346   :  { %v12397_v31 = vpop.f32.mrb[78].mxu1 }
 0x347   :  { %v1371_v57 = vadd.f32 %v1370_v39, %v1323_v47  ;;  %v1269_v61 = vadd.f32 %v1268_v29, %v12397_v31  ;;  %v1324_v18 = vmul.f32 %v12397_v31, %v12397_v31  ;;  %v9303_v13 = vpop.f32.mrb[79].mxu1 }
 0x349   :  { %v1372_v19 = vadd.f32 %v1371_v57, %v1324_v18 }
 0x34c   :  { %v12402_v49 = vpop.f32.mrb[80].mxu1 }
 0x34d   :  { %16779 = vst [vmem:[#allocation44_spill] sm:$0xff] %v12402_v49  ;;  %v1270_v23 = vadd.f32 %v1269_v61, %v12402_v49  ;;  %v1325_v20 = vmul.f32 %v12402_v49, %v12402_v49  ;;  %v9306_v24 = vpop.f32.mrb[81].mxu1 }
 0x34e   :  { %v12407_v12 = vpop.f32.mrb[82].mxu1 }
 0x34f   :  { %16780 = vst [vmem:[#allocation46_spill] sm:$0xff] %v12407_v12  ;;  %v1373_v40 = vadd.f32 %v1372_v19, %v1325_v20  ;;  %v1271_v39 = vadd.f32 %v1270_v23, %v12407_v12  ;;  %v1326_v29 = vmul.f32 %v12407_v12, %v12407_v12  ;;  %v9307_v47 = vpop.f32.mrb[83].mxu1 }
 0x351   :  { %v1374_v3 = vadd.f32 %v1373_v40, %v1326_v29 }
 0x354   :  { %v12412_v13 = vpop.f32.mrb[84].mxu1 }
 0x355   :  { %16781 = vst [vmem:[#allocation48_spill] sm:$0xff] %v12412_v13  ;;  %v1272_v57 = vadd.f32 %v1271_v39, %v12412_v13  ;;  %v1327_v61 = vmul.f32 %v12412_v13, %v12412_v13  ;;  %v9310_v18 = vpop.f32.mrb[85].mxu1 }
 0x356   :  { %v12417_v59 = vpop.f32.mrb[86].mxu1 }
 0x357   :  { %16782 = vst [vmem:[#allocation50_spill] sm:$0xff] %v12417_v59  ;;  %v1375_v24 = vadd.f32 %v1374_v3, %v1327_v61  ;;  %v1273_v19 = vadd.f32 %v1272_v57, %v12417_v59  ;;  %v1328_v23 = vmul.f32 %v12417_v59, %v12417_v59  ;;  %v9311_v20 = vpop.f32.mrb[87].mxu1 }
 0x359   :  { %v1376_v50 = vadd.f32 %v1375_v24, %v1328_v23 }
 0x35c   :  { %v12422_v47 = vpop.f32.mrb[88].mxu1 }
 0x35d   :  { %16783 = vst [vmem:[#allocation71_spill] sm:$0xff] %v12422_v47  ;;  %v1274_v40 = vadd.f32 %v1273_v19, %v12422_v47  ;;  %v1329_v39 = vmul.f32 %v12422_v47, %v12422_v47  ;;  %v9314_v29 = vpop.f32.mrb[89].mxu1 }
 0x35e   :  { %v12427_v43 = vpop.f32.mrb[90].mxu1 }
 0x35f   :  { %16784 = vst [vmem:[#allocation72_spill] sm:$0xff] %v12427_v43  ;;  %v1377_v18 = vadd.f32 %v1376_v50, %v1329_v39  ;;  %v1275_v3 = vadd.f32 %v1274_v40, %v12427_v43  ;;  %v1330_v57 = vmul.f32 %v12427_v43, %v12427_v43  ;;  %v9315_v61 = vpop.f32.mrb[91].mxu1 }
 0x361   :  { %v1378_v30 = vadd.f32 %v1377_v18, %v1330_v57 }
 0x364   :  { %v12432_v20 = vpop.f32.mrb[92].mxu1 }
 0x365   :  { %16785 = vst [vmem:[#allocation73_spill] sm:$0xff] %v12432_v20  ;;  %v1276_v24 = vadd.f32 %v1275_v3, %v12432_v20  ;;  %v1331_v19 = vmul.f32 %v12432_v20, %v12432_v20  ;;  %v9318_v23 = vpop.f32.mrb[93].mxu1 }
 0x366   :  { %v12437_v16 = vpop.f32.mrb[94].mxu1 }
 0x367   :  { %16786 = vst [vmem:[#allocation74_spill] sm:$0xff] %v12437_v16  ;;  %v1379_v29 = vadd.f32 %v1378_v30, %v1331_v19  ;;  %v1277_v50 = vadd.f32 %v1276_v24, %v12437_v16  ;;  %v1332_v40 = vmul.f32 %v12437_v16, %v12437_v16  ;;  %v9319_v39 = vpop.f32.mrb[95].mxu1 }
 0x369   :  { %v1380_v33 = vadd.f32 %v1379_v29, %v1332_v40 }
 0x36c   :  { %v1223_v61 = vpop.f32.mrb[96].mxu1 }
 0x36d   :  { %v1278_v18 = vadd.f32 %v1277_v50, %v1223_v61  ;;  %v1333_v57 = vmul.f32 %v1223_v61, %v1223_v61  ;;  %v9322_v15 = vpop.f32.mrb[97].mxu1 }
 0x36e   :  { %v1226_v9 = vpop.f32.mrb[98].mxu1 }
 0x36f   :  { %v1279_v3 = vrot.slane %v1278_v18, 4  ;;  %v1381_v58 = vadd.f32 %v1380_v33, %v1333_v57  ;;  %v9323_v43 = vpop.f32.mrb[99].mxu1  ;;  %v10316_v33 = vld [vmem:[%s16414_s4 + $0x4] ss:$16 sps:$4 sm:$0xff]  }
 0x370   :  { %3577 = vmatprep.mubr.bf16.mxu0 %v10316_v33  ;;  %v16791_v33 = vld [vmem:[#allocation48_spill] sm:$0xff] }
 0x371   :  { %v1280_v20 = vadd.f32 %v1279_v3, %v1278_v18  ;;  %v1382_v23 = vrot.slane %v1381_v58, 4 }
 0x373   :  { %v1281_v47 = vrot.slane %v1280_v20, 2  ;;  %v1383_v59 = vadd.f32 %v1382_v23, %v1381_v58  ;;  %v1229_v58 = vld [vmem:[%s16413_s3 + $0x2] sm:$0x1] }
 0x375   :  { %v1282_v30 = vadd.f32 %v1281_v47, %v1280_v20  ;;  %v1384_v19 = vrot.slane %v1383_v59, 2 }
 0x377   :  { %v1283_v24 = vrot.slane %v1282_v30, 1  ;;  %v1385_v13 = vadd.f32 %v1384_v19, %v1383_v59 }
 0x379   :  { %v1284_v12 = vadd.f32 %v1283_v24, %v1282_v30  ;;  %v1386_v16 = vrot.slane %v1385_v13, 1 }
 0x37b   :  { %v1387_v39 = vadd.f32 %v1386_v16, %v1385_v13  ;;  %v1388_v29 = vmul.f32 0.0025510204, %v1284_v12  ;;  %v1230_v16 = vld [vmem:[%s16413_s3 + $0x3] sm:$0x1]  ;;  %v16787_v13 = vld [vmem:[#allocation70_spill] sm:$0xff] }
 0x37d   :  { %v1389_v40 = vmul.f32 0.0025510204, %v1387_v39  ;;  %v1390_v50 = vmul.f32 %v1388_v29, %v1388_v29 }
 0x37f   :  { %v1391_v49 = vsub.f32 %v1389_v40, %v1390_v50 }
 0x381   :  { %v1392_v15 = vmax.f32 %v1391_v49, 0.0 }
 0x383   :  { %v1393_v9 = vadd.f32 1e-05, %v1392_v15  ;;  %v16789_v15 = vld [vmem:[#allocation44_spill] sm:$0xff] }
 0x385   :  { %10784 = vrsqrt.f32 %v1393_v9  ;;  %v16790_v9 = vld [vmem:[#allocation46_spill] sm:$0xff] }
 0x38f   :  { %v10785_v43 = vpop.eup %10784 }
 0x390   :  { %v1395_v59 = vmul.f32 %v10785_v43, %v1229_v58  ;;  %v16792_v58 = vld [vmem:[#allocation50_spill] sm:$0xff]  ;;  %v16793_v43 = vld [vmem:[#allocation71_spill] sm:$0xff] }
 0x392   :  { %v1396_v12 = vmul.f32 %v1395_v59, %v1388_v29  ;;  %v1401_v49 = vrot.slane %v1395_v59, %v16787_v13  ;;  %v16794_v59 = vld [vmem:[#allocation72_spill] sm:$0xff] }
 0x394   :  { %v1397_v47 = vsub.f32 %v1230_v16, %v1396_v12  ;;  %v1450_v20 = vmul.f32 %v1401_v49, %v1223_v61  ;;  %v1402_v18 = vmul.f32 %v1401_v49, %v12202_v48  ;;  %v1403_v57 = vmul.f32 %v1401_v49, %v12204_v28  ;;  %v16795_v16 = vld [vmem:[#allocation73_spill] sm:$0xff]  ;;  %v16796_v12 = vld [vmem:[#allocation74_spill] sm:$0xff] }
 0x395   :  { %v1404_v3 = vmul.f32 %v1401_v49, %v12212_v46  ;;  %v1405_v23 = vmul.f32 %v1401_v49, %v12217_v56  ;;  %v1406_v30 = vmul.f32 %v1401_v49, %v12222_v62  ;;  %v1407_v19 = vmul.f32 %v1401_v49, %v12227_v60 }
 0x396   :  { %v12459_v24 = vrot.slane %v1397_v47, %v16787_v13  ;;  %v1408_v39 = vmul.f32 %v1401_v49, %v12232_v34  ;;  %v1409_v29 = vmul.f32 %v1401_v49, %v12237_v1  ;;  %v1410_v61 = vmul.f32 %v1401_v49, %v12242_v45 }
 0x397   :  { %v1411_v48 = vmul.f32 %v1401_v49, %v12247_v63  ;;  %v1412_v28 = vmul.f32 %v1401_v49, %v12252_v44  ;;  %v1413_v46 = vmul.f32 %v1401_v49, %v12257_v42  ;;  %v1414_v56 = vmul.f32 %v1401_v49, %v12262_v51 }
 0x398   :  { %v12469_v62 = vadd.f32 %v12459_v24, %v1450_v20  ;;  %v1415_v60 = vmul.f32 %v1401_v49, %v12267_v35  ;;  %v1416_v40 = vmul.f32 %v1401_v49, %v12272_v6  ;;  %v1417_v34 = vmul.f32 %v1401_v49, %v12277_v25 }
 0x399   :  { %v1418_v1 = vmul.f32 %v1401_v49, %v12282_v21  ;;  %v1419_v45 = vmul.f32 %v1401_v49, %v12287_v5  ;;  %v1420_v63 = vmul.f32 %v1401_v49, %v12292_v8  ;;  %v1421_v44 = vmul.f32 %v1401_v49, %v12297_v17 }
 0x39a   :  { %16788 = vst [vmem:[#allocation60_spill] sm:$0xff] %v12469_v62  ;;  %v1422_v42 = vmul.f32 %v1401_v49, %v12302_v27  ;;  %v1423_v51 = vmul.f32 %v1401_v49, %v12307_v26  ;;  %v1424_v50 = vmul.f32 %v1401_v49, %v12312_v41  ;;  %v1425_v35 = vmul.f32 %v1401_v49, %v12317_v54 }
 0x39b   :  { %v1426_v6 = vmul.f32 %v1401_v49, %v12322_v14  ;;  %v1427_v25 = vmul.f32 %v1401_v49, %v12327_v53  ;;  %v1428_v21 = vmul.f32 %v1401_v49, %v12332_v38  ;;  %v1429_v5 = vmul.f32 %v1401_v49, %v12337_v7 }
 0x39c   :  { %v1430_v8 = vmul.f32 %v1401_v49, %v12342_v37  ;;  %v1431_v17 = vmul.f32 %v1401_v49, %v12347_v32  ;;  %v1432_v27 = vmul.f32 %v1401_v49, %v12352_v55  ;;  %v1433_v26 = vmul.f32 %v1401_v49, %v12357_v0 }
 0x39d   :  { %v1434_v41 = vmul.f32 %v1401_v49, %v12362_v4  ;;  %v1435_v54 = vmul.f32 %v1401_v49, %v12367_v36  ;;  %v1436_v14 = vmul.f32 %v1401_v49, %v12372_v2  ;;  %v1437_v53 = vmul.f32 %v1401_v49, %v12377_v10 }
 0x39e   :  { %v1438_v38 = vmul.f32 %v1401_v49, %v12382_v11  ;;  %v1439_v7 = vmul.f32 %v1401_v49, %v12387_v52  ;;  %v1440_v37 = vmul.f32 %v1401_v49, %v12392_v22  ;;  %v1441_v32 = vmul.f32 %v1401_v49, %v12397_v31 }
 0x39f   :  { %v1442_v55 = vmul.f32 %v1401_v49, %v16789_v15  ;;  %v1443_v0 = vmul.f32 %v1401_v49, %v16790_v9  ;;  %v1444_v4 = vmul.f32 %v1401_v49, %v16791_v33  ;;  %v1445_v36 = vmul.f32 %v1401_v49, %v16792_v58 }
 0x3a0   :  { %v1446_v2 = vmul.f32 %v1401_v49, %v16793_v43  ;;  %v1447_v10 = vmul.f32 %v1401_v49, %v16794_v59  ;;  %v1448_v11 = vmul.f32 %v1401_v49, %v16795_v16  ;;  %v1449_v52 = vmul.f32 %v1401_v49, %v16796_v12  ;;  %v16797_v59 = vld [vmem:[#allocation12_spill] sm:$0xff] }
 0x3a1   :  { %v12507_v22 = vadd.f32 %v12459_v24, %v1402_v18  ;;  %v12510_v31 = vadd.f32 %v12459_v24, %v1403_v57  ;;  %v12513_v47 = vadd.f32 %v12459_v24, %v1404_v3  ;;  %v12516_v20 = vadd.f32 %v12459_v24, %v1405_v23 }
 0x3a2   :  { %v12519_v15 = vadd.f32 %v12459_v24, %v1406_v30  ;;  %v12522_v9 = vadd.f32 %v12459_v24, %v1407_v19  ;;  %v12525_v49 = vadd.f32 %v12459_v24, %v1408_v39  ;;  %v12528_v18 = vadd.f32 %v12459_v24, %v1409_v29 }
 0x3a3   :  { %v1463_v57 = vadd.f32 %v12459_v24, %v1410_v61  ;;  %v1464_v3 = vadd.f32 %v12459_v24, %v1411_v48  ;;  %v1465_v33 = vadd.f32 %v12459_v24, %v1412_v28  ;;  %v1466_v23 = vadd.f32 %v12459_v24, %v1413_v46 }
 0x3a4   :  { %v1467_v30 = vadd.f32 %v12459_v24, %v1414_v56  ;;  %v1468_v58 = vadd.f32 %v12459_v24, %v1415_v60  ;;  %v1469_v19 = vadd.f32 %v12459_v24, %v1416_v40  ;;  %v1470_v39 = vadd.f32 %v12459_v24, %v1417_v34 }
 0x3a5   :  { %v1471_v43 = vadd.f32 %v12459_v24, %v1418_v1  ;;  %v1472_v29 = vadd.f32 %v12459_v24, %v1419_v45  ;;  %v1473_v61 = vadd.f32 %v12459_v24, %v1420_v63  ;;  %v1474_v48 = vadd.f32 %v12459_v24, %v1421_v44 }
 0x3a6   :  { %v1475_v28 = vadd.f32 %v12459_v24, %v1422_v42  ;;  %v1476_v46 = vadd.f32 %v12459_v24, %v1423_v51  ;;  %v1477_v56 = vadd.f32 %v12459_v24, %v1424_v50  ;;  %v1478_v60 = vadd.f32 %v12459_v24, %v1425_v35 }
 0x3a7   :  { %v1479_v40 = vadd.f32 %v12459_v24, %v1426_v6  ;;  %v1480_v34 = vadd.f32 %v12459_v24, %v1427_v25  ;;  %v1481_v1 = vadd.f32 %v12459_v24, %v1428_v21  ;;  %v1482_v45 = vadd.f32 %v12459_v24, %v1429_v5 }
 0x3a8   :  { %v1483_v63 = vadd.f32 %v12459_v24, %v1430_v8  ;;  %v1484_v44 = vadd.f32 %v12459_v24, %v1431_v17  ;;  %v1485_v42 = vadd.f32 %v12459_v24, %v1432_v27  ;;  %v1486_v51 = vadd.f32 %v12459_v24, %v1433_v26 }
 0x3a9   :  { %v1487_v50 = vadd.f32 %v12459_v24, %v1434_v41  ;;  %v1488_v35 = vadd.f32 %v12459_v24, %v1435_v54  ;;  %v1489_v6 = vadd.f32 %v12459_v24, %v1436_v14  ;;  %v1490_v25 = vadd.f32 %v12459_v24, %v1437_v53 }
 0x3aa   :  { %v1491_v21 = vadd.f32 %v12459_v24, %v1438_v38  ;;  %v1492_v5 = vadd.f32 %v12459_v24, %v1439_v7  ;;  %v1493_v8 = vadd.f32 %v12459_v24, %v1440_v37  ;;  %v1494_v17 = vadd.f32 %v12459_v24, %v1441_v32  ;;  %v16798_v32 = vld [vmem:[#allocation13_spill] sm:$0xff] }
 0x3ab   :  { %v1495_v27 = vadd.f32 %v12459_v24, %v1442_v55  ;;  %v1496_v26 = vadd.f32 %v12459_v24, %v1443_v0  ;;  %v1497_v41 = vadd.f32 %v12459_v24, %v1444_v4  ;;  %v1498_v54 = vadd.f32 %v12459_v24, %v1445_v36  ;;  %v16799_v55 = vld [vmem:[#allocation14_spill] sm:$0xff]  ;;  %v16800_v4 = vld [vmem:[#allocation15_spill] sm:$0xff]  ;;  %v16801_v36 = vld [vmem:[#allocation16_spill] sm:$0xff] }
 0x3ac   :  { %v1499_v14 = vadd.f32 %v12459_v24, %v1446_v2  ;;  %v1500_v53 = vadd.f32 %v12459_v24, %v1447_v10  ;;  %v1501_v38 = vadd.f32 %v12459_v24, %v1448_v11  ;;  %v1502_v7 = vadd.f32 %v12459_v24, %v1449_v52  ;;  %v16802_v10 = vld [vmem:[#allocation17_spill] sm:$0xff]  ;;  %v16803_v11 = vld [vmem:[#allocation18_spill] sm:$0xff]  ;;  %v16804_v52 = vld [vmem:[#allocation19_spill] sm:$0xff] }
 0x3ad   :  { %v12571_v37 = vadd.f32 %v16797_v59, %v1463_v57  ;;  %v12574_v16 = vadd.f32 %v16798_v32, %v1464_v3  ;;  %v12577_v0 = vadd.f32 %v16799_v55, %v1465_v33  ;;  %v12580_v12 = vadd.f32 %v16800_v4, %v1466_v23  ;;  %v16805_v3 = vld [vmem:[#allocation20_spill] sm:$0xff]  ;;  %v16806_v33 = vld [vmem:[#allocation21_spill] sm:$0xff]  ;;  %v16807_v23 = vld [vmem:[#allocation22_spill] sm:$0xff] }
 0x3ae   :  { %v12583_v2 = vadd.f32 %v16801_v36, %v1467_v30  ;;  %v12586_v13 = vadd.f32 %v16802_v10, %v1468_v58  ;;  %v12589_v24 = vadd.f32 %v16803_v11, %v1469_v19  ;;  %v12592_v57 = vadd.f32 %v16804_v52, %v1470_v39  ;;  %v16808_v30 = vld [vmem:[#allocation23_spill] sm:$0xff]  ;;  %v16809_v58 = vld [vmem:[#allocation24_spill] sm:$0xff]  ;;  %v16810_v19 = vld [vmem:[#allocation25_spill] sm:$0xff] }
 0x3af   :  { %v12595_v59 = vadd.f32 %v16805_v3, %v1471_v43  ;;  %v12598_v32 = vadd.f32 %v16806_v33, %v1472_v29  ;;  %v12601_v55 = vadd.f32 %v16807_v23, %v1473_v61  ;;  %v12604_v4 = vadd.f32 %v16808_v30, %v1474_v48  ;;  %v16811_v39 = vld [vmem:[#allocation26_spill] sm:$0xff]  ;;  %v16812_v43 = vld [vmem:[#allocation27_spill] sm:$0xff]  ;;  %v16813_v29 = vld [vmem:[#allocation28_spill] sm:$0xff] }
 0x3b0   :  { %v12607_v36 = vadd.f32 %v16809_v58, %v1475_v28  ;;  %v12610_v10 = vadd.f32 %v16810_v19, %v1476_v46  ;;  %v12613_v11 = vadd.f32 %v16811_v39, %v1477_v56  ;;  %v12616_v52 = vadd.f32 %v16812_v43, %v1478_v60  ;;  %v16814_v61 = vld [vmem:[#allocation29_spill] sm:$0xff]  ;;  %v16815_v48 = vld [vmem:[#allocation30_spill] sm:$0xff]  ;;  %v16816_v28 = vld [vmem:[#allocation31_spill] sm:$0xff] }
 0x3b1   :  { %v12619_v3 = vadd.f32 %v16813_v29, %v1479_v40  ;;  %v12622_v33 = vadd.f32 %v16814_v61, %v1480_v34  ;;  %v12625_v23 = vadd.f32 %v16815_v48, %v1481_v1  ;;  %v12628_v30 = vadd.f32 %v16816_v28, %v1482_v45  ;;  %v16817_v46 = vld [vmem:[#allocation32_spill] sm:$0xff]  ;;  %v16818_v56 = vld [vmem:[#allocation33_spill] sm:$0xff]  ;;  %v16819_v60 = vld [vmem:[#allocation34_spill] sm:$0xff] }
 0x3b2   :  { %v12631_v58 = vadd.f32 %v16817_v46, %v1483_v63  ;;  %v12634_v19 = vadd.f32 %v16818_v56, %v1484_v44  ;;  %v12637_v39 = vadd.f32 %v16819_v60, %v1485_v42  ;;  %v16820_v40 = vld [vmem:[#allocation35_spill] sm:$0xff]  ;;  %v16821_v34 = vld [vmem:[#allocation36_spill] sm:$0xff]  ;;  %v16822_v1 = vld [vmem:[#allocation37_spill] sm:$0xff] }
 0x3b3   :  { %v12640_v43 = vadd.f32 %v16820_v40, %v1486_v51  ;;  %v12643_v29 = vadd.f32 %v16821_v34, %v1487_v50  ;;  %v12646_v61 = vadd.f32 %v16822_v1, %v1488_v35  ;;  %v16823_v45 = vld [vmem:[#allocation38_spill] sm:$0xff]  ;;  %v16824_v63 = vld [vmem:[#allocation39_spill] sm:$0xff]  ;;  %v16825_v44 = vld [vmem:[#allocation41_spill] sm:$0xff] }
 0x3b4   :  { %v12649_v48 = vadd.f32 %v16823_v45, %v1489_v6  ;;  %v12652_v28 = vadd.f32 %v16824_v63, %v1490_v25  ;;  %v12655_v46 = vadd.f32 %v16825_v44, %v1491_v21  ;;  %v16826_v42 = vld [vmem:[#allocation43_spill] sm:$0xff]  ;;  %v16827_v51 = vld [vmem:[#allocation45_spill] sm:$0xff] }
 0x3b5   :  { %v12658_v56 = vadd.f32 %v16826_v42, %v1492_v5  ;;  %v12661_v60 = vadd.f32 %v16827_v51, %v1493_v8  ;;  %v16828_v50 = vld [vmem:[#allocation47_spill] sm:$0xff]  ;;  %v16829_v35 = vld [vmem:[#allocation49_spill] sm:$0xff] }
 0x3b6   :  { %v12664_v40 = vadd.f32 %v16828_v50, %v1494_v17  ;;  %v12667_v34 = vadd.f32 %v16829_v35, %v1495_v27  ;;  %v16830_v6 = vld [vmem:[#allocation51_spill] sm:$0xff]  ;;  %v16831_v25 = vld [vmem:[#allocation53_spill] sm:$0xff]  ;;  %v1838_v35 = vmax.f32 %v12577_v0, 0.0  ;;  %v1848_v0 = vmax.f32 %v12607_v36, 0.0 }
 0x3b7   :  { %v12670_v1 = vadd.f32 %v16830_v6, %v1496_v26  ;;  %v12673_v45 = vadd.f32 %v16831_v25, %v1497_v41  ;;  %v16832_v21 = vld [vmem:[#allocation55_spill] sm:$0xff]  ;;  %v16833_v5 = vld [vmem:[#allocation57_spill] sm:$0xff]  ;;  %v1836_v26 = vmax.f32 %v12571_v37, 0.0  ;;  %v1837_v41 = vmax.f32 %v12574_v16, 0.0 }
 0x3b8   :  { %v12676_v63 = vadd.f32 %v16832_v21, %v1498_v54  ;;  %v12679_v44 = vadd.f32 %v16833_v5, %v1499_v14  ;;  %v16834_v8 = vld [vmem:[#allocation59_spill] sm:$0xff]  ;;  %v16835_v17 = vld [vmem:[#allocation61_spill] sm:$0xff]  ;;  %v1839_v54 = vmax.f32 %v12580_v12, 0.0  ;;  %v1840_v14 = vmax.f32 %v12583_v2, 0.0 }
 0x3b9   :  { %v12682_v42 = vadd.f32 %v16834_v8, %v1500_v53  ;;  %v12685_v51 = vadd.f32 %v16835_v17, %v1501_v38  ;;  %v16836_v27 = vld [vmem:[#allocation63_spill] sm:$0xff]  ;;  %v1841_v6 = vmax.f32 %v12586_v13, 0.0  ;;  %v1842_v53 = vmax.f32 %v12589_v24, 0.0  ;;  %v16844_v17 = vld [vmem:[#allocation56_spill] sm:$0xff] }
 0x3ba   :  { %v12688_v50 = vadd.f32 %v16836_v27, %v1502_v7  ;;  %v1843_v38 = vmax.f32 %v12592_v57, 0.0  ;;  %v1844_v25 = vmax.f32 %v12595_v59, 0.0  ;;  %v1845_v7 = vmax.f32 %v12598_v32, 0.0 }
 0x3bb   :  { %v1846_v37 = vmax.f32 %v12601_v55, 0.0  ;;  %v1847_v16 = vmax.f32 %v12604_v4, 0.0  ;;  %v1849_v12 = vmax.f32 %v12610_v10, 0.0  ;;  %v1850_v2 = vmax.f32 %v12613_v11, 0.0 }
 0x3bc   :  { %16837 = vst [vmem:[#allocation62_spill] sm:$0xff] %v12688_v50  ;;  %v1851_v13 = vmax.f32 %v12616_v52, 0.0  ;;  %v1852_v24 = vmax.f32 %v12619_v3, 0.0  ;;  %v1853_v57 = vmax.f32 %v12622_v33, 0.0  ;;  %v1854_v59 = vmax.f32 %v12625_v23, 0.0 }
 0x3bd   :  { %v1855_v32 = vmax.f32 %v12628_v30, 0.0  ;;  %v1856_v55 = vmax.f32 %v12631_v58, 0.0  ;;  %v1857_v4 = vmax.f32 %v12634_v19, 0.0  ;;  %v1858_v36 = vmax.f32 %v12637_v39, 0.0 }
 0x3be   :  { %v1859_v10 = vmax.f32 %v12640_v43, 0.0  ;;  %v1860_v11 = vmax.f32 %v12643_v29, 0.0  ;;  %v1861_v52 = vmax.f32 %v12646_v61, 0.0  ;;  %v1862_v3 = vmax.f32 %v12649_v48, 0.0 }
 0x3bf   :  { %v1863_v33 = vmax.f32 %v12652_v28, 0.0  ;;  %v1864_v23 = vmax.f32 %v12655_v46, 0.0  ;;  %v1865_v30 = vmax.f32 %v12658_v56, 0.0  ;;  %v1866_v58 = vmax.f32 %v12661_v60, 0.0  ;;  %v16838_v56 = vld [vmem:[#allocation65_spill] sm:$0xff]  ;;  %v16839_v60 = vld [vmem:[#allocation67_spill] sm:$0xff] }
 0x3c0   :  { %v1867_v19 = vmax.f32 %v12664_v40, 0.0  ;;  %v1868_v39 = vmax.f32 %v12667_v34, 0.0  ;;  %v1869_v43 = vmax.f32 %v12670_v1, 0.0  ;;  %v1870_v29 = vmax.f32 %v12673_v45, 0.0  ;;  %v16840_v34 = vld [vmem:[#allocation40_spill] sm:$0xff]  ;;  %v16841_v1 = vld [vmem:[#allocation42_spill] sm:$0xff] }
 0x3c1   :  { %v1871_v61 = vmax.f32 %v12676_v63, 0.0  ;;  %v1872_v48 = vmax.f32 %v12679_v44, 0.0  ;;  %v1873_v28 = vmax.f32 %v12682_v42, 0.0  ;;  %v1874_v46 = vmax.f32 %v12685_v51, 0.0  ;;  %v16842_v63 = vld [vmem:[#allocation52_spill] sm:$0xff]  ;;  %v16843_v44 = vld [vmem:[#allocation54_spill] sm:$0xff] }
 0x3c2   :  { %v1779_v21 = vadd.f32 %v16838_v56, %v12507_v22  ;;  %v1780_v40 = vadd.f32 %v16839_v60, %v12510_v31  ;;  %v1781_v5 = vadd.f32 %v16840_v34, %v12513_v47  ;;  %v1782_v45 = vadd.f32 %v16841_v1, %v12516_v20  ;;  %v16845_v22 = vld [vmem:[#allocation58_spill] sm:$0xff] }
 0x3c3   :  { %v1783_v8 = vadd.f32 %v16842_v63, %v12519_v15  ;;  %v1784_v42 = vadd.f32 %v16843_v44, %v12522_v9  ;;  %v1785_v51 = vadd.f32 %v16844_v17, %v12525_v49  ;;  %v1786_v27 = vadd.f32 %v16845_v22, %v12528_v18  ;;  %v16846_v22 = vld [vmem:[#allocation62_spill] sm:$0xff] }
 0x3c4   :  { %v1828_v56 = vmax.f32 %v1779_v21, 0.0  ;;  %v1829_v31 = vmax.f32 %v1780_v40, 0.0  ;;  %v1830_v60 = vmax.f32 %v1781_v5, 0.0  ;;  %v1831_v62 = vmax.f32 %v1782_v45, 0.0 }
 0x3c5   :  { %v1832_v47 = vmax.f32 %v1783_v8, 0.0  ;;  %v1833_v34 = vmax.f32 %v1784_v42, 0.0  ;;  %v1834_v50 = vmax.f32 %v1785_v51, 0.0  ;;  %v1835_v20 = vmax.f32 %v1786_v27, 0.0  ;;  %v10350_v27 = vld [vmem:[%s16414_s4 + $0x184] ss:$16 sps:$4 sm:$0xff]  }
 0x3c6   :  { %v2129_v1 = vpack.c.bf16 %v1829_v31, %v1828_v56  ;;  %v2130_v15 = vpack.c.bf16 %v1831_v62, %v1830_v60  ;;  %v2133_v63 = vpack.c.bf16 %v1837_v41, %v1836_v26  ;;  %v2134_v9 = vpack.c.bf16 %v1839_v54, %v1838_v35  ;;  %v10352_v56 = vld [vmem:[%s16414_s4 + $0x180] ss:$16 sps:$4 sm:$0xff]   ;;  %v10353_v31 = vld [vmem:[%s16414_s4 + $0x1a4] ss:$16 sps:$4 sm:$0xff]  }
 0x3c7   :  { %v2131_v44 = vpack.c.bf16 %v1833_v34, %v1832_v47  ;;  %v2132_v17 = vpack.c.bf16 %v1835_v20, %v1834_v50  ;;  %v2135_v49 = vpack.c.bf16 %v1841_v6, %v1840_v14  ;;  %v2136_v18 = vpack.c.bf16 %v1843_v38, %v1842_v53  ;;  %v10355_v60 = vld [vmem:[%s16414_s4 + $0x1a0] ss:$16 sps:$4 sm:$0xff]   ;;  %v10356_v47 = vld [vmem:[%s16414_s4 + $0x1c4] ss:$16 sps:$4 sm:$0xff]  }
 0x3c8   :  { %v1875_v21 = vmax.f32 %v16846_v22, 0.0  ;;  %3546 = vmatpush1.bf16.msra.mxu0 %v2129_v1  ;;  %9824 = vmatpush1.bf16.msra.mxu1 %v2129_v1  ;;  %v2137_v40 = vpack.c.bf16 %v1845_v7, %v1844_v25  ;;  %v2138_v5 = vpack.c.bf16 %v1847_v16, %v1846_v37  ;;  %v2139_v45 = vpack.c.bf16 %v1849_v12, %v1848_v0  ;;  %v16848_v7 = vld [vmem:[#allocation60_spill] sm:$0xff]  ;;  %v16849_v37 = vld [vmem:[#allocation75_spill] sm:$0xff] }
 0x3c9   :  { %v16847_v8 = vmov 0   ;;  %v2140_v42 = vpack.c.bf16 %v1851_v13, %v1850_v2  ;;  %v2141_v51 = vpack.c.bf16 %v1853_v57, %v1852_v24  ;;  %v2142_v62 = vpack.c.bf16 %v1855_v32, %v1854_v59  ;;  %v10314_v0 = vld [vmem:[%s16414_s4] ss:$16 sps:$4 sm:$0xff]   ;;  %v10317_v12 = vld [vmem:[%s16414_s4 + $0x24] ss:$16 sps:$4 sm:$0xff]  }
 0x3ca   :  { %3547 = vmatprep.subr.bf16.mxu0 %v16847_v8  ;;  %9809 = vmatprep.subr.bf16.mxu1 %v16847_v8  ;;  %v12748_v26 = vpack.c.bf16 %v1857_v4, %v1856_v55  ;;  %v12750_v41 = vpack.c.bf16 %v1859_v10, %v1858_v36  ;;  %v12752_v50 = vpack.c.bf16 %v1861_v52, %v1860_v11  ;;  %v16850_v2 = vmov 0.0   ;;  %v10319_v13 = vld [vmem:[%s16414_s4 + $0x20] ss:$16 sps:$4 sm:$0xff]   ;;  %v10320_v24 = vld [vmem:[%s16414_s4 + $0x44] ss:$16 sps:$4 sm:$0xff]  }
 0x3cb   :  { %v12754_v35 = vpack.c.bf16 %v1863_v33, %v1862_v3  ;;  %v12756_v54 = vpack.c.bf16 %v1865_v30, %v1864_v23  ;;  %v12758_v14 = vpack.c.bf16 %v1867_v19, %v1866_v58  ;;  %v12760_v6 = vpack.c.bf16 %v1869_v43, %v1868_v39  ;;  %v10322_v57 = vld [vmem:[%s16414_s4 + $0x40] ss:$16 sps:$4 sm:$0xff]   ;;  %v10323_v59 = vld [vmem:[%s16414_s4 + $0x64] ss:$16 sps:$4 sm:$0xff]  }
 0x3cc   :  { %v12762_v53 = vpack.c.bf16 %v1871_v61, %v1870_v29  ;;  %3548 = vmatpush1.bf16.msra.mxu0 %v2130_v15  ;;  %9825 = vmatpush1.bf16.msra.mxu1 %v2130_v15  ;;  %v12764_v38 = vpack.c.bf16 %v1873_v28, %v1872_v48  ;;  %v12766_v25 = vpack.c.bf16 %v1875_v21, %v1874_v46  ;;  %v10325_v32 = vld [vmem:[%s16414_s4 + $0x60] ss:$16 sps:$4 sm:$0xff]   ;;  %v10326_v55 = vld [vmem:[%s16414_s4 + $0x84] ss:$16 sps:$4 sm:$0xff]  }
 0x3cd   :  { %v12770_v16 = vadd.f32 %v16849_v37, %v16848_v7  ;;  %3549 = vmatprep.subr.bf16.mxu0 %v16847_v8  ;;  %9810 = vmatprep.subr.bf16.mxu1 %v16847_v8  ;;  %v10328_v36 = vld [vmem:[%s16414_s4 + $0x80] ss:$16 sps:$4 sm:$0xff]   ;;  %v10329_v11 = vld [vmem:[%s16414_s4 + $0xa4] ss:$16 sps:$4 sm:$0xff]  }
 0x3ce   :  { %v10331_v3 = vld [vmem:[%s16414_s4 + $0xa0] ss:$16 sps:$4 sm:$0xff]   ;;  %v10332_v33 = vld [vmem:[%s16414_s4 + $0xc4] ss:$16 sps:$4 sm:$0xff]  }
 0x3cf   :  { %v1876_v4 = vmax.f32 %v12770_v16, 0.0  ;;  %v10334_v23 = vld [vmem:[%s16414_s4 + $0xc0] ss:$16 sps:$4 sm:$0xff]   ;;  %v10335_v30 = vld [vmem:[%s16414_s4 + $0xe4] ss:$16 sps:$4 sm:$0xff]  }
 0x3d0   :  { %3550 = vmatpush1.bf16.msra.mxu0 %v2131_v44  ;;  %9826 = vmatpush1.bf16.msra.mxu1 %v2131_v44  ;;  %v10337_v58 = vld [vmem:[%s16414_s4 + $0xe0] ss:$16 sps:$4 sm:$0xff]   ;;  %v10338_v19 = vld [vmem:[%s16414_s4 + $0x104] ss:$16 sps:$4 sm:$0xff]  }
 0x3d1   :  { %3551 = vmatprep.subr.bf16.mxu0 %v16847_v8  ;;  %9811 = vmatprep.subr.bf16.mxu1 %v16847_v8  ;;  %v2153_v10 = vpack.c.bf16 %v1876_v4, %v1876_v4  ;;  %v10340_v39 = vld [vmem:[%s16414_s4 + $0x100] ss:$16 sps:$4 sm:$0xff]   ;;  %v10341_v43 = vld [vmem:[%s16414_s4 + $0x124] ss:$16 sps:$4 sm:$0xff]  }
 0x3d2   :  { %v10343_v29 = vld [vmem:[%s16414_s4 + $0x120] ss:$16 sps:$4 sm:$0xff]   ;;  %v10344_v61 = vld [vmem:[%s16414_s4 + $0x144] ss:$16 sps:$4 sm:$0xff]  }
 0x3d3   :  { %v3543_v52 = vsel %vm3541_vm2, %v2153_v10, 0  ;;  %v10346_v48 = vld [vmem:[%s16414_s4 + $0x140] ss:$16 sps:$4 sm:$0xff]   ;;  %v10347_v28 = vld [vmem:[%s16414_s4 + $0x164] ss:$16 sps:$4 sm:$0xff]  }
 0x3d4   :  { %3552 = vmatpush1.bf16.msra.mxu0 %v2132_v17  ;;  %9827 = vmatpush1.bf16.msra.mxu1 %v2132_v17  ;;  %v10349_v46 = vld [vmem:[%s16414_s4 + $0x160] ss:$16 sps:$4 sm:$0xff]   ;;  %v10359_v20 = vld [vmem:[%s16414_s4 + $0x1e4] ss:$16 sps:$4 sm:$0xff]  }
 0x3d5   :  { %3553 = vmatprep.subr.bf16.mxu0 %v16847_v8  ;;  %9812 = vmatprep.subr.bf16.mxu1 %v16847_v8  ;;  %v10358_v34 = vld [vmem:[%s16414_s4 + $0x1c0] ss:$16 sps:$4 sm:$0xff]   ;;  %v10362_v15 = vld [vmem:[%s16414_s4 + $0x204] ss:$16 sps:$4 sm:$0xff]  }
 0x3d6   :  { %v10361_v1 = vld [vmem:[%s16414_s4 + $0x1e0] ss:$16 sps:$4 sm:$0xff]   ;;  %v10368_v17 = vld [vmem:[%s16414_s4 + $0x244] ss:$16 sps:$4 sm:$0xff]  }
 0x3d7   :  { %v10367_v44 = vld [vmem:[%s16414_s4 + $0x220] ss:$16 sps:$4 sm:$0xff]   ;;  %v10374_v21 = vld [vmem:[%s16414_s4 + $0x284] ss:$16 sps:$4 sm:$0xff]  }
 0x3d8   :  { %3554 = vmatpush1.bf16.msra.mxu0 %v2133_v63  ;;  %9828 = vmatpush1.bf16.msra.mxu1 %v2133_v63  ;;  %v10364_v63 = vld [vmem:[%s16414_s4 + $0x200] ss:$16 sps:$4 sm:$0xff]   ;;  %v10401_v7 = vld [vmem:[%s16414_s4 + $0x3a4] ss:$16 sps:$4 sm:$0xff]  }
 0x3d9   :  { %3555 = vmatprep.subr.bf16.mxu0 %v16847_v8  ;;  %9813 = vmatprep.subr.bf16.mxu1 %v16847_v8  ;;  %v10373_v22 = vld [vmem:[%s16414_s4 + $0x260] ss:$16 sps:$4 sm:$0xff]   ;;  %v10404_v16 = vld [vmem:[%s16414_s4 + $0x3c4] ss:$16 sps:$4 sm:$0xff]  }
 0x3da   :  { %v10403_v37 = vld [vmem:[%s16414_s4 + $0x3a0] ss:$16 sps:$4 sm:$0xff]  }
 0x3db   :  { %v10418_v4 = vld [vmem:[%s16414_s4 + $0x440] ss:$16 sps:$4 sm:$0xff]  }
 0x3dc   :  { %3556 = vmatpush1.bf16.msra.mxu0 %v2134_v9  ;;  %9829 = vmatpush1.bf16.msra.mxu1 %v2134_v9  ;;  %v10365_v9 = vld [vmem:[%s16414_s4 + $0x224] ss:$16 sps:$4 sm:$0xff]   ;;  %v10421_v10 = vld [vmem:[%s16414_s4 + $0x460] ss:$16 sps:$4 sm:$0xff]  }
 0x3dd   :  { %3557 = vmatprep.subr.bf16.mxu0 %v16847_v8  ;;  %9814 = vmatprep.subr.bf16.mxu1 %v16847_v8 }
 0x3e0   :  { %3558 = vmatpush1.bf16.msra.mxu0 %v2135_v49  ;;  %9830 = vmatpush1.bf16.msra.mxu1 %v2135_v49  ;;  %v10370_v49 = vld [vmem:[%s16414_s4 + $0x240] ss:$16 sps:$4 sm:$0xff]  }
 0x3e1   :  { %3559 = vmatprep.subr.bf16.mxu0 %v16847_v8  ;;  %9815 = vmatprep.subr.bf16.mxu1 %v16847_v8 }
 0x3e4   :  { %3560 = vmatpush1.bf16.msra.mxu0 %v2136_v18  ;;  %9831 = vmatpush1.bf16.msra.mxu1 %v2136_v18  ;;  %v10371_v18 = vld [vmem:[%s16414_s4 + $0x264] ss:$16 sps:$4 sm:$0xff]  }
 0x3e5   :  { %3561 = vmatprep.subr.bf16.mxu0 %v16847_v8  ;;  %9816 = vmatprep.subr.bf16.mxu1 %v16847_v8 }
 0x3e8   :  { %3562 = vmatpush1.bf16.msra.mxu0 %v2137_v40  ;;  %9832 = vmatpush1.bf16.msra.mxu1 %v2137_v40  ;;  %v10376_v40 = vld [vmem:[%s16414_s4 + $0x280] ss:$16 sps:$4 sm:$0xff]  }
 0x3e9   :  { %3563 = vmatprep.subr.bf16.mxu0 %v16847_v8  ;;  %9817 = vmatprep.subr.bf16.mxu1 %v16847_v8 }
 0x3ec   :  { %3564 = vmatpush1.bf16.msra.mxu0 %v2138_v5  ;;  %9833 = vmatpush1.bf16.msra.mxu1 %v2138_v5  ;;  %v10377_v5 = vld [vmem:[%s16414_s4 + $0x2a4] ss:$16 sps:$4 sm:$0xff]  }
 0x3ed   :  { %3565 = vmatprep.subr.bf16.mxu0 %v16847_v8  ;;  %9818 = vmatprep.subr.bf16.mxu1 %v16847_v8 }
 0x3f0   :  { %3566 = vmatpush1.bf16.msra.mxu0 %v2139_v45  ;;  %9834 = vmatpush1.bf16.msra.mxu1 %v2139_v45  ;;  %v10379_v45 = vld [vmem:[%s16414_s4 + $0x2a0] ss:$16 sps:$4 sm:$0xff]  }
 0x3f1   :  { %3567 = vmatprep.subr.bf16.mxu0 %v16847_v8  ;;  %9819 = vmatprep.subr.bf16.mxu1 %v16847_v8 }
 0x3f4   :  { %3568 = vmatpush1.bf16.msra.mxu0 %v2140_v42  ;;  %9835 = vmatpush1.bf16.msra.mxu1 %v2140_v42  ;;  %v10382_v42 = vld [vmem:[%s16414_s4 + $0x2c0] ss:$16 sps:$4 sm:$0xff]  }
 0x3f5   :  { %3569 = vmatprep.subr.bf16.mxu0 %v16847_v8  ;;  %9820 = vmatprep.subr.bf16.mxu1 %v16847_v8 }
 0x3f8   :  { %3570 = vmatpush1.bf16.msra.mxu0 %v2141_v51  ;;  %9836 = vmatpush1.bf16.msra.mxu1 %v2141_v51  ;;  %v10383_v51 = vld [vmem:[%s16414_s4 + $0x2e4] ss:$16 sps:$4 sm:$0xff]  }
 0x3f9   :  { %3571 = vmatprep.subr.bf16.mxu0 %v16847_v8  ;;  %9821 = vmatprep.subr.bf16.mxu1 %v16847_v8 }
 0x3fc   :  { %3572 = vmatpush1.bf16.msra.mxu0 %v2142_v62  ;;  %9837 = vmatpush1.bf16.msra.mxu1 %v2142_v62  ;;  %v10385_v62 = vld [vmem:[%s16414_s4 + $0x2e0] ss:$16 sps:$4 sm:$0xff]  }
 0x3fd   :  { %3573 = vmatprep.subr.bf16.mxu0 %v16847_v8  ;;  %9822 = vmatprep.subr.bf16.mxu1 %v16847_v8 }
 0x400   :  { %3574 = vmatpush1.bf16.msra.mxu0 %v12748_v26  ;;  %9838 = vmatpush1.bf16.msra.mxu1 %v12748_v26  ;;  %v10386_v26 = vld [vmem:[%s16414_s4 + $0x304] ss:$16 sps:$4 sm:$0xff]  }
 0x401   :  { %3575 = vmatprep.subr.bf16.mxu0 %v16847_v8  ;;  %9823 = vmatprep.subr.bf16.mxu1 %v16847_v8 }
 0x404   :  { %3576 = vmatpush1.bf16.msra.mxu0 %v12750_v41  ;;  %9839 = vmatpush1.bf16.msra.mxu1 %v12750_v41  ;;  %v10388_v41 = vld [vmem:[%s16414_s4 + $0x300] ss:$16 sps:$4 sm:$0xff]  }
 0x405   :  { %4082 = vmatprep.subr.bf16.mxu0 %v16847_v8  ;;  %9324 = vmatprep.subr.bf16.mxu1 %v16850_v2 }
 0x407   :  { %3578 = vmatmul.mubr.bf16.vlgmr.msra.gmra.mrb[100].mxu0 %v10314_v0  ;;  %v10406_v0 = vld [vmem:[%s16414_s4 + $0x3c0] ss:$16 sps:$4 sm:$0xff]  }
 0x408   :  { %4083 = vmatpush1.bf16.msra.mxu0 %v12752_v50  ;;  %3585 = vmatprep.mubr.bf16.mxu0 %v10317_v12  ;;  %v10389_v50 = vld [vmem:[%s16414_s4 + $0x324] ss:$16 sps:$4 sm:$0xff]  }
 0x409   :  { %4084 = vmatprep.subr.bf16.mxu0 %v16847_v8  ;;  %v10407_v12 = vld [vmem:[%s16414_s4 + $0x3e4] ss:$16 sps:$4 sm:$0xff]  }
 0x40c   :  { %4085 = vmatpush1.bf16.msra.mxu0 %v12754_v35  ;;  %v10391_v35 = vld [vmem:[%s16414_s4 + $0x320] ss:$16 sps:$4 sm:$0xff]  }
 0x40d   :  { %4086 = vmatprep.subr.bf16.mxu0 %v16847_v8 }
 0x40f   :  { %3586 = vmatmul.mubr.bf16.gmra.mrb[104].mxu0 %v10319_v13  ;;  %v10409_v13 = vld [vmem:[%s16414_s4 + $0x3e0] ss:$16 sps:$4 sm:$0xff]  }
 0x410   :  { %4087 = vmatpush1.bf16.msra.mxu0 %v12756_v54  ;;  %3593 = vmatprep.mubr.bf16.mxu0 %v10320_v24  ;;  %v10392_v54 = vld [vmem:[%s16414_s4 + $0x344] ss:$16 sps:$4 sm:$0xff]  }
 0x411   :  { %4088 = vmatprep.subr.bf16.mxu0 %v16847_v8  ;;  %v10410_v24 = vld [vmem:[%s16414_s4 + $0x404] ss:$16 sps:$4 sm:$0xff]  }
 0x414   :  { %4089 = vmatpush1.bf16.msra.mxu0 %v12758_v14  ;;  %v10394_v14 = vld [vmem:[%s16414_s4 + $0x340] ss:$16 sps:$4 sm:$0xff]  }
 0x415   :  { %4090 = vmatprep.subr.bf16.mxu0 %v16847_v8 }
 0x417   :  { %3594 = vmatmul.mubr.bf16.gmra.mrb[108].mxu0 %v10322_v57  ;;  %v10412_v57 = vld [vmem:[%s16414_s4 + $0x400] ss:$16 sps:$4 sm:$0xff]  }
 0x418   :  { %4091 = vmatpush1.bf16.msra.mxu0 %v12760_v6  ;;  %3601 = vmatprep.mubr.bf16.mxu0 %v10323_v59  ;;  %v10395_v6 = vld [vmem:[%s16414_s4 + $0x364] ss:$16 sps:$4 sm:$0xff]  }
 0x419   :  { %4092 = vmatprep.subr.bf16.mxu0 %v16847_v8  ;;  %v10413_v59 = vld [vmem:[%s16414_s4 + $0x424] ss:$16 sps:$4 sm:$0xff]  }
 0x41c   :  { %4093 = vmatpush1.bf16.msra.mxu0 %v12762_v53  ;;  %v10397_v53 = vld [vmem:[%s16414_s4 + $0x360] ss:$16 sps:$4 sm:$0xff]  }
 0x41d   :  { %4094 = vmatprep.subr.bf16.mxu0 %v16847_v8 }
 0x41f   :  { %3602 = vmatmul.mubr.bf16.gmra.mrb[112].mxu0 %v10325_v32  ;;  %v10415_v32 = vld [vmem:[%s16414_s4 + $0x420] ss:$16 sps:$4 sm:$0xff]  }
 0x420   :  { %4095 = vmatpush1.bf16.msra.mxu0 %v12764_v38  ;;  %3609 = vmatprep.mubr.bf16.mxu0 %v10326_v55  ;;  %v10398_v38 = vld [vmem:[%s16414_s4 + $0x384] ss:$16 sps:$4 sm:$0xff]  }
 0x421   :  { %4096 = vmatprep.subr.bf16.mxu0 %v16847_v8  ;;  %v10416_v55 = vld [vmem:[%s16414_s4 + $0x444] ss:$16 sps:$4 sm:$0xff]  }
 0x424   :  { %4097 = vmatpush1.bf16.msra.mxu0 %v12766_v25  ;;  %v10400_v25 = vld [vmem:[%s16414_s4 + $0x380] ss:$16 sps:$4 sm:$0xff]  }
 0x425   :  { %4098 = vmatprep.subr.bf16.mxu0 %v16847_v8  ;;  %v10380_v8 = vld [vmem:[%s16414_s4 + $0x2c4] ss:$16 sps:$4 sm:$0xff]  }
 0x427   :  { %3610 = vmatmul.mubr.bf16.gmra.mrb[116].mxu0 %v10328_v36  ;;  %v10419_v36 = vld [vmem:[%s16414_s4 + $0x464] ss:$16 sps:$4 sm:$0xff]  }
 0x428   :  { %4099 = vmatpush1.bf16.msra.mxu0 %v3543_v52  ;;  %3617 = vmatprep.mubr.bf16.mxu0 %v10329_v11  ;;  %v10422_v11 = vld [vmem:[%s16414_s4 + $0x484] ss:$16 sps:$4 sm:$0xff]   ;;  %v10424_v52 = vld [vmem:[%s16414_s4 + $0x480] ss:$16 sps:$4 sm:$0xff]  }
 0x42f   :  { %3618 = vmatmul.mubr.bf16.gmra.mrb[120].mxu0 %v10331_v3  ;;  %v10425_v3 = vld [vmem:[%s16414_s4 + $0x4a4] ss:$16 sps:$4 sm:$0xff]  }
 0x430   :  { %3625 = vmatprep.mubr.bf16.mxu0 %v10332_v33  ;;  %v10473_v33 = vld [vmem:[%s16414_s4 + $0x520] ss:$16 sps:$4 sm:$0xff]  }
 0x437   :  { %3626 = vmatmul.mubr.bf16.gmra.mrb[124].mxu0 %v10334_v23  ;;  %v10475_v23 = vld [vmem:[%s16414_s4 + $0x524] ss:$16 sps:$4 sm:$0xff]  }
 0x438   :  { %3633 = vmatprep.mubr.bf16.mxu0 %v10335_v30  ;;  %3905 = vmatprep.mubr.bf16.mxu1 %v10475_v23  ;;  %v10427_v30 = vld [vmem:[%s16414_s4 + $0x4a0] ss:$16 sps:$4 sm:$0xff]   ;;  %v10478_v23 = vld [vmem:[%s16414_s4 + $0x188] ss:$16 sps:$4 sm:$0xff]  }
 0x439   :  { %3906 = vmatmul.mubr.bf16.vlgmr.msra.gmra.mrb[100].mxu1 %v10473_v33  ;;  %v10567_v33 = vld [vmem:[%s16414_s4 + $0x700] ss:$16 sps:$4 sm:$0xff]  }
 0x43f   :  { %3634 = vmatmul.mubr.bf16.gmra.mrb[128].mxu0 %v10337_v58  ;;  %v10428_v58 = vld [vmem:[%s16414_s4 + $0x4c4] ss:$16 sps:$4 sm:$0xff]  }
 0x440   :  { %3641 = vmatprep.mubr.bf16.mxu0 %v10338_v19  ;;  %v10479_v19 = vld [vmem:[%s16414_s4 + $0x544] ss:$16 sps:$4 sm:$0xff]  }
 0x441   :  { %3913 = vmatprep.mubr.bf16.mxu1 %v10479_v19  ;;  %v10573_v19 = vld [vmem:[%s16414_s4 + $0x720] ss:$16 sps:$4 sm:$0xff]  }
 0x447   :  { %3642 = vmatmul.mubr.bf16.gmra.mrb[132].mxu0 %v10340_v39  ;;  %v10483_v39 = vld [vmem:[%s16414_s4 + $0x540] ss:$16 sps:$4 sm:$0xff]  }
 0x448   :  { %3649 = vmatprep.mubr.bf16.mxu0 %v10341_v43  ;;  %3914 = vmatmul.mubr.bf16.gmra.mrb[104].mxu1 %v10483_v39  ;;  %v10430_v43 = vld [vmem:[%s16414_s4 + $0x4c0] ss:$16 sps:$4 sm:$0xff]   ;;  %v10484_v39 = vld [vmem:[%s16414_s4 + $0x1a8] ss:$16 sps:$4 sm:$0xff]  }
 0x44f   :  { %3650 = vmatmul.mubr.bf16.gmra.mrb[136].mxu0 %v10343_v29  ;;  %v10433_v29 = vld [vmem:[%s16414_s4 + $0x4e4] ss:$16 sps:$4 sm:$0xff]  }
 0x450   :  { %3657 = vmatprep.mubr.bf16.mxu0 %v10344_v61  ;;  %v10485_v61 = vld [vmem:[%s16414_s4 + $0x564] ss:$16 sps:$4 sm:$0xff]  }
 0x451   :  { %3921 = vmatprep.mubr.bf16.mxu1 %v10485_v61  ;;  %v10579_v61 = vld [vmem:[%s16414_s4 + $0x740] ss:$16 sps:$4 sm:$0xff]  }
 0x457   :  { %3658 = vmatmul.mubr.bf16.gmra.mrb[140].mxu0 %v10346_v48  ;;  %v10489_v48 = vld [vmem:[%s16414_s4 + $0x560] ss:$16 sps:$4 sm:$0xff]  }
 0x458   :  { %3665 = vmatprep.mubr.bf16.mxu0 %v10347_v28  ;;  %3922 = vmatmul.mubr.bf16.gmra.mrb[108].mxu1 %v10489_v48  ;;  %v10431_v28 = vld [vmem:[%s16414_s4 + $0x4e0] ss:$16 sps:$4 sm:$0xff]  }
 0x459   :  { %v10581_v48 = vld [vmem:[%s16415_s5 + $0x40] sm:$0xff]  }
 0x45a   :  { %9325 = vmatpush3.bf16.msra.mxu1 %v10581_v48 }
 0x45b   :  { %9326 = vmatprep.subr.bf16.mxu1 %v16850_v2 }
 0x45f   :  { %3666 = vmatmul.mubr.bf16.gmra.mrb[144].mxu0 %v10349_v46  ;;  %v10436_v46 = vld [vmem:[%s16414_s4 + $0x504] ss:$16 sps:$4 sm:$0xff]  }
 0x460   :  { %3673 = vmatprep.mubr.bf16.mxu0 %v10350_v27  ;;  %v10491_v27 = vld [vmem:[%s16414_s4 + $0x584] ss:$16 sps:$4 sm:$0xff]  }
 0x461   :  { %3929 = vmatprep.mubr.bf16.mxu1 %v10491_v27  ;;  %v10582_v27 = vld [vmem:[%s16414_s4 + $0x764] ss:$16 sps:$4 sm:$0xff]  }
 0x467   :  { %3674 = vmatmul.mubr.bf16.gmra.mrb[148].mxu0 %v10352_v56  ;;  %v10495_v56 = vld [vmem:[%s16414_s4 + $0x580] ss:$16 sps:$4 sm:$0xff]  }
 0x468   :  { %3681 = vmatprep.mubr.bf16.mxu0 %v10353_v31  ;;  %3930 = vmatmul.mubr.bf16.gmra.mrb[112].mxu1 %v10495_v56  ;;  %v10434_v31 = vld [vmem:[%s16414_s4 + $0x500] ss:$16 sps:$4 sm:$0xff]  }
 0x469   :  { %v10586_v56 = vld [vmem:[%s16414_s4 + $0x760] ss:$16 sps:$4 sm:$0xff]  }
 0x46f   :  { %3682 = vmatmul.mubr.bf16.gmra.mrb[152].mxu0 %v10355_v60  ;;  %v10439_v60 = vld [vmem:[%s16414_s4 + $0xc] ss:$16 sps:$4 sm:$0xff]  }
 0x470   :  { %3689 = vmatprep.mubr.bf16.mxu0 %v10356_v47  ;;  %v10497_v47 = vld [vmem:[%s16414_s4 + $0x5a4] ss:$16 sps:$4 sm:$0xff]  }
 0x471   :  { %3937 = vmatprep.mubr.bf16.mxu1 %v10497_v47  ;;  %v10588_v47 = vld [vmem:[%s16415_s5 + $0x48] sm:$0xff]  }
 0x472   :  { %9327 = vmatpush3.bf16.msra.mxu1 %v10588_v47 }
 0x473   :  { %9328 = vmatprep.subr.bf16.mxu1 %v16850_v2 }
 0x477   :  { %3690 = vmatmul.mubr.bf16.gmra.mrb[156].mxu0 %v10358_v34  ;;  %v10501_v34 = vld [vmem:[%s16414_s4 + $0x5a0] ss:$16 sps:$4 sm:$0xff]  }
 0x478   :  { %3697 = vmatprep.mubr.bf16.mxu0 %v10359_v20  ;;  %3938 = vmatmul.mubr.bf16.gmra.mrb[116].mxu1 %v10501_v34  ;;  %v10437_v20 = vld [vmem:[%s16414_s4 + $0x8] ss:$16 sps:$4 sm:$0xff]   ;;  %v10589_v34 = vld [vmem:[%s16414_s4 + $0x784] ss:$16 sps:$4 sm:$0xff]  }
 0x47f   :  { %3698 = vmatmul.mubr.bf16.gmra.mrb[160].mxu0 %v10361_v1  ;;  %v10440_v1 = vld [vmem:[%s16414_s4 + $0x2c] ss:$16 sps:$4 sm:$0xff]  }
 0x480   :  { %3705 = vmatprep.mubr.bf16.mxu0 %v10362_v15  ;;  %v10503_v15 = vld [vmem:[%s16414_s4 + $0x5c4] ss:$16 sps:$4 sm:$0xff]  }
 0x481   :  { %3945 = vmatprep.mubr.bf16.mxu1 %v10503_v15  ;;  %v10502_v15 = vld [vmem:[%s16414_s4 + $0x208] ss:$16 sps:$4 sm:$0xff]  }
 0x487   :  { %3706 = vmatmul.mubr.bf16.gmra.mrb[164].mxu0 %v10364_v63  ;;  %v10507_v63 = vld [vmem:[%s16414_s4 + $0x5c0] ss:$16 sps:$4 sm:$0xff]  }
 0x488   :  { %3713 = vmatprep.mubr.bf16.mxu0 %v10365_v9  ;;  %3946 = vmatmul.mubr.bf16.gmra.mrb[120].mxu1 %v10507_v63  ;;  %v10442_v9 = vld [vmem:[%s16414_s4 + $0x28] ss:$16 sps:$4 sm:$0xff]   ;;  %v10505_v63 = vld [vmem:[%s16414_s4 + $0x22c] ss:$16 sps:$4 sm:$0xff]  }
 0x48f   :  { %3714 = vmatmul.mubr.bf16.gmra.mrb[168].mxu0 %v10367_v44  ;;  %v10443_v44 = vld [vmem:[%s16414_s4 + $0x4c] ss:$16 sps:$4 sm:$0xff]  }
 0x490   :  { %3721 = vmatprep.mubr.bf16.mxu0 %v10368_v17  ;;  %v10509_v17 = vld [vmem:[%s16414_s4 + $0x5e4] ss:$16 sps:$4 sm:$0xff]  }
 0x491   :  { %3953 = vmatprep.mubr.bf16.mxu1 %v10509_v17  ;;  %v10601_v17 = vld [vmem:[%s16414_s4 + $0x7a0] ss:$16 sps:$4 sm:$0xff]  }
 0x497   :  { %3722 = vmatmul.mubr.bf16.gmra.mrb[172].mxu0 %v10370_v49  ;;  %v10513_v49 = vld [vmem:[%s16414_s4 + $0x5e0] ss:$16 sps:$4 sm:$0xff]  }
 0x498   :  { %3729 = vmatprep.mubr.bf16.mxu0 %v10371_v18  ;;  %3954 = vmatmul.mubr.bf16.gmra.mrb[124].mxu1 %v10513_v49  ;;  %v10445_v18 = vld [vmem:[%s16414_s4 + $0x48] ss:$16 sps:$4 sm:$0xff]   ;;  %v10603_v49 = vld [vmem:[%s16415_s5 + $0x60] sm:$0xff]  }
 0x49f   :  { %3730 = vmatmul.mubr.bf16.gmra.mrb[176].mxu0 %v10373_v22  ;;  %v10446_v22 = vld [vmem:[%s16414_s4 + $0x6c] ss:$16 sps:$4 sm:$0xff]  }
 0x4a0   :  { %3737 = vmatprep.mubr.bf16.mxu0 %v10374_v21  ;;  %v10515_v21 = vld [vmem:[%s16414_s4 + $0x604] ss:$16 sps:$4 sm:$0xff]  }
 0x4a1   :  { %3961 = vmatprep.mubr.bf16.mxu1 %v10515_v21  ;;  %v10604_v21 = vld [vmem:[%s16415_s5 + $0x68] sm:$0xff]  }
 0x4a7   :  { %3738 = vmatmul.mubr.bf16.gmra.mrb[180].mxu0 %v10376_v40  ;;  %v10519_v40 = vld [vmem:[%s16414_s4 + $0x600] ss:$16 sps:$4 sm:$0xff]  }
 0x4a8   :  { %3745 = vmatprep.mubr.bf16.mxu0 %v10377_v5  ;;  %3962 = vmatmul.mubr.bf16.gmra.mrb[128].mxu1 %v10519_v40  ;;  %v10448_v5 = vld [vmem:[%s16414_s4 + $0x68] ss:$16 sps:$4 sm:$0xff]   ;;  %v10605_v40 = vld [vmem:[%s16414_s4 + $0x7c4] ss:$16 sps:$4 sm:$0xff]  }
 0x4af   :  { %3746 = vmatmul.mubr.bf16.gmra.mrb[184].mxu0 %v10379_v45  ;;  %v10449_v45 = vld [vmem:[%s16414_s4 + $0x8c] ss:$16 sps:$4 sm:$0xff]  }
 0x4b0   :  { %3753 = vmatprep.mubr.bf16.mxu0 %v10380_v8  ;;  %v10521_v8 = vld [vmem:[%s16414_s4 + $0x624] ss:$16 sps:$4 sm:$0xff]  }
 0x4b1   :  { %3969 = vmatprep.mubr.bf16.mxu1 %v10521_v8  ;;  %v10514_v8 = vld [vmem:[%s16414_s4 + $0x248] ss:$16 sps:$4 sm:$0xff]  }
 0x4b7   :  { %3754 = vmatmul.mubr.bf16.gmra.mrb[188].mxu0 %v10382_v42  ;;  %v10525_v42 = vld [vmem:[%s16414_s4 + $0x620] ss:$16 sps:$4 sm:$0xff]  }
 0x4b8   :  { %3761 = vmatprep.mubr.bf16.mxu0 %v10383_v51  ;;  %3970 = vmatmul.mubr.bf16.gmra.mrb[132].mxu1 %v10525_v42  ;;  %v10451_v51 = vld [vmem:[%s16414_s4 + $0x88] ss:$16 sps:$4 sm:$0xff]   ;;  %v10517_v42 = vld [vmem:[%s16414_s4 + $0x26c] ss:$16 sps:$4 sm:$0xff]  }
 0x4bf   :  { %3762 = vmatmul.mubr.bf16.gmra.mrb[192].mxu0 %v10385_v62  ;;  %v10452_v62 = vld [vmem:[%s16414_s4 + $0xac] ss:$16 sps:$4 sm:$0xff]  }
 0x4c0   :  { %3769 = vmatprep.mubr.bf16.mxu0 %v10386_v26  ;;  %v10527_v26 = vld [vmem:[%s16414_s4 + $0x644] ss:$16 sps:$4 sm:$0xff]  }
 0x4c1   :  { %3977 = vmatprep.mubr.bf16.mxu1 %v10527_v26  ;;  %v10523_v26 = vld [vmem:[%s16414_s4 + $0x28c] ss:$16 sps:$4 sm:$0xff]  }
 0x4c7   :  { %3770 = vmatmul.mubr.bf16.gmra.mrb[196].mxu0 %v10388_v41  ;;  %v10531_v41 = vld [vmem:[%s16414_s4 + $0x640] ss:$16 sps:$4 sm:$0xff]  }
 0x4c8   :  { %3777 = vmatprep.mubr.bf16.mxu0 %v10389_v50  ;;  %3978 = vmatmul.mubr.bf16.gmra.mrb[136].mxu1 %v10531_v41  ;;  %v10454_v50 = vld [vmem:[%s16414_s4 + $0xa8] ss:$16 sps:$4 sm:$0xff]  }
 0x4c9   :  { %v10526_v41 = vld [vmem:[%s16414_s4 + $0x288] ss:$16 sps:$4 sm:$0xff]  }
 0x4cf   :  { %3778 = vmatmul.mubr.bf16.gmra.mrb[200].mxu0 %v10391_v35  ;;  %v10455_v35 = vld [vmem:[%s16414_s4 + $0xcc] ss:$16 sps:$4 sm:$0xff]  }
 0x4d0   :  { %3785 = vmatprep.mubr.bf16.mxu0 %v10392_v54  ;;  %v10533_v54 = vld [vmem:[%s16414_s4 + $0x664] ss:$16 sps:$4 sm:$0xff]  }
 0x4d1   :  { %3985 = vmatprep.mubr.bf16.mxu1 %v10533_v54  ;;  %v10535_v54 = vld [vmem:[%s16414_s4 + $0x2cc] ss:$16 sps:$4 sm:$0xff]  }
 0x4d7   :  { %3786 = vmatmul.mubr.bf16.gmra.mrb[204].mxu0 %v10394_v14  ;;  %v10537_v14 = vld [vmem:[%s16414_s4 + $0x660] ss:$16 sps:$4 sm:$0xff]  }
 0x4d8   :  { %3793 = vmatprep.mubr.bf16.mxu0 %v10395_v6  ;;  %3986 = vmatmul.mubr.bf16.gmra.mrb[140].mxu1 %v10537_v14  ;;  %v10457_v6 = vld [vmem:[%s16414_s4 + $0xc8] ss:$16 sps:$4 sm:$0xff]  }
 0x4d9   :  { %v10538_v14 = vld [vmem:[%s16414_s4 + $0x2c8] ss:$16 sps:$4 sm:$0xff]  }
 0x4df   :  { %3794 = vmatmul.mubr.bf16.gmra.mrb[208].mxu0 %v10397_v53  ;;  %v10458_v53 = vld [vmem:[%s16414_s4 + $0xec] ss:$16 sps:$4 sm:$0xff]  }
 0x4e0   :  { %3801 = vmatprep.mubr.bf16.mxu0 %v10398_v38  ;;  %v10539_v38 = vld [vmem:[%s16414_s4 + $0x684] ss:$16 sps:$4 sm:$0xff]  }
 0x4e1   :  { %3993 = vmatprep.mubr.bf16.mxu1 %v10539_v38  ;;  %v10547_v38 = vld [vmem:[%s16414_s4 + $0x30c] ss:$16 sps:$4 sm:$0xff]  }
 0x4e7   :  { %3802 = vmatmul.mubr.bf16.gmra.mrb[212].mxu0 %v10400_v25  ;;  %v10543_v25 = vld [vmem:[%s16414_s4 + $0x680] ss:$16 sps:$4 sm:$0xff]  }
 0x4e8   :  { %3809 = vmatprep.mubr.bf16.mxu0 %v10401_v7  ;;  %3994 = vmatmul.mubr.bf16.gmra.mrb[144].mxu1 %v10543_v25  ;;  %v10460_v7 = vld [vmem:[%s16414_s4 + $0xe8] ss:$16 sps:$4 sm:$0xff]  }
 0x4e9   :  { %v10550_v25 = vld [vmem:[%s16414_s4 + $0x308] ss:$16 sps:$4 sm:$0xff]  }
 0x4ef   :  { %3810 = vmatmul.mubr.bf16.gmra.mrb[216].mxu0 %v10403_v37  ;;  %v10461_v37 = vld [vmem:[%s16414_s4 + $0x10c] ss:$16 sps:$4 sm:$0xff]  }
 0x4f0   :  { %3817 = vmatprep.mubr.bf16.mxu0 %v10404_v16  ;;  %v10545_v16 = vld [vmem:[%s16414_s4 + $0x6a4] ss:$16 sps:$4 sm:$0xff]  }
 0x4f1   :  { %4001 = vmatprep.mubr.bf16.mxu1 %v10545_v16 }
 0x4f7   :  { %3818 = vmatmul.mubr.bf16.gmra.mrb[220].mxu0 %v10406_v0  ;;  %v10549_v0 = vld [vmem:[%s16414_s4 + $0x6a0] ss:$16 sps:$4 sm:$0xff]  }
 0x4f8   :  { %3825 = vmatprep.mubr.bf16.mxu0 %v10407_v12  ;;  %4002 = vmatmul.mubr.bf16.gmra.mrb[148].mxu1 %v10549_v0  ;;  %v10463_v12 = vld [vmem:[%s16414_s4 + $0x108] ss:$16 sps:$4 sm:$0xff]  }
 0x4ff   :  { %3826 = vmatmul.mubr.bf16.gmra.mrb[224].mxu0 %v10409_v13  ;;  %v10464_v13 = vld [vmem:[%s16414_s4 + $0x12c] ss:$16 sps:$4 sm:$0xff]  }
 0x500   :  { %3833 = vmatprep.mubr.bf16.mxu0 %v10410_v24  ;;  %v10551_v24 = vld [vmem:[%s16414_s4 + $0x6c4] ss:$16 sps:$4 sm:$0xff]  }
 0x501   :  { %4009 = vmatprep.mubr.bf16.mxu1 %v10551_v24  ;;  %v10559_v24 = vld [vmem:[%s16414_s4 + $0x34c] ss:$16 sps:$4 sm:$0xff]  }
 0x507   :  { %3834 = vmatmul.mubr.bf16.gmra.mrb[228].mxu0 %v10412_v57  ;;  %v10555_v57 = vld [vmem:[%s16414_s4 + $0x6c0] ss:$16 sps:$4 sm:$0xff]  }
 0x508   :  { %3841 = vmatprep.mubr.bf16.mxu0 %v10413_v59  ;;  %4010 = vmatmul.mubr.bf16.gmra.mrb[152].mxu1 %v10555_v57  ;;  %v10466_v59 = vld [vmem:[%s16414_s4 + $0x128] ss:$16 sps:$4 sm:$0xff]  }
 0x50f   :  { %3842 = vmatmul.mubr.bf16.gmra.mrb[232].mxu0 %v10415_v32  ;;  %v10467_v32 = vld [vmem:[%s16414_s4 + $0x14c] ss:$16 sps:$4 sm:$0xff]  }
 0x510   :  { %3849 = vmatprep.mubr.bf16.mxu0 %v10416_v55  ;;  %v10557_v55 = vld [vmem:[%s16414_s4 + $0x6e4] ss:$16 sps:$4 sm:$0xff]  }
 0x511   :  { %4017 = vmatprep.mubr.bf16.mxu1 %v10557_v55 }
 0x517   :  { %3850 = vmatmul.mubr.bf16.gmra.mrb[236].mxu0 %v10418_v4  ;;  %v10561_v4 = vld [vmem:[%s16414_s4 + $0x6e0] ss:$16 sps:$4 sm:$0xff]  }
 0x518   :  { %3857 = vmatprep.mubr.bf16.mxu0 %v10419_v36  ;;  %4018 = vmatmul.mubr.bf16.gmra.mrb[156].mxu1 %v10561_v4  ;;  %v10469_v36 = vld [vmem:[%s16414_s4 + $0x148] ss:$16 sps:$4 sm:$0xff]  }
 0x519   :  { %v10562_v4 = vld [vmem:[%s16414_s4 + $0x348] ss:$16 sps:$4 sm:$0xff]  }
 0x51f   :  { %3858 = vmatmul.mubr.bf16.gmra.mrb[240].mxu0 %v10421_v10  ;;  %v10470_v10 = vld [vmem:[%s16414_s4 + $0x16c] ss:$16 sps:$4 sm:$0xff]  }
 0x520   :  { %3865 = vmatprep.mubr.bf16.mxu0 %v10422_v11  ;;  %v10472_v11 = vld [vmem:[%s16414_s4 + $0x168] ss:$16 sps:$4 sm:$0xff]  }
 0x527   :  { %3866 = vmatmul.mubr.bf16.gmra.mrb[244].mxu0 %v10424_v52  ;;  %v10476_v52 = vld [vmem:[%s16414_s4 + $0x18c] ss:$16 sps:$4 sm:$0xff]  }
 0x528   :  { %3873 = vmatprep.mubr.bf16.mxu0 %v10425_v3  ;;  %v10563_v3 = vld [vmem:[%s16414_s4 + $0x704] ss:$16 sps:$4 sm:$0xff]  }
 0x529   :  { %4025 = vmatprep.mubr.bf16.mxu1 %v10563_v3 }
 0x52a   :  { %4026 = vmatmul.mubr.bf16.gmra.mrb[160].mxu1 %v10567_v33 }
 0x52f   :  { %3874 = vmatmul.mubr.bf16.gmra.mrb[248].mxu0 %v10427_v30  ;;  %v10481_v30 = vld [vmem:[%s16414_s4 + $0x1ac] ss:$16 sps:$4 sm:$0xff]  }
 0x530   :  { %3881 = vmatprep.mubr.bf16.mxu0 %v10428_v58  ;;  %v10569_v58 = vld [vmem:[%s16414_s4 + $0x724] ss:$16 sps:$4 sm:$0xff]  }
 0x531   :  { %4033 = vmatprep.mubr.bf16.mxu1 %v10569_v58 }
 0x532   :  { %4034 = vmatmul.mubr.bf16.gmra.mrb[164].mxu1 %v10573_v19  ;;  %v10571_v19 = vld [vmem:[%s16414_s4 + $0x38c] ss:$16 sps:$4 sm:$0xff]  }
 0x537   :  { %3882 = vmatmul.mubr.bf16.gmra.mrb[252].mxu0 %v10430_v43  ;;  %v10487_v43 = vld [vmem:[%s16414_s4 + $0x1cc] ss:$16 sps:$4 sm:$0xff]  }
 0x538   :  { %3889 = vmatprep.mubr.bf16.mxu0 %v10433_v29  ;;  %v10575_v29 = vld [vmem:[%s16414_s4 + $0x744] ss:$16 sps:$4 sm:$0xff]  }
 0x539   :  { %4041 = vmatprep.mubr.bf16.mxu1 %v10575_v29 }
 0x53a   :  { %4042 = vmatmul.mubr.bf16.gmra.mrb[168].mxu1 %v10579_v61 }
 0x53b   :  { %4049 = vmatprep.mubr.bf16.mxu1 %v10582_v27 }
 0x53f   :  { %3890 = vmatmul.mubr.bf16.gmra.mrb[0].mxu0 %v10431_v28  ;;  %v10490_v28 = vld [vmem:[%s16414_s4 + $0x1c8] ss:$16 sps:$4 sm:$0xff]  }
 0x540   :  { %3897 = vmatprep.mubr.bf16.mxu0 %v10436_v46  ;;  %v10493_v46 = vld [vmem:[%s16414_s4 + $0x1ec] ss:$16 sps:$4 sm:$0xff]  }
 0x542   :  { %4050 = vmatmul.mubr.bf16.gmra.mrb[172].mxu1 %v10586_v56  ;;  %v10574_v56 = vld [vmem:[%s16414_s4 + $0x388] ss:$16 sps:$4 sm:$0xff]  }
 0x543   :  { %4057 = vmatprep.mubr.bf16.mxu1 %v10589_v34 }
 0x547   :  { %3898 = vmatmul.mubr.bf16.gmra.mrb[4].mxu0 %v10434_v31  ;;  %v10496_v31 = vld [vmem:[%s16414_s4 + $0x1e8] ss:$16 sps:$4 sm:$0xff]  }
 0x548   :  { %8654 = vmatprep.mubr.msk.bf16.mxu0 %vm3351_vm3, %v10439_v60  ;;  %v10499_v60 = vld [vmem:[%s16414_s4 + $0x20c] ss:$16 sps:$4 sm:$0xff]  }
 0x54f   :  { %4115 = vmatmul.mubr.bf16.vlgmr.msra.gmra.mrb[100].mxu0 %v10437_v20  ;;  %v10593_v20 = vld [vmem:[%s16414_s4 + $0x780] ss:$16 sps:$4 sm:$0xff]  }
 0x550   :  { %8655 = vmatprep.mubr.msk.bf16.mxu0 %vm3351_vm3, %v10440_v1  ;;  %v10595_v1 = vld [vmem:[%s16415_s5 + $0x50] sm:$0xff]   ;;  %4058 = vmatmul.mubr.bf16.gmra.mrb[176].mxu1 %v10593_v20 }
 0x551   :  { %9329 = vmatpush3.bf16.msra.mxu1 %v10595_v1 }
 0x552   :  { %9330 = vmatprep.subr.bf16.mxu1 %v16850_v2 }
 0x557   :  { %4123 = vmatmul.mubr.bf16.gmra.mrb[104].mxu0 %v10442_v9  ;;  %v10596_v9 = vld [vmem:[%s16415_s5 + $0x58] sm:$0xff]  }
 0x558   :  { %8656 = vmatprep.mubr.msk.bf16.mxu0 %vm3351_vm3, %v10443_v44  ;;  %v10597_v44 = vld [vmem:[%s16414_s4 + $0x7a4] ss:$16 sps:$4 sm:$0xff]   ;;  %9331 = vmatpush3.bf16.msra.mxu1 %v10596_v9 }
 0x559   :  { %4065 = vmatprep.mubr.bf16.mxu1 %v10597_v44  ;;  %9332 = vmatprep.subr.bf16.mxu1 %v16850_v2 }
 0x55a   :  { %4066 = vmatmul.mubr.bf16.gmra.mrb[180].mxu1 %v10601_v17  ;;  %v10580_v17 = vld [vmem:[%s16414_s4 + $0x3a8] ss:$16 sps:$4 sm:$0xff]  }
 0x55b   :  { %4073 = vmatprep.mubr.bf16.mxu1 %v10605_v40 }
 0x55c   :  { %9333 = vmatpush3.bf16.msra.mxu1 %v10603_v49 }
 0x55d   :  { %9334 = vmatprep.subr.bf16.mxu1 %v16850_v2 }
 0x55f   :  { %4131 = vmatmul.mubr.bf16.gmra.mrb[108].mxu0 %v10445_v18  ;;  %v10508_v18 = vld [vmem:[%s16414_s4 + $0x228] ss:$16 sps:$4 sm:$0xff]  }
 0x560   :  { %8657 = vmatprep.mubr.msk.bf16.mxu0 %vm3351_vm3, %v10446_v22  ;;  %v10511_v22 = vld [vmem:[%s16414_s4 + $0x24c] ss:$16 sps:$4 sm:$0xff]   ;;  %9335 = vmatpush3.bf16.msra.mxu1 %v10604_v21 }
 0x561   :  { %9336 = vmatprep.subr.bf16.mxu1 %v16850_v2 }
 0x567   :  { %4139 = vmatmul.mubr.bf16.gmra.mrb[112].mxu0 %v10448_v5  ;;  %v10609_v5 = vld [vmem:[%s16414_s4 + $0x7c0] ss:$16 sps:$4 sm:$0xff]  }
 0x568   :  { %8658 = vmatprep.mubr.msk.bf16.mxu0 %vm3351_vm3, %v10449_v45  ;;  %v10611_v45 = vld [vmem:[%s16415_s5 + $0x70] sm:$0xff]   ;;  %4074 = vmatmul.mubr.bf16.gmra.mrb[184].mxu1 %v10609_v5 }
 0x569   :  { %9340 = vmatprep.mubr.msk.bf16.mxu1 %vm10856_vm1, %v16850_v2  ;;  %9337 = vmatpush3.bf16.msra.mxu1 %v10611_v45 }
 0x56a   :  { %9338 = vmatprep.subr.bf16.mxu1 %v16850_v2 }
 0x56f   :  { %4147 = vmatmul.mubr.bf16.gmra.mrb[116].mxu0 %v10451_v51  ;;  %v10612_v51 = vld [vmem:[%s16415_s5 + $0x78] sm:$0xff]  }
 0x570   :  { %8659 = vmatprep.mubr.msk.bf16.mxu0 %vm3351_vm3, %v10452_v62  ;;  %9339 = vmatpush3.bf16.msra.mxu1 %v10612_v51  ;;  %v10520_v62 = vld [vmem:[%s16414_s4 + $0x268] ss:$16 sps:$4 sm:$0xff]  }
 0x571   :  { %9368 = vmatprep.subr.bf16.mxu1 %v16850_v2 }
 0x577   :  { %4155 = vmatmul.mubr.bf16.gmra.mrb[120].mxu0 %v10454_v50  ;;  %v10529_v50 = vld [vmem:[%s16414_s4 + $0x2ac] ss:$16 sps:$4 sm:$0xff]  }
 0x578   :  { %8660 = vmatprep.mubr.msk.bf16.mxu0 %vm3351_vm3, %v10455_v35  ;;  %v10532_v35 = vld [vmem:[%s16414_s4 + $0x2a8] ss:$16 sps:$4 sm:$0xff]  }
 0x57f   :  { %4163 = vmatmul.mubr.bf16.gmra.mrb[124].mxu0 %v10457_v6  ;;  %v10541_v6 = vld [vmem:[%s16414_s4 + $0x2ec] ss:$16 sps:$4 sm:$0xff]  }
 0x580   :  { %8661 = vmatprep.mubr.msk.bf16.mxu0 %vm3351_vm3, %v10458_v53  ;;  %v10544_v53 = vld [vmem:[%s16414_s4 + $0x2e8] ss:$16 sps:$4 sm:$0xff]  }
 0x587   :  { %4171 = vmatmul.mubr.bf16.gmra.mrb[128].mxu0 %v10460_v7  ;;  %v10553_v7 = vld [vmem:[%s16414_s4 + $0x32c] ss:$16 sps:$4 sm:$0xff]  }
 0x588   :  { %8662 = vmatprep.mubr.msk.bf16.mxu0 %vm3351_vm3, %v10461_v37  ;;  %v13410_v37 = vpop.f32.mrb[100].mxu1 }
 0x589   :  { %v3909_v16 = vpop.f32.mrb[101].mxu1 }
 0x58a   :  { %v13412_v0 = vpop.f32.mrb[102].mxu1 }
 0x58f   :  { %4179 = vmatmul.mubr.bf16.gmra.mrb[132].mxu0 %v10463_v12  ;;  %v3912_v12 = vpop.f32.mrb[103].mxu1 }
 0x590   :  { %8663 = vmatprep.mubr.msk.bf16.mxu0 %vm3351_vm3, %v10464_v13  ;;  %v10556_v13 = vld [vmem:[%s16414_s4 + $0x328] ss:$16 sps:$4 sm:$0xff]   ;;  %v13421_v57 = vpop.f32.mrb[104].mxu1  ;;  %v10599_v12 = vld [vmem:[%s16414_s4 + $0x40c] ss:$16 sps:$4 sm:$0xff]  }
 0x597   :  { %4187 = vmatmul.mubr.bf16.gmra.mrb[136].mxu0 %v10466_v59  ;;  %v3917_v59 = vpop.f32.mrb[105].mxu1 }
 0x598   :  { %8664 = vmatprep.mubr.msk.bf16.mxu0 %vm3351_vm3, %v10467_v32  ;;  %v13423_v32 = vpop.f32.mrb[106].mxu1 }
 0x599   :  { %v3920_v55 = vpop.f32.mrb[107].mxu1 }
 0x59f   :  { %4195 = vmatmul.mubr.bf16.gmra.mrb[140].mxu0 %v10469_v36  ;;  %v10565_v36 = vld [vmem:[%s16414_s4 + $0x36c] ss:$16 sps:$4 sm:$0xff]  }
 0x5a0   :  { %8665 = vmatprep.mubr.msk.bf16.mxu0 %vm3351_vm3, %v10470_v10  ;;  %v13432_v10 = vpop.f32.mrb[108].mxu1 }
 0x5a7   :  { %4203 = vmatmul.mubr.bf16.gmra.mrb[144].mxu0 %v10472_v11  ;;  %v3925_v11 = vpop.f32.mrb[109].mxu1 }
 0x5a8   :  { %8666 = vmatprep.mubr.msk.bf16.mxu0 %vm3351_vm3, %v10476_v52  ;;  %v13434_v52 = vpop.f32.mrb[110].mxu1 }
 0x5a9   :  { %v3928_v3 = vpop.f32.mrb[111].mxu1 }
 0x5af   :  { %4211 = vmatmul.mubr.bf16.gmra.mrb[148].mxu0 %v10478_v23 }
 0x5b0   :  { %8667 = vmatprep.mubr.msk.bf16.mxu0 %vm3351_vm3, %v10481_v30  ;;  %v10568_v30 = vld [vmem:[%s16414_s4 + $0x368] ss:$16 sps:$4 sm:$0xff]  }
 0x5b7   :  { %4219 = vmatmul.mubr.bf16.gmra.mrb[152].mxu0 %v10484_v39  ;;  %v13447_v39 = vpop.f32.mrb[112].mxu1 }
 0x5b8   :  { %8668 = vmatprep.mubr.msk.bf16.mxu0 %vm3351_vm3, %v10487_v43  ;;  %v3933_v61 = vpop.f32.mrb[113].mxu1 }
 0x5b9   :  { %v13451_v48 = vpop.f32.mrb[114].mxu1 }
 0x5bf   :  { %4227 = vmatmul.mubr.bf16.gmra.mrb[156].mxu0 %v10490_v28  ;;  %v3936_v28 = vpop.f32.mrb[115].mxu1 }
 0x5c0   :  { %8669 = vmatprep.mubr.msk.bf16.mxu0 %vm3351_vm3, %v10493_v46  ;;  %v13464_v47 = vpop.f32.mrb[116].mxu1 }
 0x5c1   :  { %v3941_v1 = vpop.f32.mrb[117].mxu1 }
 0x5c7   :  { %4235 = vmatmul.mubr.bf16.gmra.mrb[160].mxu0 %v10496_v31 }
 0x5c8   :  { %8670 = vmatprep.mubr.msk.bf16.mxu0 %vm3351_vm3, %v10499_v60  ;;  %v10577_v60 = vld [vmem:[%s16414_s4 + $0x3ac] ss:$16 sps:$4 sm:$0xff]  }
 0x5cf   :  { %4243 = vmatmul.mubr.bf16.gmra.mrb[164].mxu0 %v10502_v15  ;;  %v13468_v15 = vpop.f32.mrb[118].mxu1 }
 0x5d0   :  { %8671 = vmatprep.mubr.msk.bf16.mxu0 %vm3351_vm3, %v10505_v63  ;;  %v3944_v63 = vpop.f32.mrb[119].mxu1 }
 0x5d1   :  { %v10610_v63 = vld [vmem:[%s16414_s4 + $0x428] ss:$16 sps:$4 sm:$0xff]  }
 0x5d7   :  { %4251 = vmatmul.mubr.bf16.gmra.mrb[168].mxu0 %v10508_v18  ;;  %v10584_v18 = vld [vmem:[%s16414_s4 + $0x3cc] ss:$16 sps:$4 sm:$0xff]  }
 0x5d8   :  { %8672 = vmatprep.mubr.msk.bf16.mxu0 %vm3351_vm3, %v10511_v22  ;;  %v13481_v22 = vpop.f32.mrb[120].mxu1 }
 0x5d9   :  { %v3949_v5 = vpop.f32.mrb[121].mxu1 }
 0x5da   :  { %v13485_v45 = vpop.f32.mrb[122].mxu1 }
 0x5df   :  { %4259 = vmatmul.mubr.bf16.gmra.mrb[172].mxu0 %v10514_v8  ;;  %v3952_v8 = vpop.f32.mrb[123].mxu1 }
 0x5e0   :  { %8673 = vmatprep.mubr.msk.bf16.mxu0 %vm3351_vm3, %v10517_v42 }
 0x5e7   :  { %4267 = vmatmul.mubr.bf16.gmra.mrb[176].mxu0 %v10520_v62  ;;  %v10587_v62 = vld [vmem:[%s16414_s4 + $0x3c8] ss:$16 sps:$4 sm:$0xff]  }
 0x5e8   :  { %8674 = vmatprep.mubr.msk.bf16.mxu0 %vm3351_vm3, %v10523_v26 }
 0x5ef   :  { %4275 = vmatmul.mubr.bf16.gmra.mrb[180].mxu0 %v10526_v41  ;;  %v10591_v41 = vld [vmem:[%s16414_s4 + $0x3ec] ss:$16 sps:$4 sm:$0xff]  }
 0x5f0   :  { %8675 = vmatprep.mubr.msk.bf16.mxu0 %vm3351_vm3, %v10529_v50  ;;  %v13498_v50 = vpop.f32.mrb[124].mxu1 }
 0x5f7   :  { %4283 = vmatmul.mubr.bf16.gmra.mrb[184].mxu0 %v10532_v35 }
 0x5f8   :  { %8676 = vmatprep.mubr.msk.bf16.mxu0 %vm3351_vm3, %v10535_v54 }
 0x5ff   :  { %4291 = vmatmul.mubr.bf16.gmra.mrb[188].mxu0 %v10538_v14  ;;  %v3957_v14 = vpop.f32.mrb[125].mxu1 }
 0x600   :  { %8677 = vmatprep.mubr.msk.bf16.mxu0 %vm3351_vm3, %v10541_v6  ;;  %v13502_v6 = vpop.f32.mrb[126].mxu1  ;;  %v10615_v14 = vld [vmem:[%s16414_s4 + $0x448] ss:$16 sps:$4 sm:$0xff]  }
 0x607   :  { %4299 = vmatmul.mubr.bf16.gmra.mrb[192].mxu0 %v10544_v53  ;;  %v3960_v53 = vpop.f32.mrb[127].mxu1 }
 0x608   :  { %8678 = vmatprep.mubr.msk.bf16.mxu0 %vm3351_vm3, %v10547_v38 }
 0x60f   :  { %4307 = vmatmul.mubr.bf16.gmra.mrb[196].mxu0 %v10550_v25 }
 0x610   :  { %8679 = vmatprep.mubr.msk.bf16.mxu0 %vm3351_vm3, %v10553_v7  ;;  %v10594_v7 = vld [vmem:[%s16414_s4 + $0x3e8] ss:$16 sps:$4 sm:$0xff]  }
 0x617   :  { %4315 = vmatmul.mubr.bf16.gmra.mrb[200].mxu0 %v10556_v13  ;;  %v13515_v13 = vpop.f32.mrb[128].mxu1 }
 0x618   :  { %8680 = vmatprep.mubr.msk.bf16.mxu0 %vm3351_vm3, %v10559_v24  ;;  %v3965_v55 = vpop.f32.mrb[129].mxu1  ;;  %v10642_v24 = vld [vmem:[%s16414_s4 + $0x528] ss:$16 sps:$4 sm:$0xff]  }
 0x619   :  { %v10625_v55 = vld [vmem:[%s16415_s5] sm:$0xff]  }
 0x61f   :  { %4323 = vmatmul.mubr.bf16.gmra.mrb[204].mxu0 %v10562_v4  ;;  %v13519_v4 = vpop.f32.mrb[130].mxu1 }
 0x620   :  { %8681 = vmatprep.mubr.msk.bf16.mxu0 %vm3351_vm3, %v10565_v36  ;;  %v3968_v36 = vpop.f32.mrb[131].mxu1 }
 0x622   :  { %v13437_v33 = vpop.f32.mrb[100].mxu0 }
 0x623   :  { %v4118_v23 = vpop.f32.mrb[101].mxu0 }
 0x624   :  { %v13442_v58 = vpop.f32.mrb[102].mxu0  ;;  %v10602_v23 = vld [vmem:[%s16414_s4 + $0x408] ss:$16 sps:$4 sm:$0xff]  }
 0x625   :  { %v4619_v43 = vpack.c.bf16 %v13442_v58, %v13437_v33  ;;  %v4121_v29 = vpop.f32.mrb[103].mxu0  ;;  %v10645_v33 = vld [vmem:[%s16414_s4 + $0x548] ss:$16 sps:$4 sm:$0xff]  }
 0x626   :  { %v13532_v29 = vpop.f32.mrb[132].mxu1 }
 0x627   :  { %4331 = vmatmul.mubr.bf16.gmra.mrb[208].mxu0 %v10568_v30 }
 0x628   :  { %8682 = vmatprep.mubr.msk.bf16.mxu0 %vm3351_vm3, %v10571_v19  ;;  %v10607_v19 = vld [vmem:[%s16414_s4 + $0x42c] ss:$16 sps:$4 sm:$0xff]  }
 0x62a   :  { %v13454_v46 = vpop.f32.mrb[104].mxu0 }
 0x62b   :  { %v4126_v27 = vpop.f32.mrb[105].mxu0 }
 0x62c   :  { %v13459_v31 = vpop.f32.mrb[106].mxu0  ;;  %v3973_v27 = vpop.f32.mrb[133].mxu1 }
 0x62d   :  { %v4620_v34 = vpack.c.bf16 %v13459_v31, %v13454_v46  ;;  %v4129_v20 = vpop.f32.mrb[107].mxu0  ;;  %v10648_v46 = vld [vmem:[%s16414_s4 + $0x568] ss:$16 sps:$4 sm:$0xff]  }
 0x62f   :  { %4339 = vmatmul.mubr.bf16.gmra.mrb[212].mxu0 %v10574_v56  ;;  %v13536_v56 = vpop.f32.mrb[134].mxu1 }
 0x630   :  { %8683 = vmatprep.mubr.msk.bf16.mxu0 %vm3351_vm3, %v10577_v60  ;;  %v3976_v60 = vpop.f32.mrb[135].mxu1 }
 0x631   :  { %v10618_v60 = vld [vmem:[%s16414_s4 + $0x468] ss:$16 sps:$4 sm:$0xff]  }
 0x632   :  { %v13471_v9 = vpop.f32.mrb[108].mxu0 }
 0x633   :  { %v4134_v44 = vpop.f32.mrb[109].mxu0 }
 0x634   :  { %v13476_v49 = vpop.f32.mrb[110].mxu0 }
 0x635   :  { %v4137_v40 = vpop.f32.mrb[111].mxu0 }
 0x636   :  { %v10637_v40 = vld [vmem:[%s16414_s4 + $0x508] ss:$16 sps:$4 sm:$0xff]  }
 0x637   :  { %4347 = vmatmul.mubr.bf16.gmra.mrb[216].mxu0 %v10580_v17  ;;  %v10613_v17 = vld [vmem:[%s16414_s4 + $0x44c] ss:$16 sps:$4 sm:$0xff]  }
 0x638   :  { %8684 = vmatprep.mubr.msk.bf16.mxu0 %vm3351_vm3, %v10584_v18  ;;  %v13549_v18 = vpop.f32.mrb[136].mxu1 }
 0x639   :  { %v3981_v8 = vpop.f32.mrb[137].mxu1 }
 0x63a   :  { %v13488_v42 = vpop.f32.mrb[112].mxu0 }
 0x63b   :  { %v4142_v51 = vpop.f32.mrb[113].mxu0 }
 0x63c   :  { %v13493_v26 = vpop.f32.mrb[114].mxu0  ;;  %v13553_v51 = vpop.f32.mrb[138].mxu1 }
 0x63d   :  { %v4145_v54 = vpop.f32.mrb[115].mxu0 }
 0x63f   :  { %4355 = vmatmul.mubr.bf16.gmra.mrb[220].mxu0 %v10587_v62  ;;  %v3984_v62 = vpop.f32.mrb[139].mxu1 }
 0x640   :  { %8685 = vmatprep.mubr.msk.bf16.mxu0 %vm3351_vm3, %v10591_v41  ;;  %v10630_v62 = vld [vmem:[%s16415_s5 + $0x10] sm:$0xff]  }
 0x642   :  { %v13505_v38 = vpop.f32.mrb[116].mxu0 }
 0x643   :  { %v4150_v25 = vpop.f32.mrb[117].mxu0 }
 0x644   :  { %v13510_v16 = vpop.f32.mrb[118].mxu0  ;;  %v10616_v25 = vld [vmem:[%s16414_s4 + $0x46c] ss:$16 sps:$4 sm:$0xff]  }
 0x645   :  { %v4153_v59 = vpop.f32.mrb[119].mxu0 }
 0x647   :  { %4363 = vmatmul.mubr.bf16.gmra.mrb[224].mxu0 %v10594_v7  ;;  %v13562_v7 = vpop.f32.mrb[140].mxu1 }
 0x648   :  { %8686 = vmatprep.mubr.msk.bf16.mxu0 %vm3351_vm3, %v10599_v12  ;;  %v3989_v36 = vpop.f32.mrb[141].mxu1 }
 0x649   :  { %v10622_v36 = vld [vmem:[%s16414_s4 + $0x4ac] ss:$16 sps:$4 sm:$0xff]  }
 0x64a   :  { %v13522_v11 = vpop.f32.mrb[120].mxu0 }
 0x64b   :  { %v4158_v3 = vpop.f32.mrb[121].mxu0 }
 0x64c   :  { %v13527_v30 = vpop.f32.mrb[122].mxu0  ;;  %v13567_v3 = vpop.f32.mrb[142].mxu1 }
 0x64d   :  { %v4161_v28 = vpop.f32.mrb[123].mxu0 }
 0x64f   :  { %4371 = vmatmul.mubr.bf16.gmra.mrb[228].mxu0 %v10602_v23  ;;  %v3992_v23 = vpop.f32.mrb[143].mxu1 }
 0x650   :  { %8687 = vmatprep.mubr.msk.bf16.mxu0 %vm3351_vm3, %v10607_v19  ;;  %v10626_v19 = vld [vmem:[%s16415_s5 + $0x8] sm:$0xff]  }
 0x652   :  { %v13539_v20 = vpop.f32.mrb[124].mxu0 }
 0x653   :  { %v4166_v1 = vpop.f32.mrb[125].mxu0 }
 0x654   :  { %v13544_v44 = vpop.f32.mrb[126].mxu0 }
 0x655   :  { %v4169_v5 = vpop.f32.mrb[127].mxu0 }
 0x657   :  { %4379 = vmatmul.mubr.bf16.gmra.mrb[232].mxu0 %v10610_v63  ;;  %v10619_v63 = vld [vmem:[%s16414_s4 + $0x48c] ss:$16 sps:$4 sm:$0xff]  }
 0x658   :  { %8688 = vmatprep.mubr.msk.bf16.mxu0 %vm3351_vm3, %v10613_v17  ;;  %v13582_v17 = vpop.f32.mrb[144].mxu1 }
 0x65a   :  { %v4172_v41 = vpop.f32.mrb[128].mxu0 }
 0x65b   :  { %v4174_v54 = vpop.f32.mrb[129].mxu0 }
 0x65c   :  { %v4175_v53 = vpop.f32.mrb[130].mxu0 }
 0x65d   :  { %v4626_v12 = vpack.c.bf16 %v4175_v53, %v4172_v41  ;;  %v4177_v59 = vpop.f32.mrb[131].mxu0  ;;  %v3997_v41 = vpop.f32.mrb[145].mxu1  ;;  %v10631_v53 = vld [vmem:[%s16415_s5 + $0x18] sm:$0xff]  }
 0x65e   :  { %v13588_v54 = vpop.f32.mrb[146].mxu1  ;;  %v10621_v59 = vld [vmem:[%s16414_s4 + $0x488] ss:$16 sps:$4 sm:$0xff]  }
 0x65f   :  { %4387 = vmatmul.mubr.bf16.gmra.mrb[236].mxu0 %v10615_v14  ;;  %9341 = vmatmul.mubr.bf16.vlgmr.msra.gmra.mrb[188].mxu1 %v4626_v12  ;;  %v4000_v14 = vpop.f32.mrb[147].mxu1  ;;  %v10624_v41 = vld [vmem:[%s16414_s4 + $0x4a8] ss:$16 sps:$4 sm:$0xff]  }
 0x660   :  { %8689 = vmatprep.mubr.msk.bf16.mxu0 %vm3351_vm3, %v10616_v25  ;;  %9344 = vmatprep.mubr.msk.bf16.mxu1 %vm10856_vm1, %v16850_v2  ;;  %v13603_v23 = vpop.f32.mrb[148].mxu1 }
 0x661   :  { %9369 = vmatpush3.bf16.msra.mxu1 %v10625_v55 }
 0x662   :  { %v4180_v28 = vpop.f32.mrb[132].mxu0  ;;  %9370 = vmatprep.subr.bf16.mxu1 %v16850_v2 }
 0x663   :  { %v4182_v27 = vpop.f32.mrb[133].mxu0 }
 0x664   :  { %v4183_v1 = vpop.f32.mrb[134].mxu0  ;;  %v10635_v27 = vld [vmem:[%s16415_s5 + $0x20] sm:$0xff]  }
 0x665   :  { %v4627_v5 = vpack.c.bf16 %v4183_v1, %v4180_v28  ;;  %v4185_v8 = vpop.f32.mrb[135].mxu0  ;;  %9371 = vmatpush3.bf16.msra.mxu1 %v10626_v19 }
 0x666   :  { %9372 = vmatprep.subr.bf16.mxu1 %v16850_v2 }
 0x667   :  { %4395 = vmatmul.mubr.bf16.gmra.mrb[240].mxu0 %v10618_v60  ;;  %9345 = vmatmul.mubr.bf16.gmra.mrb[192].mxu1 %v4627_v5  ;;  %v4005_v60 = vpop.f32.mrb[149].mxu1  ;;  %v10636_v5 = vld [vmem:[%s16415_s5 + $0x28] sm:$0xff]  }
 0x668   :  { %8690 = vmatprep.mubr.msk.bf16.mxu0 %vm3351_vm3, %v10619_v63  ;;  %9348 = vmatprep.mubr.msk.bf16.mxu1 %vm10856_vm1, %v16850_v2  ;;  %v13609_v1 = vpop.f32.mrb[150].mxu1 }
 0x669   :  { %9373 = vmatpush3.bf16.msra.mxu1 %v10630_v62  ;;  %v4008_v63 = vpop.f32.mrb[151].mxu1 }
 0x66a   :  { %v4188_v25 = vpop.f32.mrb[136].mxu0  ;;  %9374 = vmatprep.subr.bf16.mxu1 %v16850_v2 }
 0x66b   :  { %v4190_v12 = vpop.f32.mrb[137].mxu0 }
 0x66c   :  { %v4191_v55 = vpop.f32.mrb[138].mxu0 }
 0x66d   :  { %v4628_v19 = vpack.c.bf16 %v4191_v55, %v4188_v25  ;;  %v4193_v28 = vpop.f32.mrb[139].mxu0  ;;  %9375 = vmatpush3.bf16.msra.mxu1 %v10631_v53  ;;  %v10627_v53 = vld [vmem:[%s16414_s4 + $0x4cc] ss:$16 sps:$4 sm:$0xff]   ;;  %v13624_v25 = vpop.f32.mrb[152].mxu1  ;;  %v10640_v55 = vld [vmem:[%s16415_s5 + $0x30] sm:$0xff]  }
 0x66e   :  { %9376 = vmatprep.subr.bf16.mxu1 %v16850_v2 }
 0x66f   :  { %4403 = vmatmul.mubr.bf16.gmra.mrb[244].mxu0 %v10621_v59  ;;  %9349 = vmatmul.mubr.bf16.gmra.mrb[196].mxu1 %v4628_v19 }
 0x670   :  { %8691 = vmatprep.mubr.msk.bf16.mxu0 %vm3351_vm3, %v10622_v36  ;;  %9352 = vmatprep.mubr.msk.bf16.mxu1 %vm10856_vm1, %v16850_v2  ;;  %v4013_v36 = vpop.f32.mrb[153].mxu1 }
 0x671   :  { %9377 = vmatpush3.bf16.msra.mxu1 %v10635_v27  ;;  %v13630_v19 = vpop.f32.mrb[154].mxu1  ;;  %v10641_v27 = vld [vmem:[%s16415_s5 + $0x38] sm:$0xff]  }
 0x672   :  { %v4196_v8 = vpop.f32.mrb[140].mxu0  ;;  %9378 = vmatprep.subr.bf16.mxu1 %v16850_v2  ;;  %v4016_v28 = vpop.f32.mrb[155].mxu1 }
 0x673   :  { %v4198_v62 = vpop.f32.mrb[141].mxu0 }
 0x674   :  { %v4199_v14 = vpop.f32.mrb[142].mxu0  ;;  %v10634_v62 = vld [vmem:[%s16414_s4 + $0x4ec] ss:$16 sps:$4 sm:$0xff]  }
 0x675   :  { %v4629_v12 = vpack.c.bf16 %v4199_v14, %v4196_v8  ;;  %v4201_v59 = vpop.f32.mrb[143].mxu0  ;;  %9379 = vmatpush3.bf16.msra.mxu1 %v10636_v5  ;;  %v10629_v5 = vld [vmem:[%s16414_s4 + $0x4c8] ss:$16 sps:$4 sm:$0xff]  }
 0x676   :  { %9380 = vmatprep.subr.bf16.mxu1 %v16850_v2 }
 0x677   :  { %4411 = vmatmul.mubr.bf16.gmra.mrb[248].mxu0 %v10624_v41  ;;  %9353 = vmatmul.mubr.bf16.gmra.mrb[200].mxu1 %v4629_v12  ;;  %v13645_v41 = vpop.f32.mrb[156].mxu1 }
 0x678   :  { %8692 = vmatprep.mubr.msk.bf16.mxu0 %vm3351_vm3, %v10627_v53  ;;  %9356 = vmatprep.mubr.msk.bf16.mxu1 %vm10856_vm1, %v16850_v2  ;;  %v4021_v12 = vpop.f32.mrb[157].mxu1 }
 0x679   :  { %9381 = vmatpush3.bf16.msra.mxu1 %v10640_v55  ;;  %v13648_v59 = vpop.f32.mrb[158].mxu1 }
 0x67a   :  { %v4204_v60 = vpop.f32.mrb[144].mxu0  ;;  %9382 = vmatprep.subr.bf16.mxu1 %v16850_v2  ;;  %v4024_v55 = vpop.f32.mrb[159].mxu1 }
 0x67b   :  { %v4206_v63 = vpop.f32.mrb[145].mxu0 }
 0x67c   :  { %v4207_v8 = vpop.f32.mrb[146].mxu0  ;;  %v10639_v63 = vld [vmem:[%s16414_s4 + $0x50c] ss:$16 sps:$4 sm:$0xff]  }
 0x67d   :  { %v4630_v14 = vpack.c.bf16 %v4207_v8, %v4204_v60  ;;  %v4209_v53 = vpop.f32.mrb[147].mxu0  ;;  %9383 = vmatpush3.bf16.msra.mxu1 %v10641_v27  ;;  %v10632_v60 = vld [vmem:[%s16414_s4 + $0x4e8] ss:$16 sps:$4 sm:$0xff]  }
 0x67e   :  { %9412 = vmatprep.subr.bf16.mxu1 %v16850_v2 }
 0x67f   :  { %4419 = vmatmul.mubr.bf16.gmra.mrb[252].mxu0 %v10629_v5  ;;  %9357 = vmatmul.mubr.bf16.gmra.mrb[204].mxu1 %v4630_v14  ;;  %v13659_v5 = vpop.f32.mrb[160].mxu1 }
 0x680   :  { %8693 = vmatprep.mubr.msk.bf16.mxu0 %vm3351_vm3, %v10634_v62  ;;  %9360 = vmatprep.mubr.msk.bf16.mxu1 %vm10856_vm1, %v16850_v2  ;;  %v4029_v62 = vpop.f32.mrb[161].mxu1 }
 0x681   :  { %v13661_v53 = vpop.f32.mrb[162].mxu1 }
 0x682   :  { %v4212_v36 = vpop.f32.mrb[148].mxu0  ;;  %v4032_v12 = vpop.f32.mrb[163].mxu1 }
 0x683   :  { %v4214_v28 = vpop.f32.mrb[149].mxu0 }
 0x684   :  { %v4215_v27 = vpop.f32.mrb[150].mxu0 }
 0x685   :  { %v4631_v8 = vpack.c.bf16 %v4215_v27, %v4212_v36  ;;  %v4217_v14 = vpop.f32.mrb[151].mxu0  ;;  %v10644_v36 = vld [vmem:[%s16414_s4 + $0x52c] ss:$16 sps:$4 sm:$0xff]  }
 0x687   :  { %4427 = vmatmul.mubr.bf16.gmra.mrb[0].mxu0 %v10632_v60  ;;  %9361 = vmatmul.mubr.bf16.gmra.mrb[208].mxu1 %v4631_v8  ;;  %v13672_v60 = vpop.f32.mrb[164].mxu1 }
 0x688   :  { %8694 = vmatprep.mubr.msk.bf16.mxu0 %vm3351_vm3, %v10639_v63  ;;  %9364 = vmatprep.mubr.msk.bf16.mxu1 %vm10856_vm1, %v16850_v2  ;;  %v4037_v63 = vpop.f32.mrb[165].mxu1 }
 0x689   :  { %v13674_v14 = vpop.f32.mrb[166].mxu1 }
 0x68a   :  { %v4220_v55 = vpop.f32.mrb[152].mxu0  ;;  %v4040_v62 = vpop.f32.mrb[167].mxu1 }
 0x68b   :  { %v4222_v28 = vpop.f32.mrb[153].mxu0 }
 0x68c   :  { %v4223_v61 = vpop.f32.mrb[154].mxu0 }
 0x68d   :  { %v4632_v27 = vpack.c.bf16 %v4223_v61, %v4220_v55  ;;  %v4225_v8 = vpop.f32.mrb[155].mxu0  ;;  %v13689_v55 = vpop.f32.mrb[168].mxu1 }
 0x68e   :  { %v10654_v8 = vld [vmem:[%s16415_s5 + $0x80] sm:$0xff]   ;;  %v4045_v63 = vpop.f32.mrb[169].mxu1 }
 0x68f   :  { %4435 = vmatmul.mubr.bf16.gmra.mrb[4].mxu0 %v10637_v40  ;;  %9365 = vmatmul.mubr.bf16.gmra.mrb[212].mxu1 %v4632_v27  ;;  %v10647_v40 = vld [vmem:[%s16414_s4 + $0x54c] ss:$16 sps:$4 sm:$0xff]   ;;  %v13696_v62 = vpop.f32.mrb[170].mxu1 }
 0x690   :  { %8695 = vmatprep.mubr.msk.bf16.mxu0 %vm3351_vm3, %v10644_v36  ;;  %9384 = vmatprep.mubr.msk.bf16.mxu1 %vm10856_vm1, %v16850_v2 }
 0x692   :  { %v13679_v12 = vpop.f32.mrb[156].mxu0 }
 0x693   :  { %v4230_v28 = vpop.f32.mrb[157].mxu0 }
 0x694   :  { %v13684_v61 = vpop.f32.mrb[158].mxu0  ;;  %v4048_v28 = vpop.f32.mrb[171].mxu1 }
 0x695   :  { %v4233_v27 = vpop.f32.mrb[159].mxu0  ;;  %v10659_v28 = vld [vmem:[%s16415_s5 + $0x90] sm:$0xff]  }
 0x696   :  { %v10655_v27 = vld [vmem:[%s16415_s5 + $0x88] sm:$0xff]  }
 0x697   :  { %4443 = vmatmul.mubr.bf16.gmra.mrb[8].mxu0 %v10642_v24  ;;  %9385 = vmatmul.mubr.bf16.vlgmr.msra.gmra.mrb[188].mxu1 %v4619_v43  ;;  %v10650_v43 = vld [vmem:[%s16414_s4 + $0x56c] ss:$16 sps:$4 sm:$0xff]  }
 0x698   :  { %8696 = vmatprep.mubr.msk.bf16.mxu0 %vm3351_vm3, %v10647_v40  ;;  %9388 = vmatprep.mubr.msk.bf16.mxu1 %vm10856_vm1, %v16850_v2  ;;  %v13718_v40 = vpop.f32.mrb[172].mxu1 }
 0x699   :  { %9413 = vmatpush3.bf16.msra.mxu1 %v10654_v8  ;;  %v16853_v8 = vpack.c.bf16 %v13476_v49, %v13471_v9  ;;  %v10651_v9 = vld [vmem:[%s16414_s4 + $0x588] ss:$16 sps:$4 sm:$0xff]  }
 0x69a   :  { %v13707_v36 = vpop.f32.mrb[160].mxu0  ;;  %9414 = vmatprep.subr.bf16.mxu1 %v16850_v2 }
 0x69b   :  { %v4238_v24 = vpop.f32.mrb[161].mxu0 }
 0x69c   :  { %v13713_v58 = vpop.f32.mrb[162].mxu0  ;;  %v4053_v24 = vpop.f32.mrb[173].mxu1 }
 0x69d   :  { %v4241_v63 = vpop.f32.mrb[163].mxu0  ;;  %9415 = vmatpush3.bf16.msra.mxu1 %v10655_v27  ;;  %v13726_v35 = vpop.f32.mrb[174].mxu1  ;;  %v10660_v27 = vld [vmem:[%s16415_s5 + $0x98] sm:$0xff]   ;;  %v10664_v24 = vld [vmem:[%s16415_s5 + $0xa0] sm:$0xff]  }
 0x69e   :  { %9416 = vmatprep.subr.bf16.mxu1 %v16850_v2  ;;  %16851 = vst [vmem:[#allocation64_spill] sm:$0xff] %v13726_v35  ;;  %v4056_v21 = vpop.f32.mrb[175].mxu1 }
 0x69f   :  { %4451 = vmatmul.mubr.bf16.gmra.mrb[12].mxu0 %v10645_v33  ;;  %9389 = vmatmul.mubr.bf16.gmra.mrb[192].mxu1 %v4620_v34  ;;  %v10653_v34 = vld [vmem:[%s16414_s4 + $0x58c] ss:$16 sps:$4 sm:$0xff]   ;;  %v13748_v21 = vpop.f32.mrb[176].mxu1 }
 0x6a0   :  { %8697 = vmatprep.mubr.msk.bf16.mxu0 %vm3351_vm3, %v10650_v43  ;;  %9392 = vmatprep.mubr.msk.bf16.mxu1 %vm10856_vm1, %v16850_v2  ;;  %16852 = vst [vmem:[#allocation66_spill] sm:$0xff] %v13748_v21 }
 0x6a1   :  { %9417 = vmatpush3.bf16.msra.mxu1 %v10659_v28 }
 0x6a2   :  { %v13737_v63 = vpop.f32.mrb[164].mxu0  ;;  %9418 = vmatprep.subr.bf16.mxu1 %v16850_v2 }
 0x6a3   :  { %v4246_v33 = vpop.f32.mrb[165].mxu0 }
 0x6a4   :  { %v13743_v31 = vpop.f32.mrb[166].mxu0  ;;  %v4061_v33 = vpop.f32.mrb[177].mxu1 }
 0x6a5   :  { %v4249_v28 = vpop.f32.mrb[167].mxu0  ;;  %9419 = vmatpush3.bf16.msra.mxu1 %v10660_v27  ;;  %v13759_v35 = vpop.f32.mrb[178].mxu1 }
 0x6a6   :  { %9420 = vmatprep.subr.bf16.mxu1 %v16850_v2  ;;  %16854 = vst [vmem:[#allocation68_spill] sm:$0xff] %v13759_v35  ;;  %v4064_v27 = vpop.f32.mrb[179].mxu1  ;;  %v10665_v28 = vld [vmem:[%s16415_s5 + $0xa8] sm:$0xff]   ;;  %v16856_v35 = vpack.c.bf16 %v13493_v26, %v13488_v42 }
 0x6a7   :  { %4459 = vmatmul.mubr.bf16.gmra.mrb[16].mxu0 %v10648_v46  ;;  %9393 = vmatmul.mubr.bf16.gmra.mrb[196].mxu1 %v16853_v8  ;;  %v10658_v8 = vld [vmem:[%s16414_s4 + $0x5ac] ss:$16 sps:$4 sm:$0xff]   ;;  %v10669_v27 = vld [vmem:[%s16415_s5 + $0xb0] sm:$0xff]   ;;  %v10656_v42 = vld [vmem:[%s16414_s4 + $0x5a8] ss:$16 sps:$4 sm:$0xff]  }
 0x6a8   :  { %8698 = vmatprep.mubr.msk.bf16.mxu0 %vm3351_vm3, %v10653_v34  ;;  %9396 = vmatprep.mubr.msk.bf16.mxu1 %vm10856_vm1, %v16850_v2  ;;  %v13778_v34 = vpop.f32.mrb[180].mxu1 }
 0x6a9   :  { %9421 = vmatpush3.bf16.msra.mxu1 %v10664_v24  ;;  %16855 = vst [vmem:[#allocation8_spill] sm:$0xff] %v13778_v34 }
 0x6aa   :  { %v13767_v43 = vpop.f32.mrb[168].mxu0  ;;  %9422 = vmatprep.subr.bf16.mxu1 %v16850_v2 }
 0x6ab   :  { %v4254_v46 = vpop.f32.mrb[169].mxu0 }
 0x6ac   :  { %v13773_v49 = vpop.f32.mrb[170].mxu0  ;;  %v4069_v46 = vpop.f32.mrb[181].mxu1 }
 0x6ad   :  { %v4257_v33 = vpop.f32.mrb[171].mxu0  ;;  %9423 = vmatpush3.bf16.msra.mxu1 %v10665_v28  ;;  %v13789_v21 = vpop.f32.mrb[182].mxu1 }
 0x6ae   :  { %9424 = vmatprep.subr.bf16.mxu1 %v16850_v2  ;;  %16857 = vst [vmem:[#allocation9_spill] sm:$0xff] %v13789_v21  ;;  %v4072_v28 = vpop.f32.mrb[183].mxu1  ;;  %v10670_v33 = vld [vmem:[%s16415_s5 + $0xb8] sm:$0xff]  }
 0x6af   :  { %4467 = vmatmul.mubr.bf16.gmra.mrb[20].mxu0 %v10651_v9  ;;  %9397 = vmatmul.mubr.bf16.gmra.mrb[200].mxu1 %v16856_v35  ;;  %v10663_v35 = vld [vmem:[%s16414_s4 + $0x5cc] ss:$16 sps:$4 sm:$0xff]  }
 0x6b0   :  { %8699 = vmatprep.mubr.msk.bf16.mxu0 %vm3351_vm3, %v10658_v8  ;;  %9400 = vmatprep.mubr.msk.bf16.mxu1 %vm10856_vm1, %v16850_v2  ;;  %v13808_v8 = vpop.f32.mrb[184].mxu1 }
 0x6b1   :  { %9425 = vmatpush3.bf16.msra.mxu1 %v10669_v27  ;;  %16858 = vst [vmem:[#allocation10_spill] sm:$0xff] %v13808_v8  ;;  %v4077_v28 = vpop.f32.mrb[185].mxu1 }
 0x6b2   :  { %v13797_v24 = vpop.f32.mrb[172].mxu0  ;;  %9426 = vmatprep.subr.bf16.mxu1 %v16850_v2  ;;  %v13816_v21 = vpop.f32.mrb[186].mxu1 }
 0x6b3   :  { %v4262_v9 = vpop.f32.mrb[173].mxu0  ;;  %v4080_v8 = vpop.f32.mrb[187].mxu1 }
 0x6b4   :  { %v13803_v26 = vpop.f32.mrb[174].mxu0  ;;  %v16859_v9 = vpack.c.bf16 %v13510_v16, %v13505_v38  ;;  %v10668_v38 = vld [vmem:[%s16414_s4 + $0x5ec] ss:$16 sps:$4 sm:$0xff]   ;;  %v16860_v8 = vpack.c.bf16 %v13527_v30, %v13522_v11 }
 0x6b5   :  { %v4265_v46 = vpop.f32.mrb[175].mxu0  ;;  %9427 = vmatpush3.bf16.msra.mxu1 %v10670_v33  ;;  %v10661_v33 = vld [vmem:[%s16414_s4 + $0x5c8] ss:$16 sps:$4 sm:$0xff]  }
 0x6b6   :  { %9456 = vmatprep.subr.bf16.mxu1 %v16850_v2 }
 0x6b7   :  { %4475 = vmatmul.mubr.bf16.gmra.mrb[24].mxu0 %v10656_v42  ;;  %9401 = vmatmul.mubr.bf16.gmra.mrb[204].mxu1 %v16859_v9 }
 0x6b8   :  { %8700 = vmatprep.mubr.msk.bf16.mxu0 %vm3351_vm3, %v10663_v35  ;;  %9404 = vmatprep.mubr.msk.bf16.mxu1 %vm10856_vm1, %v16850_v2 }
 0x6ba   :  { %v13821_v34 = vpop.f32.mrb[176].mxu0 }
 0x6bb   :  { %v4270_v46 = vpop.f32.mrb[177].mxu0 }
 0x6bc   :  { %v13826_v42 = vpop.f32.mrb[178].mxu0  ;;  %v10666_v46 = vld [vmem:[%s16414_s4 + $0x5e8] ss:$16 sps:$4 sm:$0xff]  }
 0x6bd   :  { %v4273_v35 = vpop.f32.mrb[179].mxu0 }
 0x6bf   :  { %4483 = vmatmul.mubr.bf16.gmra.mrb[28].mxu0 %v10661_v33  ;;  %9405 = vmatmul.mubr.bf16.gmra.mrb[208].mxu1 %v16860_v8  ;;  %v10673_v33 = vld [vmem:[%s16414_s4 + $0x60c] ss:$16 sps:$4 sm:$0xff]  }
 0x6c0   :  { %8701 = vmatprep.mubr.msk.bf16.mxu0 %vm3351_vm3, %v10668_v38  ;;  %9408 = vmatprep.mubr.msk.bf16.mxu1 %vm10856_vm1, %v16850_v2  ;;  %v16861_v38 = vpack.c.bf16 %v13544_v44, %v13539_v20 }
 0x6c2   :  { %v13839_v28 = vpop.f32.mrb[180].mxu0 }
 0x6c3   :  { %v4278_v9 = vpop.f32.mrb[181].mxu0 }
 0x6c4   :  { %v13844_v27 = vpop.f32.mrb[182].mxu0  ;;  %v10671_v9 = vld [vmem:[%s16414_s4 + $0x608] ss:$16 sps:$4 sm:$0xff]  }
 0x6c5   :  { %v4281_v30 = vpop.f32.mrb[183].mxu0 }
 0x6c6   :  { %v16862_v30 = vpack.c.bf16 %v13684_v61, %v13679_v12  ;;  %v10674_v12 = vld [vmem:[%s16414_s4 + $0x628] ss:$16 sps:$4 sm:$0xff]  }
 0x6c7   :  { %4491 = vmatmul.mubr.bf16.gmra.mrb[32].mxu0 %v10666_v46  ;;  %9409 = vmatmul.mubr.bf16.gmra.mrb[212].mxu1 %v16861_v38  ;;  %v10676_v46 = vld [vmem:[%s16414_s4 + $0x62c] ss:$16 sps:$4 sm:$0xff]  }
 0x6c8   :  { %8702 = vmatprep.mubr.msk.bf16.mxu0 %vm3351_vm3, %v10673_v33  ;;  %9428 = vmatprep.mubr.msk.bf16.mxu1 %vm10856_vm1, %v16850_v2  ;;  %v10683_v33 = vld [vmem:[%s16415_s5 + $0xc0] sm:$0xff]   ;;  %v10684_v38 = vld [vmem:[%s16415_s5 + $0xc8] sm:$0xff]  }
 0x6ca   :  { %v13857_v35 = vpop.f32.mrb[184].mxu0 }
 0x6cb   :  { %v4286_v8 = vpop.f32.mrb[185].mxu0 }
 0x6cc   :  { %v13862_v16 = vpop.f32.mrb[186].mxu0 }
 0x6cd   :  { %v4289_v44 = vpop.f32.mrb[187].mxu0 }
 0x6cf   :  { %4499 = vmatmul.mubr.bf16.gmra.mrb[36].mxu0 %v10671_v9  ;;  %9429 = vmatmul.mubr.bf16.vlgmr.msra.gmra.mrb[188].mxu1 %v16862_v30  ;;  %v10679_v9 = vld [vmem:[%s16414_s4 + $0x64c] ss:$16 sps:$4 sm:$0xff]   ;;  %v10688_v30 = vld [vmem:[%s16415_s5 + $0xd0] sm:$0xff]  }
 0x6d0   :  { %8703 = vmatprep.mubr.msk.bf16.mxu0 %vm3351_vm3, %v10676_v46  ;;  %9432 = vmatprep.mubr.msk.bf16.mxu1 %vm10856_vm1, %v16850_v2 }
 0x6d1   :  { %9457 = vmatpush3.bf16.msra.mxu1 %v10683_v33 }
 0x6d2   :  { %v13881_v8 = vpop.f32.mrb[188].mxu0  ;;  %9458 = vmatprep.subr.bf16.mxu1 %v16850_v2 }
 0x6d3   :  { %v4294_v44 = vpop.f32.mrb[189].mxu0 }
 0x6d4   :  { %v13887_v61 = vpop.f32.mrb[190].mxu0  ;;  %v16863_v44 = vpack.c.bf16 %v13713_v58, %v13707_v36  ;;  %v10677_v36 = vld [vmem:[%s16414_s4 + $0x648] ss:$16 sps:$4 sm:$0xff]  }
 0x6d5   :  { %v4297_v33 = vpop.f32.mrb[191].mxu0  ;;  %9459 = vmatpush3.bf16.msra.mxu1 %v10684_v38  ;;  %v10689_v38 = vld [vmem:[%s16415_s5 + $0xd8] sm:$0xff]  }
 0x6d6   :  { %9460 = vmatprep.subr.bf16.mxu1 %v16850_v2 }
 0x6d7   :  { %4507 = vmatmul.mubr.bf16.gmra.mrb[40].mxu0 %v10674_v12  ;;  %9433 = vmatmul.mubr.bf16.gmra.mrb[192].mxu1 %v16863_v44  ;;  %v10682_v12 = vld [vmem:[%s16414_s4 + $0x66c] ss:$16 sps:$4 sm:$0xff]   ;;  %v10693_v44 = vld [vmem:[%s16415_s5 + $0xe0] sm:$0xff]  }
 0x6d8   :  { %8704 = vmatprep.mubr.msk.bf16.mxu0 %vm3351_vm3, %v10679_v9  ;;  %9436 = vmatprep.mubr.msk.bf16.mxu1 %vm10856_vm1, %v16850_v2 }
 0x6d9   :  { %9461 = vmatpush3.bf16.msra.mxu1 %v10688_v30 }
 0x6da   :  { %v13907_v33 = vpop.f32.mrb[192].mxu0  ;;  %9462 = vmatprep.subr.bf16.mxu1 %v16850_v2 }
 0x6db   :  { %v4302_v46 = vpop.f32.mrb[193].mxu0 }
 0x6dc   :  { %v13913_v58 = vpop.f32.mrb[194].mxu0  ;;  %v16864_v46 = vpack.c.bf16 %v13743_v31, %v13737_v63  ;;  %v10680_v63 = vld [vmem:[%s16414_s4 + $0x668] ss:$16 sps:$4 sm:$0xff]  }
 0x6dd   :  { %v4305_v30 = vpop.f32.mrb[195].mxu0  ;;  %9463 = vmatpush3.bf16.msra.mxu1 %v10689_v38  ;;  %v10694_v38 = vld [vmem:[%s16415_s5 + $0xe8] sm:$0xff]  }
 0x6de   :  { %9464 = vmatprep.subr.bf16.mxu1 %v16850_v2 }
 0x6df   :  { %4515 = vmatmul.mubr.bf16.gmra.mrb[44].mxu0 %v10677_v36  ;;  %9437 = vmatmul.mubr.bf16.gmra.mrb[196].mxu1 %v16864_v46  ;;  %v10687_v36 = vld [vmem:[%s16414_s4 + $0x68c] ss:$16 sps:$4 sm:$0xff]   ;;  %v10698_v46 = vld [vmem:[%s16415_s5 + $0xf0] sm:$0xff]  }
 0x6e0   :  { %8705 = vmatprep.mubr.msk.bf16.mxu0 %vm3351_vm3, %v10682_v12  ;;  %9440 = vmatprep.mubr.msk.bf16.mxu1 %vm10856_vm1, %v16850_v2 }
 0x6e1   :  { %9465 = vmatpush3.bf16.msra.mxu1 %v10693_v44 }
 0x6e2   :  { %v13933_v30 = vpop.f32.mrb[196].mxu0  ;;  %9466 = vmatprep.subr.bf16.mxu1 %v16850_v2 }
 0x6e3   :  { %v4310_v9 = vpop.f32.mrb[197].mxu0 }
 0x6e4   :  { %v13939_v31 = vpop.f32.mrb[198].mxu0  ;;  %v16865_v9 = vpack.c.bf16 %v13773_v49, %v13767_v43  ;;  %v10685_v43 = vld [vmem:[%s16414_s4 + $0x688] ss:$16 sps:$4 sm:$0xff]  }
 0x6e5   :  { %v4313_v44 = vpop.f32.mrb[199].mxu0  ;;  %9467 = vmatpush3.bf16.msra.mxu1 %v10694_v38  ;;  %v10699_v38 = vld [vmem:[%s16415_s5 + $0xf8] sm:$0xff]  }
 0x6e6   :  { %9468 = vmatprep.subr.bf16.mxu1 %v16850_v2 }
 0x6e7   :  { %4523 = vmatmul.mubr.bf16.gmra.mrb[48].mxu0 %v10680_v63  ;;  %9441 = vmatmul.mubr.bf16.gmra.mrb[200].mxu1 %v16865_v9  ;;  %v10692_v63 = vld [vmem:[%s16414_s4 + $0x6ac] ss:$16 sps:$4 sm:$0xff]  }
 0x6e8   :  { %8706 = vmatprep.mubr.msk.bf16.mxu0 %vm3351_vm3, %v10687_v36  ;;  %9444 = vmatprep.mubr.msk.bf16.mxu1 %vm10856_vm1, %v16850_v2  ;;  %v10695_v36 = vld [vmem:[%s16414_s4 + $0x6c8] ss:$16 sps:$4 sm:$0xff]  }
 0x6e9   :  { %9469 = vmatpush3.bf16.msra.mxu1 %v10698_v46 }
 0x6ea   :  { %v13959_v44 = vpop.f32.mrb[200].mxu0  ;;  %9470 = vmatprep.subr.bf16.mxu1 %v16850_v2 }
 0x6eb   :  { %v4318_v12 = vpop.f32.mrb[201].mxu0 }
 0x6ec   :  { %v13965_v49 = vpop.f32.mrb[202].mxu0  ;;  %v16866_v12 = vpack.c.bf16 %v13803_v26, %v13797_v24 }
 0x6ed   :  { %v4321_v46 = vpop.f32.mrb[203].mxu0  ;;  %9471 = vmatpush3.bf16.msra.mxu1 %v10699_v38 }
 0x6ee   :  { %9500 = vmatprep.subr.bf16.mxu1 %v16850_v2  ;;  %v10690_v46 = vld [vmem:[%s16414_s4 + $0x6a8] ss:$16 sps:$4 sm:$0xff]  }
 0x6ef   :  { %4531 = vmatmul.mubr.bf16.gmra.mrb[52].mxu0 %v10685_v43  ;;  %9445 = vmatmul.mubr.bf16.gmra.mrb[204].mxu1 %v16866_v12  ;;  %v10697_v43 = vld [vmem:[%s16414_s4 + $0x6cc] ss:$16 sps:$4 sm:$0xff]  }
 0x6f0   :  { %8707 = vmatprep.mubr.msk.bf16.mxu0 %vm3351_vm3, %v10692_v63  ;;  %9448 = vmatprep.mubr.msk.bf16.mxu1 %vm10856_vm1, %v16850_v2  ;;  %v16867_v63 = vpack.c.bf16 %v13826_v42, %v13821_v34 }
 0x6f2   :  { %v13979_v9 = vpop.f32.mrb[204].mxu0 }
 0x6f3   :  { %v4326_v20 = vpop.f32.mrb[205].mxu0 }
 0x6f4   :  { %v13984_v38 = vpop.f32.mrb[206].mxu0 }
 0x6f5   :  { %v4329_v26 = vpop.f32.mrb[207].mxu0 }
 0x6f7   :  { %4539 = vmatmul.mubr.bf16.gmra.mrb[56].mxu0 %v10690_v46  ;;  %9449 = vmatmul.mubr.bf16.gmra.mrb[208].mxu1 %v16867_v63  ;;  %v10702_v46 = vld [vmem:[%s16414_s4 + $0x6ec] ss:$16 sps:$4 sm:$0xff]  }
 0x6f8   :  { %8708 = vmatprep.mubr.msk.bf16.mxu0 %vm3351_vm3, %v10697_v43  ;;  %9452 = vmatprep.mubr.msk.bf16.mxu1 %vm10856_vm1, %v16850_v2  ;;  %v16868_v43 = vpack.c.bf16 %v13844_v27, %v13839_v28  ;;  %v10712_v28 = vld [vmem:[%s16415_s5 + $0x100] sm:$0xff]  }
 0x6fa   :  { %v13997_v20 = vpop.f32.mrb[208].mxu0 }
 0x6fb   :  { %v4334_v12 = vpop.f32.mrb[209].mxu0 }
 0x6fc   :  { %v14002_v11 = vpop.f32.mrb[210].mxu0  ;;  %v10700_v12 = vld [vmem:[%s16414_s4 + $0x6e8] ss:$16 sps:$4 sm:$0xff]  }
 0x6fd   :  { %v4646_v34 = vpack.c.bf16 %v14002_v11, %v13997_v20  ;;  %v4337_v42 = vpop.f32.mrb[211].mxu0 }
 0x6ff   :  { %4547 = vmatmul.mubr.bf16.gmra.mrb[60].mxu0 %v10695_v36  ;;  %9453 = vmatmul.mubr.bf16.gmra.mrb[212].mxu1 %v16868_v43  ;;  %v10705_v36 = vld [vmem:[%s16414_s4 + $0x70c] ss:$16 sps:$4 sm:$0xff]  }
 0x700   :  { %8709 = vmatprep.mubr.msk.bf16.mxu0 %vm3351_vm3, %v10702_v46  ;;  %9472 = vmatprep.mubr.msk.bf16.mxu1 %vm10856_vm1, %v16850_v2  ;;  %v16869_v46 = vpack.c.bf16 %v13862_v16, %v13857_v35  ;;  %v10708_v35 = vld [vmem:[%s16414_s4 + $0x72c] ss:$16 sps:$4 sm:$0xff]  }
 0x702   :  { %v4340_v26 = vpop.f32.mrb[212].mxu0 }
 0x703   :  { %v4342_v63 = vpop.f32.mrb[213].mxu0 }
 0x704   :  { %v4343_v24 = vpop.f32.mrb[214].mxu0  ;;  %v10703_v63 = vld [vmem:[%s16414_s4 + $0x708] ss:$16 sps:$4 sm:$0xff]  }
 0x705   :  { %v14021_v42 = vpack.c.bf16 %v4343_v24, %v4340_v26  ;;  %v4345_v27 = vpop.f32.mrb[215].mxu0  ;;  %v10713_v24 = vld [vmem:[%s16415_s5 + $0x108] sm:$0xff]  }
 0x706   :  { %v10717_v27 = vld [vmem:[%s16415_s5 + $0x110] sm:$0xff]  }
 0x707   :  { %4555 = vmatmul.mubr.bf16.gmra.mrb[64].mxu0 %v10700_v12  ;;  %9473 = vmatmul.mubr.bf16.vlgmr.msra.gmra.mrb[188].mxu1 %v16869_v46  ;;  %v10718_v46 = vld [vmem:[%s16415_s5 + $0x118] sm:$0xff]  }
 0x708   :  { %8710 = vmatprep.mubr.msk.bf16.mxu0 %vm3351_vm3, %v10705_v36  ;;  %9476 = vmatprep.mubr.msk.bf16.mxu1 %vm10856_vm1, %v16850_v2 }
 0x709   :  { %9501 = vmatpush3.bf16.msra.mxu1 %v10712_v28  ;;  %v16870_v28 = vpack.c.bf16 %v13887_v61, %v13881_v8  ;;  %v10711_v61 = vld [vmem:[%s16414_s4 + $0x74c] ss:$16 sps:$4 sm:$0xff]  }
 0x70a   :  { %v4348_v43 = vpop.f32.mrb[216].mxu0  ;;  %9502 = vmatprep.subr.bf16.mxu1 %v16850_v2 }
 0x70b   :  { %v4350_v26 = vpop.f32.mrb[217].mxu0 }
 0x70c   :  { %v4351_v16 = vpop.f32.mrb[218].mxu0  ;;  %v10706_v26 = vld [vmem:[%s16414_s4 + $0x728] ss:$16 sps:$4 sm:$0xff]  }
 0x70d   :  { %v14042_v12 = vpack.c.bf16 %v4351_v16, %v4348_v43  ;;  %v4353_v36 = vpop.f32.mrb[219].mxu0  ;;  %9503 = vmatpush3.bf16.msra.mxu1 %v10713_v24 }
 0x70e   :  { %9504 = vmatprep.subr.bf16.mxu1 %v16850_v2  ;;  %v16872_v36 = vpack.c.bf16 %v13913_v58, %v13907_v33  ;;  %v10716_v58 = vld [vmem:[%s16414_s4 + $0x76c] ss:$16 sps:$4 sm:$0xff]  }
 0x70f   :  { %4563 = vmatmul.mubr.bf16.gmra.mrb[68].mxu0 %v10703_v63  ;;  %9477 = vmatmul.mubr.bf16.gmra.mrb[192].mxu1 %v16870_v28 }
 0x710   :  { %8711 = vmatprep.mubr.msk.bf16.mxu0 %vm3351_vm3, %v10708_v35  ;;  %9480 = vmatprep.mubr.msk.bf16.mxu1 %vm10856_vm1, %v16850_v2  ;;  %v10722_v35 = vld [vmem:[%s16415_s5 + $0x120] sm:$0xff]  }
 0x711   :  { %9505 = vmatpush3.bf16.msra.mxu1 %v10717_v27  ;;  %v10723_v27 = vld [vmem:[%s16415_s5 + $0x128] sm:$0xff]  }
 0x712   :  { %v4356_v24 = vpop.f32.mrb[220].mxu0  ;;  %9506 = vmatprep.subr.bf16.mxu1 %v16850_v2 }
 0x713   :  { %v4358_v43 = vpop.f32.mrb[221].mxu0 }
 0x714   :  { %v4359_v8 = vpop.f32.mrb[222].mxu0 }
 0x715   :  { %v14064_v63 = vpack.c.bf16 %v4359_v8, %v4356_v24  ;;  %v4361_v16 = vpop.f32.mrb[223].mxu0  ;;  %9507 = vmatpush3.bf16.msra.mxu1 %v10718_v46  ;;  %v10709_v24 = vld [vmem:[%s16414_s4 + $0x748] ss:$16 sps:$4 sm:$0xff]   ;;  %v10727_v8 = vld [vmem:[%s16415_s5 + $0x130] sm:$0xff]  }
 0x716   :  { %9508 = vmatprep.subr.bf16.mxu1 %v16850_v2  ;;  %v10728_v16 = vld [vmem:[%s16415_s5 + $0x138] sm:$0xff]  }
 0x717   :  { %16871 = vst [vmem:[#allocation11_spill] sm:$0xff] %v14064_v63  ;;  %4571 = vmatmul.mubr.bf16.gmra.mrb[72].mxu0 %v10706_v26  ;;  %9481 = vmatmul.mubr.bf16.gmra.mrb[196].mxu1 %v16872_v36 }
 0x718   :  { %8712 = vmatprep.mubr.msk.bf16.mxu0 %vm3351_vm3, %v10711_v61  ;;  %9484 = vmatprep.mubr.msk.bf16.mxu1 %vm10856_vm1, %v16850_v2  ;;  %v16874_v61 = vpack.c.bf16 %v13939_v31, %v13933_v30  ;;  %v10721_v31 = vld [vmem:[%s16414_s4 + $0x78c] ss:$16 sps:$4 sm:$0xff]  }
 0x719   :  { %9509 = vmatpush3.bf16.msra.mxu1 %v10722_v35 }
 0x71a   :  { %v4364_v28 = vpop.f32.mrb[224].mxu0  ;;  %9510 = vmatprep.subr.bf16.mxu1 %v16850_v2 }
 0x71b   :  { %v4366_v46 = vpop.f32.mrb[225].mxu0 }
 0x71c   :  { %v4367_v33 = vpop.f32.mrb[226].mxu0 }
 0x71d   :  { %v14086_v43 = vpack.c.bf16 %v4367_v33, %v4364_v28  ;;  %v4369_v26 = vpop.f32.mrb[227].mxu0  ;;  %9511 = vmatpush3.bf16.msra.mxu1 %v10723_v27  ;;  %v10714_v27 = vld [vmem:[%s16414_s4 + $0x768] ss:$16 sps:$4 sm:$0xff]  }
 0x71e   :  { %9512 = vmatprep.subr.bf16.mxu1 %v16850_v2  ;;  %v10719_v26 = vld [vmem:[%s16414_s4 + $0x788] ss:$16 sps:$4 sm:$0xff]  }
 0x71f   :  { %16873 = vst [vmem:[#allocation44_spill] sm:$0xff] %v14086_v43  ;;  %4579 = vmatmul.mubr.bf16.gmra.mrb[76].mxu0 %v10709_v24  ;;  %9485 = vmatmul.mubr.bf16.gmra.mrb[200].mxu1 %v16874_v61  ;;  %v16876_v24 = vpack.c.bf16 %v13965_v49, %v13959_v44  ;;  %v10726_v61 = vld [vmem:[%s16414_s4 + $0x7ac] ss:$16 sps:$4 sm:$0xff]   ;;  %v16877_v49 = vpack.c.bf16 %v13984_v38, %v13979_v9 }
 0x720   :  { %8713 = vmatprep.mubr.msk.bf16.mxu0 %vm3351_vm3, %v10716_v58  ;;  %9488 = vmatprep.mubr.msk.bf16.mxu1 %vm10856_vm1, %v16850_v2 }
 0x721   :  { %9513 = vmatpush3.bf16.msra.mxu1 %v10727_v8 }
 0x722   :  { %v4372_v35 = vpop.f32.mrb[228].mxu0  ;;  %9514 = vmatprep.subr.bf16.mxu1 %v16850_v2 }
 0x723   :  { %v4374_v36 = vpop.f32.mrb[229].mxu0 }
 0x724   :  { %v4375_v30 = vpop.f32.mrb[230].mxu0 }
 0x725   :  { %v14108_v28 = vpack.c.bf16 %v4375_v30, %v4372_v35  ;;  %v4377_v46 = vpop.f32.mrb[231].mxu0  ;;  %9515 = vmatpush3.bf16.msra.mxu1 %v10728_v16 }
 0x726   :  { %9544 = vmatprep.subr.bf16.mxu1 %v16850_v2 }
 0x727   :  { %16875 = vst [vmem:[#allocation46_spill] sm:$0xff] %v14108_v28  ;;  %4587 = vmatmul.mubr.bf16.gmra.mrb[80].mxu0 %v10714_v27  ;;  %9489 = vmatmul.mubr.bf16.gmra.mrb[204].mxu1 %v16876_v24  ;;  %v10724_v27 = vld [vmem:[%s16414_s4 + $0x7a8] ss:$16 sps:$4 sm:$0xff]  }
 0x728   :  { %8714 = vmatprep.mubr.msk.bf16.mxu0 %vm3351_vm3, %v10721_v31  ;;  %9492 = vmatprep.mubr.msk.bf16.mxu1 %vm10856_vm1, %v16850_v2  ;;  %v10731_v31 = vld [vmem:[%s16414_s4 + $0x7cc] ss:$16 sps:$4 sm:$0xff]  }
 0x72a   :  { %v4380_v33 = vpop.f32.mrb[232].mxu0 }
 0x72b   :  { %v4382_v58 = vpop.f32.mrb[233].mxu0 }
 0x72c   :  { %v4383_v8 = vpop.f32.mrb[234].mxu0 }
 0x72d   :  { %v14123_v16 = vpack.c.bf16 %v4383_v8, %v4380_v33  ;;  %v4385_v44 = vpop.f32.mrb[235].mxu0  ;;  %v10729_v33 = vld [vmem:[%s16414_s4 + $0x7c8] ss:$16 sps:$4 sm:$0xff]  }
 0x72f   :  { %4595 = vmatmul.mubr.bf16.gmra.mrb[84].mxu0 %v10719_v26  ;;  %9493 = vmatmul.mubr.bf16.gmra.mrb[208].mxu1 %v16877_v49  ;;  %v10732_v26 = vld [vmem:[%s16415_s5 + $0x140] sm:$0xff]   ;;  %v10734_v49 = vld [vmem:[%s16415_s5 + $0x150] sm:$0xff]  }
 0x730   :  { %8715 = vmatprep.mubr.msk.bf16.mxu0 %vm3351_vm3, %v10726_v61  ;;  %9496 = vmatprep.mubr.msk.bf16.mxu1 %vm10856_vm1, %v16850_v2 }
 0x732   :  { %v4388_v35 = vpop.f32.mrb[236].mxu0 }
 0x733   :  { %v4390_v36 = vpop.f32.mrb[237].mxu0 }
 0x734   :  { %v4391_v30 = vpop.f32.mrb[238].mxu0 }
 0x735   :  { %v14137_v46 = vpack.c.bf16 %v4391_v30, %v4388_v35  ;;  %v4393_v9 = vpop.f32.mrb[239].mxu0 }
 0x737   :  { %4603 = vmatmul.mubr.bf16.gmra.mrb[88].mxu0 %v10724_v27  ;;  %9497 = vmatmul.mubr.bf16.gmra.mrb[212].mxu1 %v4646_v34  ;;  %v10733_v34 = vld [vmem:[%s16415_s5 + $0x148] sm:$0xff]   ;;  %v10735_v27 = vld [vmem:[%s16415_s5 + $0x158] sm:$0xff]  }
 0x738   :  { %8716 = vmatprep.mubr.msk.bf16.mxu0 %vm3351_vm3, %v10731_v31  ;;  %9516 = vmatprep.mubr.msk.bf16.mxu1 %vm10856_vm1, %v16850_v2 }
 0x73a   :  { %v14145_v38 = vpop.f32.mrb[240].mxu0 }
 0x73b   :  { %v4398_v24 = vpop.f32.mrb[241].mxu0 }
 0x73c   :  { %v14150_v58 = vpop.f32.mrb[242].mxu0  ;;  %v10736_v24 = vld [vmem:[%s16415_s5 + $0x160] sm:$0xff]  }
 0x73d   :  { %v4401_v20 = vpop.f32.mrb[243].mxu0 }
 0x73e   :  { %v10737_v20 = vld [vmem:[%s16415_s5 + $0x168] sm:$0xff]  }
 0x73f   :  { %4611 = vmatmul.mubr.bf16.gmra.mrb[92].mxu0 %v10729_v33  ;;  %9517 = vmatmul.mubr.bf16.vlgmr.msra.gmra.mrb[188].mxu1 %v14021_v42 }
 0x740   :  { %9520 = vmatprep.mubr.msk.bf16.mxu1 %vm10856_vm1, %v16850_v2  ;;  %9545 = vmatpush3.bf16.msra.mxu1 %v10732_v26 }
 0x741   :  { %9546 = vmatprep.subr.bf16.mxu1 %v16850_v2 }
 0x742   :  { %v14164_v8 = vpop.f32.mrb[244].mxu0 }
 0x743   :  { %v4406_v61 = vpop.f32.mrb[245].mxu0 }
 0x744   :  { %v14166_v44 = vpop.f32.mrb[246].mxu0  ;;  %9547 = vmatpush3.bf16.msra.mxu1 %v10733_v34 }
 0x745   :  { %v4409_v36 = vpop.f32.mrb[247].mxu0  ;;  %9548 = vmatprep.subr.bf16.mxu1 %v16850_v2 }
 0x746   :  { %v10738_v36 = vld [vmem:[%s16415_s5 + $0x170] sm:$0xff]  }
 0x747   :  { %9521 = vmatmul.mubr.bf16.gmra.mrb[192].mxu1 %v14042_v12 }
 0x748   :  { %9524 = vmatprep.mubr.msk.bf16.mxu1 %vm10856_vm1, %v16850_v2  ;;  %9549 = vmatpush3.bf16.msra.mxu1 %v10734_v49 }
 0x749   :  { %9550 = vmatprep.subr.bf16.mxu1 %v16850_v2 }
 0x74a   :  { %v14181_v30 = vpop.f32.mrb[248].mxu0 }
 0x74b   :  { %v4414_v31 = vpop.f32.mrb[249].mxu0 }
 0x74c   :  { %v14183_v9 = vpop.f32.mrb[250].mxu0  ;;  %9551 = vmatpush3.bf16.msra.mxu1 %v10735_v27 }
 0x74d   :  { %v4417_v26 = vpop.f32.mrb[251].mxu0  ;;  %9552 = vmatprep.subr.bf16.mxu1 %v16850_v2 }
 0x74f   :  { %9525 = vmatmul.mubr.bf16.gmra.mrb[196].mxu1 %v14064_v63  ;;  %v16878_v63 = vpack.c.bf16 %v14150_v58, %v14145_v38 }
 0x750   :  { %9528 = vmatprep.mubr.msk.bf16.mxu1 %vm10856_vm1, %v16850_v2  ;;  %9553 = vmatpush3.bf16.msra.mxu1 %v10736_v24  ;;  %v10739_v24 = vld [vmem:[%s16415_s5 + $0x178] sm:$0xff]  }
 0x751   :  { %9554 = vmatprep.subr.bf16.mxu1 %v16850_v2 }
 0x752   :  { %v14198_v34 = vpop.f32.mrb[252].mxu0 }
 0x753   :  { %v4422_v61 = vpop.f32.mrb[253].mxu0 }
 0x754   :  { %v14200_v49 = vpop.f32.mrb[254].mxu0  ;;  %9555 = vmatpush3.bf16.msra.mxu1 %v10737_v20 }
 0x755   :  { %v4425_v31 = vpop.f32.mrb[255].mxu0  ;;  %9556 = vmatprep.subr.bf16.mxu1 %v16850_v2 }
 0x757   :  { %9529 = vmatmul.mubr.bf16.gmra.mrb[200].mxu1 %v14086_v43 }
 0x758   :  { %9532 = vmatprep.mubr.msk.bf16.mxu1 %vm10856_vm1, %v16850_v2  ;;  %9557 = vmatpush3.bf16.msra.mxu1 %v10738_v36 }
 0x759   :  { %9558 = vmatprep.subr.bf16.mxu1 %v16850_v2 }
 0x75a   :  { %v14215_v26 = vpop.f32.mrb[0].mxu0 }
 0x75b   :  { %v4430_v20 = vpop.f32.mrb[1].mxu0 }
 0x75c   :  { %v14217_v61 = vpop.f32.mrb[2].mxu0  ;;  %9559 = vmatpush3.bf16.msra.mxu1 %v10739_v24 }
 0x75d   :  { %v4433_v27 = vpop.f32.mrb[3].mxu0  ;;  %9588 = vmatprep.subr.bf16.mxu1 %v16850_v2 }
 0x75f   :  { %9533 = vmatmul.mubr.bf16.gmra.mrb[204].mxu1 %v14108_v28 }
 0x760   :  { %9536 = vmatprep.mubr.msk.bf16.mxu1 %vm10856_vm1, %v16850_v2 }
 0x762   :  { %v14225_v36 = vpop.f32.mrb[4].mxu0 }
 0x763   :  { %v4438_v33 = vpop.f32.mrb[5].mxu0 }
 0x764   :  { %v14227_v35 = vpop.f32.mrb[6].mxu0 }
 0x765   :  { %v4441_v24 = vpop.f32.mrb[7].mxu0 }
 0x767   :  { %9537 = vmatmul.mubr.bf16.gmra.mrb[208].mxu1 %v14123_v16 }
 0x768   :  { %9540 = vmatprep.mubr.msk.bf16.mxu1 %vm10856_vm1, %v16850_v2 }
 0x76a   :  { %v4444_v27 = vpop.f32.mrb[8].mxu0 }
 0x76b   :  { %v14235_v31 = vadd.f32 %v4444_v27, %v13410_v37  ;;  %v4446_v11 = vpop.f32.mrb[9].mxu0 }
 0x76c   :  { %v4447_v28 = vpop.f32.mrb[10].mxu0 }
 0x76d   :  { %v14238_v43 = vadd.f32 %v4447_v28, %v13412_v0  ;;  %v4449_v33 = vpop.f32.mrb[11].mxu0  ;;  %v10740_v0 = vld [vmem:[%s16415_s5 + $0x180] sm:$0xff]  }
 0x76f   :  { %9541 = vmatmul.mubr.bf16.gmra.mrb[212].mxu1 %v14137_v46 }
 0x770   :  { %9560 = vmatprep.mubr.msk.bf16.mxu1 %vm10856_vm1, %v16850_v2 }
 0x772   :  { %v4452_v24 = vpop.f32.mrb[12].mxu0 }
 0x773   :  { %v14246_v20 = vadd.f32 %v4452_v24, %v13421_v57  ;;  %v4454_v37 = vpop.f32.mrb[13].mxu0  ;;  %v10741_v57 = vld [vmem:[%s16415_s5 + $0x188] sm:$0xff]  }
 0x774   :  { %v4455_v27 = vpop.f32.mrb[14].mxu0 }
 0x775   :  { %v14252_v28 = vadd.f32 %v4455_v27, %v13423_v32  ;;  %v4457_v11 = vpop.f32.mrb[15].mxu0 }
 0x776   :  { %v10743_v11 = vld [vmem:[%s16415_s5 + $0x198] sm:$0xff]  }
 0x777   :  { %v4661_v33 = vpack.c.bf16 %v14252_v28, %v14246_v20  ;;  %9561 = vmatmul.mubr.bf16.vlgmr.msra.gmra.mrb[188].mxu1 %v16878_v63  ;;  %v10742_v63 = vld [vmem:[%s16415_s5 + $0x190] sm:$0xff]  }
 0x778   :  { %9564 = vmatprep.mubr.msk.bf16.mxu1 %vm10856_vm1, %v16850_v2  ;;  %9589 = vmatpush3.bf16.msra.mxu1 %v10740_v0  ;;  %v10750_v20 = vld [vmem:[%s16415_s5 + $0x1d0] sm:$0xff]  }
 0x779   :  { %9590 = vmatprep.subr.bf16.mxu1 %v16850_v2 }
 0x77a   :  { %v4460_v32 = vpop.f32.mrb[16].mxu0 }
 0x77b   :  { %v14266_v24 = vadd.f32 %v4460_v32, %v13432_v10  ;;  %v4462_v37 = vpop.f32.mrb[17].mxu0  ;;  %v16879_v10 = vpack.c.bf16 %v14166_v44, %v14164_v8  ;;  %v10744_v8 = vld [vmem:[%s16415_s5 + $0x1a0] sm:$0xff]  }
 0x77c   :  { %v4463_v27 = vpop.f32.mrb[18].mxu0  ;;  %9591 = vmatpush3.bf16.msra.mxu1 %v10741_v57 }
 0x77d   :  { %v14272_v38 = vadd.f32 %v4463_v27, %v13434_v52  ;;  %v4465_v58 = vpop.f32.mrb[19].mxu0  ;;  %9592 = vmatprep.subr.bf16.mxu1 %v16850_v2 }
 0x77e   :  { %v10745_v58 = vld [vmem:[%s16415_s5 + $0x1a8] sm:$0xff]  }
 0x77f   :  { %v4662_v0 = vpack.c.bf16 %v14272_v38, %v14266_v24  ;;  %9565 = vmatmul.mubr.bf16.gmra.mrb[192].mxu1 %v16879_v10  ;;  %v10752_v24 = vld [vmem:[%s16415_s5 + $0x1e0] sm:$0xff]  }
 0x780   :  { %9568 = vmatprep.mubr.msk.bf16.mxu1 %vm10856_vm1, %v16850_v2  ;;  %9593 = vmatpush3.bf16.msra.mxu1 %v10742_v63 }
 0x781   :  { %9594 = vmatprep.subr.bf16.mxu1 %v16850_v2 }
 0x782   :  { %v4468_v52 = vpop.f32.mrb[20].mxu0 }
 0x783   :  { %v14287_v57 = vadd.f32 %v4468_v52, %v13447_v39  ;;  %v4470_v32 = vpop.f32.mrb[21].mxu0  ;;  %v16880_v39 = vpack.c.bf16 %v14183_v9, %v14181_v30  ;;  %v10746_v30 = vld [vmem:[%s16415_s5 + $0x1b0] sm:$0xff]  }
 0x784   :  { %v4471_v37 = vpop.f32.mrb[22].mxu0  ;;  %9595 = vmatpush3.bf16.msra.mxu1 %v10743_v11 }
 0x785   :  { %v14293_v44 = vadd.f32 %v4471_v37, %v13451_v48  ;;  %v4473_v27 = vpop.f32.mrb[23].mxu0  ;;  %9596 = vmatprep.subr.bf16.mxu1 %v16850_v2 }
 0x787   :  { %v4663_v63 = vpack.c.bf16 %v14293_v44, %v14287_v57  ;;  %9569 = vmatmul.mubr.bf16.gmra.mrb[196].mxu1 %v16880_v39  ;;  %v10754_v57 = vld [vmem:[%s16415_s5 + $0x1f0] sm:$0xff]  }
 0x788   :  { %9572 = vmatprep.mubr.msk.bf16.mxu1 %vm10856_vm1, %v16850_v2  ;;  %9597 = vmatpush3.bf16.msra.mxu1 %v10744_v8  ;;  %v10747_v8 = vld [vmem:[%s16415_s5 + $0x1b8] sm:$0xff]  }
 0x789   :  { %9598 = vmatprep.subr.bf16.mxu1 %v16850_v2 }
 0x78a   :  { %v4476_v48 = vpop.f32.mrb[24].mxu0 }
 0x78b   :  { %v14308_v10 = vadd.f32 %v4476_v48, %v13464_v47  ;;  %v4478_v11 = vpop.f32.mrb[25].mxu0  ;;  %v16881_v47 = vpack.c.bf16 %v14200_v49, %v14198_v34 }
 0x78c   :  { %v4479_v52 = vpop.f32.mrb[26].mxu0  ;;  %9599 = vmatpush3.bf16.msra.mxu1 %v10745_v58  ;;  %v16882_v11 = vpack.c.bf16 %v14217_v61, %v14215_v26  ;;  %v16883_v26 = vpack.c.bf16 %v14227_v35, %v14225_v36  ;;  %v16884_v35 = vpack.c.bf16 %v14238_v43, %v14235_v31 }
 0x78d   :  { %v14314_v9 = vadd.f32 %v4479_v52, %v13468_v15  ;;  %v4481_v32 = vpop.f32.mrb[27].mxu0  ;;  %9600 = vmatprep.subr.bf16.mxu1 %v16850_v2 }
 0x78f   :  { %v4664_v37 = vpack.c.bf16 %v14314_v9, %v14308_v10  ;;  %9573 = vmatmul.mubr.bf16.gmra.mrb[200].mxu1 %v16881_v47 }
 0x790   :  { %9576 = vmatprep.mubr.msk.bf16.mxu1 %vm10856_vm1, %v16850_v2  ;;  %9601 = vmatpush3.bf16.msra.mxu1 %v10746_v30 }
 0x791   :  { %9602 = vmatprep.subr.bf16.mxu1 %v16850_v2 }
 0x792   :  { %v4484_v15 = vpop.f32.mrb[28].mxu0 }
 0x793   :  { %v14329_v27 = vadd.f32 %v4484_v15, %v13481_v22  ;;  %v4486_v39 = vpop.f32.mrb[29].mxu0 }
 0x794   :  { %v4487_v58 = vpop.f32.mrb[30].mxu0  ;;  %9603 = vmatpush3.bf16.msra.mxu1 %v10747_v8 }
 0x795   :  { %v14332_v34 = vadd.f32 %v4487_v58, %v13485_v45  ;;  %v4489_v49 = vpop.f32.mrb[31].mxu0  ;;  %9632 = vmatprep.subr.bf16.mxu1 %v16850_v2 }
 0x797   :  { %v4665_v48 = vpack.c.bf16 %v14332_v34, %v14329_v27  ;;  %9577 = vmatmul.mubr.bf16.gmra.mrb[204].mxu1 %v16882_v11 }
 0x798   :  { %9580 = vmatprep.mubr.msk.bf16.mxu1 %vm10856_vm1, %v16850_v2 }
 0x79a   :  { %v4492_v22 = vpop.f32.mrb[32].mxu0 }
 0x79b   :  { %v14343_v52 = vadd.f32 %v4492_v22, %v13498_v50  ;;  %v4494_v30 = vpop.f32.mrb[33].mxu0 }
 0x79c   :  { %v4495_v45 = vpop.f32.mrb[34].mxu0 }
 0x79d   :  { %v14346_v32 = vadd.f32 %v4495_v45, %v13502_v6  ;;  %v4497_v47 = vpop.f32.mrb[35].mxu0 }
 0x79f   :  { %v4666_v8 = vpack.c.bf16 %v14346_v32, %v14343_v52  ;;  %9581 = vmatmul.mubr.bf16.gmra.mrb[208].mxu1 %v16883_v26 }
 0x7a0   :  { %9584 = vmatprep.mubr.msk.bf16.mxu1 %vm10856_vm1, %v16850_v2 }
 0x7a2   :  { %v4500_v61 = vpop.f32.mrb[36].mxu0 }
 0x7a3   :  { %v14356_v50 = vadd.f32 %v4500_v61, %v13515_v13  ;;  %v4502_v15 = vpop.f32.mrb[37].mxu0 }
 0x7a4   :  { %v4503_v39 = vpop.f32.mrb[38].mxu0 }
 0x7a5   :  { %v14359_v6 = vadd.f32 %v4503_v39, %v13519_v4  ;;  %v4505_v58 = vpop.f32.mrb[39].mxu0  ;;  %v10748_v4 = vld [vmem:[%s16415_s5 + $0x1c0] sm:$0xff]  }
 0x7a7   :  { %v4667_v49 = vpack.c.bf16 %v14359_v6, %v14356_v50  ;;  %9585 = vmatmul.mubr.bf16.gmra.mrb[212].mxu1 %v16884_v35 }
 0x7a8   :  { %9604 = vmatprep.mubr.msk.bf16.mxu1 %vm10856_vm1, %v16850_v2 }
 0x7aa   :  { %v4508_v36 = vpop.f32.mrb[40].mxu0 }
 0x7ab   :  { %v14369_v13 = vadd.f32 %v4508_v36, %v13532_v29  ;;  %v4510_v11 = vpop.f32.mrb[41].mxu0  ;;  %v10749_v29 = vld [vmem:[%s16415_s5 + $0x1c8] sm:$0xff]  }
 0x7ac   :  { %v4511_v22 = vpop.f32.mrb[42].mxu0 }
 0x7ad   :  { %v14375_v30 = vadd.f32 %v4511_v22, %v13536_v56  ;;  %v4513_v45 = vpop.f32.mrb[43].mxu0 }
 0x7af   :  { %v4668_v43 = vpack.c.bf16 %v14375_v30, %v14369_v13  ;;  %9605 = vmatmul.mubr.bf16.vlgmr.msra.gmra.mrb[188].mxu1 %v4661_v33  ;;  %v10758_v13 = vld [vmem:[%s16415_s5 + $0x210] sm:$0xff]  }
 0x7b0   :  { %9608 = vmatprep.mubr.msk.bf16.mxu1 %vm10856_vm1, %v16850_v2  ;;  %9633 = vmatpush3.bf16.msra.mxu1 %v10748_v4 }
 0x7b1   :  { %9634 = vmatprep.subr.bf16.mxu1 %v16850_v2 }
 0x7b2   :  { %v4516_v56 = vpop.f32.mrb[44].mxu0 }
 0x7b3   :  { %v14389_v31 = vadd.f32 %v4516_v56, %v13549_v18  ;;  %v4518_v47 = vpop.f32.mrb[45].mxu0  ;;  %v10751_v18 = vld [vmem:[%s16415_s5 + $0x1d8] sm:$0xff]  }
 0x7b4   :  { %v4519_v26 = vpop.f32.mrb[46].mxu0  ;;  %9635 = vmatpush3.bf16.msra.mxu1 %v10749_v29 }
 0x7b5   :  { %v14395_v28 = vadd.f32 %v4519_v26, %v13553_v51  ;;  %v4521_v33 = vpop.f32.mrb[47].mxu0  ;;  %9636 = vmatprep.subr.bf16.mxu1 %v16850_v2 }
 0x7b7   :  { %v4669_v61 = vpack.c.bf16 %v14395_v28, %v14389_v31  ;;  %9609 = vmatmul.mubr.bf16.gmra.mrb[192].mxu1 %v4662_v0  ;;  %v10760_v31 = vld [vmem:[%s16415_s5 + $0x220] sm:$0xff]  }
 0x7b8   :  { %9612 = vmatprep.mubr.msk.bf16.mxu1 %vm10856_vm1, %v16850_v2  ;;  %9637 = vmatpush3.bf16.msra.mxu1 %v10750_v20 }
 0x7b9   :  { %9638 = vmatprep.subr.bf16.mxu1 %v16850_v2 }
 0x7ba   :  { %v4524_v51 = vpop.f32.mrb[48].mxu0 }
 0x7bb   :  { %v14410_v15 = vadd.f32 %v4524_v51, %v13562_v7  ;;  %v4526_v39 = vpop.f32.mrb[49].mxu0  ;;  %v10753_v7 = vld [vmem:[%s16415_s5 + $0x1e8] sm:$0xff]  }
 0x7bc   :  { %v4527_v58 = vpop.f32.mrb[50].mxu0  ;;  %9639 = vmatpush3.bf16.msra.mxu1 %v10751_v18 }
 0x7bd   :  { %v14416_v38 = vadd.f32 %v4527_v58, %v13567_v3  ;;  %v4529_v0 = vpop.f32.mrb[51].mxu0  ;;  %9640 = vmatprep.subr.bf16.mxu1 %v16850_v2 }
 0x7bf   :  { %v4670_v35 = vpack.c.bf16 %v14416_v38, %v14410_v15  ;;  %9613 = vmatmul.mubr.bf16.gmra.mrb[196].mxu1 %v4663_v63  ;;  %v10762_v15 = vld [vmem:[%s16415_s5 + $0x230] sm:$0xff]   ;;  %v16885_v38 = vld [vmem:[#allocation64_spill] sm:$0xff] }
 0x7c0   :  { %9616 = vmatprep.mubr.msk.bf16.mxu1 %vm10856_vm1, %v16850_v2  ;;  %9641 = vmatpush3.bf16.msra.mxu1 %v10752_v24 }
 0x7c1   :  { %9642 = vmatprep.subr.bf16.mxu1 %v16850_v2 }
 0x7c2   :  { %v4532_v3 = vpop.f32.mrb[52].mxu0 }
 0x7c3   :  { %v14431_v36 = vadd.f32 %v4532_v3, %v13582_v17  ;;  %v4534_v11 = vpop.f32.mrb[53].mxu0  ;;  %v10755_v17 = vld [vmem:[%s16415_s5 + $0x1f8] sm:$0xff]  }
 0x7c4   :  { %v4535_v22 = vpop.f32.mrb[54].mxu0  ;;  %9643 = vmatpush3.bf16.msra.mxu1 %v10753_v7 }
 0x7c5   :  { %v14437_v44 = vadd.f32 %v4535_v22, %v13588_v54  ;;  %v4537_v63 = vpop.f32.mrb[55].mxu0  ;;  %9644 = vmatprep.subr.bf16.mxu1 %v16850_v2 }
 0x7c7   :  { %v4671_v4 = vpack.c.bf16 %v14437_v44, %v14431_v36  ;;  %9617 = vmatmul.mubr.bf16.gmra.mrb[200].mxu1 %v4664_v37 }
 0x7c8   :  { %9620 = vmatprep.mubr.msk.bf16.mxu1 %vm10856_vm1, %v16850_v2  ;;  %9645 = vmatpush3.bf16.msra.mxu1 %v10754_v57 }
 0x7c9   :  { %9646 = vmatprep.subr.bf16.mxu1 %v16850_v2 }
 0x7ca   :  { %v4540_v54 = vpop.f32.mrb[56].mxu0 }
 0x7cb   :  { %v14452_v45 = vadd.f32 %v4540_v54, %v13603_v23  ;;  %v4542_v29 = vpop.f32.mrb[57].mxu0 }
 0x7cc   :  { %v4543_v56 = vpop.f32.mrb[58].mxu0  ;;  %9647 = vmatpush3.bf16.msra.mxu1 %v10755_v17 }
 0x7cd   :  { %v14455_v10 = vadd.f32 %v4543_v56, %v13609_v1  ;;  %v4545_v9 = vpop.f32.mrb[59].mxu0  ;;  %9676 = vmatprep.subr.bf16.mxu1 %v16850_v2 }
 0x7cf   :  { %v4672_v37 = vpack.c.bf16 %v14455_v10, %v14452_v45  ;;  %9621 = vmatmul.mubr.bf16.gmra.mrb[204].mxu1 %v4665_v48  ;;  %v16890_v10 = vld [vmem:[#allocation10_spill] sm:$0xff] }
 0x7d0   :  { %9624 = vmatprep.mubr.msk.bf16.mxu1 %vm10856_vm1, %v16850_v2 }
 0x7d2   :  { %v4548_v23 = vpop.f32.mrb[60].mxu0 }
 0x7d3   :  { %v14466_v47 = vadd.f32 %v4548_v23, %v13624_v25  ;;  %v4550_v26 = vpop.f32.mrb[61].mxu0  ;;  %v16886_v23 = vld [vmem:[#allocation66_spill] sm:$0xff] }
 0x7d4   :  { %v4551_v1 = vpop.f32.mrb[62].mxu0 }
 0x7d5   :  { %v14469_v20 = vadd.f32 %v4551_v1, %v13630_v19  ;;  %v4553_v33 = vpop.f32.mrb[63].mxu0 }
 0x7d7   :  { %v4673_v18 = vpack.c.bf16 %v14469_v20, %v14466_v47  ;;  %9625 = vmatmul.mubr.bf16.gmra.mrb[208].mxu1 %v4666_v8  ;;  %v10765_v47 = vld [vmem:[%s16416_s6 + $0x8] sm:$0xff]   ;;  %v10766_v20 = vld [vmem:[%s16416_s6 + $0x10] sm:$0xff]  }
 0x7d8   :  { %9628 = vmatprep.mubr.msk.bf16.mxu1 %vm10856_vm1, %v16850_v2 }
 0x7da   :  { %v4556_v27 = vpop.f32.mrb[64].mxu0 }
 0x7db   :  { %v14479_v25 = vadd.f32 %v4556_v27, %v13645_v41  ;;  %v4558_v34 = vpop.f32.mrb[65].mxu0  ;;  %v16887_v27 = vld [vmem:[#allocation68_spill] sm:$0xff] }
 0x7dc   :  { %v4559_v48 = vpop.f32.mrb[66].mxu0 }
 0x7dd   :  { %v14482_v19 = vadd.f32 %v4559_v48, %v13648_v59  ;;  %v4561_v51 = vpop.f32.mrb[67].mxu0  ;;  %v10756_v59 = vld [vmem:[%s16415_s5 + $0x200] sm:$0xff]  }
 0x7de   :  { %v16888_v48 = vld [vmem:[#allocation8_spill] sm:$0xff] }
 0x7df   :  { %v4674_v39 = vpack.c.bf16 %v14482_v19, %v14479_v25  ;;  %9629 = vmatmul.mubr.bf16.gmra.mrb[212].mxu1 %v4667_v49  ;;  %v10768_v25 = vld [vmem:[%s16416_s6 + $0x20] sm:$0xff]   ;;  %v10769_v19 = vld [vmem:[%s16416_s6 + $0x28] sm:$0xff]  }
 0x7e0   :  { %9648 = vmatprep.mubr.msk.bf16.mxu1 %vm10856_vm1, %v16850_v2 }
 0x7e2   :  { %v4564_v52 = vpop.f32.mrb[68].mxu0 }
 0x7e3   :  { %v14492_v41 = vadd.f32 %v4564_v52, %v13659_v5  ;;  %v4566_v32 = vpop.f32.mrb[69].mxu0  ;;  %v10757_v5 = vld [vmem:[%s16415_s5 + $0x208] sm:$0xff]  }
 0x7e4   :  { %v4567_v8 = vpop.f32.mrb[70].mxu0 }
 0x7e5   :  { %v14498_v58 = vadd.f32 %v4567_v8, %v13661_v53  ;;  %v4569_v24 = vpop.f32.mrb[71].mxu0  ;;  %v16889_v8 = vld [vmem:[#allocation9_spill] sm:$0xff] }
 0x7e7   :  { %v4675_v50 = vpack.c.bf16 %v14498_v58, %v14492_v41  ;;  %9649 = vmatmul.mubr.bf16.vlgmr.msra.gmra.mrb[188].mxu1 %v4668_v43  ;;  %v10771_v41 = vld [vmem:[%s16416_s6 + $0x38] sm:$0xff]  }
 0x7e8   :  { %9652 = vmatprep.mubr.msk.bf16.mxu1 %vm10856_vm1, %v16850_v2  ;;  %9677 = vmatpush3.bf16.msra.mxu1 %v10756_v59 }
 0x7e9   :  { %9678 = vmatprep.subr.bf16.mxu1 %v16850_v2 }
 0x7ea   :  { %v4572_v53 = vpop.f32.mrb[72].mxu0 }
 0x7eb   :  { %v14512_v6 = vadd.f32 %v4572_v53, %v13672_v60  ;;  %v4574_v49 = vpop.f32.mrb[73].mxu0  ;;  %v10759_v60 = vld [vmem:[%s16415_s5 + $0x218] sm:$0xff]  }
 0x7ec   :  { %v4575_v0 = vpop.f32.mrb[74].mxu0  ;;  %9679 = vmatpush3.bf16.msra.mxu1 %v10757_v5 }
 0x7ed   :  { %v14518_v30 = vadd.f32 %v4575_v0, %v13674_v14  ;;  %v4577_v43 = vpop.f32.mrb[75].mxu0  ;;  %9680 = vmatprep.subr.bf16.mxu1 %v16850_v2 }
 0x7ef   :  { %v4676_v7 = vpack.c.bf16 %v14518_v30, %v14512_v6  ;;  %9653 = vmatmul.mubr.bf16.gmra.mrb[192].mxu1 %v4669_v61 }
 0x7f0   :  { %9656 = vmatprep.mubr.msk.bf16.mxu1 %vm10856_vm1, %v16850_v2  ;;  %9681 = vmatpush3.bf16.msra.mxu1 %v10758_v13 }
 0x7f1   :  { %9682 = vmatprep.subr.bf16.mxu1 %v16850_v2 }
 0x7f2   :  { %v4580_v14 = vpop.f32.mrb[76].mxu0 }
 0x7f3   :  { %v4581_v3 = vadd.f32 %v4580_v14, %v13689_v55  ;;  %v4582_v11 = vpop.f32.mrb[77].mxu0  ;;  %v10761_v55 = vld [vmem:[%s16415_s5 + $0x228] sm:$0xff]  }
 0x7f4   :  { %v4583_v22 = vpop.f32.mrb[78].mxu0  ;;  %9683 = vmatpush3.bf16.msra.mxu1 %v10759_v60 }
 0x7f5   :  { %v4584_v28 = vadd.f32 %v4583_v22, %v13696_v62  ;;  %v4585_v61 = vpop.f32.mrb[79].mxu0  ;;  %9684 = vmatprep.subr.bf16.mxu1 %v16850_v2 }
 0x7f7   :  { %v4677_v57 = vpack.c.bf16 %v4584_v28, %v4581_v3  ;;  %9657 = vmatmul.mubr.bf16.gmra.mrb[196].mxu1 %v4670_v35 }
 0x7f8   :  { %9660 = vmatprep.mubr.msk.bf16.mxu1 %vm10856_vm1, %v16850_v2  ;;  %9685 = vmatpush3.bf16.msra.mxu1 %v10760_v31 }
 0x7f9   :  { %9686 = vmatprep.subr.bf16.mxu1 %v16850_v2 }
 0x7fa   :  { %v4588_v63 = vpop.f32.mrb[80].mxu0 }
 0x7fb   :  { %v4589_v62 = vadd.f32 %v4588_v63, %v13718_v40  ;;  %v4590_v17 = vpop.f32.mrb[81].mxu0  ;;  %v10763_v40 = vld [vmem:[%s16415_s5 + $0x238] sm:$0xff]  }
 0x7fc   :  { %v4591_v54 = vpop.f32.mrb[82].mxu0  ;;  %9687 = vmatpush3.bf16.msra.mxu1 %v10761_v55 }
 0x7fd   :  { %v4592_v35 = vadd.f32 %v4591_v54, %v16885_v38  ;;  %v4593_v29 = vpop.f32.mrb[83].mxu0  ;;  %9688 = vmatprep.subr.bf16.mxu1 %v16850_v2 }
 0x7ff   :  { %v4678_v56 = vpack.c.bf16 %v4592_v35, %v4589_v62  ;;  %9661 = vmatmul.mubr.bf16.gmra.mrb[200].mxu1 %v4671_v4 }
 0x800   :  { %9664 = vmatprep.mubr.msk.bf16.mxu1 %vm10856_vm1, %v16850_v2  ;;  %9689 = vmatpush3.bf16.msra.mxu1 %v10762_v15 }
 0x801   :  { %9690 = vmatprep.subr.bf16.mxu1 %v16850_v2 }
 0x802   :  { %v4596_v9 = vpop.f32.mrb[84].mxu0 }
 0x803   :  { %v4597_v26 = vadd.f32 %v4596_v9, %v16886_v23  ;;  %v4598_v1 = vpop.f32.mrb[85].mxu0 }
 0x804   :  { %v4599_v33 = vpop.f32.mrb[86].mxu0  ;;  %9691 = vmatpush3.bf16.msra.mxu1 %v10763_v40 }
 0x805   :  { %v4600_v34 = vadd.f32 %v4599_v33, %v16887_v27  ;;  %v4601_v36 = vpop.f32.mrb[87].mxu0  ;;  %9720 = vmatprep.subr.bf16.mxu1 %v16850_v2 }
 0x807   :  { %v4679_v44 = vpack.c.bf16 %v4600_v34, %v4597_v26  ;;  %9665 = vmatmul.mubr.bf16.gmra.mrb[204].mxu1 %v4672_v37 }
 0x808   :  { %9668 = vmatprep.mubr.msk.bf16.mxu1 %vm10856_vm1, %v16850_v2 }
 0x80a   :  { %v4604_v4 = vpop.f32.mrb[88].mxu0 }
 0x80b   :  { %v4605_v51 = vadd.f32 %v4604_v4, %v16888_v48  ;;  %v4606_v52 = vpop.f32.mrb[89].mxu0 }
 0x80c   :  { %v4607_v32 = vpop.f32.mrb[90].mxu0 }
 0x80d   :  { %v4608_v59 = vadd.f32 %v4607_v32, %v16889_v8  ;;  %v4609_v24 = vpop.f32.mrb[91].mxu0 }
 0x80f   :  { %v4680_v5 = vpack.c.bf16 %v4608_v59, %v4605_v51  ;;  %9669 = vmatmul.mubr.bf16.gmra.mrb[208].mxu1 %v4673_v18  ;;  %v10767_v18 = vld [vmem:[%s16416_s6 + $0x18] sm:$0xff]  }
 0x810   :  { %9672 = vmatprep.mubr.msk.bf16.mxu1 %vm10856_vm1, %v16850_v2 }
 0x812   :  { %v4612_v45 = vpop.f32.mrb[92].mxu0 }
 0x813   :  { %v4613_v37 = vadd.f32 %v4612_v45, %v16890_v10  ;;  %v4614_v53 = vpop.f32.mrb[93].mxu0 }
 0x814   :  { %v4615_v49 = vpop.f32.mrb[94].mxu0 }
 0x815   :  { %v4616_v0 = vadd.f32 %v4615_v49, %v13816_v21  ;;  %v4617_v13 = vpop.f32.mrb[95].mxu0  ;;  %v10764_v21 = vld [vmem:[%s16416_s6] sm:$0xff]  }
 0x817   :  { %v4681_v43 = vpack.c.bf16 %v4616_v0, %v4613_v37  ;;  %9673 = vmatmul.mubr.bf16.gmra.mrb[212].mxu1 %v4674_v39  ;;  %v10770_v39 = vld [vmem:[%s16416_s6 + $0x30] sm:$0xff]  }
 0x818   :  { %9692 = vmatprep.mubr.msk.bf16.mxu1 %vm10856_vm1, %v16850_v2 }
 0x81f   :  { %9693 = vmatmul.mubr.bf16.vlgmr.msra.gmra.mrb[188].mxu1 %v4675_v50 }
 0x820   :  { %9696 = vmatprep.mubr.msk.bf16.mxu1 %vm10856_vm1, %v16850_v2  ;;  %9721 = vmatpush3.bf16.msra.mxu1 %v10764_v21 }
 0x821   :  { %9722 = vmatprep.subr.bf16.mxu1 %v16850_v2 }
 0x824   :  { %9723 = vmatpush3.bf16.msra.mxu1 %v10765_v47 }
 0x825   :  { %9724 = vmatprep.subr.bf16.mxu1 %v16850_v2 }
 0x827   :  { %9697 = vmatmul.mubr.bf16.gmra.mrb[192].mxu1 %v4676_v7 }
 0x828   :  { %9700 = vmatprep.mubr.msk.bf16.mxu1 %vm10856_vm1, %v16850_v2  ;;  %9725 = vmatpush3.bf16.msra.mxu1 %v10766_v20 }
 0x829   :  { %9726 = vmatprep.subr.bf16.mxu1 %v16850_v2 }
 0x82c   :  { %9727 = vmatpush3.bf16.msra.mxu1 %v10767_v18 }
 0x82d   :  { %9728 = vmatprep.subr.bf16.mxu1 %v16850_v2 }
 0x82f   :  { %9701 = vmatmul.mubr.bf16.gmra.mrb[196].mxu1 %v4677_v57 }
 0x830   :  { %9704 = vmatprep.mubr.msk.bf16.mxu1 %vm10856_vm1, %v16850_v2  ;;  %9729 = vmatpush3.bf16.msra.mxu1 %v10768_v25 }
 0x831   :  { %9730 = vmatprep.subr.bf16.mxu1 %v16850_v2 }
 0x834   :  { %9731 = vmatpush3.bf16.msra.mxu1 %v10769_v19 }
 0x835   :  { %9732 = vmatprep.subr.bf16.mxu1 %v16850_v2 }
 0x837   :  { %9705 = vmatmul.mubr.bf16.gmra.mrb[200].mxu1 %v4678_v56 }
 0x838   :  { %9708 = vmatprep.mubr.msk.bf16.mxu1 %vm10856_vm1, %v16850_v2  ;;  %9733 = vmatpush3.bf16.msra.mxu1 %v10770_v39 }
 0x839   :  { %9734 = vmatprep.subr.bf16.mxu1 %v16850_v2 }
 0x83c   :  { %9735 = vmatpush3.bf16.msra.mxu1 %v10771_v41 }
 0x83d   :  { %9764 = vmatprep.subr.bf16.mxu1 %v16850_v2 }
 0x83f   :  { %9709 = vmatmul.mubr.bf16.gmra.mrb[204].mxu1 %v4679_v44 }
 0x840   :  { %9712 = vmatprep.mubr.msk.bf16.mxu1 %vm10856_vm1, %v16850_v2 }
 0x847   :  { %9713 = vmatmul.mubr.bf16.gmra.mrb[208].mxu1 %v4680_v5 }
 0x848   :  { %9716 = vmatprep.mubr.msk.bf16.mxu1 %vm10856_vm1, %v16850_v2 }
 0x84f   :  { %9717 = vmatmul.mubr.bf16.gmra.mrb[212].mxu1 %v4681_v43 }
 0x850   :  { %9736 = vmatprep.mubr.msk.bf16.mxu1 %vm10856_vm1, %v16850_v2 }
 0x8f2   :  { %v14636_v58 = vpop.f32.mrb[188].mxu1 }
 0x8f3   :  { %v9694_v50 = vpop.f32.mrb[189].mxu1  ;;  %v6215_v30 = vmul.f32 %v14636_v58, %v14636_v58 }
 0x8f4   :  { %v14638_v6 = vpop.f32.mrb[190].mxu1 }
 0x8f5   :  { %v6196_v7 = vadd.f32 %v14638_v6, %v14636_v58  ;;  %v6216_v60 = vmul.f32 %v14638_v6, %v14638_v6  ;;  %v9695_v14 = vpop.f32.mrb[191].mxu1 }
 0x8f7   :  { %v6229_v3 = vadd.f32 %v6216_v60, %v6215_v30 }
 0x8fa   :  { %v14646_v11 = vpop.f32.mrb[192].mxu1 }
 0x8fb   :  { %v6197_v22 = vadd.f32 %v6196_v7, %v14646_v11  ;;  %v6217_v31 = vmul.f32 %v14646_v11, %v14646_v11  ;;  %v9698_v28 = vpop.f32.mrb[193].mxu1 }
 0x8fc   :  { %v14651_v61 = vpop.f32.mrb[194].mxu1 }
 0x8fd   :  { %v6230_v57 = vadd.f32 %v6229_v3, %v6217_v31  ;;  %v6198_v55 = vadd.f32 %v6197_v22, %v14651_v61  ;;  %v6218_v63 = vmul.f32 %v14651_v61, %v14651_v61  ;;  %v9699_v62 = vpop.f32.mrb[195].mxu1 }
 0x8ff   :  { %v6231_v17 = vadd.f32 %v6230_v57, %v6218_v63 }
 0x902   :  { %v14656_v54 = vpop.f32.mrb[196].mxu1 }
 0x903   :  { %v6199_v15 = vadd.f32 %v6198_v55, %v14656_v54  ;;  %v6219_v38 = vmul.f32 %v14656_v54, %v14656_v54  ;;  %v9702_v35 = vpop.f32.mrb[197].mxu1 }
 0x904   :  { %v14661_v29 = vpop.f32.mrb[198].mxu1 }
 0x905   :  { %v6232_v56 = vadd.f32 %v6231_v17, %v6219_v38  ;;  %v6200_v40 = vadd.f32 %v6199_v15, %v14661_v29  ;;  %v6220_v9 = vmul.f32 %v14661_v29, %v14661_v29  ;;  %v9703_v23 = vpop.f32.mrb[199].mxu1 }
 0x907   :  { %v6233_v26 = vadd.f32 %v6232_v56, %v6220_v9 }
 0x90a   :  { %v14666_v1 = vpop.f32.mrb[200].mxu1 }
 0x90b   :  { %v6201_v33 = vadd.f32 %v6200_v40, %v14666_v1  ;;  %v6221_v27 = vmul.f32 %v14666_v1, %v14666_v1  ;;  %v9706_v34 = vpop.f32.mrb[201].mxu1 }
 0x90c   :  { %v14671_v36 = vpop.f32.mrb[202].mxu1 }
 0x90d   :  { %v6234_v44 = vadd.f32 %v6233_v26, %v6221_v27  ;;  %v6202_v4 = vadd.f32 %v6201_v33, %v14671_v36  ;;  %v6222_v48 = vmul.f32 %v14671_v36, %v14671_v36  ;;  %v9707_v51 = vpop.f32.mrb[203].mxu1 }
 0x90f   :  { %v6235_v52 = vadd.f32 %v6234_v44, %v6222_v48  ;;  %v6194_v48 = vld [vmem:[%s16418_s8] sm:$0x1] }
 0x912   :  { %v14676_v32 = vpop.f32.mrb[204].mxu1 }
 0x913   :  { %v6203_v8 = vadd.f32 %v6202_v4, %v14676_v32  ;;  %v6223_v59 = vmul.f32 %v14676_v32, %v14676_v32  ;;  %v9710_v24 = vpop.f32.mrb[205].mxu1 }
 0x914   :  { %v6131_v5 = vpop.f32.mrb[206].mxu1  ;;  %v16891_v24 = vld [vmem:[#allocation70_spill] sm:$0xff] }
 0x915   :  { %v6236_v45 = vadd.f32 %v6235_v52, %v6223_v59  ;;  %v6204_v10 = vadd.f32 %v6203_v8, %v6131_v5  ;;  %v6224_v37 = vmul.f32 %v6131_v5, %v6131_v5  ;;  %v9711_v53 = vpop.f32.mrb[207].mxu1  ;;  %v6195_v8 = vld [vmem:[%s16418_s8 + $0x1] sm:$0x1] }
 0x917   :  { %v6237_v49 = vadd.f32 %v6236_v45, %v6224_v37 }
 0x91a   :  { %v6136_v0 = vpop.f32.mrb[208].mxu1 }
 0x91b   :  { %v6205_v13 = vadd.f32 %v6204_v10, %v6136_v0  ;;  %v6225_v43 = vmul.f32 %v6136_v0, %v6136_v0  ;;  %v9714_v21 = vpop.f32.mrb[209].mxu1 }
 0x91c   :  { %v6139_v47 = vpop.f32.mrb[210].mxu1 }
 0x91d   :  { %v6238_v20 = vadd.f32 %v6237_v49, %v6225_v43  ;;  %v6206_v18 = vadd.f32 %v6205_v13, %v6139_v47  ;;  %v6226_v25 = vmul.f32 %v6139_v47, %v6139_v47  ;;  %v9715_v19 = vpop.f32.mrb[211].mxu1 }
 0x91f   :  { %v6239_v39 = vadd.f32 %v6238_v20, %v6226_v25 }
 0x922   :  { %v6144_v41 = vpop.f32.mrb[212].mxu1 }
 0x923   :  { %v6207_v50 = vadd.f32 %v6206_v18, %v6144_v41  ;;  %v6227_v30 = vmul.f32 %v6144_v41, %v6144_v41  ;;  %v9718_v7 = vpop.f32.mrb[213].mxu1 }
 0x924   :  { %v6147_v60 = vpop.f32.mrb[214].mxu1 }
 0x925   :  { %v6240_v14 = vadd.f32 %v6239_v39, %v6227_v30  ;;  %v6208_v3 = vadd.f32 %v6207_v50, %v6147_v60  ;;  %v6228_v22 = vmul.f32 %v6147_v60, %v6147_v60  ;;  %v9719_v31 = vpop.f32.mrb[215].mxu1 }
 0x927   :  { %v6209_v28 = vrot.slane %v6208_v3, 4  ;;  %v6241_v57 = vadd.f32 %v6240_v14, %v6228_v22 }
 0x929   :  { %v6210_v55 = vadd.f32 %v6209_v28, %v6208_v3  ;;  %v6242_v63 = vrot.slane %v6241_v57, 4 }
 0x92b   :  { %v6211_v62 = vrot.slane %v6210_v55, 2  ;;  %v6243_v17 = vadd.f32 %v6242_v63, %v6241_v57 }
 0x92d   :  { %v6212_v15 = vadd.f32 %v6211_v62, %v6210_v55  ;;  %v6244_v38 = vrot.slane %v6243_v17, 2 }
 0x92f   :  { %v6213_v35 = vrot.slane %v6212_v15, 1  ;;  %v6245_v56 = vadd.f32 %v6244_v38, %v6243_v17 }
 0x931   :  { %v6214_v40 = vadd.f32 %v6213_v35, %v6212_v15  ;;  %v6246_v9 = vrot.slane %v6245_v56, 1 }
 0x933   :  { %v6247_v23 = vadd.f32 %v6246_v9, %v6245_v56  ;;  %v6248_v26 = vmul.f32 0.010204081, %v6214_v40  ;;  %v10773_v40 = vld [vmem:[%s16417_s7 + $0x8] sm:$0xff]  }
 0x935   :  { %v6249_v33 = vmul.f32 0.010204081, %v6247_v23  ;;  %v6250_v27 = vmul.f32 %v6248_v26, %v6248_v26 }
 0x937   :  { %v6251_v34 = vsub.f32 %v6249_v33, %v6250_v27  ;;  %v10774_v27 = vld [vmem:[%s16417_s7 + $0x10] sm:$0xff]  }
 0x939   :  { %v6252_v44 = vmax.f32 %v6251_v34, 0.0  ;;  %v10775_v34 = vld [vmem:[%s16417_s7 + $0x18] sm:$0xff]  }
 0x93b   :  { %v6253_v4 = vadd.f32 1e-05, %v6252_v44  ;;  %v10776_v44 = vld [vmem:[%s16417_s7 + $0x20] sm:$0xff]  }
 0x93d   :  { %10786 = vrsqrt.f32 %v6253_v4  ;;  %v10777_v4 = vld [vmem:[%s16417_s7 + $0x28] sm:$0xff]  }
 0x947   :  { %v10787_v51 = vpop.eup %10786 }
 0x948   :  { %v6255_v52 = vmul.f32 %v10787_v51, %v6194_v48  ;;  %v10778_v48 = vld [vmem:[%s16417_s7 + $0x30] sm:$0xff]   ;;  %v10779_v51 = vld [vmem:[%s16417_s7 + $0x38] sm:$0xff]  }
 0x94a   :  { %v6256_v59 = vmul.f32 %v6255_v52, %v6248_v26  ;;  %v6261_v45 = vrot.slane %v6255_v52, %v16891_v24  ;;  %v16892_v52 = vld [vmem:[#allocation69_spill] sm:$0xff] }
 0x94c   :  { %v6257_v10 = vsub.f32 %v6195_v8, %v6256_v59  ;;  %v6262_v37 = vmul.f32 %v6261_v45, %v14636_v58  ;;  %v6263_v53 = vmul.f32 %v6261_v45, %v14638_v6  ;;  %v6264_v49 = vmul.f32 %v6261_v45, %v14646_v11 }
 0x94d   :  { %v6265_v13 = vmul.f32 %v6261_v45, %v14651_v61  ;;  %v6266_v43 = vmul.f32 %v6261_v45, %v14656_v54  ;;  %v6267_v21 = vmul.f32 %v6261_v45, %v14661_v29  ;;  %v6268_v20 = vmul.f32 %v6261_v45, %v14666_v1 }
 0x94e   :  { %v6279_v18 = vrot.slane %v6257_v10, %v16891_v24  ;;  %v6269_v25 = vmul.f32 %v6261_v45, %v14671_v36  ;;  %v6270_v19 = vmul.f32 %v6261_v45, %v14676_v32  ;;  %v6271_v39 = vmul.f32 %v6261_v45, %v6131_v5  ;;  %v10772_v5 = vld [vmem:[%s16417_s7] sm:$0xff]  }
 0x94f   :  { %v6272_v58 = vmul.f32 %v6261_v45, %v6136_v0  ;;  %v6273_v50 = vmul.f32 %v6261_v45, %v6139_v47  ;;  %v6274_v6 = vmul.f32 %v6261_v45, %v6144_v41  ;;  %v6178_v8 = vadd.s32 96, %v16892_v52  ;;  %v16893_v10 = vld [vmem:[#allocation11_spill] sm:$0xff] }
 0x950   :  { %v6280_v30 = vadd.f32 %v6279_v18, %v6262_v37  ;;  %v6281_v11 = vadd.f32 %v6279_v18, %v6263_v53  ;;  %v6282_v7 = vadd.f32 %v6279_v18, %v6264_v49  ;;  %v6283_v61 = vadd.f32 %v6279_v18, %v6265_v13  ;;  %v16894_v37 = vld [vmem:[#allocation44_spill] sm:$0xff]  ;;  %v16895_v53 = vld [vmem:[#allocation46_spill] sm:$0xff] }
 0x951   :  { %v6284_v60 = vadd.f32 %v6279_v18, %v6266_v43  ;;  %v6285_v54 = vadd.f32 %v6279_v18, %v6267_v21  ;;  %v6286_v14 = vadd.f32 %v6279_v18, %v6268_v20  ;;  %v6287_v29 = vadd.f32 %v6279_v18, %v6269_v25 }
 0x952   :  { %v6294_v3 = vmax.f32 %v6280_v30, 0.0  ;;  %v6295_v1 = vmax.f32 %v6281_v11, 0.0  ;;  %v6296_v22 = vmax.f32 %v6282_v7, 0.0  ;;  %v6297_v31 = vmax.f32 %v6283_v61, 0.0 }
 0x953   :  { %v6298_v28 = vmax.f32 %v6284_v60, 0.0  ;;  %v6299_v36 = vmax.f32 %v6285_v54, 0.0  ;;  %v6300_v57 = vmax.f32 %v6286_v14, 0.0  ;;  %v6301_v32 = vmax.f32 %v6287_v29, 0.0 }
 0x954   :  { %v6350_v0 = vpack.c.bf16 %v6295_v1, %v6294_v3  ;;  %v6351_v47 = vpack.c.bf16 %v6297_v31, %v6296_v22  ;;  %v6288_v41 = vadd.f32 %v6279_v18, %v6270_v19  ;;  %v6289_v55 = vadd.f32 %v6279_v18, %v6271_v39 }
 0x955   :  { %v6352_v63 = vpack.c.bf16 %v6299_v36, %v6298_v28  ;;  %v6353_v62 = vpack.c.bf16 %v6301_v32, %v6300_v57  ;;  %v6290_v17 = vadd.f32 %v6279_v18, %v6272_v58  ;;  %v6291_v15 = vadd.f32 %v6279_v18, %v6273_v50 }
 0x956   :  { %9737 = vmatmul.mubr.bf16.vlgmr.msra.gmra.mrb[216].mxu1 %v6350_v0  ;;  %v6302_v38 = vmax.f32 %v6288_v41, 0.0  ;;  %v6303_v35 = vmax.f32 %v6289_v55, 0.0  ;;  %v6292_v56 = vadd.f32 %v6279_v18, %v6274_v6  ;;  %vm6192_vm4 = vcmp.lt.s32.totalorder %v6178_v8, 98 }
 0x957   :  { %9740 = vmatprep.mubr.msk.bf16.mxu1 %vm10856_vm1, %v16850_v2  ;;  %9765 = vmatpush3.bf16.msra.mxu1 %v10772_v5  ;;  %v6304_v9 = vmax.f32 %v6290_v17, 0.0  ;;  %v6305_v23 = vmax.f32 %v6291_v15, 0.0  ;;  %vm8925_vm6 = vmpackc.low %vm10857_vm5, %vm6192_vm4 }
 0x958   :  { %9766 = vmatprep.subr.bf16.mxu1 %v16850_v2  ;;  %v6354_v26 = vpack.c.bf16 %v6303_v35, %v6302_v38  ;;  %v6306_v59 = vmax.f32 %v6292_v56, 0.0 }
 0x959   :  { %v6355_v33 = vpack.c.bf16 %v6305_v23, %v6304_v9 }
 0x95a   :  { %v8926_v45 = vpack.c.bf16 %v16850_v2, %v6306_v59 }
 0x95b   :  { %9767 = vmatpush3.bf16.msra.mxu1 %v10773_v40 }
 0x95c   :  { %9768 = vmatprep.subr.bf16.mxu1 %v16850_v2 }
 0x95e   :  { %9741 = vmatmul.mubr.bf16.gmra.mrb[220].mxu1 %v6351_v47 }
 0x95f   :  { %9744 = vmatprep.mubr.msk.bf16.mxu1 %vm10856_vm1, %v16850_v2  ;;  %9769 = vmatpush3.bf16.msra.mxu1 %v10774_v27 }
 0x960   :  { %9770 = vmatprep.subr.bf16.mxu1 %v16850_v2 }
 0x963   :  { %9771 = vmatpush3.bf16.msra.mxu1 %v10775_v34 }
 0x964   :  { %9772 = vmatprep.subr.bf16.mxu1 %v16850_v2 }
 0x966   :  { %9745 = vmatmul.mubr.bf16.gmra.mrb[224].mxu1 %v6352_v63 }
 0x967   :  { %9748 = vmatprep.mubr.msk.bf16.mxu1 %vm10856_vm1, %v16850_v2  ;;  %9773 = vmatpush3.bf16.msra.mxu1 %v10776_v44 }
 0x968   :  { %9774 = vmatprep.subr.bf16.mxu1 %v16850_v2 }
 0x96b   :  { %9775 = vmatpush3.bf16.msra.mxu1 %v10777_v4 }
 0x96c   :  { %9776 = vmatprep.subr.bf16.mxu1 %v16850_v2 }
 0x96e   :  { %9749 = vmatmul.mubr.bf16.gmra.mrb[228].mxu1 %v6353_v62 }
 0x96f   :  { %9752 = vmatprep.mubr.msk.bf16.mxu1 %vm10856_vm1, %v16850_v2  ;;  %9777 = vmatpush3.bf16.msra.mxu1 %v10778_v48 }
 0x970   :  { %9778 = vmatprep.subr.bf16.mxu1 %v16850_v2 }
 0x973   :  { %9779 = vmatpush3.bf16.msra.mxu1 %v10779_v51 }
 0x976   :  { %9753 = vmatmul.mubr.bf16.gmra.mrb[232].mxu1 %v6354_v26 }
 0x977   :  { %9756 = vmatprep.mubr.msk.bf16.mxu1 %vm10856_vm1, %v16850_v2 }
 0x97e   :  { %9757 = vmatmul.mubr.bf16.gmra.mrb[236].mxu1 %v6355_v33 }
 0x97f   :  { %9760 = vmatprep.mubr.msk.bf16.mxu1 %vm10856_vm1, %v16850_v2 }
 0x986   :  { %9761 = vmatmul.mubr.msk.bf16.gmra.mrb[240].mxu1 %vm8925_vm6, %v8926_v45 }
 0x987   :  { %9780 = vmatprep.mubr.msk.bf16.mxu1 %vm10856_vm1, %v16850_v2 }
 0x98e   :  { %9781 = vmatmul.mubr.bf16.vlgmr.msra.gmra.mrb[244].mxu1 %v14021_v42 }
 0x98f   :  { %9784 = vmatprep.mubr.msk.bf16.mxu1 %vm10856_vm1, %v16850_v2 }
 0x996   :  { %9785 = vmatmul.mubr.bf16.gmra.mrb[248].mxu1 %v14042_v12 }
 0x997   :  { %9788 = vmatprep.mubr.msk.bf16.mxu1 %vm10856_vm1, %v16850_v2 }
 0x99e   :  { %9789 = vmatmul.mubr.bf16.gmra.mrb[252].mxu1 %v16893_v10 }
 0x99f   :  { %9792 = vmatprep.mubr.msk.bf16.mxu1 %vm10856_vm1, %v16850_v2 }
 0x9a6   :  { %9793 = vmatmul.mubr.bf16.gmra.mrb[0].mxu1 %v16894_v37 }
 0x9a7   :  { %9796 = vmatprep.mubr.msk.bf16.mxu1 %vm10856_vm1, %v16850_v2 }
 0x9ae   :  { %9797 = vmatmul.mubr.bf16.gmra.mrb[4].mxu1 %v16895_v53 }
 0x9af   :  { %9800 = vmatprep.mubr.msk.bf16.mxu1 %vm10856_vm1, %v16850_v2 }
 0x9b6   :  { %9801 = vmatmul.mubr.bf16.gmra.mrb[8].mxu1 %v14123_v16 }
 0x9b7   :  { %9804 = vmatprep.mubr.msk.bf16.mxu1 %vm10856_vm1, %v16850_v2 }
 0x9be   :  { %9805 = vmatmul.mubr.bf16.gmra.mrb[12].mxu1 %v14137_v46 }
 0xa29   :  { %v14764_v42 = vpop.f32.mrb[216].mxu1 }
 0xa2a   :  { %v9738_v12 = vpop.f32.mrb[217].mxu1  ;;  %v6684_v13 = vmul.f32 %v14764_v42, %v14764_v42 }
 0xa2b   :  { %v14766_v49 = vpop.f32.mrb[218].mxu1 }
 0xa2c   :  { %v6665_v43 = vadd.f32 %v14766_v49, %v14764_v42  ;;  %v6685_v21 = vmul.f32 %v14766_v49, %v14766_v49  ;;  %v9739_v16 = vpop.f32.mrb[219].mxu1 }
 0xa2e   :  { %v6698_v20 = vadd.f32 %v6685_v21, %v6684_v13 }
 0xa31   :  { %v14774_v18 = vpop.f32.mrb[220].mxu1 }
 0xa32   :  { %v6666_v46 = vadd.f32 %v6665_v43, %v14774_v18  ;;  %v6686_v25 = vmul.f32 %v14774_v18, %v14774_v18  ;;  %v9742_v19 = vpop.f32.mrb[221].mxu1 }
 0xa33   :  { %v14779_v39 = vpop.f32.mrb[222].mxu1 }
 0xa34   :  { %v6699_v58 = vadd.f32 %v6698_v20, %v6686_v25  ;;  %v6667_v50 = vadd.f32 %v6666_v46, %v14779_v39  ;;  %v6687_v6 = vmul.f32 %v14779_v39, %v14779_v39  ;;  %v9743_v30 = vpop.f32.mrb[223].mxu1 }
 0xa36   :  { %v6700_v11 = vadd.f32 %v6699_v58, %v6687_v6 }
 0xa39   :  { %v14784_v7 = vpop.f32.mrb[224].mxu1 }
 0xa3a   :  { %v6668_v61 = vadd.f32 %v6667_v50, %v14784_v7  ;;  %v6688_v60 = vmul.f32 %v14784_v7, %v14784_v7  ;;  %v9746_v54 = vpop.f32.mrb[225].mxu1 }
 0xa3b   :  { %v14789_v14 = vpop.f32.mrb[226].mxu1 }
 0xa3c   :  { %v6701_v29 = vadd.f32 %v6700_v11, %v6688_v60  ;;  %v6669_v3 = vadd.f32 %v6668_v61, %v14789_v14  ;;  %v6689_v1 = vmul.f32 %v14789_v14, %v14789_v14  ;;  %v9747_v22 = vpop.f32.mrb[227].mxu1 }
 0xa3e   :  { %v6702_v31 = vadd.f32 %v6701_v29, %v6689_v1 }
 0xa41   :  { %v14794_v28 = vpop.f32.mrb[228].mxu1 }
 0xa42   :  { %v6670_v36 = vadd.f32 %v6669_v3, %v14794_v28  ;;  %v6690_v57 = vmul.f32 %v14794_v28, %v14794_v28  ;;  %v9750_v32 = vpop.f32.mrb[229].mxu1 }
 0xa43   :  { %v14799_v5 = vpop.f32.mrb[230].mxu1 }
 0xa44   :  { %v6703_v0 = vadd.f32 %v6702_v31, %v6690_v57  ;;  %v6671_v47 = vadd.f32 %v6670_v36, %v14799_v5  ;;  %v6691_v41 = vmul.f32 %v14799_v5, %v14799_v5  ;;  %v9751_v55 = vpop.f32.mrb[231].mxu1 }
 0xa46   :  { %v6704_v63 = vadd.f32 %v6703_v0, %v6691_v41 }
 0xa49   :  { %v14804_v62 = vpop.f32.mrb[232].mxu1 }
 0xa4a   :  { %v6672_v17 = vadd.f32 %v6671_v47, %v14804_v62  ;;  %v6692_v15 = vmul.f32 %v14804_v62, %v14804_v62  ;;  %v9754_v38 = vpop.f32.mrb[233].mxu1 }
 0xa4b   :  { %v14809_v35 = vpop.f32.mrb[234].mxu1 }
 0xa4c   :  { %v6705_v56 = vadd.f32 %v6704_v63, %v6692_v15  ;;  %v6673_v40 = vadd.f32 %v6672_v17, %v14809_v35  ;;  %v6693_v9 = vmul.f32 %v14809_v35, %v14809_v35  ;;  %v9755_v23 = vpop.f32.mrb[235].mxu1 }
 0xa4e   :  { %v6706_v26 = vadd.f32 %v6705_v56, %v6693_v9 }
 0xa51   :  { %v14814_v33 = vpop.f32.mrb[236].mxu1 }
 0xa52   :  { %v6674_v27 = vadd.f32 %v6673_v40, %v14814_v33  ;;  %v6694_v34 = vmul.f32 %v14814_v33, %v14814_v33  ;;  %v9758_v44 = vpop.f32.mrb[237].mxu1 }
 0xa53   :  { %v14819_v4 = vpop.f32.mrb[238].mxu1 }
 0xa54   :  { %v6707_v48 = vadd.f32 %v6706_v26, %v6694_v34  ;;  %v6675_v51 = vadd.f32 %v6674_v27, %v14819_v4  ;;  %v6695_v52 = vmul.f32 %v14819_v4, %v14819_v4  ;;  %v9759_v8 = vpop.f32.mrb[239].mxu1 }
 0xa56   :  { %v6708_v59 = vadd.f32 %v6707_v48, %v6695_v52 }
 0xa59   :  { %v14824_v45 = vpop.f32.mrb[240].mxu1 }
 0xa5a   :  { %v6676_v10 = vadd.f32 %v6675_v51, %v14824_v45  ;;  %v6696_v37 = vmul.f32 %v14824_v45, %v14824_v45  ;;  %v9762_v53 = vpop.f32.mrb[241].mxu1 }
 0xa5b   :  { %v6506_v12 = vpop.f32.mrb[242].mxu1 }
 0xa5c   :  { %v6709_v13 = vadd.f32 %v6708_v59, %v6696_v37  ;;  %v6677_v43 = vadd.f32 %v6676_v10, %v6506_v12  ;;  %v6697_v21 = vmul.f32 %v6506_v12, %v6506_v12  ;;  %v9763_v16 = vpop.f32.mrb[243].mxu1 }
 0xa5e   :  { %v6678_v20 = vrot.slane %v6677_v43, 4  ;;  %v6710_v46 = vadd.f32 %v6709_v13, %v6697_v21 }
 0xa60   :  { %v6679_v25 = vadd.f32 %v6678_v20, %v6677_v43  ;;  %v6711_v19 = vrot.slane %v6710_v46, 4 }
 0xa61   :  { %v14829_v58 = vpop.f32.mrb[244].mxu1 }
 0xa62   :  { %v6680_v50 = vrot.slane %v6679_v25, 2  ;;  %v6712_v6 = vadd.f32 %v6711_v19, %v6710_v46  ;;  %v9782_v30 = vpop.f32.mrb[245].mxu1  ;;  %v6782_v11 = vmul.f32 %v14829_v58, %v14829_v58  ;;  %v6663_v19 = vld [vmem:[%s16418_s8 + $0x2] sm:$0x1] }
 0xa63   :  { %v14833_v61 = vpop.f32.mrb[246].mxu1 }
 0xa64   :  { %v6681_v60 = vadd.f32 %v6680_v50, %v6679_v25  ;;  %v6713_v54 = vrot.slane %v6712_v6, 2  ;;  %v6763_v29 = vadd.f32 %v14833_v61, %v14829_v58  ;;  %v6783_v3 = vmul.f32 %v14833_v61, %v14833_v61  ;;  %v9783_v1 = vpop.f32.mrb[247].mxu1 }
 0xa66   :  { %v6682_v22 = vrot.slane %v6681_v60, 1  ;;  %v6714_v31 = vadd.f32 %v6713_v54, %v6712_v6  ;;  %v6796_v36 = vadd.f32 %v6783_v3, %v6782_v11  ;;  %v6664_v3 = vld [vmem:[%s16418_s8 + $0x3] sm:$0x1] }
 0xa68   :  { %v6683_v57 = vadd.f32 %v6682_v22, %v6681_v60  ;;  %v6715_v32 = vrot.slane %v6714_v31, 1 }
 0xa69   :  { %v14839_v0 = vpop.f32.mrb[248].mxu1 }
 0xa6a   :  { %v6716_v47 = vadd.f32 %v6715_v32, %v6714_v31  ;;  %v6717_v41 = vmul.f32 0.010204081, %v6683_v57  ;;  %v6764_v55 = vadd.f32 %v6763_v29, %v14839_v0  ;;  %v6784_v63 = vmul.f32 %v14839_v0, %v14839_v0  ;;  %v9786_v17 = vpop.f32.mrb[249].mxu1 }
 0xa6b   :  { %v14844_v15 = vpop.f32.mrb[250].mxu1 }
 0xa6c   :  { %v6718_v38 = vmul.f32 0.010204081, %v6716_v47  ;;  %v6719_v56 = vmul.f32 %v6717_v41, %v6717_v41  ;;  %v6797_v40 = vadd.f32 %v6796_v36, %v6784_v63  ;;  %v6765_v9 = vadd.f32 %v6764_v55, %v14844_v15  ;;  %v9787_v23 = vpop.f32.mrb[251].mxu1 }
 0xa6d   :  { %v6785_v26 = vmul.f32 %v14844_v15, %v14844_v15 }
 0xa6e   :  { %v6720_v27 = vsub.f32 %v6718_v38, %v6719_v56 }
 0xa6f   :  { %v6798_v34 = vadd.f32 %v6797_v40, %v6785_v26 }
 0xa70   :  { %v6721_v44 = vmax.f32 %v6720_v27, 0.0 }
 0xa71   :  { %v14849_v48 = vpop.f32.mrb[252].mxu1 }
 0xa72   :  { %v6722_v51 = vadd.f32 1e-05, %v6721_v44  ;;  %v6766_v52 = vadd.f32 %v6765_v9, %v14849_v48  ;;  %v6786_v8 = vmul.f32 %v14849_v48, %v14849_v48  ;;  %v9790_v59 = vpop.f32.mrb[253].mxu1 }
 0xa73   :  { %v14854_v10 = vpop.f32.mrb[254].mxu1 }
 0xa74   :  { %10788 = vrsqrt.f32 %v6722_v51  ;;  %v6799_v37 = vadd.f32 %v6798_v34, %v6786_v8  ;;  %v6767_v53 = vadd.f32 %v6766_v52, %v14854_v10  ;;  %v6787_v12 = vmul.f32 %v14854_v10, %v14854_v10  ;;  %v9791_v13 = vpop.f32.mrb[255].mxu1 }
 0xa76   :  { %v6800_v43 = vadd.f32 %v6799_v37, %v6787_v12 }
 0xa79   :  { %v14859_v21 = vpop.f32.mrb[0].mxu1 }
 0xa7a   :  { %v6768_v16 = vadd.f32 %v6767_v53, %v14859_v21  ;;  %v6788_v20 = vmul.f32 %v14859_v21, %v14859_v21  ;;  %v9794_v46 = vpop.f32.mrb[1].mxu1 }
 0xa7b   :  { %v14864_v25 = vpop.f32.mrb[2].mxu1 }
 0xa7c   :  { %v6801_v50 = vadd.f32 %v6800_v43, %v6788_v20  ;;  %v6769_v6 = vadd.f32 %v6768_v16, %v14864_v25  ;;  %v6789_v30 = vmul.f32 %v14864_v25, %v14864_v25  ;;  %v9795_v11 = vpop.f32.mrb[3].mxu1 }
 0xa7e   :  { %v10789_v60 = vpop.eup %10788  ;;  %v6802_v54 = vadd.f32 %v6801_v50, %v6789_v30 }
 0xa7f   :  { %v6724_v29 = vmul.f32 %v10789_v60, %v6663_v19 }
 0xa81   :  { %v6725_v1 = vmul.f32 %v6724_v29, %v6717_v41  ;;  %v6730_v22 = vrot.slane %v6724_v29, %v16891_v24  ;;  %v14876_v31 = vpop.f32.mrb[4].mxu1 }
 0xa82   :  { %v6770_v36 = vadd.f32 %v6769_v6, %v14876_v31  ;;  %v6790_v57 = vmul.f32 %v14876_v31, %v14876_v31  ;;  %v9798_v32 = vpop.f32.mrb[5].mxu1 }
 0xa83   :  { %v6726_v47 = vsub.f32 %v6664_v3, %v6725_v1  ;;  %v6737_v55 = vmul.f32 %v6730_v22, %v14794_v28  ;;  %v14882_v63 = vpop.f32.mrb[6].mxu1  ;;  %v6739_v17 = vmul.f32 %v6730_v22, %v14804_v62  ;;  %v6738_v38 = vmul.f32 %v6730_v22, %v14799_v5 }
 0xa84   :  { %v6803_v41 = vadd.f32 %v6802_v54, %v6790_v57  ;;  %v6771_v56 = vadd.f32 %v6770_v36, %v14882_v63  ;;  %v6791_v40 = vmul.f32 %v14882_v63, %v14882_v63  ;;  %v9799_v9 = vpop.f32.mrb[7].mxu1  ;;  %v6740_v23 = vmul.f32 %v6730_v22, %v14809_v35 }
 0xa85   :  { %v6747_v26 = vrot.slane %v6726_v47, %v16891_v24  ;;  %v6732_v27 = vmul.f32 %v6730_v22, %v14766_v49  ;;  %v6731_v28 = vmul.f32 %v6730_v22, %v14764_v42  ;;  %v6741_v34 = vmul.f32 %v6730_v22, %v14814_v33 }
 0xa86   :  { %v6804_v62 = vadd.f32 %v6803_v41, %v6791_v40  ;;  %v6733_v5 = vmul.f32 %v6730_v22, %v14774_v18  ;;  %v6742_v44 = vmul.f32 %v6730_v22, %v14819_v4  ;;  %v6734_v51 = vmul.f32 %v6730_v22, %v14779_v39 }
 0xa87   :  { %v14897_v52 = vadd.f32 %v6747_v26, %v6737_v55  ;;  %v14899_v8 = vadd.f32 %v6747_v26, %v6739_v17  ;;  %v14901_v35 = vadd.f32 %v6747_v26, %v6738_v38  ;;  %v14903_v59 = vadd.f32 %v6747_v26, %v6740_v23 }
 0xa88   :  { %v14905_v49 = vadd.f32 %v6747_v26, %v6732_v27  ;;  %v14907_v42 = vadd.f32 %v6747_v26, %v6731_v28  ;;  %v14909_v33 = vadd.f32 %v6747_v26, %v6741_v34  ;;  %v14911_v37 = vadd.f32 %v6747_v26, %v6733_v5 }
 0xa89   :  { %v14913_v18 = vpop.f32.mrb[8].mxu1  ;;  %v14915_v4 = vadd.f32 %v6747_v26, %v6742_v44  ;;  %v14917_v39 = vadd.f32 %v6747_v26, %v6734_v51  ;;  %v6735_v53 = vmul.f32 %v6730_v22, %v14784_v7  ;;  %v6736_v12 = vmul.f32 %v6730_v22, %v14789_v14 }
 0xa8a   :  { %v6772_v13 = vadd.f32 %v6771_v56, %v14913_v18  ;;  %v6792_v43 = vmul.f32 %v14913_v18, %v14913_v18  ;;  %v9802_v16 = vpop.f32.mrb[9].mxu1  ;;  %v6743_v20 = vmul.f32 %v6730_v22, %v14824_v45 }
 0xa8b   :  { %v14925_v46 = vpop.f32.mrb[10].mxu1  ;;  %v14927_v19 = vadd.f32 %v6747_v26, %v6735_v53  ;;  %v14929_v50 = vadd.f32 %v6747_v26, %v6736_v12  ;;  %v14954_v16 = vld [vmem:[%s16419_s9] sm:$0xff] }
 0xa8c   :  { %v6805_v6 = vadd.f32 %v6804_v62, %v6792_v43  ;;  %v6773_v30 = vadd.f32 %v6772_v13, %v14925_v46  ;;  %v6793_v7 = vmul.f32 %v14925_v46, %v14925_v46  ;;  %v9803_v14 = vpop.f32.mrb[11].mxu1  ;;  %v14934_v11 = vadd.f32 %v6747_v26, %v6743_v20  ;;  %v14944_v13 = vld [vmem:[%s16419_s9 + $0x8] sm:$0xff]  ;;  %v14949_v43 = vld [vmem:[%s16419_s9 + $0x10] sm:$0xff]  ;;  %v6761_v20 = vld [vmem:[%s16418_s8 + $0x4] sm:$0x1] }
 0xa8d   :  { %v16508_v14 = vrot.slane %v14954_v16, 7 }
 0xa8e   :  { %v6806_v60 = vadd.f32 %v6805_v6, %v6793_v7  ;;  %v7377_v7 = vrot.slane %v14949_v43, 7 }
 0xa91   :  { %v14936_v54 = vpop.f32.mrb[12].mxu1 }
 0xa92   :  { %v6774_v45 = vadd.f32 %v6773_v30, %v14936_v54  ;;  %v6794_v29 = vmul.f32 %v14936_v54, %v14936_v54  ;;  %v9806_v3 = vpop.f32.mrb[13].mxu1  ;;  %v7375_v30 = vrot.slane %v14944_v13, 7 }
 0xa93   :  { %v6659_v1 = vpop.f32.mrb[14].mxu1  ;;  %v6762_v3 = vld [vmem:[%s16418_s8 + $0x5] sm:$0x1] }
 0xa94   :  { %v6807_v22 = vadd.f32 %v6806_v60, %v6794_v29  ;;  %v6775_v36 = vadd.f32 %v6774_v45, %v6659_v1  ;;  %v6795_v57 = vmul.f32 %v6659_v1, %v6659_v1  ;;  %v9807_v32 = vpop.f32.mrb[15].mxu1  ;;  %v14965_v45 = vld [vmem:[%s16419_s9 + $0x40] sm:$0xff]  ;;  %v14970_v29 = vld [vmem:[%s16419_s9 + $0x48] sm:$0xff] }
 0xa95   :  { %v7470_v32 = vrot.slane %v14965_v45, 7 }
 0xa96   :  { %v6776_v47 = vrot.slane %v6775_v36, 4  ;;  %v6808_v55 = vadd.f32 %v6807_v22, %v6795_v57  ;;  %v7376_v57 = vsel %vm6913_vm7, %v16508_v14, %v7375_v30  ;;  %v15245_v14 = vld [vmem:[%s16419_s9 + $0x1b0] sm:$0xff] }
 0xa98   :  { %v6777_v17 = vadd.f32 %v6776_v47, %v6775_v36  ;;  %v6809_v38 = vrot.slane %v6808_v55, 4  ;;  %v7378_v36 = vsel %vm6913_vm7, %v7375_v30, %v7377_v7  ;;  %v7472_v47 = vrot.slane %v14970_v29, 7 }
 0xa9a   :  { %v6778_v41 = vrot.slane %v6777_v17, 2  ;;  %v6810_v56 = vadd.f32 %v6809_v38, %v6808_v55 }
 0xa9c   :  { %v6779_v40 = vadd.f32 %v6778_v41, %v6777_v17  ;;  %v6811_v9 = vrot.slane %v6810_v56, 2 }
 0xa9e   :  { %v6780_v23 = vrot.slane %v6779_v40, 1  ;;  %v6812_v26 = vadd.f32 %v6811_v9, %v6810_v56  ;;  %v14990_v56 = vld [vmem:[%s16419_s9 + $0x38] sm:$0xff] }
 0xaa0   :  { %v6781_v27 = vadd.f32 %v6780_v23, %v6779_v40  ;;  %v6813_v28 = vrot.slane %v6812_v26, 1 }
 0xaa2   :  { %v6814_v34 = vadd.f32 %v6813_v28, %v6812_v26  ;;  %v6815_v62 = vmul.f32 0.010204081, %v6781_v27  ;;  %v16509_v28 = vrot.slane %v14990_v56, 7 }
 0xaa4   :  { %v6816_v5 = vmul.f32 0.010204081, %v6814_v34  ;;  %v6817_v44 = vmul.f32 %v6815_v62, %v6815_v62 }
 0xaa6   :  { %v6818_v51 = vsub.f32 %v6816_v5, %v6817_v44 }
 0xaa8   :  { %v6819_v53 = vmax.f32 %v6818_v51, 0.0  ;;  %v15027_v51 = vld [vmem:[%s16419_s9 + $0x50] sm:$0xff] }
 0xaaa   :  { %v6820_v12 = vadd.f32 1e-05, %v6819_v53 }
 0xaac   :  { %10790 = vrsqrt.f32 %v6820_v12 }
 0xab6   :  { %v10791_v6 = vpop.eup %10790 }
 0xab7   :  { %v6822_v60 = vmul.f32 %v10791_v6, %v6761_v20 }
 0xab9   :  { %v6823_v1 = vmul.f32 %v6822_v60, %v6815_v62  ;;  %v6828_v22 = vrot.slane %v6822_v60, %v16891_v24  ;;  %v15055_v60 = vld [vmem:[%s16419_s9 + $0x70] sm:$0xff] }
 0xabb   :  { %v6824_v55 = vsub.f32 %v6762_v3, %v6823_v1  ;;  %v6835_v17 = vmul.f32 %v6828_v22, %v14859_v21  ;;  %v6837_v38 = vmul.f32 %v6828_v22, %v14876_v31  ;;  %v6836_v41 = vmul.f32 %v6828_v22, %v14864_v25  ;;  %v15060_v3 = vld [vmem:[%s16419_s9 + $0x78] sm:$0xff]  ;;  %v15065_v1 = vld [vmem:[%s16419_s9 + $0x80] sm:$0xff] }
 0xabc   :  { %v6838_v40 = vmul.f32 %v6828_v22, %v14882_v63  ;;  %v6830_v9 = vmul.f32 %v6828_v22, %v14833_v61  ;;  %v6829_v23 = vmul.f32 %v6828_v22, %v14829_v58  ;;  %v6839_v26 = vmul.f32 %v6828_v22, %v14913_v18 }
 0xabd   :  { %v14997_v27 = vrot.slane %v6824_v55, %v16891_v24  ;;  %v6831_v21 = vmul.f32 %v6828_v22, %v14839_v0  ;;  %v6840_v25 = vmul.f32 %v6828_v22, %v14925_v46  ;;  %v6832_v31 = vmul.f32 %v6828_v22, %v14844_v15 }
 0xabe   :  { %v6833_v34 = vmul.f32 %v6828_v22, %v14849_v48  ;;  %v15005_v63 = vmul.f32 %v6828_v22, %v14854_v10  ;;  %v15008_v58 = vmul.f32 %v6828_v22, %v14936_v54  ;;  %v16507_v55 = vrot.slane %v15055_v60, 7 }
 0xabf   :  { %v6852_v61 = vadd.f32 %v14997_v27, %v6835_v17  ;;  %v6854_v24 = vadd.f32 %v14997_v27, %v6837_v38  ;;  %v6853_v0 = vadd.f32 %v14997_v27, %v6836_v41  ;;  %v6855_v18 = vadd.f32 %v14997_v27, %v6838_v40 }
 0xac0   :  { %v6847_v15 = vadd.f32 %v14997_v27, %v6830_v9  ;;  %v6846_v46 = vadd.f32 %v14997_v27, %v6829_v23  ;;  %v6856_v48 = vadd.f32 %v14997_v27, %v6839_v26  ;;  %v6848_v10 = vadd.f32 %v14997_v27, %v6831_v21 }
 0xac1   :  { %v15019_v62 = vadd.f32 %v6852_v61, %v14897_v52  ;;  %v6867_v54 = vadd.f32 %v6854_v24, %v14899_v8  ;;  %v6866_v5 = vadd.f32 %v6853_v0, %v14901_v35  ;;  %v6868_v44 = vadd.f32 %v6855_v18, %v14903_v59  ;;  %v15042_v35 = vld [vmem:[%s16419_s9 + $0x18] sm:$0xff] }
 0xac2   :  { %v6860_v53 = vadd.f32 %v6847_v15, %v14905_v49  ;;  %v6859_v12 = vadd.f32 %v6846_v46, %v14907_v42  ;;  %v6869_v20 = vadd.f32 %v6856_v48, %v14909_v33  ;;  %v15033_v52 = vadd.f32 %v6848_v10, %v14911_v37  ;;  %v15105_v18 = vld [vmem:[%s16419_s9 + $0x58] sm:$0xff] }
 0xac3   :  { %v15035_v6 = vmax.f32 %v6867_v54, 0.0  ;;  %v15037_v8 = vmax.f32 %v6866_v5, 0.0  ;;  %v7474_v59 = vrot.slane %v15027_v51, 7  ;;  %v7473_v33 = vsel %vm6913_vm7, %v7470_v32, %v7472_v47  ;;  %v15126_v5 = vld [vmem:[%s16419_s9 + $0xb0] sm:$0xff] }
 0xac4   :  { %v7471_v37 = vsel %vm6913_vm7, %v16509_v28, %v7470_v32  ;;  %v7379_v30 = vrot.slane %v15042_v35, 7  ;;  %v15070_v32 = vmax.f32 %v6868_v44, 0.0  ;;  %v7562_v38 = vrot.slane %v15060_v3, 7 }
 0xac5   :  { %v7396_v49 = vmul.f32 %v7378_v36, %v15035_v6  ;;  %v7395_v42 = vmul.f32 %v7376_v57, %v15037_v8  ;;  %v7475_v22 = vsel %vm6913_vm7, %v7472_v47, %v7474_v59  ;;  %v7491_v36 = vmul.f32 %v7473_v33, %v15035_v6 }
 0xac6   :  { %v7490_v57 = vmul.f32 %v7471_v37, %v15037_v8  ;;  %v7380_v17 = vsel %vm6913_vm7, %v7377_v7, %v7379_v30  ;;  %v7564_v41 = vrot.slane %v15065_v1, 7  ;;  %v6857_v40 = vadd.f32 %v14997_v27, %v6840_v25 }
 0xac7   :  { %7407 = vadd.xlane.f32.xlu1 %v7396_v49  ;;  %7405 = vadd.xlane.f32.xlu0 %v7395_v42  ;;  %v6849_v47 = vadd.f32 %v14997_v27, %v6832_v31  ;;  %v7492_v23 = vmul.f32 %v7475_v22, %v15070_v32  ;;  %v7397_v26 = vmul.f32 %v7380_v17, %v15070_v32  ;;  %v15098_v0 = vmax.f32 %v6860_v53, 0.0  ;;  %v15175_v17 = vld [vmem:[%s16419_s9 + $0x28] sm:$0xff] }
 0xac8   :  { %v15081_v9 = vadd.f32 %v6857_v40, %v14915_v4  ;;  %v7563_v7 = vsel %vm6913_vm7, %v16507_v55, %v7562_v38  ;;  %v7565_v25 = vsel %vm6913_vm7, %v7562_v38, %v7564_v41  ;;  %v6850_v61 = vadd.f32 %v14997_v27, %v6833_v34  ;;  %v15180_v38 = vld [vmem:[%s16419_s9 + $0x98] sm:$0xff]  ;;  %v15185_v40 = vld [vmem:[%s16419_s9 + $0xd0] sm:$0xff] }
 0xac9   :  { %v15086_v21 = vadd.f32 %v6849_v47, %v14917_v39  ;;  %v7582_v31 = vmul.f32 %v7563_v7, %v15037_v8  ;;  %v7583_v24 = vmul.f32 %v7565_v25, %v15035_v6  ;;  %v15100_v39 = vmax.f32 %v6859_v12, 0.0  ;;  %v8951_v47 = vld [vmem:[%s16419_s9 + $0xa0] sm:$0x1]  ;;  %v8959_v7 = vld [vmem:[%s16419_s9 + $0xd8] sm:$0x1] }
 0xaca   :  { %v15094_v4 = vadd.f32 %v6850_v61, %v14927_v19  ;;  %v15110_v19 = vld [vmem:[%s16419_s9 + $0x20] sm:$0xff]  ;;  %v6851_v34 = vadd.f32 %v14997_v27, %v15005_v63  ;;  %v6895_v15 = vmul.f32 %v14944_v13, %v15098_v0  ;;  %v7476_v10 = vrot.slane %v15105_v18, 7  ;;  %v15131_v13 = vld [vmem:[%s16419_s9 + $0xb8] sm:$0xff]  ;;  %v8943_v25 = vld [vmem:[%s16419_s9 + $0x68] sm:$0x1] }
 0xacb   :  { %7501 = vadd.xlane.f32.xlu1 %v7491_v36  ;;  %7499 = vadd.xlane.f32.xlu0 %v7490_v57  ;;  %v6894_v46 = vmul.f32 %v14954_v16, %v15100_v39  ;;  %v16511_v54 = vrot.slane %v15110_v19, 7  ;;  %v6944_v63 = vmul.f32 %v14965_v45, %v15098_v0  ;;  %v6943_v44 = vmul.f32 %v14990_v56, %v15100_v39  ;;  %v15156_v45 = vld [vmem:[%s16419_s9 + $0xa8] sm:$0xff] }
 0xacc   :  { %v15119_v48 = vadd.f32 %v6851_v34, %v14929_v50  ;;  %v15136_v50 = vld [vmem:[%s16419_s9 + $0x88] sm:$0xff]  ;;  %v15142_v53 = vmax.f32 %v6869_v20, 0.0  ;;  %v7654_v12 = vrot.slane %v15126_v5, 7  ;;  %v7477_v49 = vsel %vm6913_vm7, %v7474_v59, %v7476_v10 }
 0xacd   :  { %v7382_v42 = vsel %vm6913_vm7, %v7379_v30, %v16511_v54  ;;  %v16512_v33 = vrot.slane %v15131_v13, 7  ;;  %v16510_v37 = vrot.slane %v15136_v50, 7  ;;  %v16506_v59 = vrot.slane %v15156_v45, 7  ;;  %v15164_v30 = vld [vmem:[%s16419_s9 + $0x60] sm:$0xff]  ;;  %v8991_v54 = vld [vmem:[%s16419_s9 + $0x1b8] sm:$0x1] }
 0xace   :  { %v7493_v20 = vmul.f32 %v7477_v49, %v15142_v53  ;;  %v7398_v22 = vmul.f32 %v7382_v42, %v15142_v53  ;;  %v7572_v42 = vrot.slane %v8951_v47, 7 }
 0xacf   :  { %7503 = vadd.xlane.f32.xlu1 %v7492_v23  ;;  %7409 = vadd.xlane.f32.xlu0 %v7397_v26  ;;  %v7657_v36 = vsel %vm6913_vm7, %v7654_v12, %v16512_v33  ;;  %v7567_v57 = vsel %vm6913_vm7, %v7564_v41, %v16510_v37  ;;  %v15190_v41 = vld [vmem:[%s16419_s9 + $0x30] sm:$0x1]  ;;  %v7478_v23 = vrot.slane %v15164_v30, 7  ;;  %v15199_v26 = vld [vmem:[%s16419_s9 + $0x108] sm:$0xff]  ;;  %v7655_v34 = vsel %vm6913_vm7, %v16506_v59, %v7654_v12  ;;  %v15283_v33 = vld [vmem:[%s16419_s9 + $0x220] sm:$0xff] }
 0xad0   :  { %v7675_v61 = vmul.f32 %v7657_v36, %v15035_v6  ;;  %v16513_v12 = vrot.slane %v15180_v38, 7  ;;  %v7385_v49 = vrot.slane %v15190_v41, 7  ;;  %v7664_v36 = vrot.slane %v8959_v7, 7 }
 0xad1   :  { %v16516_v59 = vrot.slane %v15199_v26, 7  ;;  %v7674_v28 = vmul.f32 %v7655_v34, %v15037_v8  ;;  %v6858_v7 = vadd.f32 %v14997_v27, %v15008_v58 }
 0xad2   :  { %v7573_v58 = vsel %vm6913_vm7, %v16513_v12, %v7572_v42 }
 0xad3   :  { %7591 = vadd.xlane.f32.xlu1 %v7582_v31  ;;  %7593 = vadd.xlane.f32.xlu0 %v7583_v24  ;;  %v7584_v31 = vmul.f32 %v7567_v57, %v15070_v32  ;;  %v15210_v24 = vmax.f32 %v15033_v52, 0.0  ;;  %v15229_v52 = vld [vmem:[%s16419_s9 + $0xc0] sm:$0xff]  ;;  %v7480_v57 = vrot.slane %v8943_v25, 7 }
 0xad4   :  { %v8983_v25 = vld [vmem:[%s16419_s9 + $0x180] sm:$0x1] }
 0xad5   :  { %v7940_v37 = vrot.slane %v8983_v25, 7 }
 0xad7   :  { %6903 = vadd.xlane.f32.xlu0 %v6895_v15  ;;  %6901 = vadd.xlane.f32.xlu1 %v6894_v46  ;;  %v15218_v15 = vld [vmem:[%s16419_s9 + $0x140] sm:$0xff]  ;;  %v8967_v46 = vld [vmem:[%s16419_s9 + $0x110] sm:$0x1] }
 0xad8   :  { %v16515_v55 = vrot.slane %v15218_v15, 7  ;;  %v7756_v47 = vrot.slane %v8967_v46, 7  ;;  %v7479_v46 = vsel %vm6913_vm7, %v7476_v10, %v7478_v23  ;;  %v15278_v10 = vld [vmem:[%s16419_s9 + $0x1e8] sm:$0xff] }
 0xada   :  { %v7757_v12 = vsel %vm6913_vm7, %v16516_v59, %v7756_v47 }
 0xadb   :  { %6952 = vadd.xlane.f32.xlu0 %v6944_v63  ;;  %6950 = vadd.xlane.f32.xlu1 %v6943_v44  ;;  %v8975_v63 = vld [vmem:[%s16419_s9 + $0x148] sm:$0x1]  ;;  %v16514_v44 = vrot.slane %v15175_v17, 7 }
 0xadd   :  { %v7386_v27 = vsel %vm6913_vm7, %v16514_v44, %v7385_v49  ;;  %v6871_v49 = vadd.f32 %v6858_v7, %v14934_v11  ;;  %v8032_v11 = vrot.slane %v8991_v54, 7  ;;  %v15307_v7 = vmax.f32 %v15081_v9, 0.0 }
 0xadf   :  { %7505 = vadd.xlane.f32.xlu0 %v7493_v20  ;;  %7411 = vadd.xlane.f32.xlu1 %v7398_v22  ;;  %v16517_v20 = vrot.slane %v15185_v40, 7  ;;  %v15238_v22 = vld [vmem:[%s16419_s9 + $0x178] sm:$0xff]  ;;  %v6884_v47 = vmax.f32 %v6871_v49, 0.0 }
 0xae0   :  { %v16518_v34 = vrot.slane %v15238_v22, 7 }
 0xae1   :  { %v7665_v42 = vsel %vm6913_vm7, %v16517_v20, %v7664_v36  ;;  %v9007_v36 = vld [vmem:[%s16419_s9 + $0x228] sm:$0x1]  ;;  %v15324_v9 = vmul.f32 %v7573_v58, %v6884_v47  ;;  %v15330_v25 = vmul.f32 %v7757_v12, %v6884_v47  ;;  %v16897_v12 = vrot.slane %v15229_v52, 7 }
 0xae2   :  { %v15326_v49 = vmul.f32 %v7665_v42, %v6884_v47  ;;  %v8216_v20 = vrot.slane %v9007_v36, 7  ;;  %v16899_v36 = vrot.slane %v15175_v17, 7 }
 0xae3   :  { %7685 = vadd.xlane.f32.xlu0 %v7675_v61  ;;  %7595 = vadd.xlane.f32.xlu1 %v7584_v31  ;;  %v7848_v61 = vrot.slane %v8975_v63, 7  ;;  %v6945_v31 = vmul.f32 %v14970_v29, %v15210_v24  ;;  %v15265_v29 = vld [vmem:[%s16419_s9 + $0xe0] sm:$0xff]  ;;  %v16520_v63 = vrot.slane %v15245_v14, 7 }
 0xae5   :  { %v7849_v44 = vsel %vm6913_vm7, %v16515_v55, %v7848_v61  ;;  %v15312_v61 = vld [vmem:[%s16419_s9 + $0xe8] sm:$0xff]  ;;  %v8033_v42 = vsel %vm6913_vm7, %v16520_v63, %v8032_v11  ;;  %v15361_v11 = vld [vmem:[%s16419_s9 + $0xf0] sm:$0xff]  ;;  %v16904_v63 = vrot.slane %v15283_v33, 7 }
 0xae6   :  { %v15332_v55 = vmul.f32 %v7849_v44, %v6884_v47  ;;  %v7746_v58 = vrot.slane %v15312_v61, 7  ;;  %v16898_v44 = vrot.slane %v15131_v13, 7 }
 0xae7   :  { %6954 = vadd.xlane.f32.xlu0 %v6945_v31  ;;  %7683 = vadd.xlane.f32.xlu1 %v7674_v28  ;;  %v7481_v28 = vsel %vm6913_vm7, %v7478_v23, %v7480_v57  ;;  %v8999_v31 = vld [vmem:[%s16419_s9 + $0x1f0] sm:$0x1]  ;;  %v6992_v23 = vmul.f32 %v15060_v3, %v15098_v0  ;;  %v6896_v57 = vmul.f32 %v14949_v43, %v15210_v24 }
 0xae8   :  { %v8124_v59 = vrot.slane %v8999_v31, 7  ;;  %v15320_v43 = vld [vmem:[%s16419_s9 + $0x90] sm:$0xff]  ;;  %v15322_v3 = vmul.f32 %v7386_v27, %v6884_v47  ;;  %v15328_v54 = vmul.f32 %v7481_v28, %v6884_v47  ;;  %16896 = vst [vmem:[#allocation48_spill] sm:$0xff] %v15332_v55  ;;  %v7941_v31 = vsel %vm6913_vm7, %v16518_v34, %v7940_v37 }
 0xae9   :  { %v6991_v27 = vmul.f32 %v15055_v60, %v15100_v39  ;;  %v7659_v28 = vsel %vm6913_vm7, %v16898_v44, %v16897_v12  ;;  %v16900_v37 = vrot.slane %v15110_v19, 7  ;;  %v16901_v34 = vrot.slane %v15278_v10, 7 }
 0xaea   :  { %v15363_v12 = vmul.f32 %v7941_v31, %v6884_v47  ;;  %v15365_v44 = vmul.f32 %v8033_v42, %v6884_v47  ;;  %v7748_v42 = vrot.slane %v15361_v11, 7 }
 0xaeb   :  { %7000 = vadd.xlane.f32.xlu0 %v6992_v23  ;;  %6905 = vadd.xlane.f32.xlu1 %v6896_v57  ;;  %v7494_v23 = vmul.f32 %v7479_v46, %v15307_v7  ;;  %v7384_v46 = vsel %vm6913_vm7, %v16900_v37, %v16899_v36  ;;  %v7568_v57 = vrot.slane %v15320_v43, 7  ;;  %v8125_v2 = vsel %vm6913_vm7, %v16901_v34, %v8124_v59 }
 0xaec   :  { %16902 = vst [vmem:[#allocation50_spill] sm:$0xff] %v15363_v12  ;;  %16903 = vst [vmem:[#allocation71_spill] sm:$0xff] %v15365_v44  ;;  %v8217_v36 = vsel %vm6913_vm7, %v16904_v63, %v8216_v20  ;;  %v7676_v37 = vmul.f32 %v7659_v28, %v15070_v32  ;;  %v7399_v55 = vmul.f32 %v7384_v46, %v15307_v7  ;;  %v16906_v34 = vrot.slane %v15265_v29, 7 }
 0xaed   :  { %v15372_v59 = vmul.f32 %v8125_v2, %v6884_v47  ;;  %v15381_v44 = vmul.f32 %v8217_v36, %v6884_v47  ;;  %v15386_v2 = vmax.f32 %v15086_v21, 0.0  ;;  %v7749_v28 = vsel %vm6913_vm7, %v7746_v58, %v7748_v42  ;;  %v15410_v36 = vld [vmem:[%s16419_s9 + $0x128] sm:$0xff] }
 0xaee   :  { %v6993_v21 = vmul.f32 %v15065_v1, %v15210_v24  ;;  %v15415_v1 = vld [vmem:[%s16419_s9 + $0xf8] sm:$0xff] }
 0xaef   :  { %7507 = vadd.xlane.f32.xlu0 %v7494_v23  ;;  %6998 = vadd.xlane.f32.xlu1 %v6991_v27  ;;  %16905 = vst [vmem:[#allocation72_spill] sm:$0xff] %v15372_v59  ;;  %v7747_v23 = vsel %vm6913_vm7, %v16906_v34, %v7746_v58  ;;  %v16907_v27 = vrot.slane %v15136_v50, 7  ;;  %16908 = vst [vmem:[#allocation73_spill] sm:$0xff] %v15381_v44  ;;  %v6897_v46 = vmul.f32 %v15042_v35, %v15386_v2  ;;  %v15405_v35 = vld [vmem:[%s16419_s9 + $0x120] sm:$0xff] }
 0xaf0   :  { %v7766_v20 = vmul.f32 %v7747_v23, %v15037_v8  ;;  %v7767_v34 = vmul.f32 %v7749_v28, %v15035_v6  ;;  %v6946_v47 = vmul.f32 %v15027_v51, %v15386_v2  ;;  %v7040_v51 = vmul.f32 %v15126_v5, %v15098_v0  ;;  %v15433_v5 = vld [vmem:[%s16419_s9 + $0x118] sm:$0xff] }
 0xaf1   :  { %v7569_v31 = vsel %vm6913_vm7, %v16907_v27, %v7568_v57  ;;  %v7838_v23 = vrot.slane %v15405_v35, 7  ;;  %v16909_v27 = vrot.slane %v15229_v52, 7  ;;  %v7840_v28 = vrot.slane %v15410_v36, 7 }
 0xaf2   :  { %v7585_v63 = vmul.f32 %v7569_v31, %v15142_v53  ;;  %v15506_v44 = vmax.f32 %v15119_v48, 0.0  ;;  %v7042_v48 = vmul.f32 %v15229_v52, %v15386_v2  ;;  %v7135_v52 = vmul.f32 %v15433_v5, %v15100_v39 }
 0xaf3   :  { %7687 = vadd.xlane.f32.xlu0 %v7676_v37  ;;  %7413 = vadd.xlane.f32.xlu1 %v7399_v55  ;;  %v15395_v55 = vld [vmem:[%s16419_s9 + $0xc8] sm:$0xff]  ;;  %v7039_v37 = vmul.f32 %v15156_v45, %v15100_v39 }
 0xaf4   :  { %v7660_v58 = vrot.slane %v15395_v55, 7 }
 0xaf6   :  { %v7661_v31 = vsel %vm6913_vm7, %v16909_v27, %v7660_v58 }
 0xaf7   :  { %7775 = vadd.xlane.f32.xlu0 %v7766_v20  ;;  %7597 = vadd.xlane.f32.xlu1 %v7585_v63  ;;  %v16910_v20 = vrot.slane %v15180_v38, 7 }
 0xaf9   :  { %v7571_v63 = vsel %vm6913_vm7, %v7568_v57, %v16910_v20  ;;  %v16521_v57 = vrot.slane %v15433_v5, 7  ;;  %v15443_v20 = vmax.f32 %v15094_v4, 0.0 }
 0xafb   :  { %6907 = vadd.xlane.f32.xlu0 %v6897_v46  ;;  %7777 = vadd.xlane.f32.xlu1 %v7767_v34  ;;  %v7750_v46 = vrot.slane %v15415_v1, 7  ;;  %v7677_v34 = vmul.f32 %v7661_v31, %v15142_v53  ;;  %v7839_v31 = vsel %vm6913_vm7, %v16521_v57, %v7838_v23  ;;  %v6898_v4 = vmul.f32 %v15110_v19, %v15443_v20 }
 0xafc   :  { %v16911_v19 = vrot.slane %v15185_v40, 7 }
 0xafd   :  { %v7751_v27 = vsel %vm6913_vm7, %v7748_v42, %v7750_v46  ;;  %v6947_v42 = vmul.f32 %v15105_v18, %v15443_v20  ;;  %v15463_v18 = vld [vmem:[%s16419_s9 + $0x100] sm:$0xff] }
 0xaff   :  { %7002 = vadd.xlane.f32.xlu0 %v6993_v21  ;;  %6956 = vadd.xlane.f32.xlu1 %v6946_v47  ;;  %v7586_v21 = vmul.f32 %v7571_v63, %v15307_v7  ;;  %v7841_v47 = vsel %vm6913_vm7, %v7838_v23, %v7840_v28  ;;  %v7858_v63 = vmul.f32 %v7839_v31, %v15037_v8  ;;  %v15458_v23 = vld [vmem:[%s16419_s9 + $0x130] sm:$0xff] }
 0xb00   :  { %v7087_v31 = vmul.f32 %v15265_v29, %v15100_v39 }
 0xb03   :  { %7048 = vadd.xlane.f32.xlu0 %v7040_v51  ;;  %7046 = vadd.xlane.f32.xlu1 %v7039_v37  ;;  %v7859_v51 = vmul.f32 %v7841_v47, %v15035_v6  ;;  %v7768_v37 = vmul.f32 %v7751_v27, %v15070_v32  ;;  %v7663_v47 = vsel %vm6913_vm7, %v7660_v58, %v16911_v19  ;;  %v7842_v27 = vrot.slane %v15458_v23, 7 }
 0xb04   :  { %v7678_v58 = vmul.f32 %v7663_v47, %v15307_v7 }
 0xb07   :  { %7689 = vadd.xlane.f32.xlu0 %v7677_v34  ;;  %7599 = vadd.xlane.f32.xlu1 %v7586_v21  ;;  %v7041_v34 = vmul.f32 %v15131_v13, %v15210_v24  ;;  %v7088_v21 = vmul.f32 %v15312_v61, %v15098_v0  ;;  %v6994_v13 = vmul.f32 %v15136_v50, %v15386_v2  ;;  %v15482_v61 = vld [vmem:[%s16419_s9 + $0x158] sm:$0xff]  ;;  %v15487_v50 = vld [vmem:[%s16419_s9 + $0x160] sm:$0xff] }
 0xb0b   :  { %7869 = vadd.xlane.f32.xlu0 %v7859_v51  ;;  %7779 = vadd.xlane.f32.xlu1 %v7768_v37  ;;  %v7752_v51 = vrot.slane %v15463_v18, 7  ;;  %v15477_v37 = vld [vmem:[%s16419_s9 + $0x150] sm:$0xff] }
 0xb0f   :  { %6958 = vadd.xlane.f32.xlu0 %v6947_v42  ;;  %7867 = vadd.xlane.f32.xlu1 %v7858_v63  ;;  %v16524_v42 = vrot.slane %v15477_v37, 7  ;;  %v7843_v63 = vsel %vm6913_vm7, %v7840_v28, %v7842_v27 }
 0xb13   :  { %7050 = vadd.xlane.f32.xlu0 %v7041_v34  ;;  %6909 = vadd.xlane.f32.xlu1 %v6898_v4  ;;  %v7753_v34 = vsel %vm6913_vm7, %v7750_v46, %v7752_v51  ;;  %v7930_v4 = vrot.slane %v15482_v61, 7 }
 0xb14   :  { %v7769_v19 = vmul.f32 %v7753_v34, %v15142_v53 }
 0xb15   :  { %v7931_v47 = vsel %vm6913_vm7, %v16524_v42, %v7930_v4 }
 0xb16   :  { %v7950_v28 = vmul.f32 %v7931_v47, %v15037_v8  ;;  %v15542_v47 = vld [vmem:[%s16419_s9 + $0x168] sm:$0xff] }
 0xb17   :  { %7096 = vadd.xlane.f32.xlu0 %v7088_v21  ;;  %7004 = vadd.xlane.f32.xlu1 %v6994_v13  ;;  %v7932_v21 = vrot.slane %v15487_v50, 7  ;;  %v7860_v13 = vmul.f32 %v7843_v63, %v15070_v32  ;;  %v15515_v63 = vld [vmem:[%s16419_s9 + $0x138] sm:$0xff] }
 0xb18   :  { %v7844_v34 = vrot.slane %v15515_v63, 7 }
 0xb19   :  { %v7933_v57 = vsel %vm6913_vm7, %v7930_v4, %v7932_v21 }
 0xb1a   :  { %v7951_v46 = vmul.f32 %v7933_v57, %v15035_v6  ;;  %v6995_v57 = vmul.f32 %v15320_v43, %v15443_v20  ;;  %v7089_v43 = vmul.f32 %v15361_v11, %v15210_v24  ;;  %v7845_v4 = vsel %vm6913_vm7, %v7842_v27, %v7844_v34 }
 0xb1b   :  { %7691 = vadd.xlane.f32.xlu0 %v7678_v58  ;;  %7094 = vadd.xlane.f32.xlu1 %v7087_v31  ;;  %v6899_v58 = vmul.f32 %v15175_v17, %v15506_v44  ;;  %v6948_v31 = vmul.f32 %v15164_v30, %v15506_v44  ;;  %v15525_v30 = vld [vmem:[%s16419_s9 + $0x190] sm:$0xff]  ;;  %v15530_v17 = vld [vmem:[%s16419_s9 + $0x198] sm:$0xff]  ;;  %v7861_v11 = vmul.f32 %v7845_v4, %v15142_v53 }
 0xb1c   :  { %v7043_v4 = vmul.f32 %v15395_v55, %v15443_v20  ;;  %v15579_v55 = vld [vmem:[%s16419_s9 + $0x1c8] sm:$0xff] }
 0xb1f   :  { %7871 = vadd.xlane.f32.xlu0 %v7860_v13  ;;  %7781 = vadd.xlane.f32.xlu1 %v7769_v19  ;;  %v8022_v13 = vrot.slane %v15525_v30, 7  ;;  %v8024_v19 = vrot.slane %v15530_v17, 7 }
 0xb23   :  { %7959 = vadd.xlane.f32.xlu0 %v7950_v28  ;;  %7961 = vadd.xlane.f32.xlu1 %v7951_v46  ;;  %v7136_v28 = vmul.f32 %v15405_v35, %v15098_v0  ;;  %v16912_v46 = vrot.slane %v15199_v26, 7 }
 0xb25   :  { %v7755_v27 = vsel %vm6913_vm7, %v7752_v51, %v16912_v46  ;;  %v7137_v46 = vmul.f32 %v15410_v36, %v15210_v24  ;;  %v7184_v36 = vmul.f32 %v15482_v61, %v15098_v0  ;;  %v15604_v61 = vld [vmem:[%s16419_s9 + $0x1a0] sm:$0xff] }
 0xb27   :  { %6911 = vadd.xlane.f32.xlu0 %v6899_v58  ;;  %6960 = vadd.xlane.f32.xlu1 %v6948_v31  ;;  %v8025_v58 = vsel %vm6913_vm7, %v8022_v13, %v8024_v19  ;;  %v7934_v31 = vrot.slane %v15542_v47, 7 }
 0xb28   :  { %v8043_v35 = vmul.f32 %v8025_v58, %v15035_v6  ;;  %v6996_v58 = vmul.f32 %v15180_v38, %v15506_v44 }
 0xb2b   :  { %7006 = vadd.xlane.f32.xlu0 %v6995_v57  ;;  %7052 = vadd.xlane.f32.xlu1 %v7042_v48  ;;  %v15555_v57 = vld [vmem:[%s16419_s9 + $0x188] sm:$0xff]  ;;  %v7770_v48 = vmul.f32 %v7755_v27, %v15307_v7 }
 0xb2f   :  { %7098 = vadd.xlane.f32.xlu0 %v7089_v43  ;;  %7142 = vadd.xlane.f32.xlu1 %v7135_v52  ;;  %v7935_v43 = vsel %vm6913_vm7, %v7932_v21, %v7934_v31  ;;  %v16523_v52 = vrot.slane %v15555_v57, 7 }
 0xb30   :  { %v7952_v51 = vmul.f32 %v7935_v43, %v15070_v32 }
 0xb33   :  { %7144 = vadd.xlane.f32.xlu0 %v7136_v28  ;;  %7873 = vadd.xlane.f32.xlu1 %v7861_v11  ;;  %v8023_v28 = vsel %vm6913_vm7, %v16523_v52, %v8022_v13  ;;  %v15570_v11 = vld [vmem:[%s16419_s9 + $0x170] sm:$0xff] }
 0xb34   :  { %v8042_v21 = vmul.f32 %v8023_v28, %v15037_v8  ;;  %v16528_v27 = vrot.slane %v15570_v11, 7  ;;  %v15584_v13 = vld [vmem:[%s16419_s9 + $0x1d0] sm:$0xff] }
 0xb35   :  { %v16526_v43 = vrot.slane %v15584_v13, 7 }
 0xb37   :  { %7783 = vadd.xlane.f32.xlu0 %v7770_v48  ;;  %8053 = vadd.xlane.f32.xlu1 %v8043_v35  ;;  %v7937_v48 = vsel %vm6913_vm7, %v7934_v31, %v16528_v27  ;;  %v8114_v35 = vrot.slane %v15579_v55, 7  ;;  %v7183_v31 = vmul.f32 %v15477_v37, %v15100_v39 }
 0xb39   :  { %v8117_v38 = vsel %vm6913_vm7, %v8114_v35, %v16526_v43 }
 0xb3a   :  { %v8135_v28 = vmul.f32 %v8117_v38, %v15035_v6 }
 0xb3b   :  { %7963 = vadd.xlane.f32.xlu0 %v7952_v51  ;;  %7054 = vadd.xlane.f32.xlu1 %v7043_v4  ;;  %v7090_v51 = vmul.f32 %v15415_v1, %v15386_v2  ;;  %v7953_v4 = vmul.f32 %v7937_v48, %v15142_v53  ;;  %v16913_v1 = vrot.slane %v15218_v15, 7  ;;  %v7091_v48 = vmul.f32 %v15463_v18, %v15443_v20 }
 0xb3f   :  { %8051 = vadd.xlane.f32.xlu0 %v8042_v21  ;;  %7146 = vadd.xlane.f32.xlu1 %v7137_v46  ;;  %v7847_v21 = vsel %vm6913_vm7, %v7844_v34, %v16913_v1  ;;  %v8026_v46 = vrot.slane %v15604_v61, 7  ;;  %v15626_v34 = vld [vmem:[%s16419_s9 + $0x1a8] sm:$0xff] }
 0xb40   :  { %v15643_v1 = vld [vmem:[%s16419_s9 + $0x208] sm:$0xff] }
 0xb43   :  { %7008 = vadd.xlane.f32.xlu0 %v6996_v58  ;;  %7192 = vadd.xlane.f32.xlu1 %v7184_v36  ;;  %v15616_v58 = vld [vmem:[%s16419_s9 + $0x1c0] sm:$0xff]  ;;  %v7862_v36 = vmul.f32 %v7847_v21, %v15307_v7 }
 0xb47   :  { %7100 = vadd.xlane.f32.xlu0 %v7090_v51  ;;  %7965 = vadd.xlane.f32.xlu1 %v7953_v4  ;;  %v8027_v51 = vsel %vm6913_vm7, %v8024_v19, %v8026_v46  ;;  %v16522_v4 = vrot.slane %v15616_v58, 7  ;;  %v16525_v19 = vrot.slane %v15626_v34, 7 }
 0xb48   :  { %v8044_v38 = vmul.f32 %v8027_v51, %v15070_v32  ;;  %v7232_v51 = vmul.f32 %v15525_v30, %v15098_v0 }
 0xb49   :  { %v8115_v18 = vsel %vm6913_vm7, %v16522_v4, %v8114_v35  ;;  %v16529_v4 = vrot.slane %v15643_v1, 7 }
 0xb4b   :  { %7190 = vadd.xlane.f32.xlu0 %v7183_v31  ;;  %8145 = vadd.xlane.f32.xlu1 %v8135_v28  ;;  %v7185_v31 = vmul.f32 %v15487_v50, %v15210_v24  ;;  %v15638_v28 = vld [vmem:[%s16419_s9 + $0x200] sm:$0xff] }
 0xb4f   :  { %7875 = vadd.xlane.f32.xlu0 %v7862_v36  ;;  %7102 = vadd.xlane.f32.xlu1 %v7091_v48  ;;  %v8134_v48 = vmul.f32 %v8115_v18, %v15037_v8 }
 0xb53   :  { %8055 = vadd.xlane.f32.xlu0 %v8044_v38  ;;  %7194 = vadd.xlane.f32.xlu1 %v7185_v31  ;;  %v8029_v38 = vsel %vm6913_vm7, %v8026_v46, %v16525_v19  ;;  %v8206_v31 = vrot.slane %v15638_v28, 7  ;;  %v7044_v46 = vmul.f32 %v15185_v40, %v15506_v44  ;;  %v7138_v40 = vmul.f32 %v15458_v23, %v15386_v2 }
 0xb54   :  { %v7408_v21 = vpop.xlane.xlu1 %7407  ;;  %v15645_v50 = vpop.xlane.xlu0 %7405  ;;  %v8045_v19 = vmul.f32 %v8029_v38, %v15142_v53 }
 0xb55   :  { %16914 = vst [vmem:[#allocation74_spill] sm:$0xff] %v15645_v50  ;;  %v7430_v36 = vrot.slane %v7408_v21, 1  ;;  %v16527_v35 = vrot.slane %v15645_v50, 1  ;;  %v8209_v43 = vsel %vm6913_vm7, %v8206_v31, %v16529_v4 }
 0xb56   :  { %v8227_v38 = vmul.f32 %v8209_v43, %v15035_v6  ;;  %v7231_v6 = vmul.f32 %v15555_v57, %v15100_v39  ;;  %v16921_v43 = vrot.slane %v15238_v22, 7 }
 0xb57   :  { %v15659_v52 = vsel %vm7426_vm8, %v16527_v35, %v7430_v36  ;;  %8143 = vadd.xlane.f32.xlu0 %v8134_v48  ;;  %7240 = vadd.xlane.f32.xlu1 %v7232_v51 }
 0xb58   :  { %16915 = vst [vmem:[#allocation12_spill] sm:$0xff] %v15659_v52  ;;  %v7502_v21 = vpop.xlane.xlu1 %7501  ;;  %v15661_v18 = vpop.xlane.xlu0 %7499 }
 0xb59   :  { %16916 = vst [vmem:[#allocation13_spill] sm:$0xff] %v15661_v18  ;;  %v7522_v42 = vrot.slane %v7502_v21, 1  ;;  %v16530_v30 = vrot.slane %v15661_v18, 1 }
 0xb5b   :  { %v15673_v48 = vsel %vm7426_vm8, %v16530_v30, %v7522_v42  ;;  %7056 = vadd.xlane.f32.xlu0 %v7044_v46  ;;  %8057 = vadd.xlane.f32.xlu1 %v8045_v19  ;;  %v15687_v19 = vld [vmem:[%s16419_s9 + $0x1d8] sm:$0xff] }
 0xb5c   :  { %16917 = vst [vmem:[#allocation14_spill] sm:$0xff] %v15673_v48  ;;  %v7504_v51 = vpop.xlane.xlu1 %7503  ;;  %v7410_v21 = vpop.xlane.xlu0 %7409 }
 0xb5d   :  { %v7524_v35 = vrot.slane %v7504_v51, 1  ;;  %v7432_v27 = vrot.slane %v7410_v21, 1 }
 0xb5f   :  { %v15679_v52 = vsel %vm7426_vm8, %v7522_v42, %v7524_v35  ;;  %v15682_v4 = vsel %vm7426_vm8, %v7430_v36, %v7432_v27  ;;  %7148 = vadd.xlane.f32.xlu0 %v7138_v40  ;;  %8237 = vadd.xlane.f32.xlu1 %v8227_v38  ;;  %v7139_v42 = vmul.f32 %v15515_v63, %v15443_v20  ;;  %v16922_v36 = vrot.slane %v15570_v11, 7  ;;  %v15715_v63 = vld [vmem:[%s16419_s9 + $0x1e0] sm:$0xff] }
 0xb60   :  { %16918 = vst [vmem:[#allocation15_spill] sm:$0xff] %v15679_v52  ;;  %16919 = vst [vmem:[#allocation16_spill] sm:$0xff] %v15682_v4  ;;  %v15689_v46 = vpop.xlane.xlu1 %7591  ;;  %v7594_v51 = vpop.xlane.xlu0 %7593  ;;  %v8118_v38 = vrot.slane %v15687_v19, 7  ;;  %v8120_v50 = vrot.slane %v15715_v63, 7 }
 0xb61   :  { %16920 = vst [vmem:[#allocation17_spill] sm:$0xff] %v15689_v46  ;;  %v16532_v23 = vrot.slane %v15689_v46, 1  ;;  %v7614_v21 = vrot.slane %v7594_v51, 1  ;;  %v7939_v40 = vsel %vm6913_vm7, %v16922_v36, %v16921_v43  ;;  %v15710_v51 = vld [vmem:[%s16419_s9 + $0x1f8] sm:$0xff] }
 0xb62   :  { %v7954_v46 = vmul.f32 %v7939_v40, %v15307_v7  ;;  %v7280_v40 = vmul.f32 %v15579_v55, %v15098_v0 }
 0xb63   :  { %v15705_v30 = vsel %vm7426_vm8, %v16532_v23, %v7614_v21  ;;  %7238 = vadd.xlane.f32.xlu0 %v7231_v6  ;;  %7150 = vadd.xlane.f32.xlu1 %v7139_v42  ;;  %v7233_v23 = vmul.f32 %v15530_v17, %v15210_v24  ;;  %v16924_v6 = vrot.slane %v15584_v13, 7 }
 0xb64   :  { %16923 = vst [vmem:[#allocation18_spill] sm:$0xff] %v15705_v30  ;;  %v6904_v43 = vpop.xlane.xlu0 %6903  ;;  %v6902_v36 = vpop.xlane.xlu1 %6901  ;;  %v16536_v30 = vrot.slane %v15710_v51, 7 }
 0xb65   :  { %v6917_v4 = vadd.f32 %v6904_v43, %v6902_v36  ;;  %v8119_v42 = vsel %vm6913_vm7, %v16924_v6, %v8118_v38  ;;  %v8121_v36 = vsel %vm6913_vm7, %v8118_v38, %v8120_v50 }
 0xb66   :  { %v8136_v43 = vmul.f32 %v8119_v42, %v15070_v32  ;;  %v8207_v17 = vsel %vm6913_vm7, %v16536_v30, %v8206_v31 }
 0xb67   :  { %7967 = vadd.xlane.f32.xlu0 %v7954_v46  ;;  %7242 = vadd.xlane.f32.xlu1 %v7233_v23  ;;  %v8226_v12 = vmul.f32 %v8207_v17, %v15037_v8 }
 0xb68   :  { %v6953_v52 = vpop.xlane.xlu0 %6952  ;;  %v6951_v48 = vpop.xlane.xlu1 %6950 }
 0xb69   :  { %v6965_v18 = vadd.f32 %v6953_v52, %v6951_v48  ;;  %v8137_v52 = vmul.f32 %v8121_v36, %v15142_v53 }
 0xb6b   :  { %8147 = vadd.xlane.f32.xlu0 %v8136_v43  ;;  %7288 = vadd.xlane.f32.xlu1 %v7280_v40  ;;  %v7092_v43 = vmul.f32 %v15199_v26, %v15506_v44  ;;  %v7234_v26 = vmul.f32 %v15604_v61, %v15386_v2  ;;  %v7327_v61 = vmul.f32 %v15710_v51, %v15100_v39 }
 0xb6c   :  { %v7506_v6 = vpop.xlane.xlu0 %7505  ;;  %v7412_v59 = vpop.xlane.xlu1 %7411 }
 0xb6d   :  { %v7526_v46 = vrot.slane %v7506_v6, 1  ;;  %v7434_v23 = vrot.slane %v7412_v59, 1  ;;  %v7140_v59 = vmul.f32 %v15218_v15, %v15506_v44 }
 0xb6f   :  { %v15735_v48 = vsel %vm7426_vm8, %v7524_v35, %v7526_v46  ;;  %v15738_v55 = vsel %vm7426_vm8, %v7432_v27, %v7434_v23  ;;  %8235 = vadd.xlane.f32.xlu0 %v8226_v12  ;;  %8149 = vadd.xlane.f32.xlu1 %v8137_v52  ;;  %v7186_v12 = vmul.f32 %v15542_v47, %v15386_v2 }
 0xb70   :  { %v7686_v31 = vpop.xlane.xlu0 %7685  ;;  %v7596_v38 = vpop.xlane.xlu1 %7595  ;;  %v7279_v52 = vmul.f32 %v15616_v58, %v15100_v39 }
 0xb71   :  { %v7616_v42 = vrot.slane %v7596_v38, 1  ;;  %v7706_v27 = vrot.slane %v7686_v31, 1  ;;  %v16925_v31 = vrot.slane %v15245_v14, 7  ;;  %v16926_v38 = vrot.slane %v15626_v34, 7 }
 0xb73   :  { %v15745_v8 = vsel %vm7426_vm8, %v7614_v21, %v7616_v42  ;;  %7104 = vadd.xlane.f32.xlu0 %v7092_v43  ;;  %7152 = vadd.xlane.f32.xlu1 %v7140_v59  ;;  %v15762_v21 = vld [vmem:[%s16419_s9 + $0x210] sm:$0xff]  ;;  %v8031_v43 = vsel %vm6913_vm7, %v16926_v38, %v16925_v31  ;;  %v16927_v59 = vrot.slane %v15278_v10, 7  ;;  %v16929_v31 = vrot.slane %v15643_v1, 7 }
 0xb74   :  { %v6955_v35 = vpop.xlane.xlu0 %6954  ;;  %v15747_v40 = vpop.xlane.xlu1 %7683 }
 0xb75   :  { %v6966_v17 = vadd.f32 %v6965_v18, %v6955_v35  ;;  %v16535_v36 = vrot.slane %v15747_v40, 1  ;;  %v8123_v35 = vsel %vm6913_vm7, %v8120_v50, %v16927_v59 }
 0xb76   :  { %v8138_v30 = vmul.f32 %v8123_v35, %v15307_v7 }
 0xb77   :  { %v15757_v15 = vsel %vm7426_vm8, %v16535_v36, %v7706_v27  ;;  %7196 = vadd.xlane.f32.xlu0 %v7186_v12  ;;  %7244 = vadd.xlane.f32.xlu1 %v7234_v26  ;;  %v8210_v12 = vrot.slane %v15762_v21, 7  ;;  %v8046_v36 = vmul.f32 %v8031_v43, %v15307_v7 }
 0xb78   :  { %v7001_v47 = vpop.xlane.xlu0 %7000  ;;  %v6906_v6 = vpop.xlane.xlu1 %6905 }
 0xb79   :  { %v6918_v18 = vadd.f32 %v6917_v4, %v6906_v6  ;;  %v8211_v38 = vsel %vm6913_vm7, %v16929_v31, %v8210_v12 }
 0xb7a   :  { %v8228_v35 = vmul.f32 %v8211_v38, %v15070_v32  ;;  %v7187_v32 = vmul.f32 %v15570_v11, %v15443_v20 }
 0xb7b   :  { %7286 = vadd.xlane.f32.xlu0 %v7279_v52  ;;  %7334 = vadd.xlane.f32.xlu1 %v7327_v61  ;;  %v15793_v52 = vld [vmem:[%s16419_s9 + $0x218] sm:$0xff] }
 0xb7c   :  { %v15777_v4 = vpop.xlane.xlu0 %7507  ;;  %v6999_v26 = vpop.xlane.xlu1 %6998 }
 0xb7d   :  { %16928 = vst [vmem:[#allocation19_spill] sm:$0xff] %v15777_v4  ;;  %v16537_v6 = vrot.slane %v15777_v4, 1  ;;  %v7013_v39 = vadd.f32 %v7001_v47, %v6999_v26  ;;  %v7188_v26 = vmul.f32 %v15238_v22, %v15506_v44  ;;  %v7282_v22 = vmul.f32 %v15687_v19, %v15386_v2 }
 0xb7f   :  { %v15788_v50 = vsel %vm7426_vm8, %v7526_v46, %v16537_v6  ;;  %8059 = vadd.xlane.f32.xlu0 %v8046_v36  ;;  %8151 = vadd.xlane.f32.xlu1 %v8138_v30  ;;  %v8212_v46 = vrot.slane %v15793_v52, 7 }
 0xb80   :  { %v7688_v47 = vpop.xlane.xlu0 %7687  ;;  %v15795_v61 = vpop.xlane.xlu1 %7413 }
 0xb81   :  { %v7708_v43 = vrot.slane %v7688_v47, 1  ;;  %v16539_v59 = vrot.slane %v15795_v61, 1 }
 0xb83   :  { %v15803_v30 = vsel %vm7426_vm8, %v7706_v27, %v7708_v43  ;;  %v15808_v36 = vsel %vm7426_vm8, %v7434_v23, %v16539_v59  ;;  %8239 = vadd.xlane.f32.xlu0 %v8228_v35  ;;  %7200 = vadd.xlane.f32.xlu1 %v7188_v26  ;;  %v16930_v27 = vrot.slane %v15283_v33, 7  ;;  %v7281_v26 = vmul.f32 %v15584_v13, %v15210_v24 }
 0xb84   :  { %v15810_v31 = vpop.xlane.xlu0 %7775  ;;  %v7598_v47 = vpop.xlane.xlu1 %7597  ;;  %v7328_v13 = vmul.f32 %v15638_v28, %v15098_v0  ;;  %v16931_v0 = vrot.slane %v14990_v56, 7  ;;  %v16932_v56 = vrot.slane %v15265_v29, 7 }
 0xb85   :  { %v7618_v6 = vrot.slane %v7598_v47, 1  ;;  %v8215_v38 = vsel %vm6913_vm7, %v8212_v46, %v16930_v27  ;;  %v16549_v47 = vrot.slane %v15810_v31, 1 }
 0xb86   :  { %v8230_v19 = vmul.f32 %v8215_v38, %v15307_v7  ;;  %v8213_v7 = vsel %vm6913_vm7, %v8210_v12, %v8212_v46 }
 0xb87   :  { %v15820_v4 = vsel %vm7426_vm8, %v7616_v42, %v7618_v6  ;;  %7198 = vadd.xlane.f32.xlu0 %v7187_v32  ;;  %7292 = vadd.xlane.f32.xlu1 %v7282_v22 }
 0xb88   :  { %v6908_v23 = vpop.xlane.xlu0 %6907  ;;  %v7778_v35 = vpop.xlane.xlu1 %7777 }
 0xb89   :  { %v6919_v11 = vadd.f32 %v6918_v18, %v6908_v23  ;;  %v7798_v59 = vrot.slane %v7778_v35, 1  ;;  %v7283_v18 = vmul.f32 %v15715_v63, %v15443_v20  ;;  %v15836_v23 = vmax.f32 %v15019_v62, 0.0 }
 0xb8b   :  { %v15829_v33 = vsel %vm7426_vm8, %v16549_v47, %v7798_v59  ;;  %7290 = vadd.xlane.f32.xlu0 %v7281_v26  ;;  %8243 = vadd.xlane.f32.xlu1 %v8230_v19  ;;  %v8229_v19 = vmul.f32 %v8213_v7, %v15142_v53  ;;  %v7489_v28 = vmul.f32 %v16931_v0, %v15836_v23 }
 0xb8c   :  { %v7003_v42 = vpop.xlane.xlu0 %7002  ;;  %v6957_v32 = vpop.xlane.xlu1 %6956  ;;  %v7235_v53 = vmul.f32 %v15626_v34, %v15443_v20  ;;  %v7765_v46 = vmul.f32 %v16932_v56, %v15836_v23  ;;  %v7329_v7 = vmul.f32 %v15643_v1, %v15210_v24  ;;  %v7236_v0 = vmul.f32 %v15245_v14, %v15506_v44 }
 0xb8d   :  { %v7014_v22 = vadd.f32 %v7013_v39, %v7003_v42  ;;  %v6967_v27 = vadd.f32 %v6966_v17, %v6957_v32  ;;  %v7284_v17 = vmul.f32 %v15278_v10, %v15506_v44  ;;  %v7496_v10 = vsel %vm7401_vm9, %v7489_v28, 0.0 }
 0xb8e   :  { %v7772_v29 = vsel %vm7401_vm9, %v7765_v46, 0.0  ;;  %v7416_v24 = vsel %vm7415_vm10, %v15322_v3, 0.0  ;;  %v7601_v14 = vsel %vm7415_vm10, %v15324_v9, 0.0  ;;  %v16933_v3 = vrot.slane %v15477_v37, 7 }
 0xb8f   :  { %7336 = vadd.xlane.f32.xlu0 %v7328_v13  ;;  %7294 = vadd.xlane.f32.xlu1 %v7283_v18  ;;  %v6900_v9 = vmul.f32 %v15190_v41, %v15836_v23 }
 0xb90   :  { %v7049_v38 = vpop.xlane.xlu0 %7048  ;;  %v7047_v35 = vpop.xlane.xlu1 %7046  ;;  %v7949_v56 = vmul.f32 %v16933_v3, %v15836_v23 }
 0xb91   :  { %v7061_v26 = vadd.f32 %v7049_v38, %v7047_v35 }
 0xb93   :  { %8241 = vadd.xlane.f32.xlu0 %v8229_v19  ;;  %7296 = vadd.xlane.f32.xlu1 %v7284_v17 }
 0xb94   :  { %v15845_v62 = vpop.xlane.xlu0 %7689  ;;  %v15847_v63 = vpop.xlane.xlu1 %7599 }
 0xb95   :  { %v16547_v12 = vrot.slane %v15845_v62, 1  ;;  %v16544_v39 = vrot.slane %v15847_v63, 1 }
 0xb97   :  { %v15860_v42 = vsel %vm7426_vm8, %v7708_v43, %v16547_v12  ;;  %v15865_v32 = vsel %vm7426_vm8, %v7618_v6, %v16544_v39  ;;  %7246 = vadd.xlane.f32.xlu0 %v7235_v53  ;;  %7497 = vadd.xlane.f32.xlu1 %v7496_v10 }
 0xb98   :  { %v7870_v13 = vpop.xlane.xlu0 %7869  ;;  %v7780_v34 = vpop.xlane.xlu1 %7779 }
 0xb99   :  { %v7800_v18 = vrot.slane %v7780_v34, 1  ;;  %v7890_v6 = vrot.slane %v7870_v13, 1 }
 0xb9b   :  { %v15871_v38 = vsel %vm7426_vm8, %v7798_v59, %v7800_v18  ;;  %7338 = vadd.xlane.f32.xlu0 %v7329_v7  ;;  %7773 = vadd.xlane.f32.xlu1 %v7772_v29  ;;  %v7331_v7 = vmul.f32 %v15793_v52, %v15443_v20  ;;  %v16935_v20 = vrot.slane %v15055_v60, 7  ;;  %v16937_v60 = vrot.slane %v15555_v57, 7 }
 0xb9c   :  { %v6959_v43 = vpop.xlane.xlu0 %6958  ;;  %v15873_v35 = vpop.xlane.xlu1 %7867 }
 0xb9d   :  { %v6968_v19 = vadd.f32 %v6967_v27, %v6959_v43  ;;  %v16541_v17 = vrot.slane %v15873_v35, 1  ;;  %v7330_v27 = vmul.f32 %v15762_v21, %v15386_v2  ;;  %v16934_v2 = vrot.slane %v14954_v16, 7 }
 0xb9e   :  { %v7581_v52 = vmul.f32 %v16935_v20, %v15836_v23  ;;  %v16938_v20 = vrot.slane %v15433_v5, 7 }
 0xb9f   :  { %v15883_v1 = vsel %vm7426_vm8, %v16541_v17, %v7890_v6  ;;  %7248 = vadd.xlane.f32.xlu0 %v7236_v0  ;;  %7417 = vadd.xlane.f32.xlu1 %v7416_v24  ;;  %v7394_v21 = vmul.f32 %v16934_v2, %v15836_v23 }
 0xba0   :  { %v7051_v59 = vpop.xlane.xlu0 %7050  ;;  %v6910_v28 = vpop.xlane.xlu1 %6909  ;;  %v7588_v24 = vsel %vm7401_vm9, %v7581_v52, 0.0  ;;  %v7857_v52 = vmul.f32 %v16938_v20, %v15836_v23 }
 0xba1   :  { %v7062_v53 = vadd.f32 %v7061_v26, %v7051_v59  ;;  %v6920_v10 = vadd.f32 %v6919_v11, %v6910_v28  ;;  %v7956_v11 = vsel %vm7401_vm9, %v7949_v56, 0.0  ;;  %v7402_v29 = vsel %vm7401_vm9, %v7394_v21, 0.0 }
 0xba2   :  { %v7693_v59 = vsel %vm7415_vm10, %v15326_v49, 0.0  ;;  %v16936_v28 = vrot.slane %v15156_v45, 7 }
 0xba3   :  { %7340 = vadd.xlane.f32.xlu0 %v7330_v27  ;;  %7602 = vadd.xlane.f32.xlu1 %v7601_v14  ;;  %v8041_v14 = vmul.f32 %v16937_v60, %v15836_v23 }
 0xba4   :  { %v7097_v46 = vpop.xlane.xlu0 %7096  ;;  %v7005_v13 = vpop.xlane.xlu1 %7004  ;;  %v7673_v27 = vmul.f32 %v16936_v28, %v15836_v23 }
 0xba5   :  { %v7015_v34 = vadd.f32 %v7014_v22, %v7005_v13  ;;  %v6914_v22 = vsel %vm6913_vm7, %v6900_v9, 0.0 }
 0xba6   :  { %v7680_v57 = vsel %vm7401_vm9, %v7673_v27, 0.0 }
 0xba7   :  { %7342 = vadd.xlane.f32.xlu0 %v7331_v7  ;;  %7957 = vadd.xlane.f32.xlu1 %v7956_v11 }
 0xba8   :  { %v15900_v37 = vpop.xlane.xlu0 %7691  ;;  %v7095_v26 = vpop.xlane.xlu1 %7094 }
 0xba9   :  { %v7109_v60 = vadd.f32 %v7097_v46, %v7095_v26  ;;  %v16941_v46 = vrot.slane %v15710_v51, 7 }
 0xbab   :  { %7403 = vadd.xlane.f32.xlu0 %v7402_v29  ;;  %6915 = vadd.xlane.f32.xlu1 %v6914_v22  ;;  %v7509_v29 = vsel %vm7415_vm10, %v15328_v54, 0.0  ;;  %v7785_v22 = vsel %vm7415_vm10, %v15330_v25, 0.0  ;;  %v7864_v54 = vsel %vm7401_vm9, %v7857_v52, 0.0  ;;  %v10796_v25 = vld [vmem:[%s16419_s9 + $0x68] sm:$0x1]  ;;  %v8225_v26 = vmul.f32 %v16941_v46, %v15836_v23 }
 0xbac   :  { %v7872_v16 = vpop.xlane.xlu0 %7871  ;;  %v15907_v43 = vpop.xlane.xlu1 %7781  ;;  %v6949_v5 = vmul.f32 %v10796_v25, %v15836_v23 }
 0xbad   :  { %v7892_v0 = vrot.slane %v7872_v16, 1  ;;  %v7802_v41 = vrot.slane %v15907_v43, 1  ;;  %v16939_v16 = vrot.slane %v15616_v58, 7 }
 0xbaf   :  { %v15920_v3 = vsel %vm7426_vm8, %v7890_v6, %v7892_v0  ;;  %v15925_v56 = vsel %vm7426_vm8, %v7800_v18, %v7802_v41  ;;  %7589 = vadd.xlane.f32.xlu0 %v7588_v24  ;;  %7694 = vadd.xlane.f32.xlu1 %v7693_v59  ;;  %v8048_v6 = vsel %vm7401_vm9, %v8041_v14, 0.0  ;;  %v8133_v24 = vmul.f32 %v16939_v16, %v15836_v23 }
 0xbb0   :  { %v15927_v13 = vpop.xlane.xlu0 %7959  ;;  %v15929_v49 = vpop.xlane.xlu1 %7961 }
 0xbb1   :  { %v16546_v45 = vrot.slane %v15927_v13, 1  ;;  %v7982_v7 = vrot.slane %v15929_v49, 1  ;;  %v8140_v27 = vsel %vm7401_vm9, %v8133_v24, 0.0  ;;  %v8232_v24 = vsel %vm7401_vm9, %v8225_v26, 0.0  ;;  %v10802_v49 = vld [vmem:[%s16419_s9 + $0x1b8] sm:$0x1] }
 0xbb3   :  { %v15940_v18 = vsel %vm7426_vm8, %v16546_v45, %v7982_v7  ;;  %7681 = vadd.xlane.f32.xlu0 %v7680_v57  ;;  %8049 = vadd.xlane.f32.xlu1 %v8048_v6 }
 0xbb4   :  { %v6912_v11 = vpop.xlane.xlu0 %6911  ;;  %v6961_v2 = vpop.xlane.xlu1 %6960 }
 0xbb5   :  { %v15942_v21 = vadd.f32 %v6920_v10, %v6912_v11  ;;  %v15944_v9 = vadd.f32 %v6968_v19, %v6961_v2  ;;  %v10797_v11 = vld [vmem:[%s16419_s9 + $0xa0] sm:$0x1] }
 0xbb6   :  { %v6997_v2 = vmul.f32 %v10797_v11, %v15836_v23 }
 0xbb7   :  { %7510 = vadd.xlane.f32.xlu0 %v7509_v29  ;;  %7786 = vadd.xlane.f32.xlu1 %v7785_v22 }
 0xbb8   :  { %v7007_v10 = vpop.xlane.xlu0 %7006  ;;  %v7053_v59 = vpop.xlane.xlu1 %7052  ;;  %v7010_v16 = vsel %vm6913_vm7, %v6997_v2, 0.0 }
 0xbb9   :  { %v15956_v19 = vadd.f32 %v7015_v34, %v7007_v10  ;;  %v7063_v28 = vadd.f32 %v7062_v53, %v7053_v59  ;;  %v6962_v34 = vsel %vm6913_vm7, %v6949_v5, 0.0  ;;  %v16940_v53 = vld [vmem:[#allocation48_spill] sm:$0xff]  ;;  %v10798_v10 = vld [vmem:[%s16419_s9 + $0xd8] sm:$0x1] }
 0xbba   :  { %v7877_v6 = vsel %vm7415_vm10, %v16940_v53, 0.0  ;;  %v7045_v59 = vmul.f32 %v10798_v10, %v15836_v23 }
 0xbbb   :  { %7865 = vadd.xlane.f32.xlu0 %v7864_v54  ;;  %8141 = vadd.xlane.f32.xlu1 %v8140_v27 }
 0xbbc   :  { %v7099_v58 = vpop.xlane.xlu0 %7098  ;;  %v7143_v14 = vpop.xlane.xlu1 %7142  ;;  %v7058_v5 = vsel %vm6913_vm7, %v7045_v59, 0.0 }
 0xbbd   :  { %v15964_v57 = vadd.f32 %v7109_v60, %v7099_v58  ;;  %v16942_v60 = vld [vmem:[#allocation50_spill] sm:$0xff] }
 0xbbe   :  { %v7969_v58 = vsel %vm7415_vm10, %v16942_v60, 0.0 }
 0xbbf   :  { %6963 = vadd.xlane.f32.xlu0 %v6962_v34  ;;  %7878 = vadd.xlane.f32.xlu1 %v7877_v6  ;;  %v10800_v34 = vld [vmem:[%s16419_s9 + $0x148] sm:$0x1] }
 0xbc0   :  { %v7145_v29 = vpop.xlane.xlu0 %7144  ;;  %v15976_v22 = vpop.xlane.xlu1 %7873  ;;  %v7141_v53 = vmul.f32 %v10800_v34, %v15836_v23 }
 0xbc1   :  { %v7157_v20 = vadd.f32 %v7145_v29, %v7143_v14  ;;  %v7894_v52 = vrot.slane %v15976_v22, 1  ;;  %v10799_v14 = vld [vmem:[%s16419_s9 + $0x110] sm:$0x1] }
 0xbc3   :  { %v15988_v51 = vsel %vm7426_vm8, %v7892_v0, %v7894_v52  ;;  %7011 = vadd.xlane.f32.xlu0 %v7010_v16  ;;  %8233 = vadd.xlane.f32.xlu1 %v8232_v24  ;;  %v7093_v0 = vmul.f32 %v10799_v14, %v15836_v23  ;;  %v7154_v16 = vsel %vm6913_vm7, %v7141_v53, 0.0  ;;  %v10801_v24 = vld [vmem:[%s16419_s9 + $0x180] sm:$0x1] }
 0xbc4   :  { %v15990_v54 = vpop.xlane.xlu0 %7783  ;;  %v15992_v27 = vpop.xlane.xlu1 %8053  ;;  %v7189_v43 = vmul.f32 %v10801_v24, %v15836_v23 }
 0xbc5   :  { %v16542_v25 = vrot.slane %v15990_v54, 1  ;;  %v7106_v29 = vsel %vm6913_vm7, %v7093_v0, 0.0  ;;  %v8074_v59 = vrot.slane %v15992_v27, 1 }
 0xbc6   :  { %v7202_v0 = vsel %vm6913_vm7, %v7189_v43, 0.0 }
 0xbc7   :  { %v16011_v6 = vsel %vm7426_vm8, %v7802_v41, %v16542_v25  ;;  %7059 = vadd.xlane.f32.xlu0 %v7058_v5  ;;  %7970 = vadd.xlane.f32.xlu1 %v7969_v58  ;;  %v16943_v58 = vld [vmem:[#allocation71_spill] sm:$0xff] }
 0xbc8   :  { %v7964_v11 = vpop.xlane.xlu0 %7963  ;;  %v7055_v2 = vpop.xlane.xlu1 %7054  ;;  %v8061_v14 = vsel %vm7415_vm10, %v16943_v58, 0.0 }
 0xbc9   :  { %v7984_v46 = vrot.slane %v7964_v11, 1  ;;  %v16013_v26 = vadd.f32 %v7063_v28, %v7055_v2  ;;  %v16945_v11 = vld [vmem:[#allocation72_spill] sm:$0xff] }
 0xbca   :  { %v8153_v2 = vsel %vm7415_vm10, %v16945_v11, 0.0 }
 0xbcb   :  { %v16024_v41 = vsel %vm7426_vm8, %v7982_v7, %v7984_v46  ;;  %7107 = vadd.xlane.f32.xlu0 %v7106_v29  ;;  %7155 = vadd.xlane.f32.xlu1 %v7154_v16  ;;  %v7237_v7 = vmul.f32 %v10802_v49, %v15836_v23  ;;  %v10803_v16 = vld [vmem:[%s16419_s9 + $0x1f0] sm:$0x1] }
 0xbcc   :  { %v16026_v10 = vpop.xlane.xlu0 %8051  ;;  %v7147_v28 = vpop.xlane.xlu1 %7146  ;;  %v7285_v24 = vmul.f32 %v10803_v16, %v15836_v23  ;;  %v10805_v16 = vld [vmem:[%s16419_s9 + $0x220] sm:$0xff] }
 0xbcd   :  { %v16543_v5 = vrot.slane %v16026_v10, 1  ;;  %v7158_v60 = vadd.f32 %v7157_v20, %v7147_v28  ;;  %v7250_v29 = vsel %vm6913_vm7, %v7237_v7, 0.0  ;;  %v10804_v7 = vld [vmem:[%s16419_s9 + $0x228] sm:$0x1] }
 0xbce   :  { %v7298_v49 = vsel %vm6913_vm7, %v7285_v24, 0.0  ;;  %v7332_v24 = vmul.f32 %v10805_v16, %v15506_v44 }
 0xbcf   :  { %v16040_v34 = vsel %vm7426_vm8, %v16543_v5, %v8074_v59  ;;  %8062 = vadd.xlane.f32.xlu0 %v8061_v14  ;;  %7203 = vadd.xlane.f32.xlu1 %v7202_v0 }
 0xbd0   :  { %v7009_v27 = vpop.xlane.xlu0 %7008  ;;  %v7193_v20 = vpop.xlane.xlu1 %7192 }
 0xbd1   :  { %v16043_v53 = vadd.f32 %v15956_v19, %v7009_v27  ;;  %v16946_v19 = vld [vmem:[#allocation73_spill] sm:$0xff]  ;;  %v7333_v27 = vmul.f32 %v10804_v7, %v15836_v23 }
 0xbd2   :  { %v8245_v0 = vsel %vm7415_vm10, %v16946_v19, 0.0 }
 0xbd3   :  { %16944 = vst [vmem:[#allocation20_spill] sm:$0xff] %v16043_v53  ;;  %8154 = vadd.xlane.f32.xlu0 %v8153_v2  ;;  %7251 = vadd.xlane.f32.xlu1 %v7250_v29 }
 0xbd4   :  { %v7101_v43 = vpop.xlane.xlu0 %7100  ;;  %v7966_v28 = vpop.xlane.xlu1 %7965 }
 0xbd5   :  { %v7111_v58 = vadd.f32 %v15964_v57, %v7101_v43  ;;  %v7986_v14 = vrot.slane %v7966_v28, 1  ;;  %v7346_v43 = vsel %vm6913_vm7, %v7333_v27, 0.0 }
 0xbd7   :  { %v16061_v11 = vsel %vm7426_vm8, %v7984_v46, %v7986_v14  ;;  %8246 = vadd.xlane.f32.xlu0 %v8245_v0  ;;  %7299 = vadd.xlane.f32.xlu1 %v7298_v49 }
 0xbd8   :  { %v7191_v2 = vpop.xlane.xlu0 %7190  ;;  %v8146_v29 = vpop.xlane.xlu1 %8145 }
 0xbd9   :  { %v7205_v57 = vadd.f32 %v7193_v20, %v7191_v2 }
 0xbdb   :  { %7344 = vadd.xlane.f32.xlu0 %v7332_v24  ;;  %7347 = vadd.xlane.f32.xlu1 %v7346_v43  ;;  %v8166_v24 = vrot.slane %v8146_v29, 1 }
 0xbdc   :  { %v16068_v28 = vpop.xlane.xlu0 %7875  ;;  %v7103_v23 = vpop.xlane.xlu1 %7102 }
 0xbdd   :  { %v16540_v46 = vrot.slane %v16068_v28, 1  ;;  %v7112_v19 = vadd.f32 %v7111_v58, %v7103_v23 }
 0xbdf   :  { %v16076_v20 = vsel %vm7426_vm8, %v7894_v52, %v16540_v46 }
 0xbe0   :  { %16947 = vst [vmem:[#allocation21_spill] sm:$0xff] %v16076_v20  ;;  %v8056_v0 = vpop.xlane.xlu0 %8055  ;;  %v7195_v49 = vpop.xlane.xlu1 %7194 }
 0xbe1   :  { %v8076_v44 = vrot.slane %v8056_v0, 1  ;;  %v7206_v7 = vadd.f32 %v7205_v57, %v7195_v49 }
 0xbe3   :  { %v16079_v27 = vsel %vm7426_vm8, %v8074_v59, %v8076_v44 }
 0xbe4   :  { %v16081_v2 = vpop.xlane.xlu0 %8143  ;;  %v7241_v16 = vpop.xlane.xlu1 %7240 }
 0xbe5   :  { %v16545_v58 = vrot.slane %v16081_v2, 1 }
 0xbe7   :  { %v16087_v22 = vsel %vm7426_vm8, %v16545_v58, %v8166_v24 }
 0xbe8   :  { %v7057_v52 = vpop.xlane.xlu0 %7056  ;;  %v8058_v43 = vpop.xlane.xlu1 %8057 }
 0xbe9   :  { %v16090_v23 = vadd.f32 %v16013_v26, %v7057_v52  ;;  %v8078_v57 = vrot.slane %v8058_v43, 1 }
 0xbeb   :  { %16948 = vst [vmem:[#allocation22_spill] sm:$0xff] %v16090_v23  ;;  %v16093_v59 = vsel %vm7426_vm8, %v8076_v44, %v8078_v57 }
 0xbec   :  { %v7149_v0 = vpop.xlane.xlu0 %7148  ;;  %v8238_v49 = vpop.xlane.xlu1 %8237 }
 0xbed   :  { %v7159_v46 = vadd.f32 %v7158_v60, %v7149_v0 }
 0xbf0   :  { %v7239_v29 = vpop.xlane.xlu0 %7238  ;;  %v7151_v17 = vpop.xlane.xlu1 %7150 }
 0xbf1   :  { %v7253_v25 = vadd.f32 %v7241_v16, %v7239_v29  ;;  %v7160_v5 = vadd.f32 %v7159_v46, %v7151_v17  ;;  %v8258_v46 = vrot.slane %v8238_v49, 1 }
 0xbf4   :  { %v16095_v39 = vpop.xlane.xlu0 %7967  ;;  %v7243_v58 = vpop.xlane.xlu1 %7242 }
 0xbf5   :  { %16949 = vst [vmem:[#allocation23_spill] sm:$0xff] %v16095_v39  ;;  %v16548_v45 = vrot.slane %v16095_v39, 1  ;;  %v7254_v12 = vadd.f32 %v7253_v25, %v7243_v58 }
 0xbf7   :  { %v16101_v26 = vsel %vm7426_vm8, %v7986_v14, %v16548_v45 }
 0xbf8   :  { %v8148_v44 = vpop.xlane.xlu0 %8147  ;;  %v7289_v52 = vpop.xlane.xlu1 %7288 }
 0xbf9   :  { %v8168_v43 = vrot.slane %v8148_v44, 1 }
 0xbfb   :  { %v16104_v60 = vsel %vm7426_vm8, %v8166_v24, %v8168_v43 }
 0xbfc   :  { %v16106_v0 = vpop.xlane.xlu0 %8235  ;;  %v8150_v17 = vpop.xlane.xlu1 %8149 }
 0xbfd   :  { %16950 = vst [vmem:[#allocation24_spill] sm:$0xff] %v16106_v0  ;;  %v16552_v16 = vrot.slane %v16106_v0, 1  ;;  %v8170_v29 = vrot.slane %v8150_v17, 1 }
 0xbff   :  { %v16112_v25 = vsel %vm7426_vm8, %v16552_v16, %v8258_v46  ;;  %v16115_v14 = vsel %vm7426_vm8, %v8168_v43, %v8170_v29 }
 0xc00   :  { %16951 = vst [vmem:[#allocation25_spill] sm:$0xff] %v16115_v14  ;;  %v7105_v58 = vpop.xlane.xlu0 %7104  ;;  %v7153_v44 = vpop.xlane.xlu1 %7152 }
 0xc01   :  { %v16117_v45 = vadd.f32 %v7112_v19, %v7105_v58  ;;  %v16119_v24 = vadd.f32 %v7160_v5, %v7153_v44 }
 0xc03   :  { %16952 = vst [vmem:[#allocation26_spill] sm:$0xff] %v16117_v45  ;;  %16953 = vst [vmem:[#allocation27_spill] sm:$0xff] %v16119_v24 }
 0xc04   :  { %v7197_v47 = vpop.xlane.xlu0 %7196  ;;  %v7245_v39 = vpop.xlane.xlu1 %7244 }
 0xc05   :  { %v7207_v49 = vadd.f32 %v7206_v7, %v7197_v47  ;;  %v16121_v23 = vadd.f32 %v7254_v12, %v7245_v39 }
 0xc08   :  { %v7287_v17 = vpop.xlane.xlu0 %7286  ;;  %v7335_v53 = vpop.xlane.xlu1 %7334 }
 0xc09   :  { %v7301_v0 = vadd.f32 %v7289_v52, %v7287_v17 }
 0xc0c   :  { %v16123_v20 = vpop.xlane.xlu0 %8059  ;;  %v16125_v16 = vpop.xlane.xlu1 %8151 }
 0xc0d   :  { %16954 = vst [vmem:[#allocation28_spill] sm:$0xff] %v16123_v20  ;;  %16955 = vst [vmem:[#allocation29_spill] sm:$0xff] %v16125_v16  ;;  %v16554_v43 = vrot.slane %v16123_v20, 1  ;;  %v16556_v14 = vrot.slane %v16125_v16, 1 }
 0xc0f   :  { %v16132_v5 = vsel %vm7426_vm8, %v8078_v57, %v16554_v43  ;;  %v16137_v47 = vsel %vm7426_vm8, %v8170_v29, %v16556_v14 }
 0xc10   :  { %16956 = vst [vmem:[#allocation30_spill] sm:$0xff] %v16132_v5  ;;  %16957 = vst [vmem:[#allocation31_spill] sm:$0xff] %v16137_v47  ;;  %v8240_v12 = vpop.xlane.xlu0 %8239  ;;  %v7201_v39 = vpop.xlane.xlu1 %7200 }
 0xc11   :  { %v8260_v19 = vrot.slane %v8240_v12, 1 }
 0xc13   :  { %v16140_v7 = vsel %vm7426_vm8, %v8258_v46, %v8260_v19 }
 0xc14   :  { %16958 = vst [vmem:[#allocation32_spill] sm:$0xff] %v16140_v7  ;;  %v7199_v52 = vpop.xlane.xlu0 %7198  ;;  %v7293_v58 = vpop.xlane.xlu1 %7292 }
 0xc15   :  { %v7208_v44 = vadd.f32 %v7207_v49, %v7199_v52  ;;  %v16966_v52 = vld [vmem:[#allocation14_spill] sm:$0xff] }
 0xc17   :  { %v16142_v17 = vadd.f32 %v7208_v44, %v7201_v39 }
 0xc18   :  { %v7291_v20 = vpop.xlane.xlu0 %7290  ;;  %v16144_v24 = vpop.xlane.xlu1 %8243 }
 0xc19   :  { %16959 = vst [vmem:[#allocation33_spill] sm:$0xff] %v16142_v17  ;;  %16960 = vst [vmem:[#allocation34_spill] sm:$0xff] %v16144_v24  ;;  %v7302_v57 = vadd.f32 %v7301_v0, %v7291_v20  ;;  %v16557_v46 = vrot.slane %v16144_v24, 1  ;;  %v16979_v17 = vld [vmem:[#allocation16_spill] sm:$0xff] }
 0xc1b   :  { %v7303_v43 = vadd.f32 %v7302_v57, %v7293_v58  ;;  %v16967_v57 = vld [vmem:[#allocation15_spill] sm:$0xff] }
 0xc1c   :  { %v7337_v16 = vpop.xlane.xlu0 %7336  ;;  %v7295_v5 = vpop.xlane.xlu1 %7294 }
 0xc1d   :  { %v16146_v29 = vadd.f32 %v7337_v16, %v7335_v53  ;;  %v7304_v14 = vadd.f32 %v7303_v43, %v7295_v5  ;;  %v16964_v16 = vld [vmem:[#allocation13_spill] sm:$0xff] }
 0xc1e   :  { %v16965_v43 = vrot.slane %v16964_v16, 1 }
 0xc20   :  { %v8242_v47 = vpop.xlane.xlu0 %8241  ;;  %v7297_v12 = vpop.xlane.xlu1 %7296 }
 0xc21   :  { %v8262_v45 = vrot.slane %v8242_v47, 1  ;;  %v16149_v7 = vadd.f32 %v7304_v14, %v7297_v12  ;;  %v16968_v12 = vrot.slane %v15810_v31, 1 }
 0xc23   :  { %16961 = vst [vmem:[#allocation35_spill] sm:$0xff] %v16149_v7  ;;  %v16152_v49 = vsel %vm7426_vm8, %v8260_v19, %v8262_v45  ;;  %v16157_v20 = vsel %vm7426_vm8, %v8262_v45, %v16557_v46 }
 0xc24   :  { %16962 = vst [vmem:[#allocation36_spill] sm:$0xff] %v16152_v49  ;;  %16963 = vst [vmem:[#allocation37_spill] sm:$0xff] %v16157_v20  ;;  %v7247_v0 = vpop.xlane.xlu0 %7246  ;;  %v7498_v39 = vpop.xlane.xlu1 %7497 }
 0xc25   :  { %v7519_v53 = vrot.slane %v7498_v39, 1 }
 0xc27   :  { %v7521_v5 = vsel %vm7426_vm8, %v7519_v53, %v16965_v43 }
 0xc28   :  { %v7539_v58 = vadd.f32 %v16966_v52, %v7521_v5  ;;  %v7339_v47 = vpop.xlane.xlu0 %7338  ;;  %v7774_v14 = vpop.xlane.xlu1 %7773  ;;  %v16969_v52 = vlaneseq }
 0xc29   :  { %v7795_v44 = vrot.slane %v7774_v14, 1  ;;  %v7350_v24 = vadd.f32 %v16146_v29, %v7339_v47  ;;  %v16983_v47 = vld [vmem:[#allocation18_spill] sm:$0xff] }
 0xc2a   :  { %v7540_v19 = vadd.f32 %v7539_v58, %v16967_v57  ;;  %v16174_v14 = vand.u32 127, %v16969_v52  ;;  %v16973_v57 = vmov 0.0  }
 0xc2b   :  { %v7797_v7 = vsel %vm7426_vm8, %v7795_v44, %v16968_v12 }
 0xc2c   :  { %v7815_v45 = vadd.f32 %v15829_v33, %v7797_v7  ;;  %v7249_v46 = vpop.xlane.xlu0 %7248  ;;  %v7418_v20 = vpop.xlane.xlu1 %7417  ;;  %v7541_v39 = vadd.f32 %v7540_v19, %v15735_v48  ;;  %16970 = vst [vmem:[#allocation38_spill] sm:$0xff] %v16174_v14  ;;  %v16558_v33 = vrot.slane %v15900_v37, 1  ;;  %vm6930_vm11 = vcmp.eq.s32.totalorder %v16174_v14, 0 }
 0xc2d   :  { %vm6978_vm12 = vcmp.eq.s32.totalorder %v16174_v14, 1  ;;  %vm7026_vm13 = vcmp.eq.s32.totalorder %v16174_v14, 2  ;;  %v16195_v19 = vsel %vm6930_vm11, 1.0, %v16973_v57  ;;  %vm7074_vm14 = vcmp.eq.s32.totalorder %v16174_v14, 3 }
 0xc2e   :  { %v7816_v16 = vadd.f32 %v7815_v45, %v15871_v38  ;;  %v16171_v53 = vadd.f32 %v7541_v39, %v15788_v50  ;;  %v16971_v50 = vrot.slane %v15845_v62, 1  ;;  %vm7122_vm15 = vcmp.eq.s32.totalorder %v16174_v14, 4 }
 0xc2f   :  { %vm7170_vm0 = vcmp.eq.s32.totalorder %v16174_v14, 5  ;;  %v16206_v52 = vsel %vm7026_vm13, 1.0, %v16973_v57  ;;  %vm7218_vm1 = vcmp.eq.s32.totalorder %v16174_v14, 6  ;;  %vm7266_vm2 = vcmp.eq.s32.totalorder %v16174_v14, 7 }
 0xc30   :  { %v7341_v43 = vpop.xlane.xlu0 %7340  ;;  %v7603_v5 = vpop.xlane.xlu1 %7602  ;;  %v7817_v31 = vadd.f32 %v7816_v16, %v15925_v56  ;;  %v16189_v38 = vsel %vm7426_vm8, %v16971_v50, %v16558_v33  ;;  %v16972_v56 = vrot.slane %v15927_v13, 1  ;;  %v16200_v16 = vsel %vm6978_vm12, 1.0, %v16973_v57  ;;  %v16975_v50 = vld [vmem:[#allocation74_spill] sm:$0xff]  ;;  %v16978_v33 = vld [vmem:[#allocation12_spill] sm:$0xff] }
 0xc31   :  { %v16227_v14 = vsel %vm7218_vm1, 1.0, %v16973_v57 }
 0xc32   :  { %v16178_v58 = vadd.f32 %v7817_v31, %v16011_v6 }
 0xc34   :  { %v7343_v7 = vpop.xlane.xlu0 %7342  ;;  %v7958_v44 = vpop.xlane.xlu1 %7957 }
 0xc35   :  { %v7979_v48 = vrot.slane %v7958_v44, 1  ;;  %v16212_v44 = vsel %vm7074_vm14, 1.0, %v16973_v57 }
 0xc36   :  { %16974 = vst [vmem:[#allocation39_spill] sm:$0xff] %v16212_v44 }
 0xc37   :  { %v7981_v6 = vsel %vm7426_vm8, %v7979_v48, %v16972_v56  ;;  %v7438_v48 = vrot.slane %v7418_v20, 1  ;;  %v16976_v56 = vrot.slane %v16975_v50, 1  ;;  %v7256_v20 = vadd.f32 %v16121_v23, %v7247_v0  ;;  %v16981_v23 = vld [vmem:[#allocation17_spill] sm:$0xff] }
 0xc38   :  { %v7999_v12 = vadd.f32 %v15940_v18, %v7981_v6  ;;  %v7404_v45 = vpop.xlane.xlu0 %7403  ;;  %v6916_v39 = vpop.xlane.xlu1 %6915  ;;  %v7622_v50 = vrot.slane %v7603_v5, 1  ;;  %v16982_v0 = vrot.slane %v16981_v23, 1 }
 0xc39   :  { %v7427_v62 = vrot.slane %v7404_v45, 1  ;;  %v6922_v13 = vsel %vm6913_vm7, %v6916_v39, 0.0  ;;  %v16219_v45 = vsel %vm7122_vm15, 1.0, %v16973_v57  ;;  %v16222_v39 = vsel %vm7170_vm0, 1.0, %v16973_v57 }
 0xc3a   :  { %v8000_v31 = vadd.f32 %v7999_v12, %v16024_v41  ;;  %v6923_v18 = vadd.f32 %v6922_v13, %v15942_v21  ;;  %16977 = vst [vmem:[#allocation41_spill] sm:$0xff] %v16222_v39  ;;  %v16238_v44 = vadd.f32 %v7256_v20, %v7249_v46  ;;  %v7351_v46 = vadd.f32 %v7350_v24, %v7341_v43 }
 0xc3b   :  { %v7429_v6 = vsel %vm7426_vm8, %v7427_v62, %v16976_v56  ;;  %v16231_v56 = vsel %vm7266_vm2, 1.0, %v16973_v57  ;;  %v7452_v57 = vsel %vm6913_vm7, %v7438_v48, 0.0  ;;  %v16986_v24 = vrot.slane %v15747_v40, 1 }
 0xc3c   :  { %v7447_v41 = vadd.f32 %v16978_v33, %v7429_v6  ;;  %v6924_v12 = vrot.slane %v6923_v18, 4  ;;  %v7590_v21 = vpop.xlane.xlu0 %7589  ;;  %v7695_v13 = vpop.xlane.xlu1 %7694  ;;  %v8001_v49 = vadd.f32 %v8000_v31, %v16061_v11  ;;  %v16980_v11 = vrot.slane %v15795_v61, 1 }
 0xc3d   :  { %v7611_v62 = vrot.slane %v7590_v21, 1  ;;  %v7714_v21 = vrot.slane %v7695_v13, 1  ;;  %v16987_v43 = vrot.slane %v16026_v10, 1 }
 0xc3e   :  { %v7448_v39 = vadd.f32 %v7447_v41, %v16979_v17  ;;  %v6925_v33 = vadd.f32 %v6924_v12, %v6923_v18  ;;  %v16236_v6 = vadd.f32 %v8001_v49, %v16101_v26  ;;  %v7439_v31 = vsel %vm7426_vm8, %v16980_v11, %v7438_v48 }
 0xc3f   :  { %v7613_v5 = vsel %vm7426_vm8, %v7611_v62, %v16982_v0  ;;  %v16984_v41 = vrot.slane %v15847_v63, 1  ;;  %v7636_v11 = vsel %vm6913_vm7, %v7622_v50, 0.0 }
 0xc40   :  { %v7449_v29 = vadd.f32 %v7448_v39, %v15738_v55  ;;  %v6926_v17 = vrot.slane %v6925_v33, 2  ;;  %v7631_v18 = vadd.f32 %v16983_v47, %v7613_v5  ;;  %v7682_v26 = vpop.xlane.xlu0 %7681  ;;  %v8050_v49 = vpop.xlane.xlu1 %8049  ;;  %v16255_v55 = vadd.f32 %v7351_v46, %v7343_v7 }
 0xc41   :  { %v7623_v61 = vsel %vm7426_vm8, %v16984_v41, %v7622_v50  ;;  %v7703_v12 = vrot.slane %v7682_v26, 1  ;;  %v8071_v20 = vrot.slane %v8050_v49, 1  ;;  %v16985_v39 = vrot.slane %v15900_v37, 1  ;;  %v16988_v49 = vld [vmem:[#allocation19_spill] sm:$0xff] }
 0xc42   :  { %v7450_v13 = vadd.f32 %v7449_v29, %v15808_v36  ;;  %v6927_v62 = vadd.f32 %v6926_v17, %v6925_v33  ;;  %v7632_v48 = vadd.f32 %v7631_v18, %v15745_v8  ;;  %v7728_v37 = vsel %vm6913_vm7, %v7714_v21, 0.0 }
 0xc43   :  { %v7715_v23 = vsel %vm7426_vm8, %v16985_v39, %v7714_v21  ;;  %v7705_v63 = vsel %vm7426_vm8, %v7703_v12, %v16986_v24  ;;  %v8073_v0 = vsel %vm7426_vm8, %v8071_v20, %v16987_v43  ;;  %v16990_v21 = vrot.slane %v15990_v54, 1 }
 0xc44   :  { %v7451_v50 = vadd.f32 %v7450_v13, %v7439_v31  ;;  %v6928_v5 = vrot.slane %v6927_v62, 1  ;;  %v7633_v36 = vadd.f32 %v7632_v48, %v15820_v4  ;;  %v7723_v8 = vadd.f32 %v15757_v15, %v7705_v63  ;;  %v7511_v7 = vpop.xlane.xlu0 %7510  ;;  %v7787_v33 = vpop.xlane.xlu1 %7786 }
 0xc45   :  { %v8091_v29 = vadd.f32 %v16040_v34, %v8073_v0  ;;  %v7530_v17 = vrot.slane %v7511_v7, 1  ;;  %v7806_v40 = vrot.slane %v7787_v33, 1  ;;  %v16989_v4 = vrot.slane %v16988_v49, 1 }
 0xc46   :  { %v7453_v47 = vadd.f32 %v7452_v57, %v7451_v50  ;;  %v6929_v18 = vadd.f32 %v6928_v5, %v6927_v62  ;;  %v7634_v10 = vadd.f32 %v7633_v36, %v15865_v32  ;;  %v7724_v26 = vadd.f32 %v7723_v8, %v15803_v30 }
 0xc47   :  { %v8092_v31 = vadd.f32 %v8091_v29, %v16079_v27  ;;  %v7531_v15 = vsel %vm7426_vm8, %v16989_v4, %v7530_v17  ;;  %v7544_v46 = vsel %vm6913_vm7, %v7530_v17, 0.0  ;;  %v7807_v34 = vsel %vm7426_vm8, %v16990_v21, %v7806_v40 }
 0xc48   :  { %v7454_v41 = vrot.slane %v7453_v47, 4  ;;  %v16281_v57 = vmul.f32 %v16195_v19, %v6929_v18  ;;  %v7635_v12 = vadd.f32 %v7634_v10, %v7623_v61  ;;  %v7725_v32 = vadd.f32 %v7724_v26, %v15860_v42  ;;  %v7866_v30 = vpop.xlane.xlu0 %7865  ;;  %v8142_v20 = vpop.xlane.xlu1 %8141 }
 0xc49   :  { %v7543_v27 = vadd.f32 %v16171_v53, %v7531_v15  ;;  %v7819_v13 = vadd.f32 %v16178_v58, %v7807_v34  ;;  %v7820_v62 = vsel %vm6913_vm7, %v7806_v40, 0.0  ;;  %v7887_v48 = vrot.slane %v7866_v30, 1 }
 0xc4a   :  { %v7455_v39 = vadd.f32 %v7454_v41, %v7453_v47  ;;  %v7637_v54 = vadd.f32 %v7636_v11, %v7635_v12  ;;  %v7726_v24 = vadd.f32 %v7725_v32, %v16189_v38  ;;  %v8163_v63 = vrot.slane %v8142_v20, 1  ;;  %v16994_v41 = vld [vmem:[#allocation21_spill] sm:$0xff] }
 0xc4b   :  { %v7545_v43 = vadd.f32 %v7544_v46, %v7543_v27  ;;  %v7821_v0 = vadd.f32 %v7820_v62, %v7819_v13  ;;  %v16991_v61 = vrot.slane %v15873_v35, 1  ;;  %v16292_v50 = vadd.f32 %v8092_v31, %v16093_v59 }
 0xc4c   :  { %v7456_v53 = vrot.slane %v7455_v39, 2  ;;  %v7638_v5 = vrot.slane %v7637_v54, 4  ;;  %v7727_v58 = vadd.f32 %v7726_v24, %v7715_v23  ;;  %v6964_v8 = vpop.xlane.xlu0 %6963  ;;  %v7879_v7 = vpop.xlane.xlu1 %7878  ;;  %v16992_v38 = vrot.slane %v16081_v2, 1 }
 0xc4d   :  { %v7889_v42 = vsel %vm7426_vm8, %v7887_v48, %v16991_v61  ;;  %v7546_v11 = vrot.slane %v7545_v43, 4  ;;  %v7822_v33 = vrot.slane %v7821_v0, 4  ;;  %v6970_v35 = vsel %vm6913_vm7, %v6964_v8, 0.0 }
 0xc4e   :  { %v7907_v36 = vadd.f32 %v15883_v1, %v7889_v42  ;;  %v8165_v29 = vsel %vm7426_vm8, %v8163_v63, %v16992_v38  ;;  %v7457_v17 = vadd.f32 %v7456_v53, %v7455_v39  ;;  %v7729_v40 = vadd.f32 %v7728_v37, %v7727_v58  ;;  %v16996_v58 = vld [vmem:[#allocation24_spill] sm:$0xff] }
 0xc4f   :  { %v8183_v47 = vadd.f32 %v16087_v22, %v8165_v29  ;;  %v7547_v18 = vadd.f32 %v7546_v11, %v7545_v43  ;;  %v7823_v23 = vadd.f32 %v7822_v33, %v7821_v0  ;;  %v6971_v1 = vadd.f32 %v6970_v35, %v15944_v9  ;;  %v16998_v35 = vld [vmem:[#allocation22_spill] sm:$0xff] }
 0xc50   :  { %v7908_v59 = vadd.f32 %v7907_v36, %v15920_v3  ;;  %v7898_v10 = vrot.slane %v7879_v7, 1  ;;  %v7458_v26 = vrot.slane %v7457_v17, 1  ;;  %v7730_v31 = vrot.slane %v7729_v40, 4  ;;  %v7012_v4 = vpop.xlane.xlu0 %7011  ;;  %v8234_v15 = vpop.xlane.xlu1 %8233 }
 0xc51   :  { %v16303_v49 = vadd.f32 %v8183_v47, %v16104_v60  ;;  %v7548_v46 = vrot.slane %v7547_v18, 2  ;;  %v7824_v37 = vrot.slane %v7823_v23, 2  ;;  %v6972_v21 = vrot.slane %v6971_v1, 4 }
 0xc52   :  { %v7909_v2 = vadd.f32 %v7908_v59, %v15988_v51  ;;  %v16993_v3 = vrot.slane %v16068_v28, 1  ;;  %v7459_v34 = vadd.f32 %v7458_v26, %v7457_v17  ;;  %v7912_v12 = vsel %vm6913_vm7, %v7898_v10, 0.0  ;;  %v16995_v51 = vld [vmem:[#allocation20_spill] sm:$0xff] }
 0xc53   :  { %v7018_v32 = vsel %vm6913_vm7, %v7012_v4, 0.0  ;;  %v7549_v60 = vadd.f32 %v7548_v46, %v7547_v18  ;;  %v7825_v30 = vadd.f32 %v7824_v37, %v7823_v23  ;;  %v6973_v20 = vadd.f32 %v6972_v21, %v6971_v1 }
 0xc54   :  { %v7899_v22 = vsel %vm7426_vm8, %v16993_v3, %v7898_v10  ;;  %v7910_v9 = vadd.f32 %v7909_v2, %v16994_v41  ;;  %v7019_v27 = vadd.f32 %v7018_v32, %v16995_v51  ;;  %v7460_v13 = vmul.f32 %v16195_v19, %v7459_v34  ;;  %v7060_v28 = vpop.xlane.xlu0 %7059  ;;  %v7971_v61 = vpop.xlane.xlu1 %7970  ;;  %v16999_v2 = vld [vmem:[#allocation32_spill] sm:$0xff]  ;;  %v17000_v51 = vld [vmem:[#allocation23_spill] sm:$0xff] }
 0xc55   :  { %v7639_v48 = vadd.f32 %v7638_v5, %v7637_v54  ;;  %v8255_v39 = vrot.slane %v8234_v15, 1  ;;  %v7550_v24 = vrot.slane %v7549_v60, 1  ;;  %v7826_v63 = vrot.slane %v7825_v30, 1 }
 0xc56   :  { %v7911_v62 = vadd.f32 %v7910_v9, %v7899_v22  ;;  %v6974_v43 = vrot.slane %v6973_v20, 2  ;;  %v7020_v0 = vrot.slane %v7019_v27, 4  ;;  %v16997_v36 = vrot.slane %v16996_v58, 1  ;;  %v17002_v58 = vld [vmem:[#allocation26_spill] sm:$0xff] }
 0xc57   :  { %v7640_v53 = vrot.slane %v7639_v48, 2  ;;  %v7066_v7 = vsel %vm6913_vm7, %v7060_v28, 0.0  ;;  %v7551_v11 = vadd.f32 %v7550_v24, %v7549_v60  ;;  %v7827_v33 = vadd.f32 %v7826_v63, %v7825_v30 }
 0xc58   :  { %v7913_v42 = vadd.f32 %v7912_v12, %v7911_v62  ;;  %v8257_v8 = vsel %vm7426_vm8, %v8255_v39, %v16997_v36  ;;  %v6975_v19 = vadd.f32 %v6974_v43, %v6973_v20  ;;  %v7021_v38 = vadd.f32 %v7020_v0, %v7019_v27  ;;  %v7108_v1 = vpop.xlane.xlu0 %7107  ;;  %v7156_v22 = vpop.xlane.xlu1 %7155 }
 0xc59   :  { %v7641_v5 = vadd.f32 %v7640_v53, %v7639_v48  ;;  %v8275_v29 = vadd.f32 %v16112_v25, %v8257_v8  ;;  %v7067_v17 = vadd.f32 %v7066_v7, %v16998_v35  ;;  %v7552_v47 = vmul.f32 %v16200_v16, %v7551_v11 }
 0xc5a   :  { %v7914_v54 = vrot.slane %v7913_v42, 4  ;;  %v6976_v59 = vrot.slane %v6975_v19, 1  ;;  %v7022_v18 = vrot.slane %v7021_v38, 2  ;;  %v7731_v23 = vadd.f32 %v7730_v31, %v7729_v40 }
 0xc5b   :  { %v7642_v26 = vrot.slane %v7641_v5, 1  ;;  %v16322_v4 = vadd.f32 %v8275_v29, %v16999_v2  ;;  %v7068_v15 = vrot.slane %v7067_v17, 4  ;;  %v7553_v37 = vadd.f32 %v7552_v47, %v7460_v13 }
 0xc5c   :  { %v7915_v10 = vadd.f32 %v7914_v54, %v7913_v42  ;;  %v6977_v46 = vadd.f32 %v6976_v59, %v6975_v19  ;;  %v7023_v21 = vadd.f32 %v7022_v18, %v7021_v38  ;;  %v7732_v3 = vrot.slane %v7731_v23, 2  ;;  %v8063_v24 = vpop.xlane.xlu0 %8062  ;;  %v7204_v8 = vpop.xlane.xlu1 %7203  ;;  %v17003_v38 = vld [vmem:[#allocation39_spill] sm:$0xff] }
 0xc5d   :  { %v7643_v34 = vadd.f32 %v7642_v26, %v7641_v5  ;;  %v7069_v41 = vadd.f32 %v7068_v15, %v7067_v17  ;;  %v7990_v9 = vrot.slane %v7971_v61, 1  ;;  %v7114_v31 = vsel %vm6913_vm7, %v7108_v1, 0.0  ;;  %v17004_v17 = vld [vmem:[#allocation41_spill] sm:$0xff]  ;;  %v17006_v26 = vld [vmem:[#allocation30_spill] sm:$0xff] }
 0xc5e   :  { %v7916_v25 = vrot.slane %v7915_v10, 2  ;;  %v6981_v12 = vmul.f32 %v16200_v16, %v6977_v46  ;;  %v7024_v32 = vrot.slane %v7023_v21, 1  ;;  %v7733_v40 = vadd.f32 %v7732_v3, %v7731_v23 }
 0xc5f   :  { %v7644_v30 = vmul.f32 %v16206_v52, %v7643_v34  ;;  %v7070_v20 = vrot.slane %v7069_v41, 2  ;;  %v17001_v27 = vrot.slane %v17000_v51, 1  ;;  %v8004_v0 = vsel %vm6913_vm7, %v7990_v9, 0.0 }
 0xc60   :  { %v7917_v60 = vadd.f32 %v7916_v25, %v7915_v10  ;;  %v6982_v62 = vadd.f32 %v6981_v12, %v16281_v57  ;;  %v7025_v48 = vadd.f32 %v7024_v32, %v7023_v21  ;;  %v7734_v39 = vrot.slane %v7733_v40, 1  ;;  %v7252_v12 = vpop.xlane.xlu1 %7251 }
 0xc61   :  { %v7991_v13 = vsel %vm7426_vm8, %v17001_v27, %v7990_v9  ;;  %v7645_v63 = vadd.f32 %v7644_v30, %v7553_v37  ;;  %v7071_v43 = vadd.f32 %v7070_v20, %v7069_v41  ;;  %v7115_v36 = vadd.f32 %v7114_v31, %v17002_v58  ;;  %v17007_v37 = vld [vmem:[#allocation28_spill] sm:$0xff] }
 0xc62   :  { %v8003_v28 = vadd.f32 %v16236_v6, %v7991_v13  ;;  %v7918_v16 = vrot.slane %v7917_v60, 1  ;;  %v7029_v61 = vmul.f32 %v16206_v52, %v7025_v48  ;;  %v7735_v42 = vadd.f32 %v7734_v39, %v7733_v40  ;;  %v17005_v52 = vld [vmem:[#allocation27_spill] sm:$0xff]  ;;  %v17009_v13 = vld [vmem:[#allocation33_spill] sm:$0xff] }
 0xc63   :  { %v7072_v11 = vrot.slane %v7071_v43, 1  ;;  %v7828_v57 = vmul.f32 %v16219_v45, %v7827_v33  ;;  %v7162_v19 = vsel %vm6913_vm7, %v7156_v22, 0.0  ;;  %v7116_v29 = vrot.slane %v7115_v36, 4  ;;  %v8155_v33 = vpop.xlane.xlu0 %8154  ;;  %v17010_v48 = vld [vmem:[#allocation29_spill] sm:$0xff] }
 0xc64   :  { %v8005_v53 = vadd.f32 %v8004_v0, %v8003_v28  ;;  %v7919_v7 = vadd.f32 %v7918_v16, %v7917_v60  ;;  %v7030_v6 = vadd.f32 %v7029_v61, %v6982_v62  ;;  %v7736_v54 = vmul.f32 %v17003_v38, %v7735_v42 }
 0xc65   :  { %v7073_v35 = vadd.f32 %v7072_v11, %v7071_v43  ;;  %v7163_v47 = vadd.f32 %v7162_v19, %v17005_v52  ;;  %v8082_v18 = vrot.slane %v8063_v24, 1  ;;  %v7117_v10 = vadd.f32 %v7116_v29, %v7115_v36  ;;  %v17012_v24 = vld [vmem:[#allocation25_spill] sm:$0xff]  ;;  %v17013_v36 = vld [vmem:[#allocation31_spill] sm:$0xff] }
 0xc66   :  { %v8006_v5 = vrot.slane %v8005_v53, 4  ;;  %v7920_v59 = vmul.f32 %v17004_v17, %v7919_v7  ;;  %v7737_v23 = vadd.f32 %v7736_v54, %v7645_v63  ;;  %v8094_v2 = vadd.f32 %v16292_v50, %v17006_v26 }
 0xc67   :  { %v7077_v15 = vmul.f32 %v17003_v38, %v7073_v35  ;;  %v7164_v46 = vrot.slane %v7163_v47, 4  ;;  %v17008_v21 = vrot.slane %v17007_v37, 1  ;;  %v8096_v22 = vsel %vm6913_vm7, %v8082_v18, 0.0  ;;  %v8247_v42 = vpop.xlane.xlu0 %8246  ;;  %v7300_v38 = vpop.xlane.xlu1 %7299 }
 0xc68   :  { %v8007_v1 = vadd.f32 %v8006_v5, %v8005_v53  ;;  %v7118_v34 = vrot.slane %v7117_v10, 2  ;;  %v7829_v41 = vadd.f32 %v7828_v57, %v7737_v23  ;;  %v7210_v31 = vsel %vm6913_vm7, %v7204_v8, 0.0 }
 0xc69   :  { %v8083_v3 = vsel %vm7426_vm8, %v17008_v21, %v8082_v18  ;;  %v7078_v32 = vadd.f32 %v7077_v15, %v7030_v6  ;;  %v7165_v40 = vadd.f32 %v7164_v46, %v7163_v47  ;;  %v8174_v50 = vrot.slane %v8155_v33, 1 }
 0xc6a   :  { %v8008_v25 = vrot.slane %v8007_v1, 2  ;;  %v8095_v9 = vadd.f32 %v8094_v2, %v8083_v3  ;;  %v7119_v30 = vadd.f32 %v7118_v34, %v7117_v10  ;;  %v7921_v20 = vadd.f32 %v7920_v59, %v7829_v41  ;;  %v17014_v10 = vld [vmem:[#allocation34_spill] sm:$0xff] }
 0xc6b   :  { %v7166_v27 = vrot.slane %v7165_v40, 2  ;;  %v7211_v62 = vadd.f32 %v7210_v31, %v17009_v13  ;;  %v17011_v39 = vrot.slane %v17010_v48, 1  ;;  %v8185_v16 = vadd.f32 %v16303_v49, %v17012_v24 }
 0xc6c   :  { %v8009_v60 = vadd.f32 %v8008_v25, %v8007_v1  ;;  %v8097_v51 = vadd.f32 %v8096_v22, %v8095_v9  ;;  %v7120_v43 = vrot.slane %v7119_v30, 1  ;;  %v8188_v61 = vsel %vm6913_vm7, %v8174_v50, 0.0  ;;  %v7345_v25 = vpop.xlane.xlu0 %7344 }
 0xc6d   :  { %v8175_v28 = vsel %vm7426_vm8, %v17011_v39, %v8174_v50  ;;  %v7167_v53 = vadd.f32 %v7166_v27, %v7165_v40  ;;  %v7212_v58 = vrot.slane %v7211_v62, 4  ;;  %v8186_v8 = vadd.f32 %v8185_v16, %v17013_v36  ;;  %v7348_v40 = vpop.xlane.xlu1 %7347 }
 0xc6e   :  { %v8010_v63 = vrot.slane %v8009_v60, 1  ;;  %v8098_v0 = vrot.slane %v8097_v51, 4  ;;  %v7258_v7 = vsel %vm6913_vm7, %v7252_v12, 0.0  ;;  %v7121_v57 = vadd.f32 %v7120_v43, %v7119_v30 }
 0xc6f   :  { %v7259_v6 = vadd.f32 %v7258_v7, %v16238_v44  ;;  %v7168_v54 = vrot.slane %v7167_v53, 1  ;;  %v7213_v49 = vadd.f32 %v7212_v58, %v7211_v62  ;;  %v8187_v5 = vadd.f32 %v8186_v8, %v8175_v28 }
 0xc70   :  { %v8011_v11 = vadd.f32 %v8010_v63, %v8009_v60  ;;  %v8099_v19 = vadd.f32 %v8098_v0, %v8097_v51  ;;  %v8266_v29 = vrot.slane %v8247_v42, 1  ;;  %v7125_v35 = vmul.f32 %v16219_v45, %v7121_v57  ;;  %v17016_v45 = vld [vmem:[#allocation36_spill] sm:$0xff]  ;;  %v17017_v60 = vld [vmem:[#allocation37_spill] sm:$0xff]  ;;  %v17018_v51 = vld [vmem:[#allocation35_spill] sm:$0xff] }
 0xc71   :  { %v7260_v47 = vrot.slane %v7259_v6, 4  ;;  %v7169_v18 = vadd.f32 %v7168_v54, %v7167_v53  ;;  %v7214_v23 = vrot.slane %v7213_v49, 2  ;;  %v8189_v1 = vadd.f32 %v8188_v61, %v8187_v5  ;;  %v17019_v42 = vld [vmem:[#allocation38_spill] sm:$0xff] }
 0xc72   :  { %v8100_v59 = vrot.slane %v8099_v19, 2  ;;  %v8012_v52 = vmul.f32 %v16227_v14, %v8011_v11  ;;  %v17015_v26 = vrot.slane %v17014_v10, 1  ;;  %v7126_v33 = vadd.f32 %v7125_v35, %v7078_v32 }
 0xc73   :  { %v7261_v46 = vadd.f32 %v7260_v47, %v7259_v6  ;;  %v7173_v37 = vmul.f32 %v17004_v17, %v7169_v18  ;;  %v7215_v21 = vadd.f32 %v7214_v23, %v7213_v49  ;;  %v8190_v3 = vrot.slane %v8189_v1, 4 }
 0xc74   :  { %v8267_v2 = vsel %vm7426_vm8, %v17015_v26, %v8266_v29  ;;  %v8101_v44 = vadd.f32 %v8100_v59, %v8099_v19  ;;  %v8013_v15 = vadd.f32 %v8012_v52, %v7921_v20  ;;  %v8277_v22 = vadd.f32 %v16322_v4, %v17016_v45 }
 0xc75   :  { %v7262_v41 = vrot.slane %v7261_v46, 2  ;;  %v8280_v9 = vsel %vm6913_vm7, %v8266_v29, 0.0  ;;  %v7306_v12 = vsel %vm6913_vm7, %v7300_v38, 0.0  ;;  %v7174_v31 = vadd.f32 %v7173_v37, %v7126_v33 }
 0xc76   :  { %v8102_v34 = vrot.slane %v8101_v44, 1  ;;  %v7216_v32 = vrot.slane %v7215_v21, 1  ;;  %v8191_v50 = vadd.f32 %v8190_v3, %v8189_v1  ;;  %v8278_v30 = vadd.f32 %v8277_v22, %v17017_v60  ;;  %v9009_v22 = vld [vmem:[%s16420_s10] ss:$0 sm:$0xff]  ;;  %s8320_s10 = sshll.u32 %s10858_s23, 4  ;;  %s8321_s10 = int_to_ptr.vmem [resolvable:$true] %s8320_s10 }
 0xc77   :  { %v7263_v17 = vadd.f32 %v7262_v41, %v7261_v46  ;;  %v7307_v27 = vadd.f32 %v7306_v12, %v17018_v51  ;;  %v7353_v13 = vadd.f32 %v16255_v55, %v7345_v25  ;;  %v7354_v39 = vsel %vm6913_vm7, %v7348_v40, 0.0  ;;  %s10806_s24 = scalar_lea.vmem %s8321_s10, 32  ;;  %p10811_p1 = scmp.lt.s32.totalorder %s8321_s10, %s8321_s10 }
 0xc78   :  { %v8103_v20 = vadd.f32 %v8102_v34, %v8101_v44  ;;  %v7217_v4 = vadd.f32 %v7216_v32, %v7215_v21  ;;  %v8192_v62 = vrot.slane %v8191_v50, 2  ;;  %v8279_v48 = vadd.f32 %v8278_v30, %v8267_v2  ;;  %p10807_p0 = scmp.ne.s32.totalorder %s8321_s10, %s10806_s24  ;;  %p10812_p2 = scmp.lt.s32.totalorder %s10806_s24, %s10806_s24 }
 0xc79   :  { %v7264_v24 = vrot.slane %v7263_v17, 1  ;;  %v7308_v16 = vrot.slane %v7307_v27, 4  ;;  %v7355_v63 = vadd.f32 %v7354_v39, %v7353_v13  ;;  %vm7314_vm3 = vcmp.eq.s32.totalorder %v17019_v42, 8 }
 0xc7a   :  { %v8104_v28 = vmul.f32 %v16231_v56, %v8103_v20  ;;  %v7221_v43 = vmul.f32 %v16227_v14, %v7217_v4  ;;  %v8193_v0 = vadd.f32 %v8192_v62, %v8191_v50  ;;  %v8281_v61 = vadd.f32 %v8280_v9, %v8279_v48  ;;  %p10813_p3 = por %p10812_p2, %p10811_p1 }
 0xc7b   :  { %v7265_v58 = vadd.f32 %v7264_v24, %v7263_v17  ;;  %v7309_v36 = vadd.f32 %v7308_v16, %v7307_v27  ;;  %v7356_v55 = vrot.slane %v7355_v63, 4  ;;  %v17020_v19 = vmov 0.0  }
 0xc7c   :  { %v8105_v53 = vadd.f32 %v8104_v28, %v8013_v15  ;;  %v7222_v8 = vadd.f32 %v7221_v43, %v7174_v31  ;;  %v8194_v7 = vrot.slane %v8193_v0, 1  ;;  %v8282_v11 = vrot.slane %v8281_v61, 4  ;;  %p10814_p4 = pnand %p10813_p3, %p10807_p0 }
 0xc7d   :  { %v7269_v57 = vmul.f32 %v16231_v56, %v7265_v58  ;;  %v9000_v6 = vsel %vm7314_vm3, 1.0, %v17020_v19  ;;  %v7310_v38 = vrot.slane %v7309_v36, 2  ;;  %v7357_v54 = vadd.f32 %v7356_v55, %v7355_v63 }
 0xc7e   :  { %v8195_v49 = vadd.f32 %v8194_v7, %v8193_v0  ;;  %v8283_v5 = vadd.f32 %v8282_v11, %v8281_v61  ;;  %vm7362_vm4 = vcmp.eq.s32.totalorder %v17019_v42, 9  ;;  %vm8300_vm5 = vcmp.lt.s32.totalorder %v17019_v42, 10 }
 0xc7f   :  { %v7270_v14 = vadd.f32 %v7269_v57, %v7222_v8  ;;  %v7311_v29 = vadd.f32 %v7310_v38, %v7309_v36  ;;  %v7358_v35 = vrot.slane %v7357_v54, 2  ;;  %v9008_v2 = vsel %vm7362_vm4, 1.0, %v17020_v19 }
 0xc80   :  { %v8284_v59 = vrot.slane %v8283_v5, 2  ;;  %v8196_v52 = vmul.f32 %v9000_v6, %v8195_v49 }
 0xc81   :  { %v7312_v47 = vrot.slane %v7311_v29, 1  ;;  %v7359_v18 = vadd.f32 %v7358_v35, %v7357_v54 }
 0xc82   :  { %v8285_v23 = vadd.f32 %v8284_v59, %v8283_v5  ;;  %v8197_v1 = vadd.f32 %v8196_v52, %v8105_v53 }
 0xc83   :  { %v7313_v10 = vadd.f32 %v7312_v47, %v7311_v29  ;;  %v7360_v26 = vrot.slane %v7359_v18, 1 }
 0xc84   :  { %v8286_v56 = vrot.slane %v8285_v23, 1 }
 0xc85   :  { %v7317_v33 = vmul.f32 %v9000_v6, %v7313_v10  ;;  %v7361_v44 = vadd.f32 %v7360_v26, %v7359_v18 }
 0xc86   :  { %v8287_v15 = vadd.f32 %v8286_v56, %v8285_v23 }
 0xc87   :  { %v7318_v46 = vadd.f32 %v7317_v33, %v7270_v14  ;;  %v7365_v37 = vmul.f32 %v9008_v2, %v7361_v44 }
 0xc88   :  { %v8288_v21 = vmul.f32 %v9008_v2, %v8287_v15 }
 0xc89   :  { %v7366_v3 = vadd.f32 %v7365_v37, %v7318_v46 }
 0xc8a   :  { %v8289_v45 = vadd.f32 %v8288_v21, %v8197_v1 }
 0xc8c   :  { %v8290_v25 = vsel %vm6913_vm7, %v7366_v3, %v8289_v45 }
 0xc8d   :  { %v8298_v34 = vadd.f32 %v9009_v22, %v8290_v25 }
 0xc8f   :  { %v8301_v41 = vsel %vm8300_vm5, %v8298_v34, -1e+30  ;;  %8299 = vst [vmem:[#allocation2] sm:$0x3] %v8298_v34 }
 0xc90   :  { %v8302_v9 = vsel %vm7415_vm10, %v8301_v41, -inf }
 0xc91   :  { %8303 = vmax.xlane.f32.xlu0 %v8302_v9 }
 0xd1e   :  { %v8304_v12 = vpop.xlane.xlu0 %8303 }
 0xd1f   :  { %v8305_v40 = vsub.f32 %v8301_v41, %v8304_v12 }
 0xd21   :  { %v8306_v31 = vmul.f32 1.442695, %v8305_v40 }
 0xd23   :  { %10792 = vpow2.f32 %v8306_v31 }
 0xd2d   :  { %v10793_v32 = vpop.eup %10792 }
 0xd2e   :  { %v8308_v50 = vsel %vm7415_vm10, %v10793_v32, 0.0 }
 0xd2f   :  { %8309 = vadd.xlane.f32.xlu1 %v8308_v50 }
 0xd30   :  { %10817 = shalt.err (!%p10814_p4)
}
 0xd31   :  { %s10818_s26 = scalar_lea.hbm %s16421_s11, 32 }
 0xd32   :  { %p10819_p5 = scmp.ne.s32.totalorder %s16421_s11, %s10818_s26  ;;  %p10822_p6 = scmp.lt.u32.totalorder %s10818_s26, %s16421_s11 }
 0xd34   :  { %p10824_p7 = pnand %p10822_p6, %p10819_p5 }
 0xd36   :  { %10827 = shalt.err (!%p10824_p7)
}
 0xd37   :  { %8323 = dma.vmem_to_hbm [thread:$0]  %s8321_s10, 32, %s16421_s11, [#allocation3]  }
 0xd38   :  { %s10859_s8 = smov [#allocation4]  }
 0xd39   :  { %s8330_s13 = sshll.u32 %s10859_s8, 4  ;;  %s8331_s13 = int_to_ptr.vmem [resolvable:$true] %s8330_s13 }
 0xd3a   :  { %s10828_s2 = scalar_lea.vmem %s8331_s13, 32  ;;  %p10833_p9 = scmp.lt.s32.totalorder %s8331_s13, %s8331_s13 }
 0xd3b   :  { %p10829_p8 = scmp.ne.s32.totalorder %s8331_s13, %s10828_s2  ;;  %p10834_p10 = scmp.lt.s32.totalorder %s10828_s2, %s10828_s2 }
 0xd3d   :  { %p10835_p11 = por %p10834_p10, %p10833_p9 }
 0xd3f   :  { %p10836_p12 = pnand %p10835_p11, %p10829_p8 }
 0xdbc   :  { %v8310_v60 = vpop.xlane.xlu1 %8309 }
 0xdbd   :  { %10794 = vrcp.f32 %v8310_v60 }
 0xdc7   :  { %v10795_v30 = vpop.eup %10794 }
 0xdc8   :  { %v8312_v20 = vmul.f32 %v10795_v30, %v10793_v32 }
 0xdca   :  { %8313 = vst [vmem:[#allocation4] sm:$0x3] %v8312_v20 }
 0xdcb   :  { %10839 = shalt.err (!%p10836_p12)
}
 0xdcc   :  { %s10840_s16 = scalar_lea.hbm %s16422_s12, 32 }
 0xdcd   :  { %p10841_p13 = scmp.ne.s32.totalorder %s16422_s12, %s10840_s16  ;;  %p10844_p0 = scmp.lt.u32.totalorder %s10840_s16, %s16422_s12 }
 0xdcf   :  { %p10846_p1 = pnand %p10844_p0, %p10841_p13 }
 0xdd1   :  { %10849 = shalt.err (!%p10846_p1)
}
 0xdd2   :  { %8333 = dma.vmem_to_hbm [thread:$0]  %s8331_s13, 32, %s16422_s12, [#allocation5]  }
 0xdd3   :  { %10850 = dma.done.wait [#allocation3], 32  }
 0xdd4   :  { %10851 = vsyncadd [#allocation3], 4294967264 }
 0xdd5   :  { %10852 = dma.done.wait [#allocation5], 32  }
 0xdd6   :  { %10853 = vsyncadd [#allocation5], 4294967264 }
 0xdd7   :  { %8340 = vsyncpa [#allocation3], 1 }
 0xdd8   :  { %8341 = vsyncpa [#allocation5], 1 }

</bundles_post_ra>
